<compile_context>
chip_gen: v5e
topology: v5e:2x2
jax: 0.10.0
libtpu: 0.0.40
codegen_flags: <defaults>
</compile_context>

<pallas_src>
import math
import functools

import numpy as np
import jax
import jax.numpy as jnp
from jax.experimental import pallas as pl
from jax.experimental.pallas import tpu as pltpu


ACT_DTYPE = jnp.bfloat16       # activation stream dtype
WGT_DTYPE = jnp.bfloat16       # matmul weight dtype
VMEM_LIMIT = 32 * 1024 * 1024  # safe across v5e / v6e / v7x scoped-VMEM limits

_PER_BATCH_PARAMS = pltpu.CompilerParams(
    dimension_semantics=("parallel",), vmem_limit_bytes=VMEM_LIMIT)
_MATMUL_PARAMS = pltpu.CompilerParams(
    dimension_semantics=("parallel", "parallel", "arbitrary"),
    vmem_limit_bytes=VMEM_LIMIT)


# ----------------------------------------------------------------------------
# In-kernel helpers (operate on values already loaded from VMEM refs)
# ----------------------------------------------------------------------------

def _ln_mod(x, shift, scale, eps=1e-6):
    """(1 + scale) * LayerNorm(x, eps, no affine) + shift; all f32."""
    mean = jnp.mean(x, axis=-1, keepdims=True)
    xc = x - mean
    var = jnp.mean(xc * xc, axis=-1, keepdims=True)
    return (1.0 + scale) * (xc * jax.lax.rsqrt(var + eps)) + shift


def _rms(x, w, eps=1e-6):
    return x * jax.lax.rsqrt(jnp.mean(x * x, axis=-1, keepdims=True) + eps) * w


def _rope_halfsplit(x, cos, sin):
    """RoPE on channels pre-permuted to [pair-comp-0 | pair-comp-1]; x (L,D)."""
    d2 = x.shape[-1] // 2
    x0, x1 = x[:, :d2], x[:, d2:]
    return jnp.concatenate([cos * x0 - sin * x1, sin * x0 + cos * x1], axis=-1)


def _sdpa(q, k, v, scale):
    """softmax(q k^T * scale) v with f32 stats, bf16 MXU operands."""
    s = jax.lax.dot_general(
        q.astype(jnp.bfloat16), k.astype(jnp.bfloat16),
        (((1,), (1,)), ((), ())), preferred_element_type=jnp.float32) * scale
    m = jnp.max(s, axis=-1, keepdims=True)
    p = jnp.exp(s - m)
    num = jnp.dot(p.astype(jnp.bfloat16), v.astype(jnp.bfloat16),
                  preferred_element_type=jnp.float32)
    return num * pl.reciprocal(jnp.sum(p, axis=-1, keepdims=True), approx=True)


# ----------------------------------------------------------------------------
# Generic tiled linear: y = act(maybe_silu(x) @ W + b)
# ----------------------------------------------------------------------------

def _matmul_kernel(x_ref, w_ref, b_ref, o_ref, acc_ref, *, pre_silu, activation):
    @pl.when(pl.program_id(2) == 0)
    def _():
        acc_ref[...] = jnp.zeros_like(acc_ref)

    x = x_ref[...]
    if pre_silu:  # silu applied to the *input* (modulation / adaLN paths)
        xf = x.astype(jnp.float32)
        x = xf * jax.nn.sigmoid(xf)
    acc_ref[...] += jnp.dot(x.astype(w_ref.dtype), w_ref[...],
                            preferred_element_type=jnp.float32)

    @pl.when(pl.program_id(2) == pl.num_programs(2) - 1)
    def _():
        y = acc_ref[...] + b_ref[...].astype(jnp.float32)
        if activation == "silu":
            y = y * jax.nn.sigmoid(y)
        elif activation == "gelu_tanh":
            y = jax.nn.gelu(y, approximate=True)
        o_ref[...] = y.astype(o_ref.dtype)


def _pick_tile(dim, cap, align):
    """Largest tile <= cap that divides dim and respects the (8,128) rule."""
    if dim <= cap:
        return dim
    t = (cap // align) * align
    while t >= align:
        if dim % t == 0:
            return t
        t -= align
    return dim  # fall back to a full-dim block


def pallas_linear(x, w, b, *, pre_silu=False, activation=None, out_dtype=None):
    """x: (..., K) @ w: (K, N) + b: (1, N).  Tiled (M,N,K) grid, f32 acc."""
    lead = x.shape[:-1]
    K = x.shape[-1]
    N = w.shape[1]
    x2 = x.reshape(-1, K)
    M = x2.shape[0]
    out_dtype = out_dtype if out_dtype is not None else ACT_DTYPE
    tm = _pick_tile(M, 256, 8)      # v7x-safe defaults; collapse to full dim
    tn = _pick_tile(N, 512, 128)    # at this toy config
    tk = _pick_tile(K, 1024, 128)
    grid = (M // tm, N // tn, K // tk)
    out = pl.pallas_call(
        functools.partial(_matmul_kernel, pre_silu=pre_silu, activation=activation),
        out_shape=jax.ShapeDtypeStruct((M, N), out_dtype),
        grid=grid,
        in_specs=[
            pl.BlockSpec((tm, tk), lambda i, j, k: (i, k)),
            pl.BlockSpec((tk, tn), lambda i, j, k: (k, j)),
            pl.BlockSpec((1, tn), lambda i, j, k: (0, j)),
        ],
        out_specs=pl.BlockSpec((tm, tn), lambda i, j, k: (i, j)),
        scratch_shapes=[pltpu.VMEM((tm, tn), jnp.float32)],
        compiler_params=_MATMUL_PARAMS,
    )(x2, w, b)
    return out.reshape(*lead, N)


# ----------------------------------------------------------------------------
# Fused per-batch kernels
# ----------------------------------------------------------------------------

def _ln_mod_linear_kernel(x_ref, shift_ref, scale_ref, w_ref, b_ref, o_ref):
    x = x_ref[0].astype(jnp.float32)                       # (S, H)
    mod = _ln_mod(x, shift_ref[0], scale_ref[0])
    y = jnp.dot(mod.astype(w_ref.dtype), w_ref[...],
                preferred_element_type=jnp.float32) + b_ref[...].astype(jnp.float32)
    o_ref[0] = y.astype(o_ref.dtype)


def fused_ln_mod_linear(x, shift, scale, w, b):
    B, S, H = x.shape
    N = w.shape[1]
    return pl.pallas_call(
        _ln_mod_linear_kernel,
        out_shape=jax.ShapeDtypeStruct((B, S, N), ACT_DTYPE),
        grid=(B,),
        in_specs=[
            pl.BlockSpec((1, S, H), lambda i: (i, 0, 0)),
            pl.BlockSpec((1, 1, H), lambda i: (i, 0, 0)),
            pl.BlockSpec((1, 1, H), lambda i: (i, 0, 0)),
            pl.BlockSpec((H, N), lambda i: (0, 0)),
            pl.BlockSpec((1, N), lambda i: (0, 0)),
        ],
        out_specs=pl.BlockSpec((1, S, N), lambda i: (i, 0, 0)),
        compiler_params=_PER_BATCH_PARAMS,
    )(x, shift, scale, w, b)


def _proj_residual_kernel(res_ref, a_ref, gate_ref, w_ref, b_ref, o_ref):
    y = jnp.dot(a_ref[0], w_ref[...], preferred_element_type=jnp.float32)
    y = y + b_ref[...].astype(jnp.float32)
    o_ref[0] = (res_ref[0].astype(jnp.float32) + gate_ref[0] * y).astype(o_ref.dtype)


def fused_proj_gate_residual(res, attn, gate, w, b):
    B, S, H = res.shape
    N = w.shape[1]
    return pl.pallas_call(
        _proj_residual_kernel,
        out_shape=jax.ShapeDtypeStruct((B, S, N), ACT_DTYPE),
        grid=(B,),
        in_specs=[
            pl.BlockSpec((1, S, H), lambda i: (i, 0, 0)),
            pl.BlockSpec((1, S, H), lambda i: (i, 0, 0)),
            pl.BlockSpec((1, 1, H), lambda i: (i, 0, 0)),
            pl.BlockSpec((H, N), lambda i: (0, 0)),
            pl.BlockSpec((1, N), lambda i: (0, 0)),
        ],
        out_specs=pl.BlockSpec((1, S, N), lambda i: (i, 0, 0)),
        compiler_params=_PER_BATCH_PARAMS,
    )(res, attn, gate, w, b)


def _mlp_residual_kernel(x_ref, shift_ref, scale_ref, gate_ref,
                         w1_ref, b1_ref, w2_ref, b2_ref, o_ref):
    x = x_ref[0].astype(jnp.float32)
    mod = _ln_mod(x, shift_ref[0], scale_ref[0])
    h = jnp.dot(mod.astype(w1_ref.dtype), w1_ref[...],
                preferred_element_type=jnp.float32) + b1_ref[...].astype(jnp.float32)
    h = jax.nn.gelu(h, approximate=True)
    y = jnp.dot(h.astype(w2_ref.dtype), w2_ref[...],
                preferred_element_type=jnp.float32) + b2_ref[...].astype(jnp.float32)
    o_ref[0] = (x + gate_ref[0] * y).astype(o_ref.dtype)


def fused_mlp_residual(x, shift, scale, gate, w1, b1, w2, b2):
    B, S, H = x.shape
    MLP = w1.shape[1]
    return pl.pallas_call(
        _mlp_residual_kernel,
        out_shape=jax.ShapeDtypeStruct((B, S, H), ACT_DTYPE),
        grid=(B,),
        in_specs=[
            pl.BlockSpec((1, S, H), lambda i: (i, 0, 0)),
            pl.BlockSpec((1, 1, H), lambda i: (i, 0, 0)),
            pl.BlockSpec((1, 1, H), lambda i: (i, 0, 0)),
            pl.BlockSpec((1, 1, H), lambda i: (i, 0, 0)),
            pl.BlockSpec((H, MLP), lambda i: (0, 0)),
            pl.BlockSpec((1, MLP), lambda i: (0, 0)),
            pl.BlockSpec((MLP, H), lambda i: (0, 0)),
            pl.BlockSpec((1, H), lambda i: (0, 0)),
        ],
        out_specs=pl.BlockSpec((1, S, H), lambda i: (i, 0, 0)),
        compiler_params=_PER_BATCH_PARAMS,
    )(x, shift, scale, gate, w1, b1, w2, b2)


def _attn_double_kernel(qkv_t_ref, qkv_i_ref, cos_ref, sin_ref,
                        qn_i_ref, kn_i_ref, qn_t_ref, kn_t_ref,
                        o_t_ref, o_i_ref, *, num_heads, head_dim, hidden, s_txt):
    qkv_t = qkv_t_ref[0].astype(jnp.float32)               # (S_txt, 3H)
    qkv_i = qkv_i_ref[0].astype(jnp.float32)               # (S_img, 3H)
    cos = cos_ref[...]
    sin = sin_ref[...]
    cos_t, cos_i = cos[:s_txt], cos[s_txt:]
    sin_t, sin_i = sin[:s_txt], sin[s_txt:]
    qn_i, kn_i = qn_i_ref[...], kn_i_ref[...]
    qn_t, kn_t = qn_t_ref[...], kn_t_ref[...]
    scale = 1.0 / math.sqrt(head_dim)
    out_t, out_i = [], []
    for h in range(num_heads):
        o0, o1 = h * head_dim, (h + 1) * head_dim
        q = jnp.concatenate([
            _rope_halfsplit(_rms(qkv_t[:, o0:o1], qn_t), cos_t, sin_t),
            _rope_halfsplit(_rms(qkv_i[:, o0:o1], qn_i), cos_i, sin_i)], axis=0)
        k = jnp.concatenate([
            _rope_halfsplit(_rms(qkv_t[:, hidden + o0:hidden + o1], kn_t), cos_t, sin_t),
            _rope_halfsplit(_rms(qkv_i[:, hidden + o0:hidden + o1], kn_i), cos_i, sin_i)],
            axis=0)
        v = jnp.concatenate([qkv_t[:, 2 * hidden + o0:2 * hidden + o1],
                             qkv_i[:, 2 * hidden + o0:2 * hidden + o1]], axis=0)
        o = _sdpa(q, k, v, scale)                           # (L, D) f32
        out_t.append(o[:s_txt])
        out_i.append(o[s_txt:])
    o_t_ref[0] = jnp.concatenate(out_t, axis=-1).astype(o_t_ref.dtype)
    o_i_ref[0] = jnp.concatenate(out_i, axis=-1).astype(o_i_ref.dtype)


def fused_double_attention(qkv_txt, qkv_img, cos, sin,
                           qn_img, kn_img, qn_txt, kn_txt, num_heads, head_dim):
    B, s_txt, threeH = qkv_txt.shape
    s_img = qkv_img.shape[1]
    H = num_heads * head_dim
    L = s_txt + s_img
    kern = functools.partial(_attn_double_kernel, num_heads=num_heads,
                             head_dim=head_dim, hidden=H, s_txt=s_txt)
    return pl.pallas_call(
        kern,
        out_shape=(jax.ShapeDtypeStruct((B, s_txt, H), ACT_DTYPE),
                   jax.ShapeDtypeStruct((B, s_img, H), ACT_DTYPE)),
        grid=(B,),
        in_specs=[
            pl.BlockSpec((1, s_txt, threeH), lambda i: (i, 0, 0)),
            pl.BlockSpec((1, s_img, threeH), lambda i: (i, 0, 0)),
            pl.BlockSpec((L, head_dim // 2), lambda i: (0, 0)),
            pl.BlockSpec((L, head_dim // 2), lambda i: (0, 0)),
            pl.BlockSpec((1, head_dim), lambda i: (0, 0)),
            pl.BlockSpec((1, head_dim), lambda i: (0, 0)),
            pl.BlockSpec((1, head_dim), lambda i: (0, 0)),
            pl.BlockSpec((1, head_dim), lambda i: (0, 0)),
        ],
        out_specs=(pl.BlockSpec((1, s_txt, H), lambda i: (i, 0, 0)),
                   pl.BlockSpec((1, s_img, H), lambda i: (i, 0, 0))),
        compiler_params=_PER_BATCH_PARAMS,
    )(qkv_txt, qkv_img, cos, sin, qn_img, kn_img, qn_txt, kn_txt)


def _attn_single_kernel(qkv_ref, cos_ref, sin_ref, qn_ref, kn_ref, o_ref,
                        *, num_heads, head_dim, hidden):
    qkv = qkv_ref[0].astype(jnp.float32)                    # (L, 3H)
    cos = cos_ref[...]
    sin = sin_ref[...]
    qn, kn = qn_ref[...], kn_ref[...]
    scale = 1.0 / math.sqrt(head_dim)
    outs = []
    for h in range(num_heads):
        o0, o1 = h * head_dim, (h + 1) * head_dim
        q = _rope_halfsplit(_rms(qkv[:, o0:o1], qn), cos, sin)
        k = _rope_halfsplit(_rms(qkv[:, hidden + o0:hidden + o1], kn), cos, sin)
        v = qkv[:, 2 * hidden + o0:2 * hidden + o1]
        outs.append(_sdpa(q, k, v, scale))
    o_ref[0] = jnp.concatenate(outs, axis=-1).astype(o_ref.dtype)


def fused_single_attention(qkv, cos, sin, qn, kn, num_heads, head_dim):
    B, L, threeH = qkv.shape
    H = num_heads * head_dim
    kern = functools.partial(_attn_single_kernel, num_heads=num_heads,
                             head_dim=head_dim, hidden=H)
    return pl.pallas_call(
        kern,
        out_shape=jax.ShapeDtypeStruct((B, L, H), ACT_DTYPE),
        grid=(B,),
        in_specs=[
            pl.BlockSpec((1, L, threeH), lambda i: (i, 0, 0)),
            pl.BlockSpec((L, head_dim // 2), lambda i: (0, 0)),
            pl.BlockSpec((L, head_dim // 2), lambda i: (0, 0)),
            pl.BlockSpec((1, head_dim), lambda i: (0, 0)),
            pl.BlockSpec((1, head_dim), lambda i: (0, 0)),
        ],
        out_specs=pl.BlockSpec((1, L, H), lambda i: (i, 0, 0)),
        compiler_params=_PER_BATCH_PARAMS,
    )(qkv, cos, sin, qn, kn)


def _ln_mod_lin1_kernel(x_ref, shift_ref, scale_ref, wq_ref, bq_ref,
                        wm_ref, bm_ref, qkv_ref, mlp_ref):
    x = x_ref[0].astype(jnp.float32)
    mod = _ln_mod(x, shift_ref[0], scale_ref[0]).astype(wq_ref.dtype)
    q = jnp.dot(mod, wq_ref[...], preferred_element_type=jnp.float32)
    qkv_ref[0] = (q + bq_ref[...].astype(jnp.float32)).astype(qkv_ref.dtype)
    h = jnp.dot(mod, wm_ref[...], preferred_element_type=jnp.float32)
    h = jax.nn.gelu(h + bm_ref[...].astype(jnp.float32), approximate=True)
    mlp_ref[0] = h.astype(mlp_ref.dtype)


def fused_ln_mod_lin1(x, shift, scale, w_qkv, b_qkv, w_mlp, b_mlp):
    B, S, H = x.shape
    NQ = w_qkv.shape[1]
    NM = w_mlp.shape[1]
    return pl.pallas_call(
        _ln_mod_lin1_kernel,
        out_shape=(jax.ShapeDtypeStruct((B, S, NQ), ACT_DTYPE),
                   jax.ShapeDtypeStruct((B, S, NM), ACT_DTYPE)),
        grid=(B,),
        in_specs=[
            pl.BlockSpec((1, S, H), lambda i: (i, 0, 0)),
            pl.BlockSpec((1, 1, H), lambda i: (i, 0, 0)),
            pl.BlockSpec((1, 1, H), lambda i: (i, 0, 0)),
            pl.BlockSpec((H, NQ), lambda i: (0, 0)),
            pl.BlockSpec((1, NQ), lambda i: (0, 0)),
            pl.BlockSpec((H, NM), lambda i: (0, 0)),
            pl.BlockSpec((1, NM), lambda i: (0, 0)),
        ],
        out_specs=(pl.BlockSpec((1, S, NQ), lambda i: (i, 0, 0)),
                   pl.BlockSpec((1, S, NM), lambda i: (i, 0, 0))),
        compiler_params=_PER_BATCH_PARAMS,
    )(x, shift, scale, w_qkv, b_qkv, w_mlp, b_mlp)


def _single_out_kernel(x_ref, attn_ref, mlp_ref, gate_ref,
                       w2a_ref, w2b_ref, b2_ref, o_ref):
    y = jnp.dot(attn_ref[0], w2a_ref[...], preferred_element_type=jnp.float32)
    y = y + jnp.dot(mlp_ref[0], w2b_ref[...], preferred_element_type=jnp.float32)
    y = y + b2_ref[...].astype(jnp.float32)
    o_ref[0] = (x_ref[0].astype(jnp.float32) + gate_ref[0] * y).astype(o_ref.dtype)


def fused_single_out(x, attn, mlp_h, gate, w2a, w2b, b2):
    B, S, H = x.shape
    MLP = w2b.shape[0]
    return pl.pallas_call(
        _single_out_kernel,
        out_shape=jax.ShapeDtypeStruct((B, S, H), ACT_DTYPE),
        grid=(B,),
        in_specs=[
            pl.BlockSpec((1, S, H), lambda i: (i, 0, 0)),
            pl.BlockSpec((1, S, H), lambda i: (i, 0, 0)),
            pl.BlockSpec((1, S, MLP), lambda i: (i, 0, 0)),
            pl.BlockSpec((1, 1, H), lambda i: (i, 0, 0)),
            pl.BlockSpec((H, H), lambda i: (0, 0)),
            pl.BlockSpec((MLP, H), lambda i: (0, 0)),
            pl.BlockSpec((1, H), lambda i: (0, 0)),
        ],
        out_specs=pl.BlockSpec((1, S, H), lambda i: (i, 0, 0)),
        compiler_params=_PER_BATCH_PARAMS,
    )(x, attn, mlp_h, gate, w2a, w2b, b2)


def _vec_embed_kernel(t_ref, g_ref, y_ref,
                      tw1, tb1, tw2, tb2,
                      gw1, gb1, gw2, gb2,
                      yw1, yb1, yw2, yb2, o_ref):
    def two_layer(x_ref, w1, b1, w2, b2):
        h = jnp.dot(x_ref[...], w1[...], preferred_element_type=jnp.float32)
        h = h + b1[...].astype(jnp.float32)
        h = h * jax.nn.sigmoid(h)
        y = jnp.dot(h.astype(w2.dtype), w2[...], preferred_element_type=jnp.float32)
        return y + b2[...].astype(jnp.float32)

    o_ref[...] = (two_layer(t_ref, tw1, tb1, tw2, tb2)
                  + two_layer(g_ref, gw1, gb1, gw2, gb2)
                  + two_layer(y_ref, yw1, yb1, yw2, yb2))


def pallas_vec_embed(t_emb, g_emb, y, prep, hidden):
    B = t_emb.shape[0]
    inputs = [t_emb, g_emb, y]
    for name in ("time_in", "guidance_in", "vector_in"):
        p = prep[name]
        inputs += [p["in"]["w"], p["in"]["b"], p["out"]["w"], p["out"]["b"]]
    in_specs = [pl.BlockSpec(a.shape, lambda i: (0, 0)) for a in inputs]
    return pl.pallas_call(
        _vec_embed_kernel,
        out_shape=jax.ShapeDtypeStruct((B, hidden), jnp.float32),
        grid=(1,),
        in_specs=in_specs,
        out_specs=pl.BlockSpec((B, hidden), lambda i: (0, 0)),
        compiler_params=pltpu.CompilerParams(vmem_limit_bytes=VMEM_LIMIT),
    )(*inputs)


def _final_kernel(dt_ref, x_ref, shift_ref, scale_ref, w_ref, b_ref, img_ref, o_ref):
    x = x_ref[0].astype(jnp.float32)
    mod = _ln_mod(x, shift_ref[0], scale_ref[0])
    pred = jnp.dot(mod.astype(w_ref.dtype), w_ref[...],
                   preferred_element_type=jnp.float32) + b_ref[...].astype(jnp.float32)
    o_ref[0] = (img_ref[0].astype(jnp.float32) + dt_ref[0] * pred).astype(o_ref.dtype)


def final_layer_and_update(x_hidden, vec, img, dt, p):
    """Fused adaLN LayerNorm + final linear + Euler update img + dt*pred."""
    ada = pallas_linear(vec, p["ada"]["w"], p["ada"]["b"],
                        pre_silu=True, out_dtype=jnp.float32)
    shift, scale = jnp.split(ada, 2, axis=-1)
    B, S, H = x_hidden.shape
    C = p["linear"]["w"].shape[1]
    return pl.pallas_call(
        _final_kernel,
        out_shape=jax.ShapeDtypeStruct((B, S, C), img.dtype),
        grid=(B,),
        in_specs=[
            pl.BlockSpec(memory_space=pltpu.MemorySpace.SMEM),     # dt scalar
            pl.BlockSpec((1, S, H), lambda i: (i, 0, 0)),
            pl.BlockSpec((1, 1, H), lambda i: (i, 0, 0)),
            pl.BlockSpec((1, 1, H), lambda i: (i, 0, 0)),
            pl.BlockSpec((H, C), lambda i: (0, 0)),
            pl.BlockSpec((1, C), lambda i: (0, 0)),
            pl.BlockSpec((1, S, C), lambda i: (i, 0, 0)),
        ],
        out_specs=pl.BlockSpec((1, S, C), lambda i: (i, 0, 0)),
        compiler_params=_PER_BATCH_PARAMS,
    )(dt, x_hidden, shift.reshape(B, 1, H), scale.reshape(B, 1, H),
      p["linear"]["w"], p["linear"]["b"], img)


# ----------------------------------------------------------------------------
# Plain-JAX glue (tiny embeddings / tables) and block wiring
# ----------------------------------------------------------------------------

def timestep_embedding(t, dim=256, max_period=10000.0, time_factor=1000.0):
    t = time_factor * t
    half = dim // 2
    freqs = jnp.exp(-math.log(max_period) * jnp.arange(half, dtype=jnp.float32) / half)
    args = t[:, None].astype(jnp.float32) * freqs[None, :]
    return jnp.concatenate([jnp.cos(args), jnp.sin(args)], axis=-1)


def rope_tables(ids, axes_dim, theta):
    # ids: (1, L, n_axes) -> cos/sin tables (L, sum(axes_dim)//2)
    cos_parts, sin_parts = [], []
    for i, d in enumerate(axes_dim):
        scale = jnp.arange(0, d, 2, dtype=jnp.float32) / d
        omega = 1.0 / (float(theta) ** scale)
        args = ids[0, :, i][:, None] * omega[None, :]
        cos_parts.append(jnp.cos(args))
        sin_parts.append(jnp.sin(args))
    return (jnp.concatenate(cos_parts, -1).astype(jnp.float32),
            jnp.concatenate(sin_parts, -1).astype(jnp.float32))


def double_block(img, txt, vec, cos, sin, p, cfg):
    H = cfg["hidden_size"]
    heads = cfg["num_heads"]
    D = H // heads
    B = img.shape[0]

    mod = pallas_linear(vec, p["mod"]["w"], p["mod"]["b"],
                        pre_silu=True, out_dtype=jnp.float32)      # (B, 12H)
    parts = [m.reshape(B, 1, H) for m in jnp.split(mod, 12, axis=-1)]
    (i_sh1, i_sc1, i_g1, i_sh2, i_sc2, i_g2,
     t_sh1, t_sc1, t_g1, t_sh2, t_sc2, t_g2) = parts

    img_qkv = fused_ln_mod_linear(img, i_sh1, i_sc1, p["img_qkv"]["w"], p["img_qkv"]["b"])
    txt_qkv = fused_ln_mod_linear(txt, t_sh1, t_sc1, p["txt_qkv"]["w"], p["txt_qkv"]["b"])

    txt_attn, img_attn = fused_double_attention(
        txt_qkv, img_qkv, cos, sin,
        p["img_q_norm"], p["img_k_norm"], p["txt_q_norm"], p["txt_k_norm"], heads, D)

    img = fused_proj_gate_residual(img, img_attn, i_g1, p["img_proj"]["w"], p["img_proj"]["b"])
    img = fused_mlp_residual(img, i_sh2, i_sc2, i_g2,
                             p["img_mlp1"]["w"], p["img_mlp1"]["b"],
                             p["img_mlp2"]["w"], p["img_mlp2"]["b"])

    txt = fused_proj_gate_residual(txt, txt_attn, t_g1, p["txt_proj"]["w"], p["txt_proj"]["b"])
    txt = fused_mlp_residual(txt, t_sh2, t_sc2, t_g2,
                             p["txt_mlp1"]["w"], p["txt_mlp1"]["b"],
                             p["txt_mlp2"]["w"], p["txt_mlp2"]["b"])
    return img, txt


def single_block(x, vec, cos, sin, p, cfg):
    H = cfg["hidden_size"]
    heads = cfg["num_heads"]
    D = H // heads
    B = x.shape[0]

    mod = pallas_linear(vec, p["mod"]["w"], p["mod"]["b"],
                        pre_silu=True, out_dtype=jnp.float32)      # (B, 3H)
    m_sh, m_sc, m_g = [m.reshape(B, 1, H) for m in jnp.split(mod, 3, axis=-1)]

    qkv, mlp_h = fused_ln_mod_lin1(x, m_sh, m_sc, p["w_qkv"], p["b_qkv"],
                                   p["w_mlp"], p["b_mlp"])
    attn = fused_single_attention(qkv, cos, sin, p["q_norm"], p["k_norm"], heads, D)
    return fused_single_out(x, attn, mlp_h, m_g, p["w2a"], p["w2b"], p["b2"])


def flux_forward(prep, cfg, img, img_ids, txt, txt_ids, t_vec, y, guidance):
    H = cfg["hidden_size"]
    img_h = pallas_linear(img, prep["img_in"]["w"], prep["img_in"]["b"])
    txt_h = pallas_linear(txt, prep["txt_in"]["w"], prep["txt_in"]["b"])

    t_emb = timestep_embedding(t_vec, 256).astype(ACT_DTYPE)
    g_emb = timestep_embedding(guidance, 256).astype(ACT_DTYPE)
    vec = pallas_vec_embed(t_emb, g_emb, y.astype(ACT_DTYPE), prep, H)   # (B, H) f32

    ids = jnp.concatenate([txt_ids, img_ids], axis=1)
    cos, sin = rope_tables(ids, cfg["axes_dim"], cfg["theta"])

    for bp in prep["double_blocks"]:
        img_h, txt_h = double_block(img_h, txt_h, vec, cos, sin, bp, cfg)
    x = jnp.concatenate([txt_h, img_h], axis=1)
    for bp in prep["single_blocks"]:
        x = single_block(x, vec, cos, sin, bp, cfg)
    img_h = x[:, txt.shape[1]:, :]
    return img_h, vec


def flux_denoise_step(prep, cfg, img_ids, txt_ids,
                      img, txt, vec_in, step, timesteps, guidance_scale):
    B = cfg["batch_size"]
    guidance_vec = jnp.tile(guidance_scale, (B,))
    t_curr = timesteps[step]                 # (1,)
    t_prev = timesteps[step + 1]             # (1,)
    t_vec = jnp.tile(t_curr, (B,))
    img_h, vec = flux_forward(prep, cfg, img, img_ids, txt, txt_ids,
                              t_vec, vec_in, guidance_vec)
    dt = (t_prev - t_curr).astype(jnp.float32)
    return final_layer_and_update(img_h, vec, img, dt, prep["final_layer"])


# ----------------------------------------------------------------------------
# Deterministic synthetic parameter initialization + prep (bf16 / QK perm)
# ----------------------------------------------------------------------------

def init_params(key, cfg):
    H = cfg["hidden_size"]
    heads = cfg["num_heads"]
    D = H // heads
    mlp = int(cfg["mlp_ratio"] * H)
    kit = iter(jax.random.split(key, 512))

    def lin(fan_in, fan_out):
        k1, k2 = jax.random.split(next(kit))
        w = jax.random.normal(k1, (fan_in, fan_out), jnp.float32) / math.sqrt(fan_in)
        b = jax.random.normal(k2, (fan_out,), jnp.float32) * 0.02
        return {"w": w, "b": b}

    def mlp_embed(in_dim):
        return {"in": lin(in_dim, H), "out": lin(H, H)}

    def double_block_p():
        return {
            "img_mod": lin(H, 6 * H), "img_qkv": lin(H, 3 * H),
            "img_q_norm": jnp.ones((D,), jnp.float32),
            "img_k_norm": jnp.ones((D,), jnp.float32),
            "img_proj": lin(H, H), "img_mlp1": lin(H, mlp), "img_mlp2": lin(mlp, H),
            "txt_mod": lin(H, 6 * H), "txt_qkv": lin(H, 3 * H),
            "txt_q_norm": jnp.ones((D,), jnp.float32),
            "txt_k_norm": jnp.ones((D,), jnp.float32),
            "txt_proj": lin(H, H), "txt_mlp1": lin(H, mlp), "txt_mlp2": lin(mlp, H),
        }

    def single_block_p():
        return {
            "mod": lin(H, 3 * H),
            "lin1": lin(H, 3 * H + mlp),
            "lin2": lin(H + mlp, H),
            "q_norm": jnp.ones((D,), jnp.float32),
            "k_norm": jnp.ones((D,), jnp.float32),
        }

    return {
        "img_in": lin(cfg["in_channels"], H),
        "txt_in": lin(cfg["context_in_dim"], H),
        "time_in": mlp_embed(256),
        "vector_in": mlp_embed(cfg["vec_in_dim"]),
        "guidance_in": mlp_embed(256),
        "double_blocks": [double_block_p() for _ in range(cfg["depth"])],
        "single_blocks": [single_block_p() for _ in range(cfg["depth_single_blocks"])],
        "final_layer": {"ada": lin(H, 2 * H), "linear": lin(H, cfg["in_channels"])},
    }


def _qk_head_perm(head_dim):
    return np.concatenate([np.arange(0, head_dim, 2), np.arange(1, head_dim, 2)])


def _qkv_col_perm(num_heads, head_dim, hidden):
    hp = _qk_head_perm(head_dim)
    cols = []
    for part in range(3):                 # q, k, v column blocks
        for h in range(num_heads):
            off = part * hidden + h * head_dim
            cols.append(off + (hp if part < 2 else np.arange(head_dim)))
    return np.concatenate(cols)


def prepare_params(params, cfg):
    """Cast matmul weights to bf16, reshape biases to (1,N), permute Q/K
    columns for the half-split in-kernel RoPE, and pre-concatenate/pre-split
    weights so each fused kernel gets exactly the operands it needs."""
    H = cfg["hidden_size"]
    heads = cfg["num_heads"]
    D = H // heads
    hp = _qk_head_perm(D)
    qkv_perm = _qkv_col_perm(heads, D, H)

    def lin(p, perm=None):
        w, b = p["w"], p["b"]
        if perm is not None:
            w, b = w[:, perm], b[perm]
        return {"w": w.astype(WGT_DTYPE), "b": b.astype(jnp.float32).reshape(1, -1)}

    def mlp_embed(p):
        return {"in": lin(p["in"]), "out": lin(p["out"])}

    prep = {
        "img_in": lin(params["img_in"]),
        "txt_in": lin(params["txt_in"]),
        "time_in": mlp_embed(params["time_in"]),
        "vector_in": mlp_embed(params["vector_in"]),
        "guidance_in": mlp_embed(params["guidance_in"]),
    }

    dbl = []
    for bp in params["double_blocks"]:
        mod_w = jnp.concatenate([bp["img_mod"]["w"], bp["txt_mod"]["w"]], axis=1)
        mod_b = jnp.concatenate([bp["img_mod"]["b"], bp["txt_mod"]["b"]], axis=0)
        dbl.append({
            "mod": {"w": mod_w.astype(WGT_DTYPE),
                    "b": mod_b.astype(jnp.float32).reshape(1, -1)},
            "img_qkv": lin(bp["img_qkv"], qkv_perm),
            "txt_qkv": lin(bp["txt_qkv"], qkv_perm),
            "img_q_norm": bp["img_q_norm"][hp].reshape(1, D).astype(jnp.float32),
            "img_k_norm": bp["img_k_norm"][hp].reshape(1, D).astype(jnp.float32),
            "txt_q_norm": bp["txt_q_norm"][hp].reshape(1, D).astype(jnp.float32),
            "txt_k_norm": bp["txt_k_norm"][hp].reshape(1, D).astype(jnp.float32),
            "img_proj": lin(bp["img_proj"]),
            "txt_proj": lin(bp["txt_proj"]),
            "img_mlp1": lin(bp["img_mlp1"]), "img_mlp2": lin(bp["img_mlp2"]),
            "txt_mlp1": lin(bp["txt_mlp1"]), "txt_mlp2": lin(bp["txt_mlp2"]),
        })
    prep["double_blocks"] = dbl

    sng = []
    for bp in params["single_blocks"]:
        w1, b1 = bp["lin1"]["w"], bp["lin1"]["b"]
        w2, b2 = bp["lin2"]["w"], bp["lin2"]["b"]
        sng.append({
            "mod": lin(bp["mod"]),
            "w_qkv": w1[:, :3 * H][:, qkv_perm].astype(WGT_DTYPE),
            "b_qkv": b1[:3 * H][qkv_perm].astype(jnp.float32).reshape(1, -1),
            "w_mlp": w1[:, 3 * H:].astype(WGT_DTYPE),
            "b_mlp": b1[3 * H:].astype(jnp.float32).reshape(1, -1),
            "w2a": w2[:H].astype(WGT_DTYPE),
            "w2b": w2[H:].astype(WGT_DTYPE),
            "b2": b2.astype(jnp.float32).reshape(1, -1),
            "q_norm": bp["q_norm"][hp].reshape(1, D).astype(jnp.float32),
            "k_norm": bp["k_norm"][hp].reshape(1, D).astype(jnp.float32),
        })
    prep["single_blocks"] = sng

    prep["final_layer"] = {"ada": lin(params["final_layer"]["ada"]),
                           "linear": lin(params["final_layer"]["linear"])}
    return prep


def make_img_ids(height, width):
    h, w = height // 16, width // 16
    ids = jnp.zeros((h, w, 3), jnp.float32)
    ids = ids.at[..., 1].add(jnp.arange(h, dtype=jnp.float32)[:, None])
    ids = ids.at[..., 2].add(jnp.arange(w, dtype=jnp.float32)[None, :])
    return ids.reshape(1, h * w, 3)


# ----------------------------------------------------------------------------
# Main
# ----------------------------------------------------------------------------

if __name__ == "__main__":
    cfg = dict(
        in_channels=16, context_in_dim=32, vec_in_dim=32,
        hidden_size=64, num_heads=2, axes_dim=(8, 12, 12), theta=10000,
        depth=1, depth_single_blocks=1, mlp_ratio=4.0,
        batch_size=2, max_length=8, height=64, width=64,
    )
    key = jax.random.PRNGKey(0)
    pkey, ikey = jax.random.split(key)
    params = init_params(pkey, cfg)
    prep = prepare_params(params, cfg)

    B = cfg["batch_size"]
    img_seq = cfg["height"] * cfg["width"] // 256          # 16 tokens
    k1, k2, k3 = jax.random.split(ikey, 3)
    img = jax.random.normal(k1, (B, img_seq, cfg["in_channels"]), jnp.float32)
    txt = jax.random.normal(k2, (B, cfg["max_length"], cfg["context_in_dim"]), jnp.float32)
    vec = jax.random.normal(k3, (B, cfg["vec_in_dim"]), jnp.float32)
    step = jnp.array([1], jnp.int32)
    timesteps = jnp.linspace(1.0, 0.0, 5, dtype=jnp.float32)
    guidance_scale = jnp.array([3.5], jnp.float32)

    img_ids = make_img_ids(cfg["height"], cfg["width"])
    txt_ids = jnp.zeros((1, cfg["max_length"], 3), jnp.float32)

    @jax.jit
    def step_fn(prep, img, txt, vec, step, timesteps, guidance_scale):
        return flux_denoise_step(prep, cfg, img_ids, txt_ids,
                                 img, txt, vec, step, timesteps, guidance_scale)

    out = step_fn(prep, img, txt, vec, step, timesteps, guidance_scale)
    jax.block_until_ready(out)
    assert out.shape == img.shape and out.dtype == jnp.float32
    assert bool(jnp.all(jnp.isfinite(out)))
    print("KERNEL_OK")
</pallas_src>

<mosaic_0001>
module attributes {stable_mosaic.version = 11 : i64} {
  func.func @_vec_embed_kernel(%arg0: i32, %arg1: memref<2x256xbf16, #tpu.memory_space<vmem>>, %arg2: memref<2x256xbf16, #tpu.memory_space<vmem>>, %arg3: memref<2x32xbf16, #tpu.memory_space<vmem>>, %arg4: memref<256x64xbf16, #tpu.memory_space<vmem>>, %arg5: memref<1x64xf32, #tpu.memory_space<vmem>>, %arg6: memref<64x64xbf16, #tpu.memory_space<vmem>>, %arg7: memref<1x64xf32, #tpu.memory_space<vmem>>, %arg8: memref<256x64xbf16, #tpu.memory_space<vmem>>, %arg9: memref<1x64xf32, #tpu.memory_space<vmem>>, %arg10: memref<64x64xbf16, #tpu.memory_space<vmem>>, %arg11: memref<1x64xf32, #tpu.memory_space<vmem>>, %arg12: memref<32x64xbf16, #tpu.memory_space<vmem>>, %arg13: memref<1x64xf32, #tpu.memory_space<vmem>>, %arg14: memref<64x64xbf16, #tpu.memory_space<vmem>>, %arg15: memref<1x64xf32, #tpu.memory_space<vmem>>, %arg16: memref<2x64xf32, #tpu.memory_space<vmem>>) attributes {dimension_semantics = [#tpu.dimension_semantics<arbitrary>], iteration_bounds = array<i64: 1>, scalar_prefetch = 0 : i64, scratch_operands = 0 : i64, tpu.core_type = #tpu.core_type<tc>, window_params = [{pipeline_mode = #tpu.pipeline_mode<synchronous>, transform_indices = @transform_0, window_bounds = array<i64: 2, 256>}, {pipeline_mode = #tpu.pipeline_mode<synchronous>, transform_indices = @transform_1, window_bounds = array<i64: 2, 256>}, {pipeline_mode = #tpu.pipeline_mode<synchronous>, transform_indices = @transform_2, window_bounds = array<i64: 2, 32>}, {pipeline_mode = #tpu.pipeline_mode<synchronous>, transform_indices = @transform_3, window_bounds = array<i64: 256, 64>}, {pipeline_mode = #tpu.pipeline_mode<synchronous>, transform_indices = @transform_4, window_bounds = array<i64: 1, 64>}, {pipeline_mode = #tpu.pipeline_mode<synchronous>, transform_indices = @transform_5, window_bounds = array<i64: 64, 64>}, {pipeline_mode = #tpu.pipeline_mode<synchronous>, transform_indices = @transform_6, window_bounds = array<i64: 1, 64>}, {pipeline_mode = #tpu.pipeline_mode<synchronous>, transform_indices = @transform_7, window_bounds = array<i64: 256, 64>}, {pipeline_mode = #tpu.pipeline_mode<synchronous>, transform_indices = @transform_8, window_bounds = array<i64: 1, 64>}, {pipeline_mode = #tpu.pipeline_mode<synchronous>, transform_indices = @transform_9, window_bounds = array<i64: 64, 64>}, {pipeline_mode = #tpu.pipeline_mode<synchronous>, transform_indices = @transform_10, window_bounds = array<i64: 1, 64>}, {pipeline_mode = #tpu.pipeline_mode<synchronous>, transform_indices = @transform_11, window_bounds = array<i64: 32, 64>}, {pipeline_mode = #tpu.pipeline_mode<synchronous>, transform_indices = @transform_12, window_bounds = array<i64: 1, 64>}, {pipeline_mode = #tpu.pipeline_mode<synchronous>, transform_indices = @transform_13, window_bounds = array<i64: 64, 64>}, {pipeline_mode = #tpu.pipeline_mode<synchronous>, transform_indices = @transform_14, window_bounds = array<i64: 1, 64>}, {pipeline_mode = #tpu.pipeline_mode<synchronous>, transform_indices = @transform_15, window_bounds = array<i64: 2, 64>}]} {
    %c0 = arith.constant 0 : index
    %c0_0 = arith.constant 0 : index
    %0 = vector.load %arg1[%c0, %c0_0] : memref<2x256xbf16, #tpu.memory_space<vmem>>, vector<2x256xbf16>
    %c0_1 = arith.constant 0 : index
    %c0_2 = arith.constant 0 : index
    %1 = vector.load %arg4[%c0_1, %c0_2] : memref<256x64xbf16, #tpu.memory_space<vmem>>, vector<256x64xbf16>
    %cst = arith.constant dense<0.000000e+00> : vector<2x64xf32>
    %2 = tpu.matmul %0, %1, %cst {dimension_numbers = #tpu.dot_dimension_numbers<[1], [0], [0], [1], [0, 0, 1, 1], [], []>} : vector<2x256xbf16>, vector<256x64xbf16>, vector<2x64xf32> -> vector<2x64xf32>
    %c0_3 = arith.constant 0 : index
    %c0_4 = arith.constant 0 : index
    %3 = vector.load %arg5[%c0_3, %c0_4] : memref<1x64xf32, #tpu.memory_space<vmem>>, vector<1x64xf32>
    %4 = vector.broadcast %3 : vector<1x64xf32> to vector<2x64xf32>
    %5 = arith.addf %2, %4 : vector<2x64xf32>
    %6 = arith.negf %5 : vector<2x64xf32>
    %7 = math.exp %6 : vector<2x64xf32>
    %cst_5 = arith.constant 1.000000e+00 : f32
    %8 = vector.broadcast %cst_5 : f32 to vector<2x64xf32>
    %9 = arith.addf %8, %7 : vector<2x64xf32>
    %10 = arith.divf %8, %9 : vector<2x64xf32>
    %11 = arith.mulf %5, %10 : vector<2x64xf32>
    %12 = arith.truncf %11 : vector<2x64xf32> to vector<2x64xbf16>
    %c0_6 = arith.constant 0 : index
    %c0_7 = arith.constant 0 : index
    %13 = vector.load %arg6[%c0_6, %c0_7] : memref<64x64xbf16, #tpu.memory_space<vmem>>, vector<64x64xbf16>
    %cst_8 = arith.constant dense<0.000000e+00> : vector<2x64xf32>
    %14 = tpu.matmul %12, %13, %cst_8 {dimension_numbers = #tpu.dot_dimension_numbers<[1], [0], [0], [1], [0, 0, 1, 1], [], []>} : vector<2x64xbf16>, vector<64x64xbf16>, vector<2x64xf32> -> vector<2x64xf32>
    %c0_9 = arith.constant 0 : index
    %c0_10 = arith.constant 0 : index
    %15 = vector.load %arg7[%c0_9, %c0_10] : memref<1x64xf32, #tpu.memory_space<vmem>>, vector<1x64xf32>
    %16 = vector.broadcast %15 : vector<1x64xf32> to vector<2x64xf32>
    %17 = arith.addf %14, %16 : vector<2x64xf32>
    %c0_11 = arith.constant 0 : index
    %c0_12 = arith.constant 0 : index
    %18 = vector.load %arg2[%c0_11, %c0_12] : memref<2x256xbf16, #tpu.memory_space<vmem>>, vector<2x256xbf16>
    %c0_13 = arith.constant 0 : index
    %c0_14 = arith.constant 0 : index
    %19 = vector.load %arg8[%c0_13, %c0_14] : memref<256x64xbf16, #tpu.memory_space<vmem>>, vector<256x64xbf16>
    %cst_15 = arith.constant dense<0.000000e+00> : vector<2x64xf32>
    %20 = tpu.matmul %18, %19, %cst_15 {dimension_numbers = #tpu.dot_dimension_numbers<[1], [0], [0], [1], [0, 0, 1, 1], [], []>} : vector<2x256xbf16>, vector<256x64xbf16>, vector<2x64xf32> -> vector<2x64xf32>
    %c0_16 = arith.constant 0 : index
    %c0_17 = arith.constant 0 : index
    %21 = vector.load %arg9[%c0_16, %c0_17] : memref<1x64xf32, #tpu.memory_space<vmem>>, vector<1x64xf32>
    %22 = vector.broadcast %21 : vector<1x64xf32> to vector<2x64xf32>
    %23 = arith.addf %20, %22 : vector<2x64xf32>
    %24 = arith.negf %23 : vector<2x64xf32>
    %25 = math.exp %24 : vector<2x64xf32>
    %cst_18 = arith.constant 1.000000e+00 : f32
    %26 = vector.broadcast %cst_18 : f32 to vector<2x64xf32>
    %27 = arith.addf %26, %25 : vector<2x64xf32>
    %28 = arith.divf %26, %27 : vector<2x64xf32>
    %29 = arith.mulf %23, %28 : vector<2x64xf32>
    %30 = arith.truncf %29 : vector<2x64xf32> to vector<2x64xbf16>
    %c0_19 = arith.constant 0 : index
    %c0_20 = arith.constant 0 : index
    %31 = vector.load %arg10[%c0_19, %c0_20] : memref<64x64xbf16, #tpu.memory_space<vmem>>, vector<64x64xbf16>
    %cst_21 = arith.constant dense<0.000000e+00> : vector<2x64xf32>
    %32 = tpu.matmul %30, %31, %cst_21 {dimension_numbers = #tpu.dot_dimension_numbers<[1], [0], [0], [1], [0, 0, 1, 1], [], []>} : vector<2x64xbf16>, vector<64x64xbf16>, vector<2x64xf32> -> vector<2x64xf32>
    %c0_22 = arith.constant 0 : index
    %c0_23 = arith.constant 0 : index
    %33 = vector.load %arg11[%c0_22, %c0_23] : memref<1x64xf32, #tpu.memory_space<vmem>>, vector<1x64xf32>
    %34 = vector.broadcast %33 : vector<1x64xf32> to vector<2x64xf32>
    %35 = arith.addf %32, %34 : vector<2x64xf32>
    %36 = arith.addf %17, %35 : vector<2x64xf32>
    %c0_24 = arith.constant 0 : index
    %c0_25 = arith.constant 0 : index
    %37 = vector.load %arg3[%c0_24, %c0_25] : memref<2x32xbf16, #tpu.memory_space<vmem>>, vector<2x32xbf16>
    %c0_26 = arith.constant 0 : index
    %c0_27 = arith.constant 0 : index
    %38 = vector.load %arg12[%c0_26, %c0_27] : memref<32x64xbf16, #tpu.memory_space<vmem>>, vector<32x64xbf16>
    %cst_28 = arith.constant dense<0.000000e+00> : vector<2x64xf32>
    %39 = tpu.matmul %37, %38, %cst_28 {dimension_numbers = #tpu.dot_dimension_numbers<[1], [0], [0], [1], [0, 0, 1, 1], [], []>} : vector<2x32xbf16>, vector<32x64xbf16>, vector<2x64xf32> -> vector<2x64xf32>
    %c0_29 = arith.constant 0 : index
    %c0_30 = arith.constant 0 : index
    %40 = vector.load %arg13[%c0_29, %c0_30] : memref<1x64xf32, #tpu.memory_space<vmem>>, vector<1x64xf32>
    %41 = vector.broadcast %40 : vector<1x64xf32> to vector<2x64xf32>
    %42 = arith.addf %39, %41 : vector<2x64xf32>
    %43 = arith.negf %42 : vector<2x64xf32>
    %44 = math.exp %43 : vector<2x64xf32>
    %cst_31 = arith.constant 1.000000e+00 : f32
    %45 = vector.broadcast %cst_31 : f32 to vector<2x64xf32>
    %46 = arith.addf %45, %44 : vector<2x64xf32>
    %47 = arith.divf %45, %46 : vector<2x64xf32>
    %48 = arith.mulf %42, %47 : vector<2x64xf32>
    %49 = arith.truncf %48 : vector<2x64xf32> to vector<2x64xbf16>
    %c0_32 = arith.constant 0 : index
    %c0_33 = arith.constant 0 : index
    %50 = vector.load %arg14[%c0_32, %c0_33] : memref<64x64xbf16, #tpu.memory_space<vmem>>, vector<64x64xbf16>
    %cst_34 = arith.constant dense<0.000000e+00> : vector<2x64xf32>
    %51 = tpu.matmul %49, %50, %cst_34 {dimension_numbers = #tpu.dot_dimension_numbers<[1], [0], [0], [1], [0, 0, 1, 1], [], []>} : vector<2x64xbf16>, vector<64x64xbf16>, vector<2x64xf32> -> vector<2x64xf32>
    %c0_35 = arith.constant 0 : index
    %c0_36 = arith.constant 0 : index
    %52 = vector.load %arg15[%c0_35, %c0_36] : memref<1x64xf32, #tpu.memory_space<vmem>>, vector<1x64xf32>
    %53 = vector.broadcast %52 : vector<1x64xf32> to vector<2x64xf32>
    %54 = arith.addf %51, %53 : vector<2x64xf32>
    %55 = arith.addf %36, %54 : vector<2x64xf32>
    %c0_37 = arith.constant 0 : index
    %c0_38 = arith.constant 0 : index
    %56 = vector.load %arg16[%c0_37, %c0_38] : memref<2x64xf32, #tpu.memory_space<vmem>>, vector<2x64xf32>
    tpu.vector_store %arg16[%c0_37, %c0_38], %55 {strides = array<i32>} : memref<2x64xf32, #tpu.memory_space<vmem>>, vector<2x64xf32>,
    return
  }
  func.func @transform_0(%arg0: i32) -> (i32, i32) {
    %c0_i32 = arith.constant 0 : i32
    %c0_i32_0 = arith.constant 0 : i32
    %c0_i32_1 = arith.constant 0 : i32
    return %c0_i32, %c0_i32_0 : i32, i32
  }
  func.func @transform_1(%arg0: i32) -> (i32, i32) {
    %c0_i32 = arith.constant 0 : i32
    %c0_i32_0 = arith.constant 0 : i32
    %c0_i32_1 = arith.constant 0 : i32
    return %c0_i32, %c0_i32_0 : i32, i32
  }
  func.func @transform_2(%arg0: i32) -> (i32, i32) {
    %c0_i32 = arith.constant 0 : i32
    %c0_i32_0 = arith.constant 0 : i32
    %c0_i32_1 = arith.constant 0 : i32
    return %c0_i32, %c0_i32_0 : i32, i32
  }
  func.func @transform_3(%arg0: i32) -> (i32, i32) {
    %c0_i32 = arith.constant 0 : i32
    %c0_i32_0 = arith.constant 0 : i32
    %c0_i32_1 = arith.constant 0 : i32
    return %c0_i32, %c0_i32_0 : i32, i32
  }
  func.func @transform_4(%arg0: i32) -> (i32, i32) {
    %c0_i32 = arith.constant 0 : i32
    %c0_i32_0 = arith.constant 0 : i32
    %c0_i32_1 = arith.constant 0 : i32
    return %c0_i32, %c0_i32_0 : i32, i32
  }
  func.func @transform_5(%arg0: i32) -> (i32, i32) {
    %c0_i32 = arith.constant 0 : i32
    %c0_i32_0 = arith.constant 0 : i32
    %c0_i32_1 = arith.constant 0 : i32
    return %c0_i32, %c0_i32_0 : i32, i32
  }
  func.func @transform_6(%arg0: i32) -> (i32, i32) {
    %c0_i32 = arith.constant 0 : i32
    %c0_i32_0 = arith.constant 0 : i32
    %c0_i32_1 = arith.constant 0 : i32
    return %c0_i32, %c0_i32_0 : i32, i32
  }
  func.func @transform_7(%arg0: i32) -> (i32, i32) {
    %c0_i32 = arith.constant 0 : i32
    %c0_i32_0 = arith.constant 0 : i32
    %c0_i32_1 = arith.constant 0 : i32
    return %c0_i32, %c0_i32_0 : i32, i32
  }
  func.func @transform_8(%arg0: i32) -> (i32, i32) {
    %c0_i32 = arith.constant 0 : i32
    %c0_i32_0 = arith.constant 0 : i32
    %c0_i32_1 = arith.constant 0 : i32
    return %c0_i32, %c0_i32_0 : i32, i32
  }
  func.func @transform_9(%arg0: i32) -> (i32, i32) {
    %c0_i32 = arith.constant 0 : i32
    %c0_i32_0 = arith.constant 0 : i32
    %c0_i32_1 = arith.constant 0 : i32
    return %c0_i32, %c0_i32_0 : i32, i32
  }
  func.func @transform_10(%arg0: i32) -> (i32, i32) {
    %c0_i32 = arith.constant 0 : i32
    %c0_i32_0 = arith.constant 0 : i32
    %c0_i32_1 = arith.constant 0 : i32
    return %c0_i32, %c0_i32_0 : i32, i32
  }
  func.func @transform_11(%arg0: i32) -> (i32, i32) {
    %c0_i32 = arith.constant 0 : i32
    %c0_i32_0 = arith.constant 0 : i32
    %c0_i32_1 = arith.constant 0 : i32
    return %c0_i32, %c0_i32_0 : i32, i32
  }
  func.func @transform_12(%arg0: i32) -> (i32, i32) {
    %c0_i32 = arith.constant 0 : i32
    %c0_i32_0 = arith.constant 0 : i32
    %c0_i32_1 = arith.constant 0 : i32
    return %c0_i32, %c0_i32_0 : i32, i32
  }
  func.func @transform_13(%arg0: i32) -> (i32, i32) {
    %c0_i32 = arith.constant 0 : i32
    %c0_i32_0 = arith.constant 0 : i32
    %c0_i32_1 = arith.constant 0 : i32
    return %c0_i32, %c0_i32_0 : i32, i32
  }
  func.func @transform_14(%arg0: i32) -> (i32, i32) {
    %c0_i32 = arith.constant 0 : i32
    %c0_i32_0 = arith.constant 0 : i32
    %c0_i32_1 = arith.constant 0 : i32
    return %c0_i32, %c0_i32_0 : i32, i32
  }
  func.func @transform_15(%arg0: i32) -> (i32, i32) {
    %c0_i32 = arith.constant 0 : i32
    %c0_i32_0 = arith.constant 0 : i32
    %c0_i32_1 = arith.constant 0 : i32
    return %c0_i32, %c0_i32_0 : i32, i32
  }
}

module attributes {stable_mosaic.version = 11 : i64} {
  func.func @_matmul_kernel(%arg0: i32, %arg1: i32, %arg2: i32, %arg3: memref<2x64xf32, #tpu.memory_space<vmem>>, %arg4: memref<64x384xbf16, #tpu.memory_space<vmem>>, %arg5: memref<1x384xf32, #tpu.memory_space<vmem>>, %arg6: memref<2x384xf32, #tpu.memory_space<vmem>>, %arg7: memref<2x384xf32, #tpu.memory_space<vmem>>) attributes {dimension_semantics = [#tpu.dimension_semantics<parallel>, #tpu.dimension_semantics<parallel>, #tpu.dimension_semantics<arbitrary>], iteration_bounds = array<i64: 1, 2, 1>, scalar_prefetch = 0 : i64, scratch_operands = 1 : i64, tpu.core_type = #tpu.core_type<tc>, window_params = [{transform_indices = @transform_0, window_bounds = array<i64: 2, 64>}, {transform_indices = @transform_1, window_bounds = array<i64: 64, 384>}, {transform_indices = @transform_2, window_bounds = array<i64: 1, 384>}, {transform_indices = @transform_3, window_bounds = array<i64: 2, 384>}]} {
    %c0_i32 = arith.constant 0 : i32
    %0 = arith.cmpi eq, %arg2, %c0_i32 : i32
    %1 = arith.extui %0 : i1 to i32
    %c0_i32_0 = arith.constant 0 : i32
    %2 = arith.cmpi ne, %1, %c0_i32_0 : i32
    scf.if %2 {
      %cst_11 = arith.constant 0.000000e+00 : f32
      %19 = vector.broadcast %cst_11 : f32 to vector<2x384xf32>
      %c0_12 = arith.constant 0 : index
      %c0_13 = arith.constant 0 : index
      %20 = vector.load %arg7[%c0_12, %c0_13] : memref<2x384xf32, #tpu.memory_space<vmem>>, vector<2x384xf32>
      tpu.vector_store %arg7[%c0_12, %c0_13], %19 {strides = array<i32>} : memref<2x384xf32, #tpu.memory_space<vmem>>, vector<2x384xf32>,
    } else {
    }
    %c0 = arith.constant 0 : index
    %c0_1 = arith.constant 0 : index
    %3 = vector.load %arg3[%c0, %c0_1] : memref<2x64xf32, #tpu.memory_space<vmem>>, vector<2x64xf32>
    %4 = arith.negf %3 : vector<2x64xf32>
    %5 = math.exp %4 : vector<2x64xf32>
    %cst = arith.constant 1.000000e+00 : f32
    %6 = vector.broadcast %cst : f32 to vector<2x64xf32>
    %7 = arith.addf %6, %5 : vector<2x64xf32>
    %8 = arith.divf %6, %7 : vector<2x64xf32>
    %9 = arith.mulf %3, %8 : vector<2x64xf32>
    %c0_2 = arith.constant 0 : index
    %c0_3 = arith.constant 0 : index
    %10 = vector.load %arg7[%c0_2, %c0_3] : memref<2x384xf32, #tpu.memory_space<vmem>>, vector<2x384xf32>
    %11 = arith.truncf %9 : vector<2x64xf32> to vector<2x64xbf16>
    %c0_4 = arith.constant 0 : index
    %c0_5 = arith.constant 0 : index
    %12 = vector.load %arg4[%c0_4, %c0_5] : memref<64x384xbf16, #tpu.memory_space<vmem>>, vector<64x384xbf16>
    %cst_6 = arith.constant dense<0.000000e+00> : vector<2x384xf32>
    %13 = tpu.matmul %11, %12, %cst_6 {dimension_numbers = #tpu.dot_dimension_numbers<[1], [0], [0], [1], [0, 0, 1, 1], [], []>} : vector<2x64xbf16>, vector<64x384xbf16>, vector<2x384xf32> -> vector<2x384xf32>
    %14 = arith.addf %10, %13 : vector<2x384xf32>
    %c0_7 = arith.constant 0 : index
    %c0_8 = arith.constant 0 : index
    %15 = vector.load %arg7[%c0_7, %c0_8] : memref<2x384xf32, #tpu.memory_space<vmem>>, vector<2x384xf32>
    tpu.vector_store %arg7[%c0_7, %c0_8], %14 {strides = array<i32>} : memref<2x384xf32, #tpu.memory_space<vmem>>, vector<2x384xf32>,
    %c0_i32_9 = arith.constant 0 : i32
    %16 = arith.cmpi eq, %arg2, %c0_i32_9 : i32
    %17 = arith.extui %16 : i1 to i32
    %c0_i32_10 = arith.constant 0 : i32
    %18 = arith.cmpi ne, %17, %c0_i32_10 : i32
    scf.if %18 {
      %c0_11 = arith.constant 0 : index
      %c0_12 = arith.constant 0 : index
      %19 = vector.load %arg7[%c0_11, %c0_12] : memref<2x384xf32, #tpu.memory_space<vmem>>, vector<2x384xf32>
      %c0_13 = arith.constant 0 : index
      %c0_14 = arith.constant 0 : index
      %20 = vector.load %arg5[%c0_13, %c0_14] : memref<1x384xf32, #tpu.memory_space<vmem>>, vector<1x384xf32>
      %21 = vector.broadcast %20 : vector<1x384xf32> to vector<2x384xf32>
      %22 = arith.addf %19, %21 : vector<2x384xf32>
      %c0_15 = arith.constant 0 : index
      %c0_16 = arith.constant 0 : index
      %23 = vector.load %arg6[%c0_15, %c0_16] : memref<2x384xf32, #tpu.memory_space<vmem>>, vector<2x384xf32>
      tpu.vector_store %arg6[%c0_15, %c0_16], %22 {strides = array<i32>} : memref<2x384xf32, #tpu.memory_space<vmem>>, vector<2x384xf32>,
    } else {
    }
    return
  }
  func.func @transform_0(%arg0: i32, %arg1: i32, %arg2: i32) -> (i32, i32) {
    %c0_i32 = arith.constant 0 : i32
    return %arg0, %arg2 : i32, i32
  }
  func.func @transform_1(%arg0: i32, %arg1: i32, %arg2: i32) -> (i32, i32) {
    %c0_i32 = arith.constant 0 : i32
    return %arg2, %arg1 : i32, i32
  }
  func.func @transform_2(%arg0: i32, %arg1: i32, %arg2: i32) -> (i32, i32) {
    %c0_i32 = arith.constant 0 : i32
    %c0_i32_0 = arith.constant 0 : i32
    return %c0_i32, %arg1 : i32, i32
  }
  func.func @transform_3(%arg0: i32, %arg1: i32, %arg2: i32) -> (i32, i32) {
    %c0_i32 = arith.constant 0 : i32
    return %arg0, %arg1 : i32, i32
  }
}

module attributes {stable_mosaic.version = 11 : i64} {
  func.func @_matmul_kernel(%arg0: i32, %arg1: i32, %arg2: i32, %arg3: memref<32x16xf32, #tpu.memory_space<vmem>>, %arg4: memref<16x64xbf16, #tpu.memory_space<vmem>>, %arg5: memref<1x64xf32, #tpu.memory_space<vmem>>, %arg6: memref<32x64xbf16, #tpu.memory_space<vmem>>, %arg7: memref<32x64xf32, #tpu.memory_space<vmem>>) attributes {dimension_semantics = [#tpu.dimension_semantics<parallel>, #tpu.dimension_semantics<parallel>, #tpu.dimension_semantics<arbitrary>], iteration_bounds = array<i64: 1, 1, 1>, scalar_prefetch = 0 : i64, scratch_operands = 1 : i64, tpu.core_type = #tpu.core_type<tc>, window_params = [{transform_indices = @transform_0, window_bounds = array<i64: 32, 16>}, {transform_indices = @transform_1, window_bounds = array<i64: 16, 64>}, {transform_indices = @transform_2, window_bounds = array<i64: 1, 64>}, {transform_indices = @transform_3, window_bounds = array<i64: 32, 64>}]} {
    %c0_i32 = arith.constant 0 : i32
    %0 = arith.cmpi eq, %arg2, %c0_i32 : i32
    %1 = arith.extui %0 : i1 to i32
    %c0_i32_0 = arith.constant 0 : i32
    %2 = arith.cmpi ne, %1, %c0_i32_0 : i32
    scf.if %2 {
      %cst_10 = arith.constant 0.000000e+00 : f32
      %13 = vector.broadcast %cst_10 : f32 to vector<32x64xf32>
      %c0_11 = arith.constant 0 : index
      %c0_12 = arith.constant 0 : index
      %14 = vector.load %arg7[%c0_11, %c0_12] : memref<32x64xf32, #tpu.memory_space<vmem>>, vector<32x64xf32>
      tpu.vector_store %arg7[%c0_11, %c0_12], %13 {strides = array<i32>} : memref<32x64xf32, #tpu.memory_space<vmem>>, vector<32x64xf32>,
    } else {
    }
    %c0 = arith.constant 0 : index
    %c0_1 = arith.constant 0 : index
    %3 = vector.load %arg3[%c0, %c0_1] : memref<32x16xf32, #tpu.memory_space<vmem>>, vector<32x16xf32>
    %c0_2 = arith.constant 0 : index
    %c0_3 = arith.constant 0 : index
    %4 = vector.load %arg7[%c0_2, %c0_3] : memref<32x64xf32, #tpu.memory_space<vmem>>, vector<32x64xf32>
    %5 = arith.truncf %3 : vector<32x16xf32> to vector<32x16xbf16>
    %c0_4 = arith.constant 0 : index
    %c0_5 = arith.constant 0 : index
    %6 = vector.load %arg4[%c0_4, %c0_5] : memref<16x64xbf16, #tpu.memory_space<vmem>>, vector<16x64xbf16>
    %cst = arith.constant dense<0.000000e+00> : vector<32x64xf32>
    %7 = tpu.matmul %5, %6, %cst {dimension_numbers = #tpu.dot_dimension_numbers<[1], [0], [0], [1], [0, 0, 1, 1], [], []>} : vector<32x16xbf16>, vector<16x64xbf16>, vector<32x64xf32> -> vector<32x64xf32>
    %8 = arith.addf %4, %7 : vector<32x64xf32>
    %c0_6 = arith.constant 0 : index
    %c0_7 = arith.constant 0 : index
    %9 = vector.load %arg7[%c0_6, %c0_7] : memref<32x64xf32, #tpu.memory_space<vmem>>, vector<32x64xf32>
    tpu.vector_store %arg7[%c0_6, %c0_7], %8 {strides = array<i32>} : memref<32x64xf32, #tpu.memory_space<vmem>>, vector<32x64xf32>,
    %c0_i32_8 = arith.constant 0 : i32
    %10 = arith.cmpi eq, %arg2, %c0_i32_8 : i32
    %11 = arith.extui %10 : i1 to i32
    %c0_i32_9 = arith.constant 0 : i32
    %12 = arith.cmpi ne, %11, %c0_i32_9 : i32
    scf.if %12 {
      %c0_10 = arith.constant 0 : index
      %c0_11 = arith.constant 0 : index
      %13 = vector.load %arg7[%c0_10, %c0_11] : memref<32x64xf32, #tpu.memory_space<vmem>>, vector<32x64xf32>
      %c0_12 = arith.constant 0 : index
      %c0_13 = arith.constant 0 : index
      %14 = vector.load %arg5[%c0_12, %c0_13] : memref<1x64xf32, #tpu.memory_space<vmem>>, vector<1x64xf32>
      %15 = vector.broadcast %14 : vector<1x64xf32> to vector<32x64xf32>
      %16 = arith.addf %13, %15 : vector<32x64xf32>
      %17 = arith.truncf %16 : vector<32x64xf32> to vector<32x64xbf16>
      %c0_14 = arith.constant 0 : index
      %c0_15 = arith.constant 0 : index
      %18 = vector.load %arg6[%c0_14, %c0_15] : memref<32x64xbf16, #tpu.memory_space<vmem>>, vector<32x64xbf16>
      tpu.vector_store %arg6[%c0_14, %c0_15], %17 {strides = array<i32>} : memref<32x64xbf16, #tpu.memory_space<vmem>>, vector<32x64xbf16>,
    } else {
    }
    return
  }
  func.func @transform_0(%arg0: i32, %arg1: i32, %arg2: i32) -> (i32, i32) {
    %c0_i32 = arith.constant 0 : i32
    return %arg0, %arg2 : i32, i32
  }
  func.func @transform_1(%arg0: i32, %arg1: i32, %arg2: i32) -> (i32, i32) {
    %c0_i32 = arith.constant 0 : i32
    return %arg2, %arg1 : i32, i32
  }
  func.func @transform_2(%arg0: i32, %arg1: i32, %arg2: i32) -> (i32, i32) {
    %c0_i32 = arith.constant 0 : i32
    %c0_i32_0 = arith.constant 0 : i32
    return %c0_i32, %arg1 : i32, i32
  }
  func.func @transform_3(%arg0: i32, %arg1: i32, %arg2: i32) -> (i32, i32) {
    %c0_i32 = arith.constant 0 : i32
    return %arg0, %arg1 : i32, i32
  }
}

module attributes {stable_mosaic.version = 11 : i64} {
  func.func @_ln_mod_linear_kernel(%arg0: i32, %arg1: memref<1x16x64xbf16, #tpu.memory_space<vmem>>, %arg2: memref<1x1x64xf32, #tpu.memory_space<vmem>>, %arg3: memref<1x1x64xf32, #tpu.memory_space<vmem>>, %arg4: memref<64x192xbf16, #tpu.memory_space<vmem>>, %arg5: memref<1x192xf32, #tpu.memory_space<vmem>>, %arg6: memref<1x16x192xbf16, #tpu.memory_space<vmem>>) attributes {dimension_semantics = [#tpu.dimension_semantics<parallel>], iteration_bounds = array<i64: 2>, scalar_prefetch = 0 : i64, scratch_operands = 0 : i64, tpu.core_type = #tpu.core_type<tc>, window_params = [{transform_indices = @transform_0, window_bounds = array<i64: 1, 16, 64>}, {transform_indices = @transform_1, window_bounds = array<i64: 1, 1, 64>}, {transform_indices = @transform_2, window_bounds = array<i64: 1, 1, 64>}, {pipeline_mode = #tpu.pipeline_mode<synchronous>, transform_indices = @transform_3, window_bounds = array<i64: 64, 192>}, {pipeline_mode = #tpu.pipeline_mode<synchronous>, transform_indices = @transform_4, window_bounds = array<i64: 1, 192>}, {transform_indices = @transform_5, window_bounds = array<i64: 1, 16, 192>}]} {
    %c0 = arith.constant 0 : index
    %c0_0 = arith.constant 0 : index
    %c0_1 = arith.constant 0 : index
    %0 = vector.load %arg1[%c0, %c0_0, %c0_1] : memref<1x16x64xbf16, #tpu.memory_space<vmem>>, vector<1x16x64xbf16>
    %1 = vector.shape_cast %0 : vector<1x16x64xbf16> to vector<16x64xbf16>
    %2 = arith.extf %1 : vector<16x64xbf16> to vector<16x64xf32>
    %c0_2 = arith.constant 0 : index
    %c0_3 = arith.constant 0 : index
    %c0_4 = arith.constant 0 : index
    %3 = vector.load %arg2[%c0_2, %c0_3, %c0_4] : memref<1x1x64xf32, #tpu.memory_space<vmem>>, vector<1x1x64xf32>
    %4 = vector.shape_cast %3 : vector<1x1x64xf32> to vector<1x64xf32>
    %c0_5 = arith.constant 0 : index
    %c0_6 = arith.constant 0 : index
    %c0_7 = arith.constant 0 : index
    %5 = vector.load %arg3[%c0_5, %c0_6, %c0_7] : memref<1x1x64xf32, #tpu.memory_space<vmem>>, vector<1x1x64xf32>
    %6 = vector.shape_cast %5 : vector<1x1x64xf32> to vector<1x64xf32>
    %cst = arith.constant dense<0.000000e+00> : vector<16xf32>
    %7 = vector.multi_reduction <add>, %2, %cst [1] : vector<16x64xf32> to vector<16xf32>
    %8 = vector.shape_cast %7 : vector<16xf32> to vector<16x1xf32>
    %cst_8 = arith.constant 6.400000e+01 : f32
    %9 = vector.broadcast %cst_8 : f32 to vector<16x1xf32>
    %10 = arith.divf %8, %9 : vector<16x1xf32>
    %11 = vector.broadcast %10 : vector<16x1xf32> to vector<16x64xf32>
    %12 = arith.subf %2, %11 : vector<16x64xf32>
    %13 = arith.mulf %12, %12 : vector<16x64xf32>
    %cst_9 = arith.constant dense<0.000000e+00> : vector<16xf32>
    %14 = vector.multi_reduction <add>, %13, %cst_9 [1] : vector<16x64xf32> to vector<16xf32>
    %15 = vector.shape_cast %14 : vector<16xf32> to vector<16x1xf32>
    %cst_10 = arith.constant 6.400000e+01 : f32
    %16 = vector.broadcast %cst_10 : f32 to vector<16x1xf32>
    %17 = arith.divf %15, %16 : vector<16x1xf32>
    %cst_11 = arith.constant 1.000000e+00 : f32
    %18 = vector.broadcast %cst_11 : f32 to vector<1x64xf32>
    %19 = arith.addf %18, %6 : vector<1x64xf32>
    %cst_12 = arith.constant 9.99999997E-7 : f32
    %20 = vector.broadcast %cst_12 : f32 to vector<16x1xf32>
    %21 = arith.addf %17, %20 : vector<16x1xf32>
    %22 = math.rsqrt %21 : vector<16x1xf32>
    %23 = vector.broadcast %22 : vector<16x1xf32> to vector<16x64xf32>
    %24 = arith.mulf %12, %23 : vector<16x64xf32>
    %25 = vector.broadcast %19 : vector<1x64xf32> to vector<16x64xf32>
    %26 = arith.mulf %25, %24 : vector<16x64xf32>
    %27 = vector.broadcast %4 : vector<1x64xf32> to vector<16x64xf32>
    %28 = arith.addf %26, %27 : vector<16x64xf32>
    %29 = arith.truncf %28 : vector<16x64xf32> to vector<16x64xbf16>
    %c0_13 = arith.constant 0 : index
    %c0_14 = arith.constant 0 : index
    %30 = vector.load %arg4[%c0_13, %c0_14] : memref<64x192xbf16, #tpu.memory_space<vmem>>, vector<64x192xbf16>
    %cst_15 = arith.constant dense<0.000000e+00> : vector<16x192xf32>
    %31 = tpu.matmul %29, %30, %cst_15 {dimension_numbers = #tpu.dot_dimension_numbers<[1], [0], [0], [1], [0, 0, 1, 1], [], []>} : vector<16x64xbf16>, vector<64x192xbf16>, vector<16x192xf32> -> vector<16x192xf32>
    %c0_16 = arith.constant 0 : index
    %c0_17 = arith.constant 0 : index
    %32 = vector.load %arg5[%c0_16, %c0_17] : memref<1x192xf32, #tpu.memory_space<vmem>>, vector<1x192xf32>
    %33 = vector.broadcast %32 : vector<1x192xf32> to vector<16x192xf32>
    %34 = arith.addf %31, %33 : vector<16x192xf32>
    %35 = arith.truncf %34 : vector<16x192xf32> to vector<16x192xbf16>
    %c0_18 = arith.constant 0 : index
    %c0_19 = arith.constant 0 : index
    %c0_20 = arith.constant 0 : index
    %36 = vector.load %arg6[%c0_18, %c0_19, %c0_20] : memref<1x16x192xbf16, #tpu.memory_space<vmem>>, vector<1x16x192xbf16>
    %37 = vector.shape_cast %36 : vector<1x16x192xbf16> to vector<16x192xbf16>
    %38 = vector.shape_cast %35 : vector<16x192xbf16> to vector<1x16x192xbf16>
    tpu.vector_store %arg6[%c0_18, %c0_19, %c0_20], %38 {strides = array<i32>} : memref<1x16x192xbf16, #tpu.memory_space<vmem>>, vector<1x16x192xbf16>,
    return
  }
  func.func @transform_0(%arg0: i32) -> (i32, i32, i32) {
    %c0_i32 = arith.constant 0 : i32
    %c0_i32_0 = arith.constant 0 : i32
    %c0_i32_1 = arith.constant 0 : i32
    return %arg0, %c0_i32, %c0_i32_0 : i32, i32, i32
  }
  func.func @transform_1(%arg0: i32) -> (i32, i32, i32) {
    %c0_i32 = arith.constant 0 : i32
    %c0_i32_0 = arith.constant 0 : i32
    %c0_i32_1 = arith.constant 0 : i32
    return %arg0, %c0_i32, %c0_i32_0 : i32, i32, i32
  }
  func.func @transform_2(%arg0: i32) -> (i32, i32, i32) {
    %c0_i32 = arith.constant 0 : i32
    %c0_i32_0 = arith.constant 0 : i32
    %c0_i32_1 = arith.constant 0 : i32
    return %arg0, %c0_i32, %c0_i32_0 : i32, i32, i32
  }
  func.func @transform_3(%arg0: i32) -> (i32, i32) {
    %c0_i32 = arith.constant 0 : i32
    %c0_i32_0 = arith.constant 0 : i32
    %c0_i32_1 = arith.constant 0 : i32
    return %c0_i32, %c0_i32_0 : i32, i32
  }
  func.func @transform_4(%arg0: i32) -> (i32, i32) {
    %c0_i32 = arith.constant 0 : i32
    %c0_i32_0 = arith.constant 0 : i32
    %c0_i32_1 = arith.constant 0 : i32
    return %c0_i32, %c0_i32_0 : i32, i32
  }
  func.func @transform_5(%arg0: i32) -> (i32, i32, i32) {
    %c0_i32 = arith.constant 0 : i32
    %c0_i32_0 = arith.constant 0 : i32
    %c0_i32_1 = arith.constant 0 : i32
    return %arg0, %c0_i32, %c0_i32_0 : i32, i32, i32
  }
}

module attributes {stable_mosaic.version = 11 : i64} {
  func.func @_matmul_kernel(%arg0: i32, %arg1: i32, %arg2: i32, %arg3: memref<16x32xf32, #tpu.memory_space<vmem>>, %arg4: memref<32x64xbf16, #tpu.memory_space<vmem>>, %arg5: memref<1x64xf32, #tpu.memory_space<vmem>>, %arg6: memref<16x64xbf16, #tpu.memory_space<vmem>>, %arg7: memref<16x64xf32, #tpu.memory_space<vmem>>) attributes {dimension_semantics = [#tpu.dimension_semantics<parallel>, #tpu.dimension_semantics<parallel>, #tpu.dimension_semantics<arbitrary>], iteration_bounds = array<i64: 1, 1, 1>, scalar_prefetch = 0 : i64, scratch_operands = 1 : i64, tpu.core_type = #tpu.core_type<tc>, window_params = [{transform_indices = @transform_0, window_bounds = array<i64: 16, 32>}, {transform_indices = @transform_1, window_bounds = array<i64: 32, 64>}, {transform_indices = @transform_2, window_bounds = array<i64: 1, 64>}, {transform_indices = @transform_3, window_bounds = array<i64: 16, 64>}]} {
    %c0_i32 = arith.constant 0 : i32
    %0 = arith.cmpi eq, %arg2, %c0_i32 : i32
    %1 = arith.extui %0 : i1 to i32
    %c0_i32_0 = arith.constant 0 : i32
    %2 = arith.cmpi ne, %1, %c0_i32_0 : i32
    scf.if %2 {
      %cst_10 = arith.constant 0.000000e+00 : f32
      %13 = vector.broadcast %cst_10 : f32 to vector<16x64xf32>
      %c0_11 = arith.constant 0 : index
      %c0_12 = arith.constant 0 : index
      %14 = vector.load %arg7[%c0_11, %c0_12] : memref<16x64xf32, #tpu.memory_space<vmem>>, vector<16x64xf32>
      tpu.vector_store %arg7[%c0_11, %c0_12], %13 {strides = array<i32>} : memref<16x64xf32, #tpu.memory_space<vmem>>, vector<16x64xf32>,
    } else {
    }
    %c0 = arith.constant 0 : index
    %c0_1 = arith.constant 0 : index
    %3 = vector.load %arg3[%c0, %c0_1] : memref<16x32xf32, #tpu.memory_space<vmem>>, vector<16x32xf32>
    %c0_2 = arith.constant 0 : index
    %c0_3 = arith.constant 0 : index
    %4 = vector.load %arg7[%c0_2, %c0_3] : memref<16x64xf32, #tpu.memory_space<vmem>>, vector<16x64xf32>
    %5 = arith.truncf %3 : vector<16x32xf32> to vector<16x32xbf16>
    %c0_4 = arith.constant 0 : index
    %c0_5 = arith.constant 0 : index
    %6 = vector.load %arg4[%c0_4, %c0_5] : memref<32x64xbf16, #tpu.memory_space<vmem>>, vector<32x64xbf16>
    %cst = arith.constant dense<0.000000e+00> : vector<16x64xf32>
    %7 = tpu.matmul %5, %6, %cst {dimension_numbers = #tpu.dot_dimension_numbers<[1], [0], [0], [1], [0, 0, 1, 1], [], []>} : vector<16x32xbf16>, vector<32x64xbf16>, vector<16x64xf32> -> vector<16x64xf32>
    %8 = arith.addf %4, %7 : vector<16x64xf32>
    %c0_6 = arith.constant 0 : index
    %c0_7 = arith.constant 0 : index
    %9 = vector.load %arg7[%c0_6, %c0_7] : memref<16x64xf32, #tpu.memory_space<vmem>>, vector<16x64xf32>
    tpu.vector_store %arg7[%c0_6, %c0_7], %8 {strides = array<i32>} : memref<16x64xf32, #tpu.memory_space<vmem>>, vector<16x64xf32>,
    %c0_i32_8 = arith.constant 0 : i32
    %10 = arith.cmpi eq, %arg2, %c0_i32_8 : i32
    %11 = arith.extui %10 : i1 to i32
    %c0_i32_9 = arith.constant 0 : i32
    %12 = arith.cmpi ne, %11, %c0_i32_9 : i32
    scf.if %12 {
      %c0_10 = arith.constant 0 : index
      %c0_11 = arith.constant 0 : index
      %13 = vector.load %arg7[%c0_10, %c0_11] : memref<16x64xf32, #tpu.memory_space<vmem>>, vector<16x64xf32>
      %c0_12 = arith.constant 0 : index
      %c0_13 = arith.constant 0 : index
      %14 = vector.load %arg5[%c0_12, %c0_13] : memref<1x64xf32, #tpu.memory_space<vmem>>, vector<1x64xf32>
      %15 = vector.broadcast %14 : vector<1x64xf32> to vector<16x64xf32>
      %16 = arith.addf %13, %15 : vector<16x64xf32>
      %17 = arith.truncf %16 : vector<16x64xf32> to vector<16x64xbf16>
      %c0_14 = arith.constant 0 : index
      %c0_15 = arith.constant 0 : index
      %18 = vector.load %arg6[%c0_14, %c0_15] : memref<16x64xbf16, #tpu.memory_space<vmem>>, vector<16x64xbf16>
      tpu.vector_store %arg6[%c0_14, %c0_15], %17 {strides = array<i32>} : memref<16x64xbf16, #tpu.memory_space<vmem>>, vector<16x64xbf16>,
    } else {
    }
    return
  }
  func.func @transform_0(%arg0: i32, %arg1: i32, %arg2: i32) -> (i32, i32) {
    %c0_i32 = arith.constant 0 : i32
    return %arg0, %arg2 : i32, i32
  }
  func.func @transform_1(%arg0: i32, %arg1: i32, %arg2: i32) -> (i32, i32) {
    %c0_i32 = arith.constant 0 : i32
    return %arg2, %arg1 : i32, i32
  }
  func.func @transform_2(%arg0: i32, %arg1: i32, %arg2: i32) -> (i32, i32) {
    %c0_i32 = arith.constant 0 : i32
    %c0_i32_0 = arith.constant 0 : i32
    return %c0_i32, %arg1 : i32, i32
  }
  func.func @transform_3(%arg0: i32, %arg1: i32, %arg2: i32) -> (i32, i32) {
    %c0_i32 = arith.constant 0 : i32
    return %arg0, %arg1 : i32, i32
  }
}

module attributes {stable_mosaic.version = 11 : i64} {
  func.func @_ln_mod_linear_kernel(%arg0: i32, %arg1: memref<1x8x64xbf16, #tpu.memory_space<vmem>>, %arg2: memref<1x1x64xf32, #tpu.memory_space<vmem>>, %arg3: memref<1x1x64xf32, #tpu.memory_space<vmem>>, %arg4: memref<64x192xbf16, #tpu.memory_space<vmem>>, %arg5: memref<1x192xf32, #tpu.memory_space<vmem>>, %arg6: memref<1x8x192xbf16, #tpu.memory_space<vmem>>) attributes {dimension_semantics = [#tpu.dimension_semantics<parallel>], iteration_bounds = array<i64: 2>, scalar_prefetch = 0 : i64, scratch_operands = 0 : i64, tpu.core_type = #tpu.core_type<tc>, window_params = [{transform_indices = @transform_0, window_bounds = array<i64: 1, 8, 64>}, {transform_indices = @transform_1, window_bounds = array<i64: 1, 1, 64>}, {transform_indices = @transform_2, window_bounds = array<i64: 1, 1, 64>}, {pipeline_mode = #tpu.pipeline_mode<synchronous>, transform_indices = @transform_3, window_bounds = array<i64: 64, 192>}, {pipeline_mode = #tpu.pipeline_mode<synchronous>, transform_indices = @transform_4, window_bounds = array<i64: 1, 192>}, {transform_indices = @transform_5, window_bounds = array<i64: 1, 8, 192>}]} {
    %c0 = arith.constant 0 : index
    %c0_0 = arith.constant 0 : index
    %c0_1 = arith.constant 0 : index
    %0 = vector.load %arg1[%c0, %c0_0, %c0_1] : memref<1x8x64xbf16, #tpu.memory_space<vmem>>, vector<1x8x64xbf16>
    %1 = vector.shape_cast %0 : vector<1x8x64xbf16> to vector<8x64xbf16>
    %2 = arith.extf %1 : vector<8x64xbf16> to vector<8x64xf32>
    %c0_2 = arith.constant 0 : index
    %c0_3 = arith.constant 0 : index
    %c0_4 = arith.constant 0 : index
    %3 = vector.load %arg2[%c0_2, %c0_3, %c0_4] : memref<1x1x64xf32, #tpu.memory_space<vmem>>, vector<1x1x64xf32>
    %4 = vector.shape_cast %3 : vector<1x1x64xf32> to vector<1x64xf32>
    %c0_5 = arith.constant 0 : index
    %c0_6 = arith.constant 0 : index
    %c0_7 = arith.constant 0 : index
    %5 = vector.load %arg3[%c0_5, %c0_6, %c0_7] : memref<1x1x64xf32, #tpu.memory_space<vmem>>, vector<1x1x64xf32>
    %6 = vector.shape_cast %5 : vector<1x1x64xf32> to vector<1x64xf32>
    %cst = arith.constant dense<0.000000e+00> : vector<8xf32>
    %7 = vector.multi_reduction <add>, %2, %cst [1] : vector<8x64xf32> to vector<8xf32>
    %8 = vector.shape_cast %7 : vector<8xf32> to vector<8x1xf32>
    %cst_8 = arith.constant 6.400000e+01 : f32
    %9 = vector.broadcast %cst_8 : f32 to vector<8x1xf32>
    %10 = arith.divf %8, %9 : vector<8x1xf32>
    %11 = vector.broadcast %10 : vector<8x1xf32> to vector<8x64xf32>
    %12 = arith.subf %2, %11 : vector<8x64xf32>
    %13 = arith.mulf %12, %12 : vector<8x64xf32>
    %cst_9 = arith.constant dense<0.000000e+00> : vector<8xf32>
    %14 = vector.multi_reduction <add>, %13, %cst_9 [1] : vector<8x64xf32> to vector<8xf32>
    %15 = vector.shape_cast %14 : vector<8xf32> to vector<8x1xf32>
    %cst_10 = arith.constant 6.400000e+01 : f32
    %16 = vector.broadcast %cst_10 : f32 to vector<8x1xf32>
    %17 = arith.divf %15, %16 : vector<8x1xf32>
    %cst_11 = arith.constant 1.000000e+00 : f32
    %18 = vector.broadcast %cst_11 : f32 to vector<1x64xf32>
    %19 = arith.addf %18, %6 : vector<1x64xf32>
    %cst_12 = arith.constant 9.99999997E-7 : f32
    %20 = vector.broadcast %cst_12 : f32 to vector<8x1xf32>
    %21 = arith.addf %17, %20 : vector<8x1xf32>
    %22 = math.rsqrt %21 : vector<8x1xf32>
    %23 = vector.broadcast %22 : vector<8x1xf32> to vector<8x64xf32>
    %24 = arith.mulf %12, %23 : vector<8x64xf32>
    %25 = vector.broadcast %19 : vector<1x64xf32> to vector<8x64xf32>
    %26 = arith.mulf %25, %24 : vector<8x64xf32>
    %27 = vector.broadcast %4 : vector<1x64xf32> to vector<8x64xf32>
    %28 = arith.addf %26, %27 : vector<8x64xf32>
    %29 = arith.truncf %28 : vector<8x64xf32> to vector<8x64xbf16>
    %c0_13 = arith.constant 0 : index
    %c0_14 = arith.constant 0 : index
    %30 = vector.load %arg4[%c0_13, %c0_14] : memref<64x192xbf16, #tpu.memory_space<vmem>>, vector<64x192xbf16>
    %cst_15 = arith.constant dense<0.000000e+00> : vector<8x192xf32>
    %31 = tpu.matmul %29, %30, %cst_15 {dimension_numbers = #tpu.dot_dimension_numbers<[1], [0], [0], [1], [0, 0, 1, 1], [], []>} : vector<8x64xbf16>, vector<64x192xbf16>, vector<8x192xf32> -> vector<8x192xf32>
    %c0_16 = arith.constant 0 : index
    %c0_17 = arith.constant 0 : index
    %32 = vector.load %arg5[%c0_16, %c0_17] : memref<1x192xf32, #tpu.memory_space<vmem>>, vector<1x192xf32>
    %33 = vector.broadcast %32 : vector<1x192xf32> to vector<8x192xf32>
    %34 = arith.addf %31, %33 : vector<8x192xf32>
    %35 = arith.truncf %34 : vector<8x192xf32> to vector<8x192xbf16>
    %c0_18 = arith.constant 0 : index
    %c0_19 = arith.constant 0 : index
    %c0_20 = arith.constant 0 : index
    %36 = vector.load %arg6[%c0_18, %c0_19, %c0_20] : memref<1x8x192xbf16, #tpu.memory_space<vmem>>, vector<1x8x192xbf16>
    %37 = vector.shape_cast %36 : vector<1x8x192xbf16> to vector<8x192xbf16>
    %38 = vector.shape_cast %35 : vector<8x192xbf16> to vector<1x8x192xbf16>
    tpu.vector_store %arg6[%c0_18, %c0_19, %c0_20], %38 {strides = array<i32>} : memref<1x8x192xbf16, #tpu.memory_space<vmem>>, vector<1x8x192xbf16>,
    return
  }
  func.func @transform_0(%arg0: i32) -> (i32, i32, i32) {
    %c0_i32 = arith.constant 0 : i32
    %c0_i32_0 = arith.constant 0 : i32
    %c0_i32_1 = arith.constant 0 : i32
    return %arg0, %c0_i32, %c0_i32_0 : i32, i32, i32
  }
  func.func @transform_1(%arg0: i32) -> (i32, i32, i32) {
    %c0_i32 = arith.constant 0 : i32
    %c0_i32_0 = arith.constant 0 : i32
    %c0_i32_1 = arith.constant 0 : i32
    return %arg0, %c0_i32, %c0_i32_0 : i32, i32, i32
  }
  func.func @transform_2(%arg0: i32) -> (i32, i32, i32) {
    %c0_i32 = arith.constant 0 : i32
    %c0_i32_0 = arith.constant 0 : i32
    %c0_i32_1 = arith.constant 0 : i32
    return %arg0, %c0_i32, %c0_i32_0 : i32, i32, i32
  }
  func.func @transform_3(%arg0: i32) -> (i32, i32) {
    %c0_i32 = arith.constant 0 : i32
    %c0_i32_0 = arith.constant 0 : i32
    %c0_i32_1 = arith.constant 0 : i32
    return %c0_i32, %c0_i32_0 : i32, i32
  }
  func.func @transform_4(%arg0: i32) -> (i32, i32) {
    %c0_i32 = arith.constant 0 : i32
    %c0_i32_0 = arith.constant 0 : i32
    %c0_i32_1 = arith.constant 0 : i32
    return %c0_i32, %c0_i32_0 : i32, i32
  }
  func.func @transform_5(%arg0: i32) -> (i32, i32, i32) {
    %c0_i32 = arith.constant 0 : i32
    %c0_i32_0 = arith.constant 0 : i32
    %c0_i32_1 = arith.constant 0 : i32
    return %arg0, %c0_i32, %c0_i32_0 : i32, i32, i32
  }
}

module attributes {stable_mosaic.version = 11 : i64} {
  func.func @_proj_residual_kernel(%arg0: i32, %arg1: memref<1x8x64xbf16, #tpu.memory_space<vmem>>, %arg2: memref<1x8x64xbf16, #tpu.memory_space<vmem>>, %arg3: memref<1x1x64xf32, #tpu.memory_space<vmem>>, %arg4: memref<64x64xbf16, #tpu.memory_space<vmem>>, %arg5: memref<1x64xf32, #tpu.memory_space<vmem>>, %arg6: memref<1x8x64xbf16, #tpu.memory_space<vmem>>) attributes {dimension_semantics = [#tpu.dimension_semantics<parallel>], iteration_bounds = array<i64: 2>, scalar_prefetch = 0 : i64, scratch_operands = 0 : i64, tpu.core_type = #tpu.core_type<tc>, window_params = [{transform_indices = @transform_0, window_bounds = array<i64: 1, 8, 64>}, {transform_indices = @transform_1, window_bounds = array<i64: 1, 8, 64>}, {transform_indices = @transform_2, window_bounds = array<i64: 1, 1, 64>}, {pipeline_mode = #tpu.pipeline_mode<synchronous>, transform_indices = @transform_3, window_bounds = array<i64: 64, 64>}, {pipeline_mode = #tpu.pipeline_mode<synchronous>, transform_indices = @transform_4, window_bounds = array<i64: 1, 64>}, {transform_indices = @transform_5, window_bounds = array<i64: 1, 8, 64>}]} {
    %c0 = arith.constant 0 : index
    %c0_0 = arith.constant 0 : index
    %c0_1 = arith.constant 0 : index
    %0 = vector.load %arg2[%c0, %c0_0, %c0_1] : memref<1x8x64xbf16, #tpu.memory_space<vmem>>, vector<1x8x64xbf16>
    %1 = vector.shape_cast %0 : vector<1x8x64xbf16> to vector<8x64xbf16>
    %c0_2 = arith.constant 0 : index
    %c0_3 = arith.constant 0 : index
    %2 = vector.load %arg4[%c0_2, %c0_3] : memref<64x64xbf16, #tpu.memory_space<vmem>>, vector<64x64xbf16>
    %cst = arith.constant dense<0.000000e+00> : vector<8x64xf32>
    %3 = tpu.matmul %1, %2, %cst {dimension_numbers = #tpu.dot_dimension_numbers<[1], [0], [0], [1], [0, 0, 1, 1], [], []>} : vector<8x64xbf16>, vector<64x64xbf16>, vector<8x64xf32> -> vector<8x64xf32>
    %c0_4 = arith.constant 0 : index
    %c0_5 = arith.constant 0 : index
    %4 = vector.load %arg5[%c0_4, %c0_5] : memref<1x64xf32, #tpu.memory_space<vmem>>, vector<1x64xf32>
    %5 = vector.broadcast %4 : vector<1x64xf32> to vector<8x64xf32>
    %6 = arith.addf %3, %5 : vector<8x64xf32>
    %c0_6 = arith.constant 0 : index
    %c0_7 = arith.constant 0 : index
    %c0_8 = arith.constant 0 : index
    %7 = vector.load %arg1[%c0_6, %c0_7, %c0_8] : memref<1x8x64xbf16, #tpu.memory_space<vmem>>, vector<1x8x64xbf16>
    %8 = vector.shape_cast %7 : vector<1x8x64xbf16> to vector<8x64xbf16>
    %9 = arith.extf %8 : vector<8x64xbf16> to vector<8x64xf32>
    %c0_9 = arith.constant 0 : index
    %c0_10 = arith.constant 0 : index
    %c0_11 = arith.constant 0 : index
    %10 = vector.load %arg3[%c0_9, %c0_10, %c0_11] : memref<1x1x64xf32, #tpu.memory_space<vmem>>, vector<1x1x64xf32>
    %11 = vector.shape_cast %10 : vector<1x1x64xf32> to vector<1x64xf32>
    %12 = vector.broadcast %11 : vector<1x64xf32> to vector<8x64xf32>
    %13 = arith.mulf %12, %6 : vector<8x64xf32>
    %14 = arith.addf %9, %13 : vector<8x64xf32>
    %15 = arith.truncf %14 : vector<8x64xf32> to vector<8x64xbf16>
    %c0_12 = arith.constant 0 : index
    %c0_13 = arith.constant 0 : index
    %c0_14 = arith.constant 0 : index
    %16 = vector.load %arg6[%c0_12, %c0_13, %c0_14] : memref<1x8x64xbf16, #tpu.memory_space<vmem>>, vector<1x8x64xbf16>
    %17 = vector.shape_cast %16 : vector<1x8x64xbf16> to vector<8x64xbf16>
    %18 = vector.shape_cast %15 : vector<8x64xbf16> to vector<1x8x64xbf16>
    tpu.vector_store %arg6[%c0_12, %c0_13, %c0_14], %18 {strides = array<i32>} : memref<1x8x64xbf16, #tpu.memory_space<vmem>>, vector<1x8x64xbf16>,
    return
  }
  func.func @transform_0(%arg0: i32) -> (i32, i32, i32) {
    %c0_i32 = arith.constant 0 : i32
    %c0_i32_0 = arith.constant 0 : i32
    %c0_i32_1 = arith.constant 0 : i32
    return %arg0, %c0_i32, %c0_i32_0 : i32, i32, i32
  }
  func.func @transform_1(%arg0: i32) -> (i32, i32, i32) {
    %c0_i32 = arith.constant 0 : i32
    %c0_i32_0 = arith.constant 0 : i32
    %c0_i32_1 = arith.constant 0 : i32
    return %arg0, %c0_i32, %c0_i32_0 : i32, i32, i32
  }
  func.func @transform_2(%arg0: i32) -> (i32, i32, i32) {
    %c0_i32 = arith.constant 0 : i32
    %c0_i32_0 = arith.constant 0 : i32
    %c0_i32_1 = arith.constant 0 : i32
    return %arg0, %c0_i32, %c0_i32_0 : i32, i32, i32
  }
  func.func @transform_3(%arg0: i32) -> (i32, i32) {
    %c0_i32 = arith.constant 0 : i32
    %c0_i32_0 = arith.constant 0 : i32
    %c0_i32_1 = arith.constant 0 : i32
    return %c0_i32, %c0_i32_0 : i32, i32
  }
  func.func @transform_4(%arg0: i32) -> (i32, i32) {
    %c0_i32 = arith.constant 0 : i32
    %c0_i32_0 = arith.constant 0 : i32
    %c0_i32_1 = arith.constant 0 : i32
    return %c0_i32, %c0_i32_0 : i32, i32
  }
  func.func @transform_5(%arg0: i32) -> (i32, i32, i32) {
    %c0_i32 = arith.constant 0 : i32
    %c0_i32_0 = arith.constant 0 : i32
    %c0_i32_1 = arith.constant 0 : i32
    return %arg0, %c0_i32, %c0_i32_0 : i32, i32, i32
  }
}

module attributes {stable_mosaic.version = 11 : i64} {
  func.func @_attn_double_kernel(%arg0: i32, %arg1: memref<1x8x192xbf16, #tpu.memory_space<vmem>>, %arg2: memref<1x16x192xbf16, #tpu.memory_space<vmem>>, %arg3: memref<24x16xf32, #tpu.memory_space<vmem>>, %arg4: memref<24x16xf32, #tpu.memory_space<vmem>>, %arg5: memref<1x32xf32, #tpu.memory_space<vmem>>, %arg6: memref<1x32xf32, #tpu.memory_space<vmem>>, %arg7: memref<1x32xf32, #tpu.memory_space<vmem>>, %arg8: memref<1x32xf32, #tpu.memory_space<vmem>>, %arg9: memref<1x8x64xbf16, #tpu.memory_space<vmem>>, %arg10: memref<1x16x64xbf16, #tpu.memory_space<vmem>>) attributes {dimension_semantics = [#tpu.dimension_semantics<parallel>], iteration_bounds = array<i64: 2>, scalar_prefetch = 0 : i64, scratch_operands = 0 : i64, tpu.core_type = #tpu.core_type<tc>, window_params = [{transform_indices = @transform_0, window_bounds = array<i64: 1, 8, 192>}, {transform_indices = @transform_1, window_bounds = array<i64: 1, 16, 192>}, {pipeline_mode = #tpu.pipeline_mode<synchronous>, transform_indices = @transform_2, window_bounds = array<i64: 24, 16>}, {pipeline_mode = #tpu.pipeline_mode<synchronous>, transform_indices = @transform_3, window_bounds = array<i64: 24, 16>}, {pipeline_mode = #tpu.pipeline_mode<synchronous>, transform_indices = @transform_4, window_bounds = array<i64: 1, 32>}, {pipeline_mode = #tpu.pipeline_mode<synchronous>, transform_indices = @transform_5, window_bounds = array<i64: 1, 32>}, {pipeline_mode = #tpu.pipeline_mode<synchronous>, transform_indices = @transform_6, window_bounds = array<i64: 1, 32>}, {pipeline_mode = #tpu.pipeline_mode<synchronous>, transform_indices = @transform_7, window_bounds = array<i64: 1, 32>}, {transform_indices = @transform_8, window_bounds = array<i64: 1, 8, 64>}, {transform_indices = @transform_9, window_bounds = array<i64: 1, 16, 64>}]} {
    %c0 = arith.constant 0 : index
    %c0_0 = arith.constant 0 : index
    %c0_1 = arith.constant 0 : index
    %0 = vector.load %arg1[%c0, %c0_0, %c0_1] : memref<1x8x192xbf16, #tpu.memory_space<vmem>>, vector<1x8x192xbf16>
    %1 = vector.shape_cast %0 : vector<1x8x192xbf16> to vector<8x192xbf16>
    %2 = arith.extf %1 : vector<8x192xbf16> to vector<8x192xf32>
    %c0_2 = arith.constant 0 : index
    %c0_3 = arith.constant 0 : index
    %c0_4 = arith.constant 0 : index
    %3 = vector.load %arg2[%c0_2, %c0_3, %c0_4] : memref<1x16x192xbf16, #tpu.memory_space<vmem>>, vector<1x16x192xbf16>
    %4 = vector.shape_cast %3 : vector<1x16x192xbf16> to vector<16x192xbf16>
    %5 = arith.extf %4 : vector<16x192xbf16> to vector<16x192xf32>
    %c0_5 = arith.constant 0 : index
    %c0_6 = arith.constant 0 : index
    %6 = vector.load %arg3[%c0_5, %c0_6] : memref<24x16xf32, #tpu.memory_space<vmem>>, vector<24x16xf32>
    %c0_7 = arith.constant 0 : index
    %c0_8 = arith.constant 0 : index
    %7 = vector.load %arg4[%c0_7, %c0_8] : memref<24x16xf32, #tpu.memory_space<vmem>>, vector<24x16xf32>
    %8 = vector.extract_strided_slice %6 {offsets = [0, 0], sizes = [8, 16], strides = [1, 1]} : vector<24x16xf32> to vector<8x16xf32>
    %9 = vector.extract_strided_slice %6 {offsets = [8, 0], sizes = [16, 16], strides = [1, 1]} : vector<24x16xf32> to vector<16x16xf32>
    %10 = vector.extract_strided_slice %7 {offsets = [0, 0], sizes = [8, 16], strides = [1, 1]} : vector<24x16xf32> to vector<8x16xf32>
    %11 = vector.extract_strided_slice %7 {offsets = [8, 0], sizes = [16, 16], strides = [1, 1]} : vector<24x16xf32> to vector<16x16xf32>
    %c0_9 = arith.constant 0 : index
    %c0_10 = arith.constant 0 : index
    %12 = vector.load %arg5[%c0_9, %c0_10] : memref<1x32xf32, #tpu.memory_space<vmem>>, vector<1x32xf32>
    %c0_11 = arith.constant 0 : index
    %c0_12 = arith.constant 0 : index
    %13 = vector.load %arg6[%c0_11, %c0_12] : memref<1x32xf32, #tpu.memory_space<vmem>>, vector<1x32xf32>
    %c0_13 = arith.constant 0 : index
    %c0_14 = arith.constant 0 : index
    %14 = vector.load %arg7[%c0_13, %c0_14] : memref<1x32xf32, #tpu.memory_space<vmem>>, vector<1x32xf32>
    %c0_15 = arith.constant 0 : index
    %c0_16 = arith.constant 0 : index
    %15 = vector.load %arg8[%c0_15, %c0_16] : memref<1x32xf32, #tpu.memory_space<vmem>>, vector<1x32xf32>
    %16 = vector.extract_strided_slice %2 {offsets = [0, 0], sizes = [8, 32], strides = [1, 1]} : vector<8x192xf32> to vector<8x32xf32>
    %17 = arith.mulf %16, %16 : vector<8x32xf32>
    %cst = arith.constant dense<0.000000e+00> : vector<8xf32>
    %18 = vector.multi_reduction <add>, %17, %cst [1] : vector<8x32xf32> to vector<8xf32>
    %19 = vector.shape_cast %18 : vector<8xf32> to vector<8x1xf32>
    %cst_17 = arith.constant 3.200000e+01 : f32
    %20 = vector.broadcast %cst_17 : f32 to vector<8x1xf32>
    %21 = arith.divf %19, %20 : vector<8x1xf32>
    %cst_18 = arith.constant 9.99999997E-7 : f32
    %22 = vector.broadcast %cst_18 : f32 to vector<8x1xf32>
    %23 = arith.addf %21, %22 : vector<8x1xf32>
    %24 = math.rsqrt %23 : vector<8x1xf32>
    %25 = vector.broadcast %24 : vector<8x1xf32> to vector<8x32xf32>
    %26 = arith.mulf %16, %25 : vector<8x32xf32>
    %27 = vector.broadcast %14 : vector<1x32xf32> to vector<8x32xf32>
    %28 = arith.mulf %26, %27 : vector<8x32xf32>
    %29 = vector.extract_strided_slice %28 {offsets = [0, 0], sizes = [8, 16], strides = [1, 1]} : vector<8x32xf32> to vector<8x16xf32>
    %30 = vector.extract_strided_slice %28 {offsets = [0, 16], sizes = [8, 16], strides = [1, 1]} : vector<8x32xf32> to vector<8x16xf32>
    %31 = arith.mulf %8, %29 : vector<8x16xf32>
    %32 = arith.mulf %10, %30 : vector<8x16xf32>
    %33 = arith.subf %31, %32 : vector<8x16xf32>
    %34 = arith.mulf %10, %29 : vector<8x16xf32>
    %35 = arith.mulf %8, %30 : vector<8x16xf32>
    %36 = arith.addf %34, %35 : vector<8x16xf32>
    %37 = tpu.concatenate %33, %36 in 1 : vector<8x16xf32>, vector<8x16xf32> -> vector<8x32xf32>
    %38 = vector.extract_strided_slice %5 {offsets = [0, 0], sizes = [16, 32], strides = [1, 1]} : vector<16x192xf32> to vector<16x32xf32>
    %39 = arith.mulf %38, %38 : vector<16x32xf32>
    %cst_19 = arith.constant dense<0.000000e+00> : vector<16xf32>
    %40 = vector.multi_reduction <add>, %39, %cst_19 [1] : vector<16x32xf32> to vector<16xf32>
    %41 = vector.shape_cast %40 : vector<16xf32> to vector<16x1xf32>
    %cst_20 = arith.constant 3.200000e+01 : f32
    %42 = vector.broadcast %cst_20 : f32 to vector<16x1xf32>
    %43 = arith.divf %41, %42 : vector<16x1xf32>
    %cst_21 = arith.constant 9.99999997E-7 : f32
    %44 = vector.broadcast %cst_21 : f32 to vector<16x1xf32>
    %45 = arith.addf %43, %44 : vector<16x1xf32>
    %46 = math.rsqrt %45 : vector<16x1xf32>
    %47 = vector.broadcast %46 : vector<16x1xf32> to vector<16x32xf32>
    %48 = arith.mulf %38, %47 : vector<16x32xf32>
    %49 = vector.broadcast %12 : vector<1x32xf32> to vector<16x32xf32>
    %50 = arith.mulf %48, %49 : vector<16x32xf32>
    %51 = vector.extract_strided_slice %50 {offsets = [0, 0], sizes = [16, 16], strides = [1, 1]} : vector<16x32xf32> to vector<16x16xf32>
    %52 = vector.extract_strided_slice %50 {offsets = [0, 16], sizes = [16, 16], strides = [1, 1]} : vector<16x32xf32> to vector<16x16xf32>
    %53 = arith.mulf %9, %51 : vector<16x16xf32>
    %54 = arith.mulf %11, %52 : vector<16x16xf32>
    %55 = arith.subf %53, %54 : vector<16x16xf32>
    %56 = arith.mulf %11, %51 : vector<16x16xf32>
    %57 = arith.mulf %9, %52 : vector<16x16xf32>
    %58 = arith.addf %56, %57 : vector<16x16xf32>
    %59 = tpu.concatenate %55, %58 in 1 : vector<16x16xf32>, vector<16x16xf32> -> vector<16x32xf32>
    %60 = tpu.concatenate %37, %59 in 0 : vector<8x32xf32>, vector<16x32xf32> -> vector<24x32xf32>
    %61 = vector.extract_strided_slice %2 {offsets = [0, 64], sizes = [8, 32], strides = [1, 1]} : vector<8x192xf32> to vector<8x32xf32>
    %62 = arith.mulf %61, %61 : vector<8x32xf32>
    %cst_22 = arith.constant dense<0.000000e+00> : vector<8xf32>
    %63 = vector.multi_reduction <add>, %62, %cst_22 [1] : vector<8x32xf32> to vector<8xf32>
    %64 = vector.shape_cast %63 : vector<8xf32> to vector<8x1xf32>
    %cst_23 = arith.constant 3.200000e+01 : f32
    %65 = vector.broadcast %cst_23 : f32 to vector<8x1xf32>
    %66 = arith.divf %64, %65 : vector<8x1xf32>
    %cst_24 = arith.constant 9.99999997E-7 : f32
    %67 = vector.broadcast %cst_24 : f32 to vector<8x1xf32>
    %68 = arith.addf %66, %67 : vector<8x1xf32>
    %69 = math.rsqrt %68 : vector<8x1xf32>
    %70 = vector.broadcast %69 : vector<8x1xf32> to vector<8x32xf32>
    %71 = arith.mulf %61, %70 : vector<8x32xf32>
    %72 = vector.broadcast %15 : vector<1x32xf32> to vector<8x32xf32>
    %73 = arith.mulf %71, %72 : vector<8x32xf32>
    %74 = vector.extract_strided_slice %73 {offsets = [0, 0], sizes = [8, 16], strides = [1, 1]} : vector<8x32xf32> to vector<8x16xf32>
    %75 = vector.extract_strided_slice %73 {offsets = [0, 16], sizes = [8, 16], strides = [1, 1]} : vector<8x32xf32> to vector<8x16xf32>
    %76 = arith.mulf %8, %74 : vector<8x16xf32>
    %77 = arith.mulf %10, %75 : vector<8x16xf32>
    %78 = arith.subf %76, %77 : vector<8x16xf32>
    %79 = arith.mulf %10, %74 : vector<8x16xf32>
    %80 = arith.mulf %8, %75 : vector<8x16xf32>
    %81 = arith.addf %79, %80 : vector<8x16xf32>
    %82 = tpu.concatenate %78, %81 in 1 : vector<8x16xf32>, vector<8x16xf32> -> vector<8x32xf32>
    %83 = vector.extract_strided_slice %5 {offsets = [0, 64], sizes = [16, 32], strides = [1, 1]} : vector<16x192xf32> to vector<16x32xf32>
    %84 = arith.mulf %83, %83 : vector<16x32xf32>
    %cst_25 = arith.constant dense<0.000000e+00> : vector<16xf32>
    %85 = vector.multi_reduction <add>, %84, %cst_25 [1] : vector<16x32xf32> to vector<16xf32>
    %86 = vector.shape_cast %85 : vector<16xf32> to vector<16x1xf32>
    %cst_26 = arith.constant 3.200000e+01 : f32
    %87 = vector.broadcast %cst_26 : f32 to vector<16x1xf32>
    %88 = arith.divf %86, %87 : vector<16x1xf32>
    %cst_27 = arith.constant 9.99999997E-7 : f32
    %89 = vector.broadcast %cst_27 : f32 to vector<16x1xf32>
    %90 = arith.addf %88, %89 : vector<16x1xf32>
    %91 = math.rsqrt %90 : vector<16x1xf32>
    %92 = vector.broadcast %91 : vector<16x1xf32> to vector<16x32xf32>
    %93 = arith.mulf %83, %92 : vector<16x32xf32>
    %94 = vector.broadcast %13 : vector<1x32xf32> to vector<16x32xf32>
    %95 = arith.mulf %93, %94 : vector<16x32xf32>
    %96 = vector.extract_strided_slice %95 {offsets = [0, 0], sizes = [16, 16], strides = [1, 1]} : vector<16x32xf32> to vector<16x16xf32>
    %97 = vector.extract_strided_slice %95 {offsets = [0, 16], sizes = [16, 16], strides = [1, 1]} : vector<16x32xf32> to vector<16x16xf32>
    %98 = arith.mulf %9, %96 : vector<16x16xf32>
    %99 = arith.mulf %11, %97 : vector<16x16xf32>
    %100 = arith.subf %98, %99 : vector<16x16xf32>
    %101 = arith.mulf %11, %96 : vector<16x16xf32>
    %102 = arith.mulf %9, %97 : vector<16x16xf32>
    %103 = arith.addf %101, %102 : vector<16x16xf32>
    %104 = tpu.concatenate %100, %103 in 1 : vector<16x16xf32>, vector<16x16xf32> -> vector<16x32xf32>
    %105 = tpu.concatenate %82, %104 in 0 : vector<8x32xf32>, vector<16x32xf32> -> vector<24x32xf32>
    %106 = vector.extract_strided_slice %2 {offsets = [0, 128], sizes = [8, 32], strides = [1, 1]} : vector<8x192xf32> to vector<8x32xf32>
    %107 = vector.extract_strided_slice %5 {offsets = [0, 128], sizes = [16, 32], strides = [1, 1]} : vector<16x192xf32> to vector<16x32xf32>
    %108 = tpu.concatenate %106, %107 in 0 : vector<8x32xf32>, vector<16x32xf32> -> vector<24x32xf32>
    %109 = arith.truncf %60 : vector<24x32xf32> to vector<24x32xbf16>
    %110 = arith.truncf %105 : vector<24x32xf32> to vector<24x32xbf16>
    %cst_28 = arith.constant dense<0.000000e+00> : vector<24x24xf32>
    %111 = tpu.matmul %109, %110, %cst_28 {dimension_numbers = #tpu.dot_dimension_numbers<[1], [1], [0], [0], [0, 0, 1, 0], [], []>} : vector<24x32xbf16>, vector<24x32xbf16>, vector<24x24xf32> -> vector<24x24xf32>
    %cst_29 = arith.constant 0.176776692 : f32
    %112 = vector.broadcast %cst_29 : f32 to vector<24x24xf32>
    %113 = arith.mulf %111, %112 : vector<24x24xf32>
    %cst_30 = arith.constant dense<0xFF800000> : vector<24xf32>
    %114 = vector.multi_reduction <maximumf>, %113, %cst_30 [1] : vector<24x24xf32> to vector<24xf32>
    %115 = vector.shape_cast %114 : vector<24xf32> to vector<24x1xf32>
    %116 = vector.broadcast %115 : vector<24x1xf32> to vector<24x24xf32>
    %117 = arith.subf %113, %116 : vector<24x24xf32>
    %118 = math.exp %117 : vector<24x24xf32>
    %119 = arith.truncf %118 : vector<24x24xf32> to vector<24x24xbf16>
    %120 = arith.truncf %108 : vector<24x32xf32> to vector<24x32xbf16>
    %cst_31 = arith.constant dense<0.000000e+00> : vector<24x32xf32>
    %121 = tpu.matmul %119, %120, %cst_31 {dimension_numbers = #tpu.dot_dimension_numbers<[1], [0], [0], [1], [0, 0, 1, 1], [], []>} : vector<24x24xbf16>, vector<24x32xbf16>, vector<24x32xf32> -> vector<24x32xf32>
    %cst_32 = arith.constant dense<0.000000e+00> : vector<24xf32>
    %122 = vector.multi_reduction <add>, %118, %cst_32 [1] : vector<24x24xf32> to vector<24xf32>
    %123 = vector.shape_cast %122 : vector<24xf32> to vector<24x1xf32>
    %124 = tpu.reciprocal %123 {approx = true} : vector<24x1xf32> -> vector<24x1xf32>
    %125 = vector.broadcast %124 : vector<24x1xf32> to vector<24x32xf32>
    %126 = arith.mulf %121, %125 : vector<24x32xf32>
    %127 = vector.extract_strided_slice %126 {offsets = [0, 0], sizes = [8, 32], strides = [1, 1]} : vector<24x32xf32> to vector<8x32xf32>
    %128 = vector.extract_strided_slice %126 {offsets = [8, 0], sizes = [16, 32], strides = [1, 1]} : vector<24x32xf32> to vector<16x32xf32>
    %129 = vector.extract_strided_slice %2 {offsets = [0, 32], sizes = [8, 32], strides = [1, 1]} : vector<8x192xf32> to vector<8x32xf32>
    %130 = arith.mulf %129, %129 : vector<8x32xf32>
    %cst_33 = arith.constant dense<0.000000e+00> : vector<8xf32>
    %131 = vector.multi_reduction <add>, %130, %cst_33 [1] : vector<8x32xf32> to vector<8xf32>
    %132 = vector.shape_cast %131 : vector<8xf32> to vector<8x1xf32>
    %cst_34 = arith.constant 3.200000e+01 : f32
    %133 = vector.broadcast %cst_34 : f32 to vector<8x1xf32>
    %134 = arith.divf %132, %133 : vector<8x1xf32>
    %cst_35 = arith.constant 9.99999997E-7 : f32
    %135 = vector.broadcast %cst_35 : f32 to vector<8x1xf32>
    %136 = arith.addf %134, %135 : vector<8x1xf32>
    %137 = math.rsqrt %136 : vector<8x1xf32>
    %138 = vector.broadcast %137 : vector<8x1xf32> to vector<8x32xf32>
    %139 = arith.mulf %129, %138 : vector<8x32xf32>
    %140 = vector.broadcast %14 : vector<1x32xf32> to vector<8x32xf32>
    %141 = arith.mulf %139, %140 : vector<8x32xf32>
    %142 = vector.extract_strided_slice %141 {offsets = [0, 0], sizes = [8, 16], strides = [1, 1]} : vector<8x32xf32> to vector<8x16xf32>
    %143 = vector.extract_strided_slice %141 {offsets = [0, 16], sizes = [8, 16], strides = [1, 1]} : vector<8x32xf32> to vector<8x16xf32>
    %144 = arith.mulf %8, %142 : vector<8x16xf32>
    %145 = arith.mulf %10, %143 : vector<8x16xf32>
    %146 = arith.subf %144, %145 : vector<8x16xf32>
    %147 = arith.mulf %10, %142 : vector<8x16xf32>
    %148 = arith.mulf %8, %143 : vector<8x16xf32>
    %149 = arith.addf %147, %148 : vector<8x16xf32>
    %150 = tpu.concatenate %146, %149 in 1 : vector<8x16xf32>, vector<8x16xf32> -> vector<8x32xf32>
    %151 = vector.extract_strided_slice %5 {offsets = [0, 32], sizes = [16, 32], strides = [1, 1]} : vector<16x192xf32> to vector<16x32xf32>
    %152 = arith.mulf %151, %151 : vector<16x32xf32>
    %cst_36 = arith.constant dense<0.000000e+00> : vector<16xf32>
    %153 = vector.multi_reduction <add>, %152, %cst_36 [1] : vector<16x32xf32> to vector<16xf32>
    %154 = vector.shape_cast %153 : vector<16xf32> to vector<16x1xf32>
    %cst_37 = arith.constant 3.200000e+01 : f32
    %155 = vector.broadcast %cst_37 : f32 to vector<16x1xf32>
    %156 = arith.divf %154, %155 : vector<16x1xf32>
    %cst_38 = arith.constant 9.99999997E-7 : f32
    %157 = vector.broadcast %cst_38 : f32 to vector<16x1xf32>
    %158 = arith.addf %156, %157 : vector<16x1xf32>
    %159 = math.rsqrt %158 : vector<16x1xf32>
    %160 = vector.broadcast %159 : vector<16x1xf32> to vector<16x32xf32>
    %161 = arith.mulf %151, %160 : vector<16x32xf32>
    %162 = vector.broadcast %12 : vector<1x32xf32> to vector<16x32xf32>
    %163 = arith.mulf %161, %162 : vector<16x32xf32>
    %164 = vector.extract_strided_slice %163 {offsets = [0, 0], sizes = [16, 16], strides = [1, 1]} : vector<16x32xf32> to vector<16x16xf32>
    %165 = vector.extract_strided_slice %163 {offsets = [0, 16], sizes = [16, 16], strides = [1, 1]} : vector<16x32xf32> to vector<16x16xf32>
    %166 = arith.mulf %9, %164 : vector<16x16xf32>
    %167 = arith.mulf %11, %165 : vector<16x16xf32>
    %168 = arith.subf %166, %167 : vector<16x16xf32>
    %169 = arith.mulf %11, %164 : vector<16x16xf32>
    %170 = arith.mulf %9, %165 : vector<16x16xf32>
    %171 = arith.addf %169, %170 : vector<16x16xf32>
    %172 = tpu.concatenate %168, %171 in 1 : vector<16x16xf32>, vector<16x16xf32> -> vector<16x32xf32>
    %173 = tpu.concatenate %150, %172 in 0 : vector<8x32xf32>, vector<16x32xf32> -> vector<24x32xf32>
    %174 = vector.extract_strided_slice %2 {offsets = [0, 96], sizes = [8, 32], strides = [1, 1]} : vector<8x192xf32> to vector<8x32xf32>
    %175 = arith.mulf %174, %174 : vector<8x32xf32>
    %cst_39 = arith.constant dense<0.000000e+00> : vector<8xf32>
    %176 = vector.multi_reduction <add>, %175, %cst_39 [1] : vector<8x32xf32> to vector<8xf32>
    %177 = vector.shape_cast %176 : vector<8xf32> to vector<8x1xf32>
    %cst_40 = arith.constant 3.200000e+01 : f32
    %178 = vector.broadcast %cst_40 : f32 to vector<8x1xf32>
    %179 = arith.divf %177, %178 : vector<8x1xf32>
    %cst_41 = arith.constant 9.99999997E-7 : f32
    %180 = vector.broadcast %cst_41 : f32 to vector<8x1xf32>
    %181 = arith.addf %179, %180 : vector<8x1xf32>
    %182 = math.rsqrt %181 : vector<8x1xf32>
    %183 = vector.broadcast %182 : vector<8x1xf32> to vector<8x32xf32>
    %184 = arith.mulf %174, %183 : vector<8x32xf32>
    %185 = vector.broadcast %15 : vector<1x32xf32> to vector<8x32xf32>
    %186 = arith.mulf %184, %185 : vector<8x32xf32>
    %187 = vector.extract_strided_slice %186 {offsets = [0, 0], sizes = [8, 16], strides = [1, 1]} : vector<8x32xf32> to vector<8x16xf32>
    %188 = vector.extract_strided_slice %186 {offsets = [0, 16], sizes = [8, 16], strides = [1, 1]} : vector<8x32xf32> to vector<8x16xf32>
    %189 = arith.mulf %8, %187 : vector<8x16xf32>
    %190 = arith.mulf %10, %188 : vector<8x16xf32>
    %191 = arith.subf %189, %190 : vector<8x16xf32>
    %192 = arith.mulf %10, %187 : vector<8x16xf32>
    %193 = arith.mulf %8, %188 : vector<8x16xf32>
    %194 = arith.addf %192, %193 : vector<8x16xf32>
    %195 = tpu.concatenate %191, %194 in 1 : vector<8x16xf32>, vector<8x16xf32> -> vector<8x32xf32>
    %196 = vector.extract_strided_slice %5 {offsets = [0, 96], sizes = [16, 32], strides = [1, 1]} : vector<16x192xf32> to vector<16x32xf32>
    %197 = arith.mulf %196, %196 : vector<16x32xf32>
    %cst_42 = arith.constant dense<0.000000e+00> : vector<16xf32>
    %198 = vector.multi_reduction <add>, %197, %cst_42 [1] : vector<16x32xf32> to vector<16xf32>
    %199 = vector.shape_cast %198 : vector<16xf32> to vector<16x1xf32>
    %cst_43 = arith.constant 3.200000e+01 : f32
    %200 = vector.broadcast %cst_43 : f32 to vector<16x1xf32>
    %201 = arith.divf %199, %200 : vector<16x1xf32>
    %cst_44 = arith.constant 9.99999997E-7 : f32
    %202 = vector.broadcast %cst_44 : f32 to vector<16x1xf32>
    %203 = arith.addf %201, %202 : vector<16x1xf32>
    %204 = math.rsqrt %203 : vector<16x1xf32>
    %205 = vector.broadcast %204 : vector<16x1xf32> to vector<16x32xf32>
    %206 = arith.mulf %196, %205 : vector<16x32xf32>
    %207 = vector.broadcast %13 : vector<1x32xf32> to vector<16x32xf32>
    %208 = arith.mulf %206, %207 : vector<16x32xf32>
    %209 = vector.extract_strided_slice %208 {offsets = [0, 0], sizes = [16, 16], strides = [1, 1]} : vector<16x32xf32> to vector<16x16xf32>
    %210 = vector.extract_strided_slice %208 {offsets = [0, 16], sizes = [16, 16], strides = [1, 1]} : vector<16x32xf32> to vector<16x16xf32>
    %211 = arith.mulf %9, %209 : vector<16x16xf32>
    %212 = arith.mulf %11, %210 : vector<16x16xf32>
    %213 = arith.subf %211, %212 : vector<16x16xf32>
    %214 = arith.mulf %11, %209 : vector<16x16xf32>
    %215 = arith.mulf %9, %210 : vector<16x16xf32>
    %216 = arith.addf %214, %215 : vector<16x16xf32>
    %217 = tpu.concatenate %213, %216 in 1 : vector<16x16xf32>, vector<16x16xf32> -> vector<16x32xf32>
    %218 = tpu.concatenate %195, %217 in 0 : vector<8x32xf32>, vector<16x32xf32> -> vector<24x32xf32>
    %219 = vector.extract_strided_slice %2 {offsets = [0, 160], sizes = [8, 32], strides = [1, 1]} : vector<8x192xf32> to vector<8x32xf32>
    %220 = vector.extract_strided_slice %5 {offsets = [0, 160], sizes = [16, 32], strides = [1, 1]} : vector<16x192xf32> to vector<16x32xf32>
    %221 = tpu.concatenate %219, %220 in 0 : vector<8x32xf32>, vector<16x32xf32> -> vector<24x32xf32>
    %222 = arith.truncf %173 : vector<24x32xf32> to vector<24x32xbf16>
    %223 = arith.truncf %218 : vector<24x32xf32> to vector<24x32xbf16>
    %cst_45 = arith.constant dense<0.000000e+00> : vector<24x24xf32>
    %224 = tpu.matmul %222, %223, %cst_45 {dimension_numbers = #tpu.dot_dimension_numbers<[1], [1], [0], [0], [0, 0, 1, 0], [], []>} : vector<24x32xbf16>, vector<24x32xbf16>, vector<24x24xf32> -> vector<24x24xf32>
    %cst_46 = arith.constant 0.176776692 : f32
    %225 = vector.broadcast %cst_46 : f32 to vector<24x24xf32>
    %226 = arith.mulf %224, %225 : vector<24x24xf32>
    %cst_47 = arith.constant dense<0xFF800000> : vector<24xf32>
    %227 = vector.multi_reduction <maximumf>, %226, %cst_47 [1] : vector<24x24xf32> to vector<24xf32>
    %228 = vector.shape_cast %227 : vector<24xf32> to vector<24x1xf32>
    %229 = vector.broadcast %228 : vector<24x1xf32> to vector<24x24xf32>
    %230 = arith.subf %226, %229 : vector<24x24xf32>
    %231 = math.exp %230 : vector<24x24xf32>
    %232 = arith.truncf %231 : vector<24x24xf32> to vector<24x24xbf16>
    %233 = arith.truncf %221 : vector<24x32xf32> to vector<24x32xbf16>
    %cst_48 = arith.constant dense<0.000000e+00> : vector<24x32xf32>
    %234 = tpu.matmul %232, %233, %cst_48 {dimension_numbers = #tpu.dot_dimension_numbers<[1], [0], [0], [1], [0, 0, 1, 1], [], []>} : vector<24x24xbf16>, vector<24x32xbf16>, vector<24x32xf32> -> vector<24x32xf32>
    %cst_49 = arith.constant dense<0.000000e+00> : vector<24xf32>
    %235 = vector.multi_reduction <add>, %231, %cst_49 [1] : vector<24x24xf32> to vector<24xf32>
    %236 = vector.shape_cast %235 : vector<24xf32> to vector<24x1xf32>
    %237 = tpu.reciprocal %236 {approx = true} : vector<24x1xf32> -> vector<24x1xf32>
    %238 = vector.broadcast %237 : vector<24x1xf32> to vector<24x32xf32>
    %239 = arith.mulf %234, %238 : vector<24x32xf32>
    %240 = vector.extract_strided_slice %239 {offsets = [0, 0], sizes = [8, 32], strides = [1, 1]} : vector<24x32xf32> to vector<8x32xf32>
    %241 = vector.extract_strided_slice %239 {offsets = [8, 0], sizes = [16, 32], strides = [1, 1]} : vector<24x32xf32> to vector<16x32xf32>
    %242 = tpu.concatenate %127, %240 in 1 : vector<8x32xf32>, vector<8x32xf32> -> vector<8x64xf32>
    %243 = arith.truncf %242 : vector<8x64xf32> to vector<8x64xbf16>
    %c0_50 = arith.constant 0 : index
    %c0_51 = arith.constant 0 : index
    %c0_52 = arith.constant 0 : index
    %244 = vector.load %arg9[%c0_50, %c0_51, %c0_52] : memref<1x8x64xbf16, #tpu.memory_space<vmem>>, vector<1x8x64xbf16>
    %245 = vector.shape_cast %244 : vector<1x8x64xbf16> to vector<8x64xbf16>
    %246 = vector.shape_cast %243 : vector<8x64xbf16> to vector<1x8x64xbf16>
    tpu.vector_store %arg9[%c0_50, %c0_51, %c0_52], %246 {strides = array<i32>} : memref<1x8x64xbf16, #tpu.memory_space<vmem>>, vector<1x8x64xbf16>,
    %247 = tpu.concatenate %128, %241 in 1 : vector<16x32xf32>, vector<16x32xf32> -> vector<16x64xf32>
    %248 = arith.truncf %247 : vector<16x64xf32> to vector<16x64xbf16>
    %c0_53 = arith.constant 0 : index
    %c0_54 = arith.constant 0 : index
    %c0_55 = arith.constant 0 : index
    %249 = vector.load %arg10[%c0_53, %c0_54, %c0_55] : memref<1x16x64xbf16, #tpu.memory_space<vmem>>, vector<1x16x64xbf16>
    %250 = vector.shape_cast %249 : vector<1x16x64xbf16> to vector<16x64xbf16>
    %251 = vector.shape_cast %248 : vector<16x64xbf16> to vector<1x16x64xbf16>
    tpu.vector_store %arg10[%c0_53, %c0_54, %c0_55], %251 {strides = array<i32>} : memref<1x16x64xbf16, #tpu.memory_space<vmem>>, vector<1x16x64xbf16>,
    return
  }
  func.func @transform_0(%arg0: i32) -> (i32, i32, i32) {
    %c0_i32 = arith.constant 0 : i32
    %c0_i32_0 = arith.constant 0 : i32
    %c0_i32_1 = arith.constant 0 : i32
    return %arg0, %c0_i32, %c0_i32_0 : i32, i32, i32
  }
  func.func @transform_1(%arg0: i32) -> (i32, i32, i32) {
    %c0_i32 = arith.constant 0 : i32
    %c0_i32_0 = arith.constant 0 : i32
    %c0_i32_1 = arith.constant 0 : i32
    return %arg0, %c0_i32, %c0_i32_0 : i32, i32, i32
  }
  func.func @transform_2(%arg0: i32) -> (i32, i32) {
    %c0_i32 = arith.constant 0 : i32
    %c0_i32_0 = arith.constant 0 : i32
    %c0_i32_1 = arith.constant 0 : i32
    return %c0_i32, %c0_i32_0 : i32, i32
  }
  func.func @transform_3(%arg0: i32) -> (i32, i32) {
    %c0_i32 = arith.constant 0 : i32
    %c0_i32_0 = arith.constant 0 : i32
    %c0_i32_1 = arith.constant 0 : i32
    return %c0_i32, %c0_i32_0 : i32, i32
  }
  func.func @transform_4(%arg0: i32) -> (i32, i32) {
    %c0_i32 = arith.constant 0 : i32
    %c0_i32_0 = arith.constant 0 : i32
    %c0_i32_1 = arith.constant 0 : i32
    return %c0_i32, %c0_i32_0 : i32, i32
  }
  func.func @transform_5(%arg0: i32) -> (i32, i32) {
    %c0_i32 = arith.constant 0 : i32
    %c0_i32_0 = arith.constant 0 : i32
    %c0_i32_1 = arith.constant 0 : i32
    return %c0_i32, %c0_i32_0 : i32, i32
  }
  func.func @transform_6(%arg0: i32) -> (i32, i32) {
    %c0_i32 = arith.constant 0 : i32
    %c0_i32_0 = arith.constant 0 : i32
    %c0_i32_1 = arith.constant 0 : i32
    return %c0_i32, %c0_i32_0 : i32, i32
  }
  func.func @transform_7(%arg0: i32) -> (i32, i32) {
    %c0_i32 = arith.constant 0 : i32
    %c0_i32_0 = arith.constant 0 : i32
    %c0_i32_1 = arith.constant 0 : i32
    return %c0_i32, %c0_i32_0 : i32, i32
  }
  func.func @transform_8(%arg0: i32) -> (i32, i32, i32) {
    %c0_i32 = arith.constant 0 : i32
    %c0_i32_0 = arith.constant 0 : i32
    %c0_i32_1 = arith.constant 0 : i32
    return %arg0, %c0_i32, %c0_i32_0 : i32, i32, i32
  }
  func.func @transform_9(%arg0: i32) -> (i32, i32, i32) {
    %c0_i32 = arith.constant 0 : i32
    %c0_i32_0 = arith.constant 0 : i32
    %c0_i32_1 = arith.constant 0 : i32
    return %arg0, %c0_i32, %c0_i32_0 : i32, i32, i32
  }
}

module attributes {stable_mosaic.version = 11 : i64} {
  func.func @_mlp_residual_kernel(%arg0: i32, %arg1: memref<1x8x64xbf16, #tpu.memory_space<vmem>>, %arg2: memref<1x1x64xf32, #tpu.memory_space<vmem>>, %arg3: memref<1x1x64xf32, #tpu.memory_space<vmem>>, %arg4: memref<1x1x64xf32, #tpu.memory_space<vmem>>, %arg5: memref<64x256xbf16, #tpu.memory_space<vmem>>, %arg6: memref<1x256xf32, #tpu.memory_space<vmem>>, %arg7: memref<256x64xbf16, #tpu.memory_space<vmem>>, %arg8: memref<1x64xf32, #tpu.memory_space<vmem>>, %arg9: memref<1x8x64xbf16, #tpu.memory_space<vmem>>) attributes {dimension_semantics = [#tpu.dimension_semantics<parallel>], iteration_bounds = array<i64: 2>, scalar_prefetch = 0 : i64, scratch_operands = 0 : i64, tpu.core_type = #tpu.core_type<tc>, window_params = [{transform_indices = @transform_0, window_bounds = array<i64: 1, 8, 64>}, {transform_indices = @transform_1, window_bounds = array<i64: 1, 1, 64>}, {transform_indices = @transform_2, window_bounds = array<i64: 1, 1, 64>}, {transform_indices = @transform_3, window_bounds = array<i64: 1, 1, 64>}, {pipeline_mode = #tpu.pipeline_mode<synchronous>, transform_indices = @transform_4, window_bounds = array<i64: 64, 256>}, {pipeline_mode = #tpu.pipeline_mode<synchronous>, transform_indices = @transform_5, window_bounds = array<i64: 1, 256>}, {pipeline_mode = #tpu.pipeline_mode<synchronous>, transform_indices = @transform_6, window_bounds = array<i64: 256, 64>}, {pipeline_mode = #tpu.pipeline_mode<synchronous>, transform_indices = @transform_7, window_bounds = array<i64: 1, 64>}, {transform_indices = @transform_8, window_bounds = array<i64: 1, 8, 64>}]} {
    %c0 = arith.constant 0 : index
    %c0_0 = arith.constant 0 : index
    %c0_1 = arith.constant 0 : index
    %0 = vector.load %arg1[%c0, %c0_0, %c0_1] : memref<1x8x64xbf16, #tpu.memory_space<vmem>>, vector<1x8x64xbf16>
    %1 = vector.shape_cast %0 : vector<1x8x64xbf16> to vector<8x64xbf16>
    %2 = arith.extf %1 : vector<8x64xbf16> to vector<8x64xf32>
    %c0_2 = arith.constant 0 : index
    %c0_3 = arith.constant 0 : index
    %c0_4 = arith.constant 0 : index
    %3 = vector.load %arg2[%c0_2, %c0_3, %c0_4] : memref<1x1x64xf32, #tpu.memory_space<vmem>>, vector<1x1x64xf32>
    %4 = vector.shape_cast %3 : vector<1x1x64xf32> to vector<1x64xf32>
    %c0_5 = arith.constant 0 : index
    %c0_6 = arith.constant 0 : index
    %c0_7 = arith.constant 0 : index
    %5 = vector.load %arg3[%c0_5, %c0_6, %c0_7] : memref<1x1x64xf32, #tpu.memory_space<vmem>>, vector<1x1x64xf32>
    %6 = vector.shape_cast %5 : vector<1x1x64xf32> to vector<1x64xf32>
    %cst = arith.constant dense<0.000000e+00> : vector<8xf32>
    %7 = vector.multi_reduction <add>, %2, %cst [1] : vector<8x64xf32> to vector<8xf32>
    %8 = vector.shape_cast %7 : vector<8xf32> to vector<8x1xf32>
    %cst_8 = arith.constant 6.400000e+01 : f32
    %9 = vector.broadcast %cst_8 : f32 to vector<8x1xf32>
    %10 = arith.divf %8, %9 : vector<8x1xf32>
    %11 = vector.broadcast %10 : vector<8x1xf32> to vector<8x64xf32>
    %12 = arith.subf %2, %11 : vector<8x64xf32>
    %13 = arith.mulf %12, %12 : vector<8x64xf32>
    %cst_9 = arith.constant dense<0.000000e+00> : vector<8xf32>
    %14 = vector.multi_reduction <add>, %13, %cst_9 [1] : vector<8x64xf32> to vector<8xf32>
    %15 = vector.shape_cast %14 : vector<8xf32> to vector<8x1xf32>
    %cst_10 = arith.constant 6.400000e+01 : f32
    %16 = vector.broadcast %cst_10 : f32 to vector<8x1xf32>
    %17 = arith.divf %15, %16 : vector<8x1xf32>
    %cst_11 = arith.constant 1.000000e+00 : f32
    %18 = vector.broadcast %cst_11 : f32 to vector<1x64xf32>
    %19 = arith.addf %18, %6 : vector<1x64xf32>
    %cst_12 = arith.constant 9.99999997E-7 : f32
    %20 = vector.broadcast %cst_12 : f32 to vector<8x1xf32>
    %21 = arith.addf %17, %20 : vector<8x1xf32>
    %22 = math.rsqrt %21 : vector<8x1xf32>
    %23 = vector.broadcast %22 : vector<8x1xf32> to vector<8x64xf32>
    %24 = arith.mulf %12, %23 : vector<8x64xf32>
    %25 = vector.broadcast %19 : vector<1x64xf32> to vector<8x64xf32>
    %26 = arith.mulf %25, %24 : vector<8x64xf32>
    %27 = vector.broadcast %4 : vector<1x64xf32> to vector<8x64xf32>
    %28 = arith.addf %26, %27 : vector<8x64xf32>
    %29 = arith.truncf %28 : vector<8x64xf32> to vector<8x64xbf16>
    %c0_13 = arith.constant 0 : index
    %c0_14 = arith.constant 0 : index
    %30 = vector.load %arg5[%c0_13, %c0_14] : memref<64x256xbf16, #tpu.memory_space<vmem>>, vector<64x256xbf16>
    %cst_15 = arith.constant dense<0.000000e+00> : vector<8x256xf32>
    %31 = tpu.matmul %29, %30, %cst_15 {dimension_numbers = #tpu.dot_dimension_numbers<[1], [0], [0], [1], [0, 0, 1, 1], [], []>} : vector<8x64xbf16>, vector<64x256xbf16>, vector<8x256xf32> -> vector<8x256xf32>
    %c0_16 = arith.constant 0 : index
    %c0_17 = arith.constant 0 : index
    %32 = vector.load %arg6[%c0_16, %c0_17] : memref<1x256xf32, #tpu.memory_space<vmem>>, vector<1x256xf32>
    %33 = vector.broadcast %32 : vector<1x256xf32> to vector<8x256xf32>
    %34 = arith.addf %31, %33 : vector<8x256xf32>
    %35 = arith.mulf %34, %34 : vector<8x256xf32>
    %36 = arith.mulf %34, %35 : vector<8x256xf32>
    %cst_18 = arith.constant 4.471500e-02 : f32
    %37 = vector.broadcast %cst_18 : f32 to vector<8x256xf32>
    %38 = arith.mulf %37, %36 : vector<8x256xf32>
    %39 = arith.addf %34, %38 : vector<8x256xf32>
    %cst_19 = arith.constant 0.797884583 : f32
    %40 = vector.broadcast %cst_19 : f32 to vector<8x256xf32>
    %41 = arith.mulf %40, %39 : vector<8x256xf32>
    %42 = math.tanh %41 : vector<8x256xf32>
    %cst_20 = arith.constant 1.000000e+00 : f32
    %43 = vector.broadcast %cst_20 : f32 to vector<8x256xf32>
    %44 = arith.addf %43, %42 : vector<8x256xf32>
    %cst_21 = arith.constant 5.000000e-01 : f32
    %45 = vector.broadcast %cst_21 : f32 to vector<8x256xf32>
    %46 = arith.mulf %45, %44 : vector<8x256xf32>
    %47 = arith.mulf %34, %46 : vector<8x256xf32>
    %48 = arith.truncf %47 : vector<8x256xf32> to vector<8x256xbf16>
    %c0_22 = arith.constant 0 : index
    %c0_23 = arith.constant 0 : index
    %49 = vector.load %arg7[%c0_22, %c0_23] : memref<256x64xbf16, #tpu.memory_space<vmem>>, vector<256x64xbf16>
    %cst_24 = arith.constant dense<0.000000e+00> : vector<8x64xf32>
    %50 = tpu.matmul %48, %49, %cst_24 {dimension_numbers = #tpu.dot_dimension_numbers<[1], [0], [0], [1], [0, 0, 1, 1], [], []>} : vector<8x256xbf16>, vector<256x64xbf16>, vector<8x64xf32> -> vector<8x64xf32>
    %c0_25 = arith.constant 0 : index
    %c0_26 = arith.constant 0 : index
    %51 = vector.load %arg8[%c0_25, %c0_26] : memref<1x64xf32, #tpu.memory_space<vmem>>, vector<1x64xf32>
    %52 = vector.broadcast %51 : vector<1x64xf32> to vector<8x64xf32>
    %53 = arith.addf %50, %52 : vector<8x64xf32>
    %c0_27 = arith.constant 0 : index
    %c0_28 = arith.constant 0 : index
    %c0_29 = arith.constant 0 : index
    %54 = vector.load %arg4[%c0_27, %c0_28, %c0_29] : memref<1x1x64xf32, #tpu.memory_space<vmem>>, vector<1x1x64xf32>
    %55 = vector.shape_cast %54 : vector<1x1x64xf32> to vector<1x64xf32>
    %56 = vector.broadcast %55 : vector<1x64xf32> to vector<8x64xf32>
    %57 = arith.mulf %56, %53 : vector<8x64xf32>
    %58 = arith.addf %2, %57 : vector<8x64xf32>
    %59 = arith.truncf %58 : vector<8x64xf32> to vector<8x64xbf16>
    %c0_30 = arith.constant 0 : index
    %c0_31 = arith.constant 0 : index
    %c0_32 = arith.constant 0 : index
    %60 = vector.load %arg9[%c0_30, %c0_31, %c0_32] : memref<1x8x64xbf16, #tpu.memory_space<vmem>>, vector<1x8x64xbf16>
    %61 = vector.shape_cast %60 : vector<1x8x64xbf16> to vector<8x64xbf16>
    %62 = vector.shape_cast %59 : vector<8x64xbf16> to vector<1x8x64xbf16>
    tpu.vector_store %arg9[%c0_30, %c0_31, %c0_32], %62 {strides = array<i32>} : memref<1x8x64xbf16, #tpu.memory_space<vmem>>, vector<1x8x64xbf16>,
    return
  }
  func.func @transform_0(%arg0: i32) -> (i32, i32, i32) {
    %c0_i32 = arith.constant 0 : i32
    %c0_i32_0 = arith.constant 0 : i32
    %c0_i32_1 = arith.constant 0 : i32
    return %arg0, %c0_i32, %c0_i32_0 : i32, i32, i32
  }
  func.func @transform_1(%arg0: i32) -> (i32, i32, i32) {
    %c0_i32 = arith.constant 0 : i32
    %c0_i32_0 = arith.constant 0 : i32
    %c0_i32_1 = arith.constant 0 : i32
    return %arg0, %c0_i32, %c0_i32_0 : i32, i32, i32
  }
  func.func @transform_2(%arg0: i32) -> (i32, i32, i32) {
    %c0_i32 = arith.constant 0 : i32
    %c0_i32_0 = arith.constant 0 : i32
    %c0_i32_1 = arith.constant 0 : i32
    return %arg0, %c0_i32, %c0_i32_0 : i32, i32, i32
  }
  func.func @transform_3(%arg0: i32) -> (i32, i32, i32) {
    %c0_i32 = arith.constant 0 : i32
    %c0_i32_0 = arith.constant 0 : i32
    %c0_i32_1 = arith.constant 0 : i32
    return %arg0, %c0_i32, %c0_i32_0 : i32, i32, i32
  }
  func.func @transform_4(%arg0: i32) -> (i32, i32) {
    %c0_i32 = arith.constant 0 : i32
    %c0_i32_0 = arith.constant 0 : i32
    %c0_i32_1 = arith.constant 0 : i32
    return %c0_i32, %c0_i32_0 : i32, i32
  }
  func.func @transform_5(%arg0: i32) -> (i32, i32) {
    %c0_i32 = arith.constant 0 : i32
    %c0_i32_0 = arith.constant 0 : i32
    %c0_i32_1 = arith.constant 0 : i32
    return %c0_i32, %c0_i32_0 : i32, i32
  }
  func.func @transform_6(%arg0: i32) -> (i32, i32) {
    %c0_i32 = arith.constant 0 : i32
    %c0_i32_0 = arith.constant 0 : i32
    %c0_i32_1 = arith.constant 0 : i32
    return %c0_i32, %c0_i32_0 : i32, i32
  }
  func.func @transform_7(%arg0: i32) -> (i32, i32) {
    %c0_i32 = arith.constant 0 : i32
    %c0_i32_0 = arith.constant 0 : i32
    %c0_i32_1 = arith.constant 0 : i32
    return %c0_i32, %c0_i32_0 : i32, i32
  }
  func.func @transform_8(%arg0: i32) -> (i32, i32, i32) {
    %c0_i32 = arith.constant 0 : i32
    %c0_i32_0 = arith.constant 0 : i32
    %c0_i32_1 = arith.constant 0 : i32
    return %arg0, %c0_i32, %c0_i32_0 : i32, i32, i32
  }
}

module attributes {stable_mosaic.version = 11 : i64} {
  func.func @_proj_residual_kernel(%arg0: i32, %arg1: memref<1x16x64xbf16, #tpu.memory_space<vmem>>, %arg2: memref<1x16x64xbf16, #tpu.memory_space<vmem>>, %arg3: memref<1x1x64xf32, #tpu.memory_space<vmem>>, %arg4: memref<64x64xbf16, #tpu.memory_space<vmem>>, %arg5: memref<1x64xf32, #tpu.memory_space<vmem>>, %arg6: memref<1x16x64xbf16, #tpu.memory_space<vmem>>) attributes {dimension_semantics = [#tpu.dimension_semantics<parallel>], iteration_bounds = array<i64: 2>, scalar_prefetch = 0 : i64, scratch_operands = 0 : i64, tpu.core_type = #tpu.core_type<tc>, window_params = [{transform_indices = @transform_0, window_bounds = array<i64: 1, 16, 64>}, {transform_indices = @transform_1, window_bounds = array<i64: 1, 16, 64>}, {transform_indices = @transform_2, window_bounds = array<i64: 1, 1, 64>}, {pipeline_mode = #tpu.pipeline_mode<synchronous>, transform_indices = @transform_3, window_bounds = array<i64: 64, 64>}, {pipeline_mode = #tpu.pipeline_mode<synchronous>, transform_indices = @transform_4, window_bounds = array<i64: 1, 64>}, {transform_indices = @transform_5, window_bounds = array<i64: 1, 16, 64>}]} {
    %c0 = arith.constant 0 : index
    %c0_0 = arith.constant 0 : index
    %c0_1 = arith.constant 0 : index
    %0 = vector.load %arg2[%c0, %c0_0, %c0_1] : memref<1x16x64xbf16, #tpu.memory_space<vmem>>, vector<1x16x64xbf16>
    %1 = vector.shape_cast %0 : vector<1x16x64xbf16> to vector<16x64xbf16>
    %c0_2 = arith.constant 0 : index
    %c0_3 = arith.constant 0 : index
    %2 = vector.load %arg4[%c0_2, %c0_3] : memref<64x64xbf16, #tpu.memory_space<vmem>>, vector<64x64xbf16>
    %cst = arith.constant dense<0.000000e+00> : vector<16x64xf32>
    %3 = tpu.matmul %1, %2, %cst {dimension_numbers = #tpu.dot_dimension_numbers<[1], [0], [0], [1], [0, 0, 1, 1], [], []>} : vector<16x64xbf16>, vector<64x64xbf16>, vector<16x64xf32> -> vector<16x64xf32>
    %c0_4 = arith.constant 0 : index
    %c0_5 = arith.constant 0 : index
    %4 = vector.load %arg5[%c0_4, %c0_5] : memref<1x64xf32, #tpu.memory_space<vmem>>, vector<1x64xf32>
    %5 = vector.broadcast %4 : vector<1x64xf32> to vector<16x64xf32>
    %6 = arith.addf %3, %5 : vector<16x64xf32>
    %c0_6 = arith.constant 0 : index
    %c0_7 = arith.constant 0 : index
    %c0_8 = arith.constant 0 : index
    %7 = vector.load %arg1[%c0_6, %c0_7, %c0_8] : memref<1x16x64xbf16, #tpu.memory_space<vmem>>, vector<1x16x64xbf16>
    %8 = vector.shape_cast %7 : vector<1x16x64xbf16> to vector<16x64xbf16>
    %9 = arith.extf %8 : vector<16x64xbf16> to vector<16x64xf32>
    %c0_9 = arith.constant 0 : index
    %c0_10 = arith.constant 0 : index
    %c0_11 = arith.constant 0 : index
    %10 = vector.load %arg3[%c0_9, %c0_10, %c0_11] : memref<1x1x64xf32, #tpu.memory_space<vmem>>, vector<1x1x64xf32>
    %11 = vector.shape_cast %10 : vector<1x1x64xf32> to vector<1x64xf32>
    %12 = vector.broadcast %11 : vector<1x64xf32> to vector<16x64xf32>
    %13 = arith.mulf %12, %6 : vector<16x64xf32>
    %14 = arith.addf %9, %13 : vector<16x64xf32>
    %15 = arith.truncf %14 : vector<16x64xf32> to vector<16x64xbf16>
    %c0_12 = arith.constant 0 : index
    %c0_13 = arith.constant 0 : index
    %c0_14 = arith.constant 0 : index
    %16 = vector.load %arg6[%c0_12, %c0_13, %c0_14] : memref<1x16x64xbf16, #tpu.memory_space<vmem>>, vector<1x16x64xbf16>
    %17 = vector.shape_cast %16 : vector<1x16x64xbf16> to vector<16x64xbf16>
    %18 = vector.shape_cast %15 : vector<16x64xbf16> to vector<1x16x64xbf16>
    tpu.vector_store %arg6[%c0_12, %c0_13, %c0_14], %18 {strides = array<i32>} : memref<1x16x64xbf16, #tpu.memory_space<vmem>>, vector<1x16x64xbf16>,
    return
  }
  func.func @transform_0(%arg0: i32) -> (i32, i32, i32) {
    %c0_i32 = arith.constant 0 : i32
    %c0_i32_0 = arith.constant 0 : i32
    %c0_i32_1 = arith.constant 0 : i32
    return %arg0, %c0_i32, %c0_i32_0 : i32, i32, i32
  }
  func.func @transform_1(%arg0: i32) -> (i32, i32, i32) {
    %c0_i32 = arith.constant 0 : i32
    %c0_i32_0 = arith.constant 0 : i32
    %c0_i32_1 = arith.constant 0 : i32
    return %arg0, %c0_i32, %c0_i32_0 : i32, i32, i32
  }
  func.func @transform_2(%arg0: i32) -> (i32, i32, i32) {
    %c0_i32 = arith.constant 0 : i32
    %c0_i32_0 = arith.constant 0 : i32
    %c0_i32_1 = arith.constant 0 : i32
    return %arg0, %c0_i32, %c0_i32_0 : i32, i32, i32
  }
  func.func @transform_3(%arg0: i32) -> (i32, i32) {
    %c0_i32 = arith.constant 0 : i32
    %c0_i32_0 = arith.constant 0 : i32
    %c0_i32_1 = arith.constant 0 : i32
    return %c0_i32, %c0_i32_0 : i32, i32
  }
  func.func @transform_4(%arg0: i32) -> (i32, i32) {
    %c0_i32 = arith.constant 0 : i32
    %c0_i32_0 = arith.constant 0 : i32
    %c0_i32_1 = arith.constant 0 : i32
    return %c0_i32, %c0_i32_0 : i32, i32
  }
  func.func @transform_5(%arg0: i32) -> (i32, i32, i32) {
    %c0_i32 = arith.constant 0 : i32
    %c0_i32_0 = arith.constant 0 : i32
    %c0_i32_1 = arith.constant 0 : i32
    return %arg0, %c0_i32, %c0_i32_0 : i32, i32, i32
  }
}

module attributes {stable_mosaic.version = 11 : i64} {
  func.func @_mlp_residual_kernel(%arg0: i32, %arg1: memref<1x16x64xbf16, #tpu.memory_space<vmem>>, %arg2: memref<1x1x64xf32, #tpu.memory_space<vmem>>, %arg3: memref<1x1x64xf32, #tpu.memory_space<vmem>>, %arg4: memref<1x1x64xf32, #tpu.memory_space<vmem>>, %arg5: memref<64x256xbf16, #tpu.memory_space<vmem>>, %arg6: memref<1x256xf32, #tpu.memory_space<vmem>>, %arg7: memref<256x64xbf16, #tpu.memory_space<vmem>>, %arg8: memref<1x64xf32, #tpu.memory_space<vmem>>, %arg9: memref<1x16x64xbf16, #tpu.memory_space<vmem>>) attributes {dimension_semantics = [#tpu.dimension_semantics<parallel>], iteration_bounds = array<i64: 2>, scalar_prefetch = 0 : i64, scratch_operands = 0 : i64, tpu.core_type = #tpu.core_type<tc>, window_params = [{transform_indices = @transform_0, window_bounds = array<i64: 1, 16, 64>}, {transform_indices = @transform_1, window_bounds = array<i64: 1, 1, 64>}, {transform_indices = @transform_2, window_bounds = array<i64: 1, 1, 64>}, {transform_indices = @transform_3, window_bounds = array<i64: 1, 1, 64>}, {pipeline_mode = #tpu.pipeline_mode<synchronous>, transform_indices = @transform_4, window_bounds = array<i64: 64, 256>}, {pipeline_mode = #tpu.pipeline_mode<synchronous>, transform_indices = @transform_5, window_bounds = array<i64: 1, 256>}, {pipeline_mode = #tpu.pipeline_mode<synchronous>, transform_indices = @transform_6, window_bounds = array<i64: 256, 64>}, {pipeline_mode = #tpu.pipeline_mode<synchronous>, transform_indices = @transform_7, window_bounds = array<i64: 1, 64>}, {transform_indices = @transform_8, window_bounds = array<i64: 1, 16, 64>}]} {
    %c0 = arith.constant 0 : index
    %c0_0 = arith.constant 0 : index
    %c0_1 = arith.constant 0 : index
    %0 = vector.load %arg1[%c0, %c0_0, %c0_1] : memref<1x16x64xbf16, #tpu.memory_space<vmem>>, vector<1x16x64xbf16>
    %1 = vector.shape_cast %0 : vector<1x16x64xbf16> to vector<16x64xbf16>
    %2 = arith.extf %1 : vector<16x64xbf16> to vector<16x64xf32>
    %c0_2 = arith.constant 0 : index
    %c0_3 = arith.constant 0 : index
    %c0_4 = arith.constant 0 : index
    %3 = vector.load %arg2[%c0_2, %c0_3, %c0_4] : memref<1x1x64xf32, #tpu.memory_space<vmem>>, vector<1x1x64xf32>
    %4 = vector.shape_cast %3 : vector<1x1x64xf32> to vector<1x64xf32>
    %c0_5 = arith.constant 0 : index
    %c0_6 = arith.constant 0 : index
    %c0_7 = arith.constant 0 : index
    %5 = vector.load %arg3[%c0_5, %c0_6, %c0_7] : memref<1x1x64xf32, #tpu.memory_space<vmem>>, vector<1x1x64xf32>
    %6 = vector.shape_cast %5 : vector<1x1x64xf32> to vector<1x64xf32>
    %cst = arith.constant dense<0.000000e+00> : vector<16xf32>
    %7 = vector.multi_reduction <add>, %2, %cst [1] : vector<16x64xf32> to vector<16xf32>
    %8 = vector.shape_cast %7 : vector<16xf32> to vector<16x1xf32>
    %cst_8 = arith.constant 6.400000e+01 : f32
    %9 = vector.broadcast %cst_8 : f32 to vector<16x1xf32>
    %10 = arith.divf %8, %9 : vector<16x1xf32>
    %11 = vector.broadcast %10 : vector<16x1xf32> to vector<16x64xf32>
    %12 = arith.subf %2, %11 : vector<16x64xf32>
    %13 = arith.mulf %12, %12 : vector<16x64xf32>
    %cst_9 = arith.constant dense<0.000000e+00> : vector<16xf32>
    %14 = vector.multi_reduction <add>, %13, %cst_9 [1] : vector<16x64xf32> to vector<16xf32>
    %15 = vector.shape_cast %14 : vector<16xf32> to vector<16x1xf32>
    %cst_10 = arith.constant 6.400000e+01 : f32
    %16 = vector.broadcast %cst_10 : f32 to vector<16x1xf32>
    %17 = arith.divf %15, %16 : vector<16x1xf32>
    %cst_11 = arith.constant 1.000000e+00 : f32
    %18 = vector.broadcast %cst_11 : f32 to vector<1x64xf32>
    %19 = arith.addf %18, %6 : vector<1x64xf32>
    %cst_12 = arith.constant 9.99999997E-7 : f32
    %20 = vector.broadcast %cst_12 : f32 to vector<16x1xf32>
    %21 = arith.addf %17, %20 : vector<16x1xf32>
    %22 = math.rsqrt %21 : vector<16x1xf32>
    %23 = vector.broadcast %22 : vector<16x1xf32> to vector<16x64xf32>
    %24 = arith.mulf %12, %23 : vector<16x64xf32>
    %25 = vector.broadcast %19 : vector<1x64xf32> to vector<16x64xf32>
    %26 = arith.mulf %25, %24 : vector<16x64xf32>
    %27 = vector.broadcast %4 : vector<1x64xf32> to vector<16x64xf32>
    %28 = arith.addf %26, %27 : vector<16x64xf32>
    %29 = arith.truncf %28 : vector<16x64xf32> to vector<16x64xbf16>
    %c0_13 = arith.constant 0 : index
    %c0_14 = arith.constant 0 : index
    %30 = vector.load %arg5[%c0_13, %c0_14] : memref<64x256xbf16, #tpu.memory_space<vmem>>, vector<64x256xbf16>
    %cst_15 = arith.constant dense<0.000000e+00> : vector<16x256xf32>
    %31 = tpu.matmul %29, %30, %cst_15 {dimension_numbers = #tpu.dot_dimension_numbers<[1], [0], [0], [1], [0, 0, 1, 1], [], []>} : vector<16x64xbf16>, vector<64x256xbf16>, vector<16x256xf32> -> vector<16x256xf32>
    %c0_16 = arith.constant 0 : index
    %c0_17 = arith.constant 0 : index
    %32 = vector.load %arg6[%c0_16, %c0_17] : memref<1x256xf32, #tpu.memory_space<vmem>>, vector<1x256xf32>
    %33 = vector.broadcast %32 : vector<1x256xf32> to vector<16x256xf32>
    %34 = arith.addf %31, %33 : vector<16x256xf32>
    %35 = arith.mulf %34, %34 : vector<16x256xf32>
    %36 = arith.mulf %34, %35 : vector<16x256xf32>
    %cst_18 = arith.constant 4.471500e-02 : f32
    %37 = vector.broadcast %cst_18 : f32 to vector<16x256xf32>
    %38 = arith.mulf %37, %36 : vector<16x256xf32>
    %39 = arith.addf %34, %38 : vector<16x256xf32>
    %cst_19 = arith.constant 0.797884583 : f32
    %40 = vector.broadcast %cst_19 : f32 to vector<16x256xf32>
    %41 = arith.mulf %40, %39 : vector<16x256xf32>
    %42 = math.tanh %41 : vector<16x256xf32>
    %cst_20 = arith.constant 1.000000e+00 : f32
    %43 = vector.broadcast %cst_20 : f32 to vector<16x256xf32>
    %44 = arith.addf %43, %42 : vector<16x256xf32>
    %cst_21 = arith.constant 5.000000e-01 : f32
    %45 = vector.broadcast %cst_21 : f32 to vector<16x256xf32>
    %46 = arith.mulf %45, %44 : vector<16x256xf32>
    %47 = arith.mulf %34, %46 : vector<16x256xf32>
    %48 = arith.truncf %47 : vector<16x256xf32> to vector<16x256xbf16>
    %c0_22 = arith.constant 0 : index
    %c0_23 = arith.constant 0 : index
    %49 = vector.load %arg7[%c0_22, %c0_23] : memref<256x64xbf16, #tpu.memory_space<vmem>>, vector<256x64xbf16>
    %cst_24 = arith.constant dense<0.000000e+00> : vector<16x64xf32>
    %50 = tpu.matmul %48, %49, %cst_24 {dimension_numbers = #tpu.dot_dimension_numbers<[1], [0], [0], [1], [0, 0, 1, 1], [], []>} : vector<16x256xbf16>, vector<256x64xbf16>, vector<16x64xf32> -> vector<16x64xf32>
    %c0_25 = arith.constant 0 : index
    %c0_26 = arith.constant 0 : index
    %51 = vector.load %arg8[%c0_25, %c0_26] : memref<1x64xf32, #tpu.memory_space<vmem>>, vector<1x64xf32>
    %52 = vector.broadcast %51 : vector<1x64xf32> to vector<16x64xf32>
    %53 = arith.addf %50, %52 : vector<16x64xf32>
    %c0_27 = arith.constant 0 : index
    %c0_28 = arith.constant 0 : index
    %c0_29 = arith.constant 0 : index
    %54 = vector.load %arg4[%c0_27, %c0_28, %c0_29] : memref<1x1x64xf32, #tpu.memory_space<vmem>>, vector<1x1x64xf32>
    %55 = vector.shape_cast %54 : vector<1x1x64xf32> to vector<1x64xf32>
    %56 = vector.broadcast %55 : vector<1x64xf32> to vector<16x64xf32>
    %57 = arith.mulf %56, %53 : vector<16x64xf32>
    %58 = arith.addf %2, %57 : vector<16x64xf32>
    %59 = arith.truncf %58 : vector<16x64xf32> to vector<16x64xbf16>
    %c0_30 = arith.constant 0 : index
    %c0_31 = arith.constant 0 : index
    %c0_32 = arith.constant 0 : index
    %60 = vector.load %arg9[%c0_30, %c0_31, %c0_32] : memref<1x16x64xbf16, #tpu.memory_space<vmem>>, vector<1x16x64xbf16>
    %61 = vector.shape_cast %60 : vector<1x16x64xbf16> to vector<16x64xbf16>
    %62 = vector.shape_cast %59 : vector<16x64xbf16> to vector<1x16x64xbf16>
    tpu.vector_store %arg9[%c0_30, %c0_31, %c0_32], %62 {strides = array<i32>} : memref<1x16x64xbf16, #tpu.memory_space<vmem>>, vector<1x16x64xbf16>,
    return
  }
  func.func @transform_0(%arg0: i32) -> (i32, i32, i32) {
    %c0_i32 = arith.constant 0 : i32
    %c0_i32_0 = arith.constant 0 : i32
    %c0_i32_1 = arith.constant 0 : i32
    return %arg0, %c0_i32, %c0_i32_0 : i32, i32, i32
  }
  func.func @transform_1(%arg0: i32) -> (i32, i32, i32) {
    %c0_i32 = arith.constant 0 : i32
    %c0_i32_0 = arith.constant 0 : i32
    %c0_i32_1 = arith.constant 0 : i32
    return %arg0, %c0_i32, %c0_i32_0 : i32, i32, i32
  }
  func.func @transform_2(%arg0: i32) -> (i32, i32, i32) {
    %c0_i32 = arith.constant 0 : i32
    %c0_i32_0 = arith.constant 0 : i32
    %c0_i32_1 = arith.constant 0 : i32
    return %arg0, %c0_i32, %c0_i32_0 : i32, i32, i32
  }
  func.func @transform_3(%arg0: i32) -> (i32, i32, i32) {
    %c0_i32 = arith.constant 0 : i32
    %c0_i32_0 = arith.constant 0 : i32
    %c0_i32_1 = arith.constant 0 : i32
    return %arg0, %c0_i32, %c0_i32_0 : i32, i32, i32
  }
  func.func @transform_4(%arg0: i32) -> (i32, i32) {
    %c0_i32 = arith.constant 0 : i32
    %c0_i32_0 = arith.constant 0 : i32
    %c0_i32_1 = arith.constant 0 : i32
    return %c0_i32, %c0_i32_0 : i32, i32
  }
  func.func @transform_5(%arg0: i32) -> (i32, i32) {
    %c0_i32 = arith.constant 0 : i32
    %c0_i32_0 = arith.constant 0 : i32
    %c0_i32_1 = arith.constant 0 : i32
    return %c0_i32, %c0_i32_0 : i32, i32
  }
  func.func @transform_6(%arg0: i32) -> (i32, i32) {
    %c0_i32 = arith.constant 0 : i32
    %c0_i32_0 = arith.constant 0 : i32
    %c0_i32_1 = arith.constant 0 : i32
    return %c0_i32, %c0_i32_0 : i32, i32
  }
  func.func @transform_7(%arg0: i32) -> (i32, i32) {
    %c0_i32 = arith.constant 0 : i32
    %c0_i32_0 = arith.constant 0 : i32
    %c0_i32_1 = arith.constant 0 : i32
    return %c0_i32, %c0_i32_0 : i32, i32
  }
  func.func @transform_8(%arg0: i32) -> (i32, i32, i32) {
    %c0_i32 = arith.constant 0 : i32
    %c0_i32_0 = arith.constant 0 : i32
    %c0_i32_1 = arith.constant 0 : i32
    return %arg0, %c0_i32, %c0_i32_0 : i32, i32, i32
  }
}

module attributes {stable_mosaic.version = 11 : i64} {
  func.func @_matmul_kernel(%arg0: i32, %arg1: i32, %arg2: i32, %arg3: memref<2x64xf32, #tpu.memory_space<vmem>>, %arg4: memref<64x192xbf16, #tpu.memory_space<vmem>>, %arg5: memref<1x192xf32, #tpu.memory_space<vmem>>, %arg6: memref<2x192xf32, #tpu.memory_space<vmem>>, %arg7: memref<2x192xf32, #tpu.memory_space<vmem>>) attributes {dimension_semantics = [#tpu.dimension_semantics<parallel>, #tpu.dimension_semantics<parallel>, #tpu.dimension_semantics<arbitrary>], iteration_bounds = array<i64: 1, 1, 1>, scalar_prefetch = 0 : i64, scratch_operands = 1 : i64, tpu.core_type = #tpu.core_type<tc>, window_params = [{transform_indices = @transform_0, window_bounds = array<i64: 2, 64>}, {transform_indices = @transform_1, window_bounds = array<i64: 64, 192>}, {transform_indices = @transform_2, window_bounds = array<i64: 1, 192>}, {transform_indices = @transform_3, window_bounds = array<i64: 2, 192>}]} {
    %c0_i32 = arith.constant 0 : i32
    %0 = arith.cmpi eq, %arg2, %c0_i32 : i32
    %1 = arith.extui %0 : i1 to i32
    %c0_i32_0 = arith.constant 0 : i32
    %2 = arith.cmpi ne, %1, %c0_i32_0 : i32
    scf.if %2 {
      %cst_11 = arith.constant 0.000000e+00 : f32
      %19 = vector.broadcast %cst_11 : f32 to vector<2x192xf32>
      %c0_12 = arith.constant 0 : index
      %c0_13 = arith.constant 0 : index
      %20 = vector.load %arg7[%c0_12, %c0_13] : memref<2x192xf32, #tpu.memory_space<vmem>>, vector<2x192xf32>
      tpu.vector_store %arg7[%c0_12, %c0_13], %19 {strides = array<i32>} : memref<2x192xf32, #tpu.memory_space<vmem>>, vector<2x192xf32>,
    } else {
    }
    %c0 = arith.constant 0 : index
    %c0_1 = arith.constant 0 : index
    %3 = vector.load %arg3[%c0, %c0_1] : memref<2x64xf32, #tpu.memory_space<vmem>>, vector<2x64xf32>
    %4 = arith.negf %3 : vector<2x64xf32>
    %5 = math.exp %4 : vector<2x64xf32>
    %cst = arith.constant 1.000000e+00 : f32
    %6 = vector.broadcast %cst : f32 to vector<2x64xf32>
    %7 = arith.addf %6, %5 : vector<2x64xf32>
    %8 = arith.divf %6, %7 : vector<2x64xf32>
    %9 = arith.mulf %3, %8 : vector<2x64xf32>
    %c0_2 = arith.constant 0 : index
    %c0_3 = arith.constant 0 : index
    %10 = vector.load %arg7[%c0_2, %c0_3] : memref<2x192xf32, #tpu.memory_space<vmem>>, vector<2x192xf32>
    %11 = arith.truncf %9 : vector<2x64xf32> to vector<2x64xbf16>
    %c0_4 = arith.constant 0 : index
    %c0_5 = arith.constant 0 : index
    %12 = vector.load %arg4[%c0_4, %c0_5] : memref<64x192xbf16, #tpu.memory_space<vmem>>, vector<64x192xbf16>
    %cst_6 = arith.constant dense<0.000000e+00> : vector<2x192xf32>
    %13 = tpu.matmul %11, %12, %cst_6 {dimension_numbers = #tpu.dot_dimension_numbers<[1], [0], [0], [1], [0, 0, 1, 1], [], []>} : vector<2x64xbf16>, vector<64x192xbf16>, vector<2x192xf32> -> vector<2x192xf32>
    %14 = arith.addf %10, %13 : vector<2x192xf32>
    %c0_7 = arith.constant 0 : index
    %c0_8 = arith.constant 0 : index
    %15 = vector.load %arg7[%c0_7, %c0_8] : memref<2x192xf32, #tpu.memory_space<vmem>>, vector<2x192xf32>
    tpu.vector_store %arg7[%c0_7, %c0_8], %14 {strides = array<i32>} : memref<2x192xf32, #tpu.memory_space<vmem>>, vector<2x192xf32>,
    %c0_i32_9 = arith.constant 0 : i32
    %16 = arith.cmpi eq, %arg2, %c0_i32_9 : i32
    %17 = arith.extui %16 : i1 to i32
    %c0_i32_10 = arith.constant 0 : i32
    %18 = arith.cmpi ne, %17, %c0_i32_10 : i32
    scf.if %18 {
      %c0_11 = arith.constant 0 : index
      %c0_12 = arith.constant 0 : index
      %19 = vector.load %arg7[%c0_11, %c0_12] : memref<2x192xf32, #tpu.memory_space<vmem>>, vector<2x192xf32>
      %c0_13 = arith.constant 0 : index
      %c0_14 = arith.constant 0 : index
      %20 = vector.load %arg5[%c0_13, %c0_14] : memref<1x192xf32, #tpu.memory_space<vmem>>, vector<1x192xf32>
      %21 = vector.broadcast %20 : vector<1x192xf32> to vector<2x192xf32>
      %22 = arith.addf %19, %21 : vector<2x192xf32>
      %c0_15 = arith.constant 0 : index
      %c0_16 = arith.constant 0 : index
      %23 = vector.load %arg6[%c0_15, %c0_16] : memref<2x192xf32, #tpu.memory_space<vmem>>, vector<2x192xf32>
      tpu.vector_store %arg6[%c0_15, %c0_16], %22 {strides = array<i32>} : memref<2x192xf32, #tpu.memory_space<vmem>>, vector<2x192xf32>,
    } else {
    }
    return
  }
  func.func @transform_0(%arg0: i32, %arg1: i32, %arg2: i32) -> (i32, i32) {
    %c0_i32 = arith.constant 0 : i32
    return %arg0, %arg2 : i32, i32
  }
  func.func @transform_1(%arg0: i32, %arg1: i32, %arg2: i32) -> (i32, i32) {
    %c0_i32 = arith.constant 0 : i32
    return %arg2, %arg1 : i32, i32
  }
  func.func @transform_2(%arg0: i32, %arg1: i32, %arg2: i32) -> (i32, i32) {
    %c0_i32 = arith.constant 0 : i32
    %c0_i32_0 = arith.constant 0 : i32
    return %c0_i32, %arg1 : i32, i32
  }
  func.func @transform_3(%arg0: i32, %arg1: i32, %arg2: i32) -> (i32, i32) {
    %c0_i32 = arith.constant 0 : i32
    return %arg0, %arg1 : i32, i32
  }
}

module attributes {stable_mosaic.version = 11 : i64} {
  func.func @_ln_mod_lin1_kernel(%arg0: i32, %arg1: memref<1x24x64xbf16, #tpu.memory_space<vmem>>, %arg2: memref<1x1x64xf32, #tpu.memory_space<vmem>>, %arg3: memref<1x1x64xf32, #tpu.memory_space<vmem>>, %arg4: memref<64x192xbf16, #tpu.memory_space<vmem>>, %arg5: memref<1x192xf32, #tpu.memory_space<vmem>>, %arg6: memref<64x256xbf16, #tpu.memory_space<vmem>>, %arg7: memref<1x256xf32, #tpu.memory_space<vmem>>, %arg8: memref<1x24x192xbf16, #tpu.memory_space<vmem>>, %arg9: memref<1x24x256xbf16, #tpu.memory_space<vmem>>) attributes {dimension_semantics = [#tpu.dimension_semantics<parallel>], iteration_bounds = array<i64: 2>, scalar_prefetch = 0 : i64, scratch_operands = 0 : i64, tpu.core_type = #tpu.core_type<tc>, window_params = [{transform_indices = @transform_0, window_bounds = array<i64: 1, 24, 64>}, {transform_indices = @transform_1, window_bounds = array<i64: 1, 1, 64>}, {transform_indices = @transform_2, window_bounds = array<i64: 1, 1, 64>}, {pipeline_mode = #tpu.pipeline_mode<synchronous>, transform_indices = @transform_3, window_bounds = array<i64: 64, 192>}, {pipeline_mode = #tpu.pipeline_mode<synchronous>, transform_indices = @transform_4, window_bounds = array<i64: 1, 192>}, {pipeline_mode = #tpu.pipeline_mode<synchronous>, transform_indices = @transform_5, window_bounds = array<i64: 64, 256>}, {pipeline_mode = #tpu.pipeline_mode<synchronous>, transform_indices = @transform_6, window_bounds = array<i64: 1, 256>}, {transform_indices = @transform_7, window_bounds = array<i64: 1, 24, 192>}, {transform_indices = @transform_8, window_bounds = array<i64: 1, 24, 256>}]} {
    %c0 = arith.constant 0 : index
    %c0_0 = arith.constant 0 : index
    %c0_1 = arith.constant 0 : index
    %0 = vector.load %arg1[%c0, %c0_0, %c0_1] : memref<1x24x64xbf16, #tpu.memory_space<vmem>>, vector<1x24x64xbf16>
    %1 = vector.shape_cast %0 : vector<1x24x64xbf16> to vector<24x64xbf16>
    %2 = arith.extf %1 : vector<24x64xbf16> to vector<24x64xf32>
    %c0_2 = arith.constant 0 : index
    %c0_3 = arith.constant 0 : index
    %c0_4 = arith.constant 0 : index
    %3 = vector.load %arg2[%c0_2, %c0_3, %c0_4] : memref<1x1x64xf32, #tpu.memory_space<vmem>>, vector<1x1x64xf32>
    %4 = vector.shape_cast %3 : vector<1x1x64xf32> to vector<1x64xf32>
    %c0_5 = arith.constant 0 : index
    %c0_6 = arith.constant 0 : index
    %c0_7 = arith.constant 0 : index
    %5 = vector.load %arg3[%c0_5, %c0_6, %c0_7] : memref<1x1x64xf32, #tpu.memory_space<vmem>>, vector<1x1x64xf32>
    %6 = vector.shape_cast %5 : vector<1x1x64xf32> to vector<1x64xf32>
    %cst = arith.constant dense<0.000000e+00> : vector<24xf32>
    %7 = vector.multi_reduction <add>, %2, %cst [1] : vector<24x64xf32> to vector<24xf32>
    %8 = vector.shape_cast %7 : vector<24xf32> to vector<24x1xf32>
    %cst_8 = arith.constant 6.400000e+01 : f32
    %9 = vector.broadcast %cst_8 : f32 to vector<24x1xf32>
    %10 = arith.divf %8, %9 : vector<24x1xf32>
    %11 = vector.broadcast %10 : vector<24x1xf32> to vector<24x64xf32>
    %12 = arith.subf %2, %11 : vector<24x64xf32>
    %13 = arith.mulf %12, %12 : vector<24x64xf32>
    %cst_9 = arith.constant dense<0.000000e+00> : vector<24xf32>
    %14 = vector.multi_reduction <add>, %13, %cst_9 [1] : vector<24x64xf32> to vector<24xf32>
    %15 = vector.shape_cast %14 : vector<24xf32> to vector<24x1xf32>
    %cst_10 = arith.constant 6.400000e+01 : f32
    %16 = vector.broadcast %cst_10 : f32 to vector<24x1xf32>
    %17 = arith.divf %15, %16 : vector<24x1xf32>
    %cst_11 = arith.constant 1.000000e+00 : f32
    %18 = vector.broadcast %cst_11 : f32 to vector<1x64xf32>
    %19 = arith.addf %18, %6 : vector<1x64xf32>
    %cst_12 = arith.constant 9.99999997E-7 : f32
    %20 = vector.broadcast %cst_12 : f32 to vector<24x1xf32>
    %21 = arith.addf %17, %20 : vector<24x1xf32>
    %22 = math.rsqrt %21 : vector<24x1xf32>
    %23 = vector.broadcast %22 : vector<24x1xf32> to vector<24x64xf32>
    %24 = arith.mulf %12, %23 : vector<24x64xf32>
    %25 = vector.broadcast %19 : vector<1x64xf32> to vector<24x64xf32>
    %26 = arith.mulf %25, %24 : vector<24x64xf32>
    %27 = vector.broadcast %4 : vector<1x64xf32> to vector<24x64xf32>
    %28 = arith.addf %26, %27 : vector<24x64xf32>
    %29 = arith.truncf %28 : vector<24x64xf32> to vector<24x64xbf16>
    %c0_13 = arith.constant 0 : index
    %c0_14 = arith.constant 0 : index
    %30 = vector.load %arg4[%c0_13, %c0_14] : memref<64x192xbf16, #tpu.memory_space<vmem>>, vector<64x192xbf16>
    %cst_15 = arith.constant dense<0.000000e+00> : vector<24x192xf32>
    %31 = tpu.matmul %29, %30, %cst_15 {dimension_numbers = #tpu.dot_dimension_numbers<[1], [0], [0], [1], [0, 0, 1, 1], [], []>} : vector<24x64xbf16>, vector<64x192xbf16>, vector<24x192xf32> -> vector<24x192xf32>
    %c0_16 = arith.constant 0 : index
    %c0_17 = arith.constant 0 : index
    %32 = vector.load %arg5[%c0_16, %c0_17] : memref<1x192xf32, #tpu.memory_space<vmem>>, vector<1x192xf32>
    %33 = vector.broadcast %32 : vector<1x192xf32> to vector<24x192xf32>
    %34 = arith.addf %31, %33 : vector<24x192xf32>
    %35 = arith.truncf %34 : vector<24x192xf32> to vector<24x192xbf16>
    %c0_18 = arith.constant 0 : index
    %c0_19 = arith.constant 0 : index
    %c0_20 = arith.constant 0 : index
    %36 = vector.load %arg8[%c0_18, %c0_19, %c0_20] : memref<1x24x192xbf16, #tpu.memory_space<vmem>>, vector<1x24x192xbf16>
    %37 = vector.shape_cast %36 : vector<1x24x192xbf16> to vector<24x192xbf16>
    %38 = vector.shape_cast %35 : vector<24x192xbf16> to vector<1x24x192xbf16>
    tpu.vector_store %arg8[%c0_18, %c0_19, %c0_20], %38 {strides = array<i32>} : memref<1x24x192xbf16, #tpu.memory_space<vmem>>, vector<1x24x192xbf16>,
    %c0_21 = arith.constant 0 : index
    %c0_22 = arith.constant 0 : index
    %39 = vector.load %arg6[%c0_21, %c0_22] : memref<64x256xbf16, #tpu.memory_space<vmem>>, vector<64x256xbf16>
    %cst_23 = arith.constant dense<0.000000e+00> : vector<24x256xf32>
    %40 = tpu.matmul %29, %39, %cst_23 {dimension_numbers = #tpu.dot_dimension_numbers<[1], [0], [0], [1], [0, 0, 1, 1], [], []>} : vector<24x64xbf16>, vector<64x256xbf16>, vector<24x256xf32> -> vector<24x256xf32>
    %c0_24 = arith.constant 0 : index
    %c0_25 = arith.constant 0 : index
    %41 = vector.load %arg7[%c0_24, %c0_25] : memref<1x256xf32, #tpu.memory_space<vmem>>, vector<1x256xf32>
    %42 = vector.broadcast %41 : vector<1x256xf32> to vector<24x256xf32>
    %43 = arith.addf %40, %42 : vector<24x256xf32>
    %44 = arith.mulf %43, %43 : vector<24x256xf32>
    %45 = arith.mulf %43, %44 : vector<24x256xf32>
    %cst_26 = arith.constant 4.471500e-02 : f32
    %46 = vector.broadcast %cst_26 : f32 to vector<24x256xf32>
    %47 = arith.mulf %46, %45 : vector<24x256xf32>
    %48 = arith.addf %43, %47 : vector<24x256xf32>
    %cst_27 = arith.constant 0.797884583 : f32
    %49 = vector.broadcast %cst_27 : f32 to vector<24x256xf32>
    %50 = arith.mulf %49, %48 : vector<24x256xf32>
    %51 = math.tanh %50 : vector<24x256xf32>
    %cst_28 = arith.constant 1.000000e+00 : f32
    %52 = vector.broadcast %cst_28 : f32 to vector<24x256xf32>
    %53 = arith.addf %52, %51 : vector<24x256xf32>
    %cst_29 = arith.constant 5.000000e-01 : f32
    %54 = vector.broadcast %cst_29 : f32 to vector<24x256xf32>
    %55 = arith.mulf %54, %53 : vector<24x256xf32>
    %56 = arith.mulf %43, %55 : vector<24x256xf32>
    %57 = arith.truncf %56 : vector<24x256xf32> to vector<24x256xbf16>
    %c0_30 = arith.constant 0 : index
    %c0_31 = arith.constant 0 : index
    %c0_32 = arith.constant 0 : index
    %58 = vector.load %arg9[%c0_30, %c0_31, %c0_32] : memref<1x24x256xbf16, #tpu.memory_space<vmem>>, vector<1x24x256xbf16>
    %59 = vector.shape_cast %58 : vector<1x24x256xbf16> to vector<24x256xbf16>
    %60 = vector.shape_cast %57 : vector<24x256xbf16> to vector<1x24x256xbf16>
    tpu.vector_store %arg9[%c0_30, %c0_31, %c0_32], %60 {strides = array<i32>} : memref<1x24x256xbf16, #tpu.memory_space<vmem>>, vector<1x24x256xbf16>,
    return
  }
  func.func @transform_0(%arg0: i32) -> (i32, i32, i32) {
    %c0_i32 = arith.constant 0 : i32
    %c0_i32_0 = arith.constant 0 : i32
    %c0_i32_1 = arith.constant 0 : i32
    return %arg0, %c0_i32, %c0_i32_0 : i32, i32, i32
  }
  func.func @transform_1(%arg0: i32) -> (i32, i32, i32) {
    %c0_i32 = arith.constant 0 : i32
    %c0_i32_0 = arith.constant 0 : i32
    %c0_i32_1 = arith.constant 0 : i32
    return %arg0, %c0_i32, %c0_i32_0 : i32, i32, i32
  }
  func.func @transform_2(%arg0: i32) -> (i32, i32, i32) {
    %c0_i32 = arith.constant 0 : i32
    %c0_i32_0 = arith.constant 0 : i32
    %c0_i32_1 = arith.constant 0 : i32
    return %arg0, %c0_i32, %c0_i32_0 : i32, i32, i32
  }
  func.func @transform_3(%arg0: i32) -> (i32, i32) {
    %c0_i32 = arith.constant 0 : i32
    %c0_i32_0 = arith.constant 0 : i32
    %c0_i32_1 = arith.constant 0 : i32
    return %c0_i32, %c0_i32_0 : i32, i32
  }
  func.func @transform_4(%arg0: i32) -> (i32, i32) {
    %c0_i32 = arith.constant 0 : i32
    %c0_i32_0 = arith.constant 0 : i32
    %c0_i32_1 = arith.constant 0 : i32
    return %c0_i32, %c0_i32_0 : i32, i32
  }
  func.func @transform_5(%arg0: i32) -> (i32, i32) {
    %c0_i32 = arith.constant 0 : i32
    %c0_i32_0 = arith.constant 0 : i32
    %c0_i32_1 = arith.constant 0 : i32
    return %c0_i32, %c0_i32_0 : i32, i32
  }
  func.func @transform_6(%arg0: i32) -> (i32, i32) {
    %c0_i32 = arith.constant 0 : i32
    %c0_i32_0 = arith.constant 0 : i32
    %c0_i32_1 = arith.constant 0 : i32
    return %c0_i32, %c0_i32_0 : i32, i32
  }
  func.func @transform_7(%arg0: i32) -> (i32, i32, i32) {
    %c0_i32 = arith.constant 0 : i32
    %c0_i32_0 = arith.constant 0 : i32
    %c0_i32_1 = arith.constant 0 : i32
    return %arg0, %c0_i32, %c0_i32_0 : i32, i32, i32
  }
  func.func @transform_8(%arg0: i32) -> (i32, i32, i32) {
    %c0_i32 = arith.constant 0 : i32
    %c0_i32_0 = arith.constant 0 : i32
    %c0_i32_1 = arith.constant 0 : i32
    return %arg0, %c0_i32, %c0_i32_0 : i32, i32, i32
  }
}

module attributes {stable_mosaic.version = 11 : i64} {
  func.func @_attn_single_kernel(%arg0: i32, %arg1: memref<1x24x192xbf16, #tpu.memory_space<vmem>>, %arg2: memref<24x16xf32, #tpu.memory_space<vmem>>, %arg3: memref<24x16xf32, #tpu.memory_space<vmem>>, %arg4: memref<1x32xf32, #tpu.memory_space<vmem>>, %arg5: memref<1x32xf32, #tpu.memory_space<vmem>>, %arg6: memref<1x24x64xbf16, #tpu.memory_space<vmem>>) attributes {dimension_semantics = [#tpu.dimension_semantics<parallel>], iteration_bounds = array<i64: 2>, scalar_prefetch = 0 : i64, scratch_operands = 0 : i64, tpu.core_type = #tpu.core_type<tc>, window_params = [{transform_indices = @transform_0, window_bounds = array<i64: 1, 24, 192>}, {pipeline_mode = #tpu.pipeline_mode<synchronous>, transform_indices = @transform_1, window_bounds = array<i64: 24, 16>}, {pipeline_mode = #tpu.pipeline_mode<synchronous>, transform_indices = @transform_2, window_bounds = array<i64: 24, 16>}, {pipeline_mode = #tpu.pipeline_mode<synchronous>, transform_indices = @transform_3, window_bounds = array<i64: 1, 32>}, {pipeline_mode = #tpu.pipeline_mode<synchronous>, transform_indices = @transform_4, window_bounds = array<i64: 1, 32>}, {transform_indices = @transform_5, window_bounds = array<i64: 1, 24, 64>}]} {
    %c0 = arith.constant 0 : index
    %c0_0 = arith.constant 0 : index
    %c0_1 = arith.constant 0 : index
    %0 = vector.load %arg1[%c0, %c0_0, %c0_1] : memref<1x24x192xbf16, #tpu.memory_space<vmem>>, vector<1x24x192xbf16>
    %1 = vector.shape_cast %0 : vector<1x24x192xbf16> to vector<24x192xbf16>
    %2 = arith.extf %1 : vector<24x192xbf16> to vector<24x192xf32>
    %c0_2 = arith.constant 0 : index
    %c0_3 = arith.constant 0 : index
    %3 = vector.load %arg2[%c0_2, %c0_3] : memref<24x16xf32, #tpu.memory_space<vmem>>, vector<24x16xf32>
    %c0_4 = arith.constant 0 : index
    %c0_5 = arith.constant 0 : index
    %4 = vector.load %arg3[%c0_4, %c0_5] : memref<24x16xf32, #tpu.memory_space<vmem>>, vector<24x16xf32>
    %c0_6 = arith.constant 0 : index
    %c0_7 = arith.constant 0 : index
    %5 = vector.load %arg4[%c0_6, %c0_7] : memref<1x32xf32, #tpu.memory_space<vmem>>, vector<1x32xf32>
    %c0_8 = arith.constant 0 : index
    %c0_9 = arith.constant 0 : index
    %6 = vector.load %arg5[%c0_8, %c0_9] : memref<1x32xf32, #tpu.memory_space<vmem>>, vector<1x32xf32>
    %7 = vector.extract_strided_slice %2 {offsets = [0, 0], sizes = [24, 32], strides = [1, 1]} : vector<24x192xf32> to vector<24x32xf32>
    %8 = arith.mulf %7, %7 : vector<24x32xf32>
    %cst = arith.constant dense<0.000000e+00> : vector<24xf32>
    %9 = vector.multi_reduction <add>, %8, %cst [1] : vector<24x32xf32> to vector<24xf32>
    %10 = vector.shape_cast %9 : vector<24xf32> to vector<24x1xf32>
    %cst_10 = arith.constant 3.200000e+01 : f32
    %11 = vector.broadcast %cst_10 : f32 to vector<24x1xf32>
    %12 = arith.divf %10, %11 : vector<24x1xf32>
    %cst_11 = arith.constant 9.99999997E-7 : f32
    %13 = vector.broadcast %cst_11 : f32 to vector<24x1xf32>
    %14 = arith.addf %12, %13 : vector<24x1xf32>
    %15 = math.rsqrt %14 : vector<24x1xf32>
    %16 = vector.broadcast %15 : vector<24x1xf32> to vector<24x32xf32>
    %17 = arith.mulf %7, %16 : vector<24x32xf32>
    %18 = vector.broadcast %5 : vector<1x32xf32> to vector<24x32xf32>
    %19 = arith.mulf %17, %18 : vector<24x32xf32>
    %20 = vector.extract_strided_slice %19 {offsets = [0, 0], sizes = [24, 16], strides = [1, 1]} : vector<24x32xf32> to vector<24x16xf32>
    %21 = vector.extract_strided_slice %19 {offsets = [0, 16], sizes = [24, 16], strides = [1, 1]} : vector<24x32xf32> to vector<24x16xf32>
    %22 = arith.mulf %3, %20 : vector<24x16xf32>
    %23 = arith.mulf %4, %21 : vector<24x16xf32>
    %24 = arith.subf %22, %23 : vector<24x16xf32>
    %25 = arith.mulf %4, %20 : vector<24x16xf32>
    %26 = arith.mulf %3, %21 : vector<24x16xf32>
    %27 = arith.addf %25, %26 : vector<24x16xf32>
    %28 = tpu.concatenate %24, %27 in 1 : vector<24x16xf32>, vector<24x16xf32> -> vector<24x32xf32>
    %29 = vector.extract_strided_slice %2 {offsets = [0, 64], sizes = [24, 32], strides = [1, 1]} : vector<24x192xf32> to vector<24x32xf32>
    %30 = arith.mulf %29, %29 : vector<24x32xf32>
    %cst_12 = arith.constant dense<0.000000e+00> : vector<24xf32>
    %31 = vector.multi_reduction <add>, %30, %cst_12 [1] : vector<24x32xf32> to vector<24xf32>
    %32 = vector.shape_cast %31 : vector<24xf32> to vector<24x1xf32>
    %cst_13 = arith.constant 3.200000e+01 : f32
    %33 = vector.broadcast %cst_13 : f32 to vector<24x1xf32>
    %34 = arith.divf %32, %33 : vector<24x1xf32>
    %cst_14 = arith.constant 9.99999997E-7 : f32
    %35 = vector.broadcast %cst_14 : f32 to vector<24x1xf32>
    %36 = arith.addf %34, %35 : vector<24x1xf32>
    %37 = math.rsqrt %36 : vector<24x1xf32>
    %38 = vector.broadcast %37 : vector<24x1xf32> to vector<24x32xf32>
    %39 = arith.mulf %29, %38 : vector<24x32xf32>
    %40 = vector.broadcast %6 : vector<1x32xf32> to vector<24x32xf32>
    %41 = arith.mulf %39, %40 : vector<24x32xf32>
    %42 = vector.extract_strided_slice %41 {offsets = [0, 0], sizes = [24, 16], strides = [1, 1]} : vector<24x32xf32> to vector<24x16xf32>
    %43 = vector.extract_strided_slice %41 {offsets = [0, 16], sizes = [24, 16], strides = [1, 1]} : vector<24x32xf32> to vector<24x16xf32>
    %44 = arith.mulf %3, %42 : vector<24x16xf32>
    %45 = arith.mulf %4, %43 : vector<24x16xf32>
    %46 = arith.subf %44, %45 : vector<24x16xf32>
    %47 = arith.mulf %4, %42 : vector<24x16xf32>
    %48 = arith.mulf %3, %43 : vector<24x16xf32>
    %49 = arith.addf %47, %48 : vector<24x16xf32>
    %50 = tpu.concatenate %46, %49 in 1 : vector<24x16xf32>, vector<24x16xf32> -> vector<24x32xf32>
    %51 = vector.extract_strided_slice %2 {offsets = [0, 128], sizes = [24, 32], strides = [1, 1]} : vector<24x192xf32> to vector<24x32xf32>
    %52 = arith.truncf %28 : vector<24x32xf32> to vector<24x32xbf16>
    %53 = arith.truncf %50 : vector<24x32xf32> to vector<24x32xbf16>
    %cst_15 = arith.constant dense<0.000000e+00> : vector<24x24xf32>
    %54 = tpu.matmul %52, %53, %cst_15 {dimension_numbers = #tpu.dot_dimension_numbers<[1], [1], [0], [0], [0, 0, 1, 0], [], []>} : vector<24x32xbf16>, vector<24x32xbf16>, vector<24x24xf32> -> vector<24x24xf32>
    %cst_16 = arith.constant 0.176776692 : f32
    %55 = vector.broadcast %cst_16 : f32 to vector<24x24xf32>
    %56 = arith.mulf %54, %55 : vector<24x24xf32>
    %cst_17 = arith.constant dense<0xFF800000> : vector<24xf32>
    %57 = vector.multi_reduction <maximumf>, %56, %cst_17 [1] : vector<24x24xf32> to vector<24xf32>
    %58 = vector.shape_cast %57 : vector<24xf32> to vector<24x1xf32>
    %59 = vector.broadcast %58 : vector<24x1xf32> to vector<24x24xf32>
    %60 = arith.subf %56, %59 : vector<24x24xf32>
    %61 = math.exp %60 : vector<24x24xf32>
    %62 = arith.truncf %61 : vector<24x24xf32> to vector<24x24xbf16>
    %63 = arith.truncf %51 : vector<24x32xf32> to vector<24x32xbf16>
    %cst_18 = arith.constant dense<0.000000e+00> : vector<24x32xf32>
    %64 = tpu.matmul %62, %63, %cst_18 {dimension_numbers = #tpu.dot_dimension_numbers<[1], [0], [0], [1], [0, 0, 1, 1], [], []>} : vector<24x24xbf16>, vector<24x32xbf16>, vector<24x32xf32> -> vector<24x32xf32>
    %cst_19 = arith.constant dense<0.000000e+00> : vector<24xf32>
    %65 = vector.multi_reduction <add>, %61, %cst_19 [1] : vector<24x24xf32> to vector<24xf32>
    %66 = vector.shape_cast %65 : vector<24xf32> to vector<24x1xf32>
    %67 = tpu.reciprocal %66 {approx = true} : vector<24x1xf32> -> vector<24x1xf32>
    %68 = vector.broadcast %67 : vector<24x1xf32> to vector<24x32xf32>
    %69 = arith.mulf %64, %68 : vector<24x32xf32>
    %70 = vector.extract_strided_slice %2 {offsets = [0, 32], sizes = [24, 32], strides = [1, 1]} : vector<24x192xf32> to vector<24x32xf32>
    %71 = arith.mulf %70, %70 : vector<24x32xf32>
    %cst_20 = arith.constant dense<0.000000e+00> : vector<24xf32>
    %72 = vector.multi_reduction <add>, %71, %cst_20 [1] : vector<24x32xf32> to vector<24xf32>
    %73 = vector.shape_cast %72 : vector<24xf32> to vector<24x1xf32>
    %cst_21 = arith.constant 3.200000e+01 : f32
    %74 = vector.broadcast %cst_21 : f32 to vector<24x1xf32>
    %75 = arith.divf %73, %74 : vector<24x1xf32>
    %cst_22 = arith.constant 9.99999997E-7 : f32
    %76 = vector.broadcast %cst_22 : f32 to vector<24x1xf32>
    %77 = arith.addf %75, %76 : vector<24x1xf32>
    %78 = math.rsqrt %77 : vector<24x1xf32>
    %79 = vector.broadcast %78 : vector<24x1xf32> to vector<24x32xf32>
    %80 = arith.mulf %70, %79 : vector<24x32xf32>
    %81 = vector.broadcast %5 : vector<1x32xf32> to vector<24x32xf32>
    %82 = arith.mulf %80, %81 : vector<24x32xf32>
    %83 = vector.extract_strided_slice %82 {offsets = [0, 0], sizes = [24, 16], strides = [1, 1]} : vector<24x32xf32> to vector<24x16xf32>
    %84 = vector.extract_strided_slice %82 {offsets = [0, 16], sizes = [24, 16], strides = [1, 1]} : vector<24x32xf32> to vector<24x16xf32>
    %85 = arith.mulf %3, %83 : vector<24x16xf32>
    %86 = arith.mulf %4, %84 : vector<24x16xf32>
    %87 = arith.subf %85, %86 : vector<24x16xf32>
    %88 = arith.mulf %4, %83 : vector<24x16xf32>
    %89 = arith.mulf %3, %84 : vector<24x16xf32>
    %90 = arith.addf %88, %89 : vector<24x16xf32>
    %91 = tpu.concatenate %87, %90 in 1 : vector<24x16xf32>, vector<24x16xf32> -> vector<24x32xf32>
    %92 = vector.extract_strided_slice %2 {offsets = [0, 96], sizes = [24, 32], strides = [1, 1]} : vector<24x192xf32> to vector<24x32xf32>
    %93 = arith.mulf %92, %92 : vector<24x32xf32>
    %cst_23 = arith.constant dense<0.000000e+00> : vector<24xf32>
    %94 = vector.multi_reduction <add>, %93, %cst_23 [1] : vector<24x32xf32> to vector<24xf32>
    %95 = vector.shape_cast %94 : vector<24xf32> to vector<24x1xf32>
    %cst_24 = arith.constant 3.200000e+01 : f32
    %96 = vector.broadcast %cst_24 : f32 to vector<24x1xf32>
    %97 = arith.divf %95, %96 : vector<24x1xf32>
    %cst_25 = arith.constant 9.99999997E-7 : f32
    %98 = vector.broadcast %cst_25 : f32 to vector<24x1xf32>
    %99 = arith.addf %97, %98 : vector<24x1xf32>
    %100 = math.rsqrt %99 : vector<24x1xf32>
    %101 = vector.broadcast %100 : vector<24x1xf32> to vector<24x32xf32>
    %102 = arith.mulf %92, %101 : vector<24x32xf32>
    %103 = vector.broadcast %6 : vector<1x32xf32> to vector<24x32xf32>
    %104 = arith.mulf %102, %103 : vector<24x32xf32>
    %105 = vector.extract_strided_slice %104 {offsets = [0, 0], sizes = [24, 16], strides = [1, 1]} : vector<24x32xf32> to vector<24x16xf32>
    %106 = vector.extract_strided_slice %104 {offsets = [0, 16], sizes = [24, 16], strides = [1, 1]} : vector<24x32xf32> to vector<24x16xf32>
    %107 = arith.mulf %3, %105 : vector<24x16xf32>
    %108 = arith.mulf %4, %106 : vector<24x16xf32>
    %109 = arith.subf %107, %108 : vector<24x16xf32>
    %110 = arith.mulf %4, %105 : vector<24x16xf32>
    %111 = arith.mulf %3, %106 : vector<24x16xf32>
    %112 = arith.addf %110, %111 : vector<24x16xf32>
    %113 = tpu.concatenate %109, %112 in 1 : vector<24x16xf32>, vector<24x16xf32> -> vector<24x32xf32>
    %114 = vector.extract_strided_slice %2 {offsets = [0, 160], sizes = [24, 32], strides = [1, 1]} : vector<24x192xf32> to vector<24x32xf32>
    %115 = arith.truncf %91 : vector<24x32xf32> to vector<24x32xbf16>
    %116 = arith.truncf %113 : vector<24x32xf32> to vector<24x32xbf16>
    %cst_26 = arith.constant dense<0.000000e+00> : vector<24x24xf32>
    %117 = tpu.matmul %115, %116, %cst_26 {dimension_numbers = #tpu.dot_dimension_numbers<[1], [1], [0], [0], [0, 0, 1, 0], [], []>} : vector<24x32xbf16>, vector<24x32xbf16>, vector<24x24xf32> -> vector<24x24xf32>
    %cst_27 = arith.constant 0.176776692 : f32
    %118 = vector.broadcast %cst_27 : f32 to vector<24x24xf32>
    %119 = arith.mulf %117, %118 : vector<24x24xf32>
    %cst_28 = arith.constant dense<0xFF800000> : vector<24xf32>
    %120 = vector.multi_reduction <maximumf>, %119, %cst_28 [1] : vector<24x24xf32> to vector<24xf32>
    %121 = vector.shape_cast %120 : vector<24xf32> to vector<24x1xf32>
    %122 = vector.broadcast %121 : vector<24x1xf32> to vector<24x24xf32>
    %123 = arith.subf %119, %122 : vector<24x24xf32>
    %124 = math.exp %123 : vector<24x24xf32>
    %125 = arith.truncf %124 : vector<24x24xf32> to vector<24x24xbf16>
    %126 = arith.truncf %114 : vector<24x32xf32> to vector<24x32xbf16>
    %cst_29 = arith.constant dense<0.000000e+00> : vector<24x32xf32>
    %127 = tpu.matmul %125, %126, %cst_29 {dimension_numbers = #tpu.dot_dimension_numbers<[1], [0], [0], [1], [0, 0, 1, 1], [], []>} : vector<24x24xbf16>, vector<24x32xbf16>, vector<24x32xf32> -> vector<24x32xf32>
    %cst_30 = arith.constant dense<0.000000e+00> : vector<24xf32>
    %128 = vector.multi_reduction <add>, %124, %cst_30 [1] : vector<24x24xf32> to vector<24xf32>
    %129 = vector.shape_cast %128 : vector<24xf32> to vector<24x1xf32>
    %130 = tpu.reciprocal %129 {approx = true} : vector<24x1xf32> -> vector<24x1xf32>
    %131 = vector.broadcast %130 : vector<24x1xf32> to vector<24x32xf32>
    %132 = arith.mulf %127, %131 : vector<24x32xf32>
    %133 = tpu.concatenate %69, %132 in 1 : vector<24x32xf32>, vector<24x32xf32> -> vector<24x64xf32>
    %134 = arith.truncf %133 : vector<24x64xf32> to vector<24x64xbf16>
    %c0_31 = arith.constant 0 : index
    %c0_32 = arith.constant 0 : index
    %c0_33 = arith.constant 0 : index
    %135 = vector.load %arg6[%c0_31, %c0_32, %c0_33] : memref<1x24x64xbf16, #tpu.memory_space<vmem>>, vector<1x24x64xbf16>
    %136 = vector.shape_cast %135 : vector<1x24x64xbf16> to vector<24x64xbf16>
    %137 = vector.shape_cast %134 : vector<24x64xbf16> to vector<1x24x64xbf16>
    tpu.vector_store %arg6[%c0_31, %c0_32, %c0_33], %137 {strides = array<i32>} : memref<1x24x64xbf16, #tpu.memory_space<vmem>>, vector<1x24x64xbf16>,
    return
  }
  func.func @transform_0(%arg0: i32) -> (i32, i32, i32) {
    %c0_i32 = arith.constant 0 : i32
    %c0_i32_0 = arith.constant 0 : i32
    %c0_i32_1 = arith.constant 0 : i32
    return %arg0, %c0_i32, %c0_i32_0 : i32, i32, i32
  }
  func.func @transform_1(%arg0: i32) -> (i32, i32) {
    %c0_i32 = arith.constant 0 : i32
    %c0_i32_0 = arith.constant 0 : i32
    %c0_i32_1 = arith.constant 0 : i32
    return %c0_i32, %c0_i32_0 : i32, i32
  }
  func.func @transform_2(%arg0: i32) -> (i32, i32) {
    %c0_i32 = arith.constant 0 : i32
    %c0_i32_0 = arith.constant 0 : i32
    %c0_i32_1 = arith.constant 0 : i32
    return %c0_i32, %c0_i32_0 : i32, i32
  }
  func.func @transform_3(%arg0: i32) -> (i32, i32) {
    %c0_i32 = arith.constant 0 : i32
    %c0_i32_0 = arith.constant 0 : i32
    %c0_i32_1 = arith.constant 0 : i32
    return %c0_i32, %c0_i32_0 : i32, i32
  }
  func.func @transform_4(%arg0: i32) -> (i32, i32) {
    %c0_i32 = arith.constant 0 : i32
    %c0_i32_0 = arith.constant 0 : i32
    %c0_i32_1 = arith.constant 0 : i32
    return %c0_i32, %c0_i32_0 : i32, i32
  }
  func.func @transform_5(%arg0: i32) -> (i32, i32, i32) {
    %c0_i32 = arith.constant 0 : i32
    %c0_i32_0 = arith.constant 0 : i32
    %c0_i32_1 = arith.constant 0 : i32
    return %arg0, %c0_i32, %c0_i32_0 : i32, i32, i32
  }
}

module attributes {stable_mosaic.version = 11 : i64} {
  func.func @_single_out_kernel(%arg0: i32, %arg1: memref<1x24x64xbf16, #tpu.memory_space<vmem>>, %arg2: memref<1x24x64xbf16, #tpu.memory_space<vmem>>, %arg3: memref<1x24x256xbf16, #tpu.memory_space<vmem>>, %arg4: memref<1x1x64xf32, #tpu.memory_space<vmem>>, %arg5: memref<64x64xbf16, #tpu.memory_space<vmem>>, %arg6: memref<256x64xbf16, #tpu.memory_space<vmem>>, %arg7: memref<1x64xf32, #tpu.memory_space<vmem>>, %arg8: memref<1x24x64xbf16, #tpu.memory_space<vmem>>) attributes {dimension_semantics = [#tpu.dimension_semantics<parallel>], iteration_bounds = array<i64: 2>, scalar_prefetch = 0 : i64, scratch_operands = 0 : i64, tpu.core_type = #tpu.core_type<tc>, window_params = [{transform_indices = @transform_0, window_bounds = array<i64: 1, 24, 64>}, {transform_indices = @transform_1, window_bounds = array<i64: 1, 24, 64>}, {transform_indices = @transform_2, window_bounds = array<i64: 1, 24, 256>}, {transform_indices = @transform_3, window_bounds = array<i64: 1, 1, 64>}, {pipeline_mode = #tpu.pipeline_mode<synchronous>, transform_indices = @transform_4, window_bounds = array<i64: 64, 64>}, {pipeline_mode = #tpu.pipeline_mode<synchronous>, transform_indices = @transform_5, window_bounds = array<i64: 256, 64>}, {pipeline_mode = #tpu.pipeline_mode<synchronous>, transform_indices = @transform_6, window_bounds = array<i64: 1, 64>}, {transform_indices = @transform_7, window_bounds = array<i64: 1, 24, 64>}]} {
    %c0 = arith.constant 0 : index
    %c0_0 = arith.constant 0 : index
    %c0_1 = arith.constant 0 : index
    %0 = vector.load %arg2[%c0, %c0_0, %c0_1] : memref<1x24x64xbf16, #tpu.memory_space<vmem>>, vector<1x24x64xbf16>
    %1 = vector.shape_cast %0 : vector<1x24x64xbf16> to vector<24x64xbf16>
    %c0_2 = arith.constant 0 : index
    %c0_3 = arith.constant 0 : index
    %2 = vector.load %arg5[%c0_2, %c0_3] : memref<64x64xbf16, #tpu.memory_space<vmem>>, vector<64x64xbf16>
    %cst = arith.constant dense<0.000000e+00> : vector<24x64xf32>
    %3 = tpu.matmul %1, %2, %cst {dimension_numbers = #tpu.dot_dimension_numbers<[1], [0], [0], [1], [0, 0, 1, 1], [], []>} : vector<24x64xbf16>, vector<64x64xbf16>, vector<24x64xf32> -> vector<24x64xf32>
    %c0_4 = arith.constant 0 : index
    %c0_5 = arith.constant 0 : index
    %c0_6 = arith.constant 0 : index
    %4 = vector.load %arg3[%c0_4, %c0_5, %c0_6] : memref<1x24x256xbf16, #tpu.memory_space<vmem>>, vector<1x24x256xbf16>
    %5 = vector.shape_cast %4 : vector<1x24x256xbf16> to vector<24x256xbf16>
    %c0_7 = arith.constant 0 : index
    %c0_8 = arith.constant 0 : index
    %6 = vector.load %arg6[%c0_7, %c0_8] : memref<256x64xbf16, #tpu.memory_space<vmem>>, vector<256x64xbf16>
    %cst_9 = arith.constant dense<0.000000e+00> : vector<24x64xf32>
    %7 = tpu.matmul %5, %6, %cst_9 {dimension_numbers = #tpu.dot_dimension_numbers<[1], [0], [0], [1], [0, 0, 1, 1], [], []>} : vector<24x256xbf16>, vector<256x64xbf16>, vector<24x64xf32> -> vector<24x64xf32>
    %8 = arith.addf %3, %7 : vector<24x64xf32>
    %c0_10 = arith.constant 0 : index
    %c0_11 = arith.constant 0 : index
    %9 = vector.load %arg7[%c0_10, %c0_11] : memref<1x64xf32, #tpu.memory_space<vmem>>, vector<1x64xf32>
    %10 = vector.broadcast %9 : vector<1x64xf32> to vector<24x64xf32>
    %11 = arith.addf %8, %10 : vector<24x64xf32>
    %c0_12 = arith.constant 0 : index
    %c0_13 = arith.constant 0 : index
    %c0_14 = arith.constant 0 : index
    %12 = vector.load %arg1[%c0_12, %c0_13, %c0_14] : memref<1x24x64xbf16, #tpu.memory_space<vmem>>, vector<1x24x64xbf16>
    %13 = vector.shape_cast %12 : vector<1x24x64xbf16> to vector<24x64xbf16>
    %14 = arith.extf %13 : vector<24x64xbf16> to vector<24x64xf32>
    %c0_15 = arith.constant 0 : index
    %c0_16 = arith.constant 0 : index
    %c0_17 = arith.constant 0 : index
    %15 = vector.load %arg4[%c0_15, %c0_16, %c0_17] : memref<1x1x64xf32, #tpu.memory_space<vmem>>, vector<1x1x64xf32>
    %16 = vector.shape_cast %15 : vector<1x1x64xf32> to vector<1x64xf32>
    %17 = vector.broadcast %16 : vector<1x64xf32> to vector<24x64xf32>
    %18 = arith.mulf %17, %11 : vector<24x64xf32>
    %19 = arith.addf %14, %18 : vector<24x64xf32>
    %20 = arith.truncf %19 : vector<24x64xf32> to vector<24x64xbf16>
    %c0_18 = arith.constant 0 : index
    %c0_19 = arith.constant 0 : index
    %c0_20 = arith.constant 0 : index
    %21 = vector.load %arg8[%c0_18, %c0_19, %c0_20] : memref<1x24x64xbf16, #tpu.memory_space<vmem>>, vector<1x24x64xbf16>
    %22 = vector.shape_cast %21 : vector<1x24x64xbf16> to vector<24x64xbf16>
    %23 = vector.shape_cast %20 : vector<24x64xbf16> to vector<1x24x64xbf16>
    tpu.vector_store %arg8[%c0_18, %c0_19, %c0_20], %23 {strides = array<i32>} : memref<1x24x64xbf16, #tpu.memory_space<vmem>>, vector<1x24x64xbf16>,
    return
  }
  func.func @transform_0(%arg0: i32) -> (i32, i32, i32) {
    %c0_i32 = arith.constant 0 : i32
    %c0_i32_0 = arith.constant 0 : i32
    %c0_i32_1 = arith.constant 0 : i32
    return %arg0, %c0_i32, %c0_i32_0 : i32, i32, i32
  }
  func.func @transform_1(%arg0: i32) -> (i32, i32, i32) {
    %c0_i32 = arith.constant 0 : i32
    %c0_i32_0 = arith.constant 0 : i32
    %c0_i32_1 = arith.constant 0 : i32
    return %arg0, %c0_i32, %c0_i32_0 : i32, i32, i32
  }
  func.func @transform_2(%arg0: i32) -> (i32, i32, i32) {
    %c0_i32 = arith.constant 0 : i32
    %c0_i32_0 = arith.constant 0 : i32
    %c0_i32_1 = arith.constant 0 : i32
    return %arg0, %c0_i32, %c0_i32_0 : i32, i32, i32
  }
  func.func @transform_3(%arg0: i32) -> (i32, i32, i32) {
    %c0_i32 = arith.constant 0 : i32
    %c0_i32_0 = arith.constant 0 : i32
    %c0_i32_1 = arith.constant 0 : i32
    return %arg0, %c0_i32, %c0_i32_0 : i32, i32, i32
  }
  func.func @transform_4(%arg0: i32) -> (i32, i32) {
    %c0_i32 = arith.constant 0 : i32
    %c0_i32_0 = arith.constant 0 : i32
    %c0_i32_1 = arith.constant 0 : i32
    return %c0_i32, %c0_i32_0 : i32, i32
  }
  func.func @transform_5(%arg0: i32) -> (i32, i32) {
    %c0_i32 = arith.constant 0 : i32
    %c0_i32_0 = arith.constant 0 : i32
    %c0_i32_1 = arith.constant 0 : i32
    return %c0_i32, %c0_i32_0 : i32, i32
  }
  func.func @transform_6(%arg0: i32) -> (i32, i32) {
    %c0_i32 = arith.constant 0 : i32
    %c0_i32_0 = arith.constant 0 : i32
    %c0_i32_1 = arith.constant 0 : i32
    return %c0_i32, %c0_i32_0 : i32, i32
  }
  func.func @transform_7(%arg0: i32) -> (i32, i32, i32) {
    %c0_i32 = arith.constant 0 : i32
    %c0_i32_0 = arith.constant 0 : i32
    %c0_i32_1 = arith.constant 0 : i32
    return %arg0, %c0_i32, %c0_i32_0 : i32, i32, i32
  }
}

module attributes {stable_mosaic.version = 11 : i64} {
  func.func @_matmul_kernel(%arg0: i32, %arg1: i32, %arg2: i32, %arg3: memref<2x64xf32, #tpu.memory_space<vmem>>, %arg4: memref<64x128xbf16, #tpu.memory_space<vmem>>, %arg5: memref<1x128xf32, #tpu.memory_space<vmem>>, %arg6: memref<2x128xf32, #tpu.memory_space<vmem>>, %arg7: memref<2x128xf32, #tpu.memory_space<vmem>>) attributes {dimension_semantics = [#tpu.dimension_semantics<parallel>, #tpu.dimension_semantics<parallel>, #tpu.dimension_semantics<arbitrary>], iteration_bounds = array<i64: 1, 1, 1>, scalar_prefetch = 0 : i64, scratch_operands = 1 : i64, tpu.core_type = #tpu.core_type<tc>, window_params = [{transform_indices = @transform_0, window_bounds = array<i64: 2, 64>}, {transform_indices = @transform_1, window_bounds = array<i64: 64, 128>}, {transform_indices = @transform_2, window_bounds = array<i64: 1, 128>}, {transform_indices = @transform_3, window_bounds = array<i64: 2, 128>}]} {
    %c0_i32 = arith.constant 0 : i32
    %0 = arith.cmpi eq, %arg2, %c0_i32 : i32
    %1 = arith.extui %0 : i1 to i32
    %c0_i32_0 = arith.constant 0 : i32
    %2 = arith.cmpi ne, %1, %c0_i32_0 : i32
    scf.if %2 {
      %cst_11 = arith.constant 0.000000e+00 : f32
      %19 = vector.broadcast %cst_11 : f32 to vector<2x128xf32>
      %c0_12 = arith.constant 0 : index
      %c0_13 = arith.constant 0 : index
      %20 = vector.load %arg7[%c0_12, %c0_13] : memref<2x128xf32, #tpu.memory_space<vmem>>, vector<2x128xf32>
      tpu.vector_store %arg7[%c0_12, %c0_13], %19 {strides = array<i32>} : memref<2x128xf32, #tpu.memory_space<vmem>>, vector<2x128xf32>,
    } else {
    }
    %c0 = arith.constant 0 : index
    %c0_1 = arith.constant 0 : index
    %3 = vector.load %arg3[%c0, %c0_1] : memref<2x64xf32, #tpu.memory_space<vmem>>, vector<2x64xf32>
    %4 = arith.negf %3 : vector<2x64xf32>
    %5 = math.exp %4 : vector<2x64xf32>
    %cst = arith.constant 1.000000e+00 : f32
    %6 = vector.broadcast %cst : f32 to vector<2x64xf32>
    %7 = arith.addf %6, %5 : vector<2x64xf32>
    %8 = arith.divf %6, %7 : vector<2x64xf32>
    %9 = arith.mulf %3, %8 : vector<2x64xf32>
    %c0_2 = arith.constant 0 : index
    %c0_3 = arith.constant 0 : index
    %10 = vector.load %arg7[%c0_2, %c0_3] : memref<2x128xf32, #tpu.memory_space<vmem>>, vector<2x128xf32>
    %11 = arith.truncf %9 : vector<2x64xf32> to vector<2x64xbf16>
    %c0_4 = arith.constant 0 : index
    %c0_5 = arith.constant 0 : index
    %12 = vector.load %arg4[%c0_4, %c0_5] : memref<64x128xbf16, #tpu.memory_space<vmem>>, vector<64x128xbf16>
    %cst_6 = arith.constant dense<0.000000e+00> : vector<2x128xf32>
    %13 = tpu.matmul %11, %12, %cst_6 {dimension_numbers = #tpu.dot_dimension_numbers<[1], [0], [0], [1], [0, 0, 1, 1], [], []>} : vector<2x64xbf16>, vector<64x128xbf16>, vector<2x128xf32> -> vector<2x128xf32>
    %14 = arith.addf %10, %13 : vector<2x128xf32>
    %c0_7 = arith.constant 0 : index
    %c0_8 = arith.constant 0 : index
    %15 = vector.load %arg7[%c0_7, %c0_8] : memref<2x128xf32, #tpu.memory_space<vmem>>, vector<2x128xf32>
    tpu.vector_store %arg7[%c0_7, %c0_8], %14 {strides = array<i32>} : memref<2x128xf32, #tpu.memory_space<vmem>>, vector<2x128xf32>,
    %c0_i32_9 = arith.constant 0 : i32
    %16 = arith.cmpi eq, %arg2, %c0_i32_9 : i32
    %17 = arith.extui %16 : i1 to i32
    %c0_i32_10 = arith.constant 0 : i32
    %18 = arith.cmpi ne, %17, %c0_i32_10 : i32
    scf.if %18 {
      %c0_11 = arith.constant 0 : index
      %c0_12 = arith.constant 0 : index
      %19 = vector.load %arg7[%c0_11, %c0_12] : memref<2x128xf32, #tpu.memory_space<vmem>>, vector<2x128xf32>
      %c0_13 = arith.constant 0 : index
      %c0_14 = arith.constant 0 : index
      %20 = vector.load %arg5[%c0_13, %c0_14] : memref<1x128xf32, #tpu.memory_space<vmem>>, vector<1x128xf32>
      %21 = vector.broadcast %20 : vector<1x128xf32> to vector<2x128xf32>
      %22 = arith.addf %19, %21 : vector<2x128xf32>
      %c0_15 = arith.constant 0 : index
      %c0_16 = arith.constant 0 : index
      %23 = vector.load %arg6[%c0_15, %c0_16] : memref<2x128xf32, #tpu.memory_space<vmem>>, vector<2x128xf32>
      tpu.vector_store %arg6[%c0_15, %c0_16], %22 {strides = array<i32>} : memref<2x128xf32, #tpu.memory_space<vmem>>, vector<2x128xf32>,
    } else {
    }
    return
  }
  func.func @transform_0(%arg0: i32, %arg1: i32, %arg2: i32) -> (i32, i32) {
    %c0_i32 = arith.constant 0 : i32
    return %arg0, %arg2 : i32, i32
  }
  func.func @transform_1(%arg0: i32, %arg1: i32, %arg2: i32) -> (i32, i32) {
    %c0_i32 = arith.constant 0 : i32
    return %arg2, %arg1 : i32, i32
  }
  func.func @transform_2(%arg0: i32, %arg1: i32, %arg2: i32) -> (i32, i32) {
    %c0_i32 = arith.constant 0 : i32
    %c0_i32_0 = arith.constant 0 : i32
    return %c0_i32, %arg1 : i32, i32
  }
  func.func @transform_3(%arg0: i32, %arg1: i32, %arg2: i32) -> (i32, i32) {
    %c0_i32 = arith.constant 0 : i32
    return %arg0, %arg1 : i32, i32
  }
}

module attributes {stable_mosaic.version = 11 : i64} {
  func.func @_final_kernel(%arg0: i32, %arg1: memref<1xf32, #tpu.memory_space<smem>>, %arg2: memref<1x16x64xbf16, #tpu.memory_space<vmem>>, %arg3: memref<1x1x64xf32, #tpu.memory_space<vmem>>, %arg4: memref<1x1x64xf32, #tpu.memory_space<vmem>>, %arg5: memref<64x16xbf16, #tpu.memory_space<vmem>>, %arg6: memref<1x16xf32, #tpu.memory_space<vmem>>, %arg7: memref<1x16x16xf32, #tpu.memory_space<vmem>>, %arg8: memref<1x16x16xf32, #tpu.memory_space<vmem>>) attributes {dimension_semantics = [#tpu.dimension_semantics<parallel>], iteration_bounds = array<i64: 2>, scalar_prefetch = 0 : i64, scratch_operands = 0 : i64, tpu.core_type = #tpu.core_type<tc>, window_params = [{transform_indices = @transform_0, window_bounds = array<i64: 1>}, {transform_indices = @transform_1, window_bounds = array<i64: 1, 16, 64>}, {transform_indices = @transform_2, window_bounds = array<i64: 1, 1, 64>}, {transform_indices = @transform_3, window_bounds = array<i64: 1, 1, 64>}, {pipeline_mode = #tpu.pipeline_mode<synchronous>, transform_indices = @transform_4, window_bounds = array<i64: 64, 16>}, {pipeline_mode = #tpu.pipeline_mode<synchronous>, transform_indices = @transform_5, window_bounds = array<i64: 1, 16>}, {transform_indices = @transform_6, window_bounds = array<i64: 1, 16, 16>}, {transform_indices = @transform_7, window_bounds = array<i64: 1, 16, 16>}]} {
    %c0 = arith.constant 0 : index
    %c0_0 = arith.constant 0 : index
    %c0_1 = arith.constant 0 : index
    %0 = vector.load %arg2[%c0, %c0_0, %c0_1] : memref<1x16x64xbf16, #tpu.memory_space<vmem>>, vector<1x16x64xbf16>
    %1 = vector.shape_cast %0 : vector<1x16x64xbf16> to vector<16x64xbf16>
    %2 = arith.extf %1 : vector<16x64xbf16> to vector<16x64xf32>
    %c0_2 = arith.constant 0 : index
    %c0_3 = arith.constant 0 : index
    %c0_4 = arith.constant 0 : index
    %3 = vector.load %arg3[%c0_2, %c0_3, %c0_4] : memref<1x1x64xf32, #tpu.memory_space<vmem>>, vector<1x1x64xf32>
    %4 = vector.shape_cast %3 : vector<1x1x64xf32> to vector<1x64xf32>
    %c0_5 = arith.constant 0 : index
    %c0_6 = arith.constant 0 : index
    %c0_7 = arith.constant 0 : index
    %5 = vector.load %arg4[%c0_5, %c0_6, %c0_7] : memref<1x1x64xf32, #tpu.memory_space<vmem>>, vector<1x1x64xf32>
    %6 = vector.shape_cast %5 : vector<1x1x64xf32> to vector<1x64xf32>
    %cst = arith.constant dense<0.000000e+00> : vector<16xf32>
    %7 = vector.multi_reduction <add>, %2, %cst [1] : vector<16x64xf32> to vector<16xf32>
    %8 = vector.shape_cast %7 : vector<16xf32> to vector<16x1xf32>
    %cst_8 = arith.constant 6.400000e+01 : f32
    %9 = vector.broadcast %cst_8 : f32 to vector<16x1xf32>
    %10 = arith.divf %8, %9 : vector<16x1xf32>
    %11 = vector.broadcast %10 : vector<16x1xf32> to vector<16x64xf32>
    %12 = arith.subf %2, %11 : vector<16x64xf32>
    %13 = arith.mulf %12, %12 : vector<16x64xf32>
    %cst_9 = arith.constant dense<0.000000e+00> : vector<16xf32>
    %14 = vector.multi_reduction <add>, %13, %cst_9 [1] : vector<16x64xf32> to vector<16xf32>
    %15 = vector.shape_cast %14 : vector<16xf32> to vector<16x1xf32>
    %cst_10 = arith.constant 6.400000e+01 : f32
    %16 = vector.broadcast %cst_10 : f32 to vector<16x1xf32>
    %17 = arith.divf %15, %16 : vector<16x1xf32>
    %cst_11 = arith.constant 1.000000e+00 : f32
    %18 = vector.broadcast %cst_11 : f32 to vector<1x64xf32>
    %19 = arith.addf %18, %6 : vector<1x64xf32>
    %cst_12 = arith.constant 9.99999997E-7 : f32
    %20 = vector.broadcast %cst_12 : f32 to vector<16x1xf32>
    %21 = arith.addf %17, %20 : vector<16x1xf32>
    %22 = math.rsqrt %21 : vector<16x1xf32>
    %23 = vector.broadcast %22 : vector<16x1xf32> to vector<16x64xf32>
    %24 = arith.mulf %12, %23 : vector<16x64xf32>
    %25 = vector.broadcast %19 : vector<1x64xf32> to vector<16x64xf32>
    %26 = arith.mulf %25, %24 : vector<16x64xf32>
    %27 = vector.broadcast %4 : vector<1x64xf32> to vector<16x64xf32>
    %28 = arith.addf %26, %27 : vector<16x64xf32>
    %29 = arith.truncf %28 : vector<16x64xf32> to vector<16x64xbf16>
    %c0_13 = arith.constant 0 : index
    %c0_14 = arith.constant 0 : index
    %30 = vector.load %arg5[%c0_13, %c0_14] : memref<64x16xbf16, #tpu.memory_space<vmem>>, vector<64x16xbf16>
    %cst_15 = arith.constant dense<0.000000e+00> : vector<16x16xf32>
    %31 = tpu.matmul %29, %30, %cst_15 {dimension_numbers = #tpu.dot_dimension_numbers<[1], [0], [0], [1], [0, 0, 1, 1], [], []>} : vector<16x64xbf16>, vector<64x16xbf16>, vector<16x16xf32> -> vector<16x16xf32>
    %c0_16 = arith.constant 0 : index
    %c0_17 = arith.constant 0 : index
    %32 = vector.load %arg6[%c0_16, %c0_17] : memref<1x16xf32, #tpu.memory_space<vmem>>, vector<1x16xf32>
    %33 = vector.broadcast %32 : vector<1x16xf32> to vector<16x16xf32>
    %34 = arith.addf %31, %33 : vector<16x16xf32>
    %c0_18 = arith.constant 0 : index
    %c0_19 = arith.constant 0 : index
    %c0_20 = arith.constant 0 : index
    %35 = vector.load %arg7[%c0_18, %c0_19, %c0_20] : memref<1x16x16xf32, #tpu.memory_space<vmem>>, vector<1x16x16xf32>
    %36 = vector.shape_cast %35 : vector<1x16x16xf32> to vector<16x16xf32>
    %c0_21 = arith.constant 0 : index
    %37 = memref.load %arg1[%c0_21] : memref<1xf32, #tpu.memory_space<smem>>
    %38 = vector.broadcast %37 : f32 to vector<16x16xf32>
    %39 = arith.mulf %38, %34 : vector<16x16xf32>
    %40 = arith.addf %36, %39 : vector<16x16xf32>
    %c0_22 = arith.constant 0 : index
    %c0_23 = arith.constant 0 : index
    %c0_24 = arith.constant 0 : index
    %41 = vector.load %arg8[%c0_22, %c0_23, %c0_24] : memref<1x16x16xf32, #tpu.memory_space<vmem>>, vector<1x16x16xf32>
    %42 = vector.shape_cast %41 : vector<1x16x16xf32> to vector<16x16xf32>
    %43 = vector.shape_cast %40 : vector<16x16xf32> to vector<1x16x16xf32>
    tpu.vector_store %arg8[%c0_22, %c0_23, %c0_24], %43 {strides = array<i32>} : memref<1x16x16xf32, #tpu.memory_space<vmem>>, vector<1x16x16xf32>,
    return
  }
  func.func @transform_0(%arg0: i32) -> i32 {
    %c0_i32 = arith.constant 0 : i32
    %c0_i32_0 = arith.constant 0 : i32
    return %c0_i32 : i32
  }
  func.func @transform_1(%arg0: i32) -> (i32, i32, i32) {
    %c0_i32 = arith.constant 0 : i32
    %c0_i32_0 = arith.constant 0 : i32
    %c0_i32_1 = arith.constant 0 : i32
    return %arg0, %c0_i32, %c0_i32_0 : i32, i32, i32
  }
  func.func @transform_2(%arg0: i32) -> (i32, i32, i32) {
    %c0_i32 = arith.constant 0 : i32
    %c0_i32_0 = arith.constant 0 : i32
    %c0_i32_1 = arith.constant 0 : i32
    return %arg0, %c0_i32, %c0_i32_0 : i32, i32, i32
  }
  func.func @transform_3(%arg0: i32) -> (i32, i32, i32) {
    %c0_i32 = arith.constant 0 : i32
    %c0_i32_0 = arith.constant 0 : i32
    %c0_i32_1 = arith.constant 0 : i32
    return %arg0, %c0_i32, %c0_i32_0 : i32, i32, i32
  }
  func.func @transform_4(%arg0: i32) -> (i32, i32) {
    %c0_i32 = arith.constant 0 : i32
    %c0_i32_0 = arith.constant 0 : i32
    %c0_i32_1 = arith.constant 0 : i32
    return %c0_i32, %c0_i32_0 : i32, i32
  }
  func.func @transform_5(%arg0: i32) -> (i32, i32) {
    %c0_i32 = arith.constant 0 : i32
    %c0_i32_0 = arith.constant 0 : i32
    %c0_i32_1 = arith.constant 0 : i32
    return %c0_i32, %c0_i32_0 : i32, i32
  }
  func.func @transform_6(%arg0: i32) -> (i32, i32, i32) {
    %c0_i32 = arith.constant 0 : i32
    %c0_i32_0 = arith.constant 0 : i32
    %c0_i32_1 = arith.constant 0 : i32
    return %arg0, %c0_i32, %c0_i32_0 : i32, i32, i32
  }
  func.func @transform_7(%arg0: i32) -> (i32, i32, i32) {
    %c0_i32 = arith.constant 0 : i32
    %c0_i32_0 = arith.constant 0 : i32
    %c0_i32_1 = arith.constant 0 : i32
    return %arg0, %c0_i32, %c0_i32_0 : i32, i32, i32
  }
}

</mosaic_0001>

<bundles_post_ra>
// kernel: step_fn.17
= control target key start
LH: loop header
LB: loop body
LE: loop exit
PB: predicated region body
PF: predicated region fallthrough
CT: control target
= control target key end

     0   :  { %8 = vsyncpa [#allocation4], 0  ;;  %s257_s0 = inlined_call_operand.hbm [shape: f32[32,16], index: 0, kind: input, shape index: {}]   ;;  %s258_s1 = inlined_call_operand.vmem [shape: bf16[16,64], index: 1, kind: input, shape index: {}]   ;;  %s259_s2 = inlined_call_operand.hbm [shape: f32[1,64], index: 2, kind: input, shape index: {}]   ;;  %s260_s3 = inlined_call_operand.vmem [shape: bf16[32,64], index: 3, kind: output, shape index: {}]  }
   0x1   :  { %s14_s14 = sshll.u32 %s257_s0, 4  ;;  %s15_s14 = int_to_ptr.hbm [resolvable:$true] %s14_s14 }
   0x2   :  { %9 = vsyncpa [#allocation6], 0  ;;  %s203_s15 = smov [#allocation3]   ;;  %s30_s19 = sshll.u32 %s259_s2, 4  ;;  %s31_s19 = int_to_ptr.hbm [resolvable:$true] %s30_s19 }
   0x3   :  { %s16_s16 = sshll.u32 %s203_s15, 4  ;;  %s204_s20 = smov 128   ;;  %s17_s16 = int_to_ptr.vmem [resolvable:$true] %s16_s16 }
   0x4   :  { %s205_s21 = smov 8   ;;  %s206_s22 = smov [#allocation5]  }
   0x5   :  { %22 = dma.hbm_to_vmem [thread:$0]  %s15_s14, 512, %s17_s16, [#allocation4], %s204_s20, %s204_s20, %s205_s21  }
   0x6   :  { %s32_s23 = sshll.u32 %s206_s22, 4  ;;  %s33_s23 = int_to_ptr.vmem [resolvable:$true] %s32_s23 }
   0x7   :  { %35 = dma.hbm_to_vmem [thread:$0]  %s31_s19, 16, %s33_s23, [#allocation6]  }
   0x8   :  { %199 = dma.done.wait [#allocation4], 512  }
   0x9   :  { %200 = vsyncadd [#allocation4], 4294966784 }
   0xa   :  { %201 = dma.done.wait [#allocation6], 16  }
   0xb   :  { %202 = vsyncadd [#allocation6], 4294967280  ;;  %vm49_vm0 = vcmask 523264   ;;  %v207_v0 = vmov 0.0   ;;  %v143_v1 = vld [vmem:[%s258_s1] sm:$0xff]  ;;  %v55_v3 = vld [vmem:[#allocation3 + $0x8] sm:$0xff] }
   0xc   :  { %50 = vst.msk [vmem:[#allocation2] sm:$0xff] %vm49_vm0, %v207_v0  ;;  %v54_v2 = vld [vmem:[#allocation3] sm:$0xff]  ;;  %v56_v5 = vld [vmem:[#allocation3 + $0x10] sm:$0xff]  ;;  %v57_v6 = vld [vmem:[#allocation3 + $0x18] sm:$0xff]  ;;  %86 = vmatpush.bf16.msra.mxu0 %v143_v1  ;;  %144 = vmatpush.bf16.msra.mxu1 %v143_v1  ;;  %vm72_vm1 = vcmask 130048   ;;  %vm126_vm2 = vcmask 519168  }
   0xd   :  { %51 = vst.msk [vmem:[#allocation2 + $0x8] sm:$0xff] %vm49_vm0, %v207_v0  ;;  %v62_v4 = vpack.c.bf16 %v55_v3, %v54_v2  ;;  %v63_v7 = vpack.c.bf16 %v57_v6, %v56_v5  ;;  %v150_v16 = vld [vmem:[#allocation5] ss:$0 sm:$0xff] }
   0xe   :  { %52 = vst.msk [vmem:[#allocation2 + $0x10] sm:$0xff] %vm49_vm0, %v207_v0 }
   0xf   :  { %53 = vst.msk [vmem:[#allocation2 + $0x18] sm:$0xff] %vm49_vm0, %v207_v0  ;;  %141 = vmatmul.msk.bf16.vlgmr.msra.gmra.mxu0 %vm72_vm1, %v62_v4  ;;  %142 = vmatmul.msk.bf16.vlgmr.msra.gmra.mxu1 %vm72_vm1, %v63_v7 }
  0x13   :  { %v58_v8 = vld [vmem:[#allocation2] sm:$0xff] }
  0x14   :  { %v59_v14 = vld [vmem:[#allocation2 + $0x8] sm:$0xff] }
  0x15   :  { %v60_v9 = vld [vmem:[#allocation2 + $0x10] sm:$0xff] }
  0x16   :  { %v61_v15 = vld [vmem:[#allocation2 + $0x18] sm:$0xff] }
  0x8c   :  { %v88_v10 = vpop.f32.mrf.mxu0  ;;  %v93_v11 = vpop.f32.mrf.mxu1 }
  0x8d   :  { %v98_v12 = vadd.f32 %v88_v10, %v58_v8  ;;  %v100_v13 = vadd.f32 %v93_v11, %v60_v9 }
  0x8f   :  { %103 = vst.msk [vmem:[#allocation2] sm:$0xff] %vm49_vm0, %v98_v12 }
  0x90   :  { %105 = vst.msk [vmem:[#allocation2 + $0x10] sm:$0xff] %vm49_vm0, %v100_v13 }
  0x94   :  { %v90_v17 = vpop.f32.mrf.mxu0  ;;  %v95_v18 = vpop.f32.mrf.mxu1 }
  0x95   :  { %v99_v19 = vadd.f32 %v90_v17, %v59_v14  ;;  %v101_v20 = vadd.f32 %v95_v18, %v61_v15 }
  0x96   :  { %v110_v21 = vld [vmem:[#allocation2] sm:$0xff] }
  0x97   :  { %v118_v22 = vadd.f32 %v150_v16, %v110_v21  ;;  %v112_v23 = vld [vmem:[#allocation2 + $0x10] sm:$0xff]  ;;  %104 = vst.msk [vmem:[#allocation2 + $0x8] sm:$0xff] %vm49_vm0, %v99_v19 }
  0x98   :  { %v120_v24 = vadd.f32 %v150_v16, %v112_v23  ;;  %106 = vst.msk [vmem:[#allocation2 + $0x18] sm:$0xff] %vm49_vm0, %v101_v20 }
  0x99   :  { %v122_v25 = vpack.c.bf16 %v118_v22, %v118_v22 }
  0x9a   :  { %v124_v26 = vpack.c.bf16 %v120_v24, %v120_v24 }
  0x9b   :  { %127 = vst.msk [vmem:[%s260_s3] sm:$0xf] %vm126_vm2, %v122_v25 }
  0x9c   :  { %129 = vst.msk [vmem:[%s260_s3 + $0x8] sm:$0xf] %vm126_vm2, %v124_v26 }
  0x9e   :  { %v111_v27 = vld [vmem:[#allocation2 + $0x8] sm:$0xff] }
  0x9f   :  { %v119_v28 = vadd.f32 %v150_v16, %v111_v27  ;;  %v113_v29 = vld [vmem:[#allocation2 + $0x18] sm:$0xff] }
  0xa0   :  { %v121_v30 = vadd.f32 %v150_v16, %v113_v29 }
  0xa1   :  { %v123_v31 = vpack.c.bf16 %v119_v28, %v119_v28 }
  0xa2   :  { %v125_v32 = vpack.c.bf16 %v121_v30, %v121_v30 }
  0xa3   :  { %128 = vst.msk [vmem:[%s260_s3 + $0x4] sm:$0xf] %vm126_vm2, %v123_v31 }
  0xa4   :  { %130 = vst.msk [vmem:[%s260_s3 + $0xc] sm:$0xf] %vm126_vm2, %v125_v32 }
  0xa5   :  { %135 = vsyncpa [#allocation4], 1 }
  0xa6   :  { %136 = vsyncpa [#allocation6], 1 }

// kernel: step_fn.20
= control target key start
LH: loop header
LB: loop body
LE: loop exit
PB: predicated region body
PF: predicated region fallthrough
CT: control target
= control target key end

     0   :  { %s818_s12 = smov 0   ;;  %s820_s13 = smov 0   ;;  %s939_s0 = inlined_call_operand.vmem [shape: f32[2,64], index: 0, kind: input, shape index: {}]   ;;  %s940_s1 = inlined_call_operand.vmem [shape: bf16[64,768], index: 1, kind: input, shape index: {}]   ;;  %s941_s2 = inlined_call_operand.vmem [shape: f32[1,768], index: 2, kind: input, shape index: {}]   ;;  %s942_s3 = inlined_call_operand.vmem [shape: f32[2,768], index: 3, kind: output, shape index: {}]  }
   0x1   :  { %s822_s14 = smov 0   ;;  %s824_s15 = smov 0  }
   0x2   :  { %s826_s16 = smov 0  }
   0x3 LB: > { %s28_s17 = sadd.s32 1, %s791_s15  ;;  %p76_p1 = scmp.ne.s32.totalorder %s783_s13, %s779_s12  ;;  %s795_s16 = sphi %s826_s16, %s13_s16   ;;  %s791_s15 = sphi %s824_s15, %s946_s15   ;;  %s787_s14 = sphi %s822_s14, %s945_s14   ;;  %s783_s13 = sphi %s820_s13, %s944_s13   ;;  %s779_s12 = sphi %s818_s12, %s943_s12  }
   0x4   : > { %p30_p0 = scmp.ge.s32.totalorder %s28_s17, 2  ;;  %p77_p2 = scmp.eq.s32.totalorder %s795_s16, 0 }
   0x5   : > { %s69_s19 = sadd.s32 1, %s783_s13  ;;  %p623_p5 = scmp.ge.s32.totalorder %s795_s16, 2 }
   0x6   : > { %s948_s17 = smov (%p30_p0, %s28_s17), 0  ;;  %p78_p3 = por %p77_p2, %p76_p1 }
   0x7   : > { %s65_s18 = ssub.s32 %s791_s15, %s948_s17  ;;  %166 = sbr.rel (%p623_p5) target bundleno = 33 (0x21), region = 20 }
   0x8   : > { %p67_p4 = scmp.eq.s32.totalorder %s65_s18, 0 }
   0xa   : > { %s853_s20 = scalar_select %p67_p4, %s783_s13, %s69_s19  }
   0xc   : > { %169 = sbr.rel (!%p78_p3) target bundleno = 33 (0x21), region = 24  ;;  %s171_s21 = sand.u32 (%p78_p3), 1, %s783_s13  }
   0xd   : > { %s697_s22 = smul.u32 (%p78_p3), 12, %s791_s15 }
   0xe   : > { %s710_s23 = smul.u32 (%p78_p3), 96, %s171_s21 }
   0xf   : > { %s861_s26 = scalar_lea.vmem (%p78_p3), %s940_s1, %s697_s22 }
  0x10   : > { %v194_v0 = vld [vmem:[%s861_s26] sm:$0xff] (%p78_p3)  ;;  %v196_v1 = vld [vmem:[%s861_s26 + $0x18] sm:$0xff] (%p78_p3)  ;;  %v198_v2 = vld [vmem:[%s861_s26 + $0x30] sm:$0xff] (%p78_p3)  ;;  %s173_s27 = scalar_lea.vmem (%p78_p3), [#allocation3], %s710_s23 }
  0x11   : > { %195 = vst [vmem:[%s173_s27] sm:$0xff] %v194_v0  ;;  %v200_v3 = vld [vmem:[%s861_s26 + $0x48] sm:$0xff]  ;;  %v202_v4 = vld [vmem:[%s861_s26 + $0x60] sm:$0xff]  ;;  %v204_v5 = vld [vmem:[%s861_s26 + $0x78] sm:$0xff] }
  0x12   : > { %197 = vst [vmem:[%s173_s27 + $0xc] sm:$0xff] %v196_v1  ;;  %v206_v6 = vld [vmem:[%s861_s26 + $0x90] sm:$0xff]  ;;  %v208_v7 = vld [vmem:[%s861_s26 + $0xa8] sm:$0xff]  ;;  %v627_v9 = vld [vmem:[%s861_s26 + $0x20] sm:$0xf] }
  0x13   : > { %199 = vst [vmem:[%s173_s27 + $0x18] sm:$0xff] %v198_v2  ;;  %v625_v8 = vld [vmem:[%s861_s26 + $0x8] sm:$0xf]  ;;  %v629_v10 = vld [vmem:[%s861_s26 + $0x38] sm:$0xf] }
  0x14   : > { %201 = vst [vmem:[%s173_s27 + $0x24] sm:$0xff] %v200_v3  ;;  %v631_v11 = vld [vmem:[%s861_s26 + $0x50] sm:$0xf]  ;;  %v633_v12 = vld [vmem:[%s861_s26 + $0x68] sm:$0xf] }
  0x15   : > { %203 = vst [vmem:[%s173_s27 + $0x30] sm:$0xff] %v202_v4  ;;  %v635_v13 = vld [vmem:[%s861_s26 + $0x80] sm:$0xf]  ;;  %v637_v14 = vld [vmem:[%s861_s26 + $0x98] sm:$0xf] }
  0x16   : > { %205 = vst [vmem:[%s173_s27 + $0x3c] sm:$0xff] %v204_v5  ;;  %v639_v15 = vld [vmem:[%s861_s26 + $0xb0] sm:$0xf] }
  0x17   : > { %207 = vst [vmem:[%s173_s27 + $0x48] sm:$0xff] %v206_v6 }
  0x18   : > { %209 = vst [vmem:[%s173_s27 + $0x54] sm:$0xff] %v208_v7 }
  0x19   : > { %626 = vst [vmem:[%s173_s27 + $0x8] sm:$0xf] %v625_v8 }
  0x1a   : > { %628 = vst [vmem:[%s173_s27 + $0x14] sm:$0xf] %v627_v9 }
  0x1b   : > { %630 = vst [vmem:[%s173_s27 + $0x20] sm:$0xf] %v629_v10 }
  0x1c   : > { %632 = vst [vmem:[%s173_s27 + $0x2c] sm:$0xf] %v631_v11 }
  0x1d   : > { %634 = vst [vmem:[%s173_s27 + $0x38] sm:$0xf] %v633_v12 }
  0x1e   : > { %636 = vst [vmem:[%s173_s27 + $0x44] sm:$0xf] %v635_v13 }
  0x1f   : > { %638 = vst [vmem:[%s173_s27 + $0x50] sm:$0xf] %v637_v14 }
  0x20   : > { %640 = vst [vmem:[%s173_s27 + $0x5c] sm:$0xf] %v639_v15 }
  0x21 PF: > { %p641_p6 = scmp.ge.s32.totalorder %s795_s16, 1  ;;  %p246_p7 = scmp.lt.s32.totalorder %s795_s16, 3 }
  0x23   : > { %p247_p8 = pnand %p641_p6, %p246_p7 }
  0x24   : > { %s253_s28 = sand.u32 (!%p247_p8), 1, %s779_s12   ;;  %s300_s6 = smul.u32 (!%p247_p8), 3, %s787_s14 }
  0x25   : > { %250 = sbr.rel (%p247_p8) target bundleno = 224 (0xe0), region = 54 }
  0x26   : > { %s711_s4 = smul.u32 (!%p247_p8), 96, %s253_s28  ;;  %p301_p9 = scmp.lt.s32.totalorder (!%p247_p8), %s300_s6, 5 }
  0x28   : > { %s888_s5 = scalar_lea.vmem (!%p247_p8), [#allocation3], %s711_s4 }
  0x2a   : > { %v885_v16 = vld [vmem:[%s939_s0] sm:$0x3]  ;;  %v682_v18 = vld [vmem:[%s888_s5 + $0x48] sm:$0xf]  ;;  %v708_v19 = vld [vmem:[%s888_s5 + $0x50] sm:$0xf0] }
  0x2b   : > { %v643_v17 = vmul.f32 -1.442695, %v885_v16  ;;  %v707_v20 = vld [vmem:[%s888_s5 + $0x4c] sm:$0xf]  ;;  %v683_v21 = vor.u32 %v708_v19, %v682_v18  ;;  %v684_v22 = vld [vmem:[%s888_s5 + $0x54] sm:$0xf0] }
  0x2c   : > { %v690_v23 = vld [vmem:[%s888_s5 + $0x50] sm:$0xf]  ;;  %v709_v24 = vld [vmem:[%s888_s5 + $0x58] sm:$0xf0]  ;;  %v687_v25 = vor.u32 %v707_v20, %v684_v22  ;;  %v704_v29 = vld [vmem:[%s888_s5 + $0x34] sm:$0xf] }
  0x2d   : > { %753 = vpow2.f32 %v643_v17  ;;  %v691_v26 = vor.u32 %v709_v24, %v690_v23  ;;  %v670_v27 = vld [vmem:[%s888_s5 + $0x30] sm:$0xf]  ;;  %v705_v28 = vld [vmem:[%s888_s5 + $0x38] sm:$0xf0]  ;;  %432 = vmatpush.bf16.msra.mxu0 %v683_v21  ;;  %v672_v31 = vld [vmem:[%s888_s5 + $0x3c] sm:$0xf0] }
  0x2e   : > { %v671_v30 = vor.u32 %v705_v28, %v670_v27  ;;  %v678_v32 = vld [vmem:[%s888_s5 + $0x38] sm:$0xf]  ;;  %v706_v33 = vld [vmem:[%s888_s5 + $0x40] sm:$0xf0]  ;;  %445 = vmatpush.bf16.msra.mxu1 %v687_v25  ;;  %v675_v34 = vor.u32 %v704_v29, %v672_v31  ;;  %v701_v38 = vld [vmem:[%s888_s5 + $0x1c] sm:$0xf] }
  0x2f   : > { %458 = vmatpush.bf16.msra.mxu2 %v691_v26  ;;  %v679_v35 = vor.u32 %v706_v33, %v678_v32  ;;  %v658_v36 = vld [vmem:[%s888_s5 + $0x18] sm:$0xf]  ;;  %v702_v37 = vld [vmem:[%s888_s5 + $0x20] sm:$0xf0]  ;;  %v660_v40 = vld [vmem:[%s888_s5 + $0x24] sm:$0xf0] }
  0x30   : > { %v666_v41 = vld [vmem:[%s888_s5 + $0x20] sm:$0xf]  ;;  %v703_v42 = vld [vmem:[%s888_s5 + $0x28] sm:$0xf0]  ;;  %v659_v43 = vor.u32 %v702_v37, %v658_v36  ;;  %v663_v45 = vor.u32 %v701_v38, %v660_v40  ;;  %v698_v48 = vld [vmem:[%s888_s5 + $0x4] sm:$0xf] }
  0x31   : > { %433 = vmatpush.bf16.msra.mxu0 %v671_v30  ;;  %v646_v44 = vld [vmem:[%s888_s5] sm:$0xf]  ;;  %v667_v46 = vor.u32 %v703_v42, %v666_v41  ;;  %v699_v47 = vld [vmem:[%s888_s5 + $0x8] sm:$0xf0]  ;;  %v648_v50 = vld [vmem:[%s888_s5 + $0xc] sm:$0xf0] }
  0x32   : > { %446 = vmatpush.bf16.msra.mxu1 %v675_v34  ;;  %v654_v51 = vld [vmem:[%s888_s5 + $0x8] sm:$0xf]  ;;  %v700_v52 = vld [vmem:[%s888_s5 + $0x10] sm:$0xf0]  ;;  %v647_v53 = vor.u32 %v699_v47, %v646_v44  ;;  %v651_v54 = vor.u32 %v698_v48, %v648_v50  ;;  %vm424_vm4 = vcmask 523264   ;;  %v797_v4 = vmov 0.0  }
  0x33   : > { %v754_v39 = vpop.eup %753  ;;  %459 = vmatpush.bf16.msra.mxu2 %v679_v35  ;;  %v655_v55 = vor.u32 %v700_v52, %v654_v51  ;;  %320 = vst [vmem:[#allocation2] sm:$0x3f] %v797_v4  ;;  %s950_s6 = smov (!%p301_p9, %s300_s6), 5  ;;  %vm472_vm5 = vcmask 1041408   ;;  %vm474_vm6 = vcmask 1043456  }
  0x34   : > { %v325_v49 = vadd.f32 1.0, %v754_v39  ;;  %s303_s9 = scalar_lea.vmem %s941_s2, %s950_s6  ;;  %s642_s10 = sshll.u32 %s950_s6, 1 }
  0x35   : > { %434 = vmatpush.bf16.msra.mxu0 %v659_v43  ;;  %v483_v8 = vld [vmem:[%s303_s9] sm:$0x7]  ;;  %s313_s14 = scalar_lea.vmem %s942_s3, %s642_s10 }
  0x36   : > { %755 = vrcp.f32 %v325_v49  ;;  %447 = vmatpush.bf16.msra.mxu1 %v663_v45  ;;  %v337_v58 = vand.u32 2147483648, %v325_v49  ;;  %vm331_vm0 = vweird.f32 %v325_v49  ;;  %v335_v60 = vand.u32 2147483647, %v325_v49 }
  0x37   : > { %460 = vmatpush.bf16.msra.mxu2 %v667_v46  ;;  %v486_v10 = vperm.slane %v483_v8, 1  ;;  %v487_v17 = vperm.slane %v483_v8, 2  ;;  %v485_v18 = vperm.slane %v483_v8, 0 }
  0x38   : > { %v338_v62 = vor.u32 1.1754944e-38, %v337_v58  ;;  %vm336_vm3 = vcmp.eq.f32.partialorder %v335_v60, 8.507059e+37 }
  0x39   : > { %435 = vmatpush.bf16.msra.mxu0 %v647_v53  ;;  %v488_v19 = vrot.slane %v486_v10, 6  ;;  %v489_v21 = vrot.slane %v487_v17, 4 }
  0x3a   : > { %448 = vmatpush.bf16.msra.mxu1 %v651_v54  ;;  %v342_v12 = vld [vmem:[#allocation2] sm:$0x3f] }
  0x3b   : > { %461 = vmatpush.bf16.msra.mxu2 %v655_v55  ;;  %v490_v22 = vsel %vm472_vm5, %v485_v18, %v488_v19 }
  0x3c   : > { %v756_v56 = vpop.eup %755  ;;  %v491_v24 = vsel %vm474_vm6, %v490_v22, %v489_v21 }
  0x3d   : > { %v327_v57 = vmul.f32 %v756_v56, %v325_v49  ;;  %vm332_vm1 = vweird.f32 %v756_v56 }
  0x3e   : > { %vm333_vm2 = vmor %vm331_vm0, %vm332_vm1 }
  0x3f   : > { %v328_v59 = vsub.f32 1.0, %v327_v57 }
  0x41   : > { %v329_v61 = vmul.f32 %v756_v56, %v328_v59 }
  0x43   : > { %v330_v63 = vadd.f32 %v756_v56, %v329_v61 }
  0x45   : > { %v334_v0 = vsel %vm333_vm2, %v756_v56, %v330_v63 }
  0x46   : > { %v339_v1 = vsel %vm336_vm3, %v338_v62, %v334_v0 }
  0x47   : > { %v341_v2 = vmul.f32 %v339_v1, %v885_v16 }
  0x49   : > { %v343_v3 = vpack.c.bf16 %v341_v2, %v341_v2 }
  0x4b   : > { %692 = vmatmul.msk.bf16.vlgmr.msra.gmra.mxu0 %vm424_vm4, %v343_v3  ;;  %693 = vmatmul.msk.bf16.vlgmr.msra.gmra.mxu1 %vm424_vm4, %v343_v3 }
  0x4c   : > { %694 = vmatmul.msk.bf16.vlgmr.msra.gmra.mxu2 %vm424_vm4, %v343_v3 }
  0xc8   : > { %v437_v5 = vpop.f32.mrf.mxu0  ;;  %v450_v6 = vpop.f32.mrf.mxu1 }
  0xc9   : > { %v470_v7 = vrot.slane %v450_v6, 6 }
  0xcb   : > { %v473_v9 = vsel %vm472_vm5, %v437_v5, %v470_v7 }
  0xcf   : > { %v463_v11 = vpop.f32.mrf.mxu2 }
  0xd0   : > { %v471_v13 = vrot.slane %v463_v11, 4  ;;  %v439_v14 = vpop.f32.mrf.mxu0  ;;  %v452_v15 = vpop.f32.mrf.mxu1 }
  0xd2   : > { %v475_v16 = vsel %vm474_vm6, %v473_v9, %v471_v13 }
  0xd3   : > { %v477_v20 = vadd.f32 %v475_v16, %v342_v12 }
  0xd5   : > { %478 = vst [vmem:[#allocation2] sm:$0x3f] %v477_v20 }
  0xd7   : > { %v465_v23 = vpop.f32.mrf.mxu2 }
  0xdc   : > { %v482_v25 = vld [vmem:[#allocation2] sm:$0x3f] }
  0xdd   : > { %v493_v26 = vadd.f32 %v491_v24, %v482_v25 }
  0xdf   : > { %494 = vst [vmem:[%s313_s14] sm:$0x3f] %v493_v26 }
  0xe0 PF: > { %s13_s16 = sadd.s32 1, %s795_s16   ;;  %s943_s12 = smov %s783_s13 }
  0xe1   : > { %p10_p10 = scmp.ge.s32.totalorder %s13_s16, 4   ;;  %s944_s13 = smov %s853_s20 }
  0xe2   : > { %s945_s14 = smov %s791_s15  ;;  %s946_s15 = smov %s948_s17 }
  0xe3   :  { %12 = sbr.rel (!%p10_p10) target bundleno = 3 (0x3), region = 113 }

// kernel: step_fn.21
= control target key start
LH: loop header
LB: loop body
LE: loop exit
PB: predicated region body
PF: predicated region fallthrough
CT: control target
= control target key end

     0   :  { %s603_s18 = smov 0   ;;  %s704_s0 = inlined_call_operand.vmem [shape: bf16[2,16,64], index: 0, kind: input, shape index: {}]   ;;  %s705_s1 = inlined_call_operand.vmem [shape: f32[2,1,64], index: 1, kind: input, shape index: {}]   ;;  %s706_s2 = inlined_call_operand.vmem [shape: f32[2,1,64], index: 2, kind: input, shape index: {}]   ;;  %s707_s3 = inlined_call_operand.vmem [shape: bf16[64,192], index: 3, kind: input, shape index: {}]   ;;  %s708_s4 = inlined_call_operand.vmem [shape: f32[1,192], index: 4, kind: input, shape index: {}]   ;;  %s709_s5 = inlined_call_operand.vmem [shape: bf16[2,16,192], index: 5, kind: output, shape index: {}]  }
   0x1 LB: > { %s489_s19 = sadd.s32 4294967295, %s570_s18   ;;  %p493_p0 = scmp.ge.s32.totalorder %s570_s18, 1  ;;  %s570_s18 = sphi %s603_s18, %s15_s18  }
   0x2   : > { %p203_p1 = scmp.lt.s32.totalorder %s570_s18, 3 }
   0x4   : > { %p204_p2 = pnand %p493_p0, %p203_p1 }
   0x5   : > { %p237_p3 = scmp.lt.s32.totalorder (!%p204_p2), %s489_s19, 1 }
   0x6   : > { %207 = sbr.rel (%p204_p2) target bundleno = 434 (0x1b2), region = 40 }
   0xb   : > { %s711_s19 = smov (!%p237_p3, %s489_s19), 1  ;;  %vm260_vm0 = vcmask 523264   ;;  %v572_v5 = vmov 64.0   ;;  %v524_v22 = vld [vmem:[%s707_s3 + $0x30] sm:$0xf]  ;;  %vm411_vm8 = vcmask 1043456  }
   0xc   : > { %s534_s20 = sshll.u32 %s711_s19, 3  ;;  %558 = vrcp.f32 %v572_v5  ;;  %s244_s26 = scalar_lea.vmem %s705_s1, %s711_s19  ;;  %v543_v23 = vld [vmem:[%s707_s3 + $0x34] sm:$0xf0]  ;;  %v542_v24 = vld [vmem:[%s707_s3 + $0x34] sm:$0xf]  ;;  %vm412_vm9 = vcmask 523268  }
   0xd   : > { %s241_s23 = scalar_lea.vmem %s704_s0, %s534_s20  ;;  %v525_v25 = vor.u32 %v543_v23, %v524_v22  ;;  %v526_v26 = vld [vmem:[%s707_s3 + $0x38] sm:$0xf0]  ;;  %v516_v28 = vld [vmem:[%s707_s3 + $0x20] sm:$0xf]  ;;  %v541_v29 = vld [vmem:[%s707_s3 + $0x24] sm:$0xf0]  ;;  %s247_s14 = scalar_lea.vmem %s706_s2, %s711_s19 }
   0xe   : > { %v545_v0 = vld [vmem:[%s241_s23] sm:$0xff]   ;;  %v529_v27 = vor.u32 %v542_v24, %v526_v26  ;;  %v517_v31 = vor.u32 %v541_v29, %v516_v28  ;;  %v518_v32 = vld [vmem:[%s707_s3 + $0x28] sm:$0xf0]  ;;  %v508_v34 = vld [vmem:[%s707_s3 + $0x10] sm:$0xf]  ;;  %s535_s21 = sshll.u32 %s711_s19, 4 }
   0xf   : > { %v546_v1 = vunpack.c.l.bf16 %v545_v0  ;;  %v547_v3 = vunpack.c.h.bf16 %v545_v0  ;;  %385 = vmatpush.bf16.msra.mxu0 %v525_v25  ;;  %v540_v30 = vld [vmem:[%s707_s3 + $0x24] sm:$0xf]  ;;  %v539_v35 = vld [vmem:[%s707_s3 + $0x14] sm:$0xf0]  ;;  %v538_v36 = vld [vmem:[%s707_s3 + $0x14] sm:$0xf]  ;;  %s252_s23 = scalar_lea.vmem %s709_s5, %s535_s21 }
  0x10   : > { %399 = vmatpush.bf16.msra.mxu1 %v529_v27  ;;  %v521_v33 = vor.u32 %v540_v30, %v518_v32  ;;  %v509_v37 = vor.u32 %v539_v35, %v508_v34  ;;  %v510_v38 = vld [vmem:[%s707_s3 + $0x18] sm:$0xf0]  ;;  %v500_v40 = vld [vmem:[%s707_s3] sm:$0xf]  ;;  %v537_v41 = vld [vmem:[%s707_s3 + $0x4] sm:$0xf0] }
  0x11   : > { %v261_v2 = vsel %vm260_vm0, %v546_v1, 0.0  ;;  %v264_v4 = vsel %vm260_vm0, %v547_v3, 0.0  ;;  %v513_v39 = vor.u32 %v538_v36, %v510_v38  ;;  %v536_v42 = vld [vmem:[%s707_s3 + $0x4] sm:$0xf]  ;;  %v501_v44 = vor.u32 %v537_v41, %v500_v40  ;;  %v502_v45 = vld [vmem:[%s707_s3 + $0x8] sm:$0xf0]  ;;  %vm413_vm10 = vmor %vm412_vm9, %vm411_vm8 }
  0x12   : > { %262 = vadd.xlane.f32.xlu0 %v261_v2  ;;  %v559_v6 = vpop.eup %558  ;;  %v505_v47 = vor.u32 %v536_v42, %v502_v45  ;;  %v259_v60 = vld [vmem:[%s247_s14] sm:$0x1] }
  0x13   : > { %v268_v7 = vmul.f32 64.0, %v559_v6  ;;  %vm272_vm1 = vweird.f32 %v559_v6  ;;  %386 = vmatpush.bf16.msra.mxu0 %v517_v31  ;;  %v288_v62 = vadd.f32 1.0, %v259_v60 }
  0x14   : > { %400 = vmatpush.bf16.msra.mxu1 %v521_v33 }
  0x15   : > { %v269_v8 = vsub.f32 1.0, %v268_v7 }
  0x17   : > { %v270_v9 = vmul.f32 %v559_v6, %v269_v8  ;;  %387 = vmatpush.bf16.msra.mxu0 %v509_v37  ;;  %v557_v8 = vld [vmem:[%s244_s26] ss:$0 sm:$0xff] }
  0x18   : > { %401 = vmatpush.bf16.msra.mxu1 %v513_v39 }
  0x19   : > { %v271_v10 = vadd.f32 %v559_v6, %v270_v9 }
  0x1a   : > { %265 = vadd.xlane.f32.xlu0 %v264_v4 }
  0x1b   : > { %v273_v11 = vsel %vm272_vm1, %v559_v6, %v271_v10  ;;  %388 = vmatpush.bf16.msra.mxu0 %v501_v44 }
  0x1c   : > { %402 = vmatpush.bf16.msra.mxu1 %v505_v47 }
  0x85   : > { %v263_v12 = vpop.xlane.xlu0 %262 }
  0x86   : > { %v274_v13 = vmul.f32 %v273_v11, %v263_v12 }
  0x88   : > { %v619_v14 = vsub.f32 %v546_v1, %v274_v13  ;;  %v332_v13 = vld [vmem:[%s708_s4] sm:$0x3] }
  0x8a   : > { %v278_v15 = vmul.f32 %v619_v14, %v619_v14 }
  0x8c   : > { %v280_v16 = vsel %vm260_vm0, %v278_v15, 0.0  ;;  %v335_v15 = vperm.slane %v332_v13, 1 }
  0x8d   : > { %281 = vadd.xlane.f32.xlu1 %v280_v16  ;;  %v266_v17 = vpop.xlane.xlu0 %265 }
  0x8e   : > { %v275_v18 = vmul.f32 %v273_v11, %v266_v17 }
  0x90   : > { %v624_v19 = vsub.f32 %v547_v3, %v275_v18  ;;  %v314_v3 = vperm.slane %v288_v62, 0 }
  0x92   : > { %v279_v20 = vmul.f32 %v624_v19, %v624_v19 }
  0x94   : > { %v283_v21 = vsel %vm260_vm0, %v279_v20, 0.0 }
  0x95   : > { %284 = vadd.xlane.f32.xlu1 %v283_v21 }
 0x100   : > { %v282_v43 = vpop.xlane.xlu1 %281 }
 0x101   : > { %v286_v46 = vmul.f32 %v282_v43, %v273_v11 }
 0x103   : > { %v289_v48 = vadd.f32 1e-06, %v286_v46 }
 0x105   : > { %560 = vrsqrt.f32 %v289_v48  ;;  %vm297_vm3 = vweird.f32 %v289_v48 }
 0x108   : > { %v285_v49 = vpop.xlane.xlu1 %284 }
 0x109   : > { %v287_v50 = vmul.f32 %v285_v49, %v273_v11 }
 0x10b   : > { %v561_v51 = vpop.eup %560  ;;  %v290_v52 = vadd.f32 1e-06, %v287_v50 }
 0x10c   : > { %v292_v53 = vmul.f32 %v561_v51, %v289_v48  ;;  %vm298_vm2 = vweird.f32 %v561_v51 }
 0x10d   : > { %562 = vrsqrt.f32 %v290_v52  ;;  %vm299_vm4 = vmor %vm297_vm3, %vm298_vm2  ;;  %vm307_vm6 = vweird.f32 %v290_v52 }
 0x10e   : > { %v293_v54 = vmul.f32 %v561_v51, %v292_v53 }
 0x110   : > { %v294_v55 = vmul.f32 0.5, %v293_v54 }
 0x112   : > { %v295_v56 = vsub.f32 1.5, %v294_v55 }
 0x113   : > { %v563_v57 = vpop.eup %562 }
 0x114   : > { %v296_v58 = vmul.f32 %v561_v51, %v295_v56  ;;  %v302_v59 = vmul.f32 %v563_v57, %v290_v52  ;;  %vm308_vm5 = vweird.f32 %v563_v57 }
 0x115   : > { %vm309_vm7 = vmor %vm307_vm6, %vm308_vm5 }
 0x116   : > { %v303_v61 = vmul.f32 %v563_v57, %v302_v59  ;;  %v300_v63 = vsel %vm299_vm4, %v561_v51, %v296_v58 }
 0x117   : > { %v311_v2 = vmul.f32 %v300_v63, %v619_v14  ;;  %v334_v14 = vperm.slane %v332_v13, 0 }
 0x118   : > { %v304_v0 = vmul.f32 0.5, %v303_v61 }
 0x119   : > { %v316_v7 = vmul.f32 %v314_v3, %v311_v2 }
 0x11a   : > { %v305_v1 = vsub.f32 1.5, %v304_v0 }
 0x11b   : > { %v321_v10 = vadd.f32 %v557_v8, %v316_v7 }
 0x11c   : > { %v306_v4 = vmul.f32 %v563_v57, %v305_v1 }
 0x11e   : > { %v310_v5 = vsel %vm309_vm7, %v563_v57, %v306_v4 }
 0x11f   : > { %v312_v6 = vmul.f32 %v310_v5, %v624_v19 }
 0x121   : > { %v317_v9 = vmul.f32 %v314_v3, %v312_v6 }
 0x123   : > { %v322_v11 = vadd.f32 %v557_v8, %v317_v9 }
 0x125   : > { %v323_v12 = vpack.c.bf16 %v322_v11, %v321_v10 }
 0x127   : > { %530 = vmatmul.msk.bf16.vlgmr.msra.gmra.mxu0 %vm260_vm0, %v323_v12  ;;  %531 = vmatmul.msk.bf16.vlgmr.msra.gmra.mxu1 %vm260_vm0, %v323_v12 }
 0x1a4   : > { %v390_v16 = vpop.f32.mrf.mxu0  ;;  %v404_v17 = vpop.f32.mrf.mxu1 }
 0x1a5   : > { %v391_v18 = vadd.f32 %v390_v16, %v334_v14  ;;  %v405_v19 = vadd.f32 %v404_v17, %v335_v15 }
 0x1a7   : > { %v409_v20 = vpack.c.bf16 %v405_v19, %v391_v18 }
 0x1a9   : > { %414 = vst.msk [vmem:[%s252_s23] sm:$0xff] %vm413_vm10, %v409_v20 }
 0x1ac   : > { %v392_v21 = vpop.f32.mrf.mxu0  ;;  %v406_v22 = vpop.f32.mrf.mxu1 }
 0x1ad   : > { %v393_v23 = vadd.f32 %v392_v21, %v334_v14  ;;  %v407_v24 = vadd.f32 %v406_v22, %v335_v15 }
 0x1af   : > { %v410_v25 = vpack.c.bf16 %v407_v24, %v393_v23 }
 0x1b1   : > { %415 = vst.msk [vmem:[%s252_s23 + $0x8] sm:$0xff] %vm413_vm10, %v410_v25 }
 0x1b2 PF: > { %s15_s18 = sadd.s32 1, %s570_s18  }
 0x1b3   : > { %p12_p4 = scmp.ge.s32.totalorder %s15_s18, 4  }
 0x1b5   :  { %14 = sbr.rel (!%p12_p4) target bundleno = 1 (0x1), region = 76 }

// kernel: step_fn.19
= control target key start
LH: loop header
LB: loop body
LE: loop exit
PB: predicated region body
PF: predicated region fallthrough
CT: control target
= control target key end

     0   :  { %20 = vsyncpa [#allocation3], 0  ;;  %s1363_s0 = inlined_call_operand.vmem [shape: bf16[2,256], index: 0, kind: input, shape index: {}]   ;;  %s1364_s1 = inlined_call_operand.vmem [shape: bf16[2,256], index: 1, kind: input, shape index: {}]   ;;  %s1365_s2 = inlined_call_operand.vmem [shape: bf16[2,32], index: 2, kind: input, shape index: {}]   ;;  %s1366_s3 = inlined_call_operand.vmem [shape: bf16[256,64], index: 3, kind: input, shape index: {}]   ;;  %s1367_s4 = inlined_call_operand.vmem [shape: f32[1,64], index: 4, kind: input, shape index: {}]   ;;  %s1368_s5 = inlined_call_operand.vmem [shape: bf16[64,64], index: 5, kind: input, shape index: {}]   ;;  %s1369_s6 = inlined_call_operand.vmem [shape: f32[1,64], index: 6, kind: input, shape index: {}]   ;;  %s1370_s7 = inlined_call_operand.vmem [shape: bf16[256,64], index: 7, kind: input, shape index: {}]   ;;  %s1371_s8 = inlined_call_operand.hbm [shape: f32[1,64], index: 8, kind: input, shape index: {}]   ;;  %s1372_s9 = inlined_call_operand.vmem [shape: bf16[64,64], index: 9, kind: input, shape index: {}]   ;;  %s1373_s10 = inlined_call_operand.hbm [shape: f32[1,64], index: 10, kind: input, shape index: {}]   ;;  %s1374_s11 = inlined_call_operand.hbm [shape: bf16[32,64], index: 11, kind: input, shape index: {}]   ;;  %s1375_s12 = inlined_call_operand.hbm [shape: f32[1,64], index: 12, kind: input, shape index: {}]   ;;  %s1376_s13 = inlined_call_operand.vmem [shape: bf16[64,64], index: 13, kind: input, shape index: {}]   ;;  %s1377_s14 = inlined_call_operand.hbm [shape: f32[1,64], index: 14, kind: input, shape index: {}]   ;;  %s1378_s15 = inlined_call_operand.vmem [shape: f32[2,64], index: 15, kind: output, shape index: {}]  }
   0x1   :  { %21 = vsyncpa [#allocation5], 0  ;;  %s57_s20 = sshll.u32 %s1373_s10, 4  ;;  %s58_s20 = int_to_ptr.hbm [resolvable:$true] %s57_s20 }
   0x2   :  { %22 = vsyncpa [#allocation8], 0  ;;  %s1108_s21 = smov [#allocation4]   ;;  %s81_s25 = sshll.u32 %s1375_s12, 4  ;;  %s82_s25 = int_to_ptr.hbm [resolvable:$true] %s81_s25 }
   0x3   :  { %s59_s22 = sshll.u32 %s1108_s21, 4  ;;  %s1109_s26 = smov [#allocation7]   ;;  %s60_s22 = int_to_ptr.vmem [resolvable:$true] %s59_s22 }
   0x4   :  { %62 = dma.hbm_to_vmem [thread:$0]  %s58_s20, 16, %s60_s22, [#allocation5]  }
   0x5   :  { %s83_s27 = sshll.u32 %s1109_s26, 4  ;;  %s44_s30 = sshll.u32 %s1371_s8, 4  ;;  %s84_s27 = int_to_ptr.vmem [resolvable:$true] %s83_s27  ;;  %s45_s30 = int_to_ptr.hbm [resolvable:$true] %s44_s30 }
   0x6   :  { %86 = dma.hbm_to_vmem [thread:$0]  %s82_s25, 16, %s84_s27, [#allocation8]  }
   0x7   :  { %s67_s17 = sshll.u32 %s1374_s11, 4  ;;  %s1110_s18 = smov [#allocation2]   ;;  %s68_s17 = int_to_ptr.hbm [resolvable:$true] %s67_s17 }
   0x8   :  { %s46_s19 = sshll.u32 %s1110_s18, 4  ;;  %s1111_s12 = smov [#allocation6]   ;;  %s47_s19 = int_to_ptr.vmem [resolvable:$true] %s46_s19 }
   0x9   :  { %49 = dma.hbm_to_vmem [thread:$0]  %s45_s30, 16, %s47_s19, [#allocation3]  }
   0xa   :  { %s69_s20 = sshll.u32 %s1111_s12, 4  ;;  %s1112_s21 = smov 64   ;;  %s70_s20 = int_to_ptr.vmem [resolvable:$true] %s69_s20 }
   0xb   :  { %s1113_s22 = smov 4   ;;  %s94_s24 = sshll.u32 %s1377_s14, 4  ;;  %s95_s24 = int_to_ptr.hbm [resolvable:$true] %s94_s24 }
   0xc   :  { %75 = dma.hbm_to_vmem [thread:$0]  %s68_s17, 256, %s70_s20, [#allocation5], %s1112_s21, %s1112_s21, %s1113_s22  }
   0xd   :  { %s1114_s25 = smov [#allocation9]  }
   0xe   :  { %s96_s26 = sshll.u32 %s1114_s25, 4  ;;  %s97_s26 = int_to_ptr.vmem [resolvable:$true] %s96_s26 }
   0xf   :  { %99 = dma.hbm_to_vmem [thread:$0]  %s95_s24, 16, %s97_s26, [#allocation8]  }
  0x10   :  { %1102 = dma.done.wait [#allocation3], 16  }
  0x11   :  { %1103 = vsyncadd [#allocation3], 4294967280 }
  0x12   :  { %1104 = dma.done.wait [#allocation5], 272  }
  0x13   :  { %1105 = vsyncadd [#allocation5], 4294967024 }
  0x14   :  { %1106 = dma.done.wait [#allocation8], 32  }
  0x15   :  { %1107 = vsyncadd [#allocation8], 4294967264  ;;  %v918_v0 = vld [vmem:[%s1366_s3 + $0x38] sm:$0xff]  ;;  %v917_v2 = vld [vmem:[%s1366_s3 + $0x30] sm:$0xff]  ;;  %vm620_vm0 = vcmask 261120   ;;  %vm343_vm5 = vcmask 523264  }
  0x16   :  { %v926_v1 = vld [vmem:[%s1366_s3 + $0x78] sm:$0xff]  ;;  %260 = vmatpush.bf16.msra.mxu0 %v918_v0  ;;  %v925_v3 = vld [vmem:[%s1366_s3 + $0x70] sm:$0xff]  ;;  %v121_v4 = vld [vmem:[%s1363_s0] sm:$0x3]  ;;  %vm711_vm14 = vcmask 517120  }
  0x17   :  { %273 = vmatpush.bf16.msra.mxu1 %v926_v1  ;;  %v916_v5 = vld [vmem:[%s1366_s3 + $0x28] sm:$0xff]  ;;  %159 = vst [vmem:[#allocation1] ss:$9 sm:$0xff] %v121_v4  ;;  %v915_v7 = vld [vmem:[%s1366_s3 + $0x20] sm:$0xff]  ;;  %v914_v12 = vld [vmem:[%s1366_s3 + $0x18] sm:$0xff] }
  0x18   :  { %v924_v6 = vld [vmem:[%s1366_s3 + $0x68] sm:$0xff]  ;;  %v923_v8 = vld [vmem:[%s1366_s3 + $0x60] sm:$0xff]  ;;  %v922_v13 = vld [vmem:[%s1366_s3 + $0x58] sm:$0xff] }
  0x19   :  { %v360_v9 = vld [vmem:[%s1364_s1] sm:$0x3]  ;;  %v913_v14 = vld [vmem:[%s1366_s3 + $0x10] sm:$0xff]  ;;  %v912_v16 = vld [vmem:[%s1366_s3 + $0x8] sm:$0xff] }
  0x1a   :  { %261 = vmatpush.bf16.msra.mxu0 %v917_v2  ;;  %v921_v15 = vld [vmem:[%s1366_s3 + $0x50] sm:$0xff]  ;;  %v920_v17 = vld [vmem:[%s1366_s3 + $0x48] sm:$0xff]  ;;  %v911_v18 = vld [vmem:[%s1366_s3] sm:$0xff] }
  0x1b   :  { %274 = vmatpush.bf16.msra.mxu1 %v925_v3  ;;  %v919_v19 = vld [vmem:[%s1366_s3 + $0x40] sm:$0xff]  ;;  %v930_v20 = vld [vmem:[%s1368_s5 + $0x18] sm:$0xff]  ;;  %v929_v23 = vld [vmem:[%s1368_s5 + $0x10] sm:$0xff] }
  0x1c   :  { %v952_v21 = vld [vmem:[#allocation6 + $0x8] sm:$0xff]  ;;  %351 = vmatpush.bf16.msra.mxu2 %v930_v20  ;;  %v951_v24 = vld [vmem:[#allocation6] sm:$0xff]  ;;  %v599_v27 = vld [vmem:[%s1365_s2] sm:$0x1] }
  0x1d   :  { %v938_v22 = vld [vmem:[%s1370_s7 + $0x38] sm:$0xff]  ;;  %v937_v25 = vld [vmem:[%s1370_s7 + $0x30] sm:$0xff]  ;;  %v928_v26 = vld [vmem:[%s1368_s5 + $0x8] sm:$0xff] }
  0x1e   :  { %262 = vmatpush.bf16.msra.mxu0 %v916_v5  ;;  %v160_v10 = vld [vmem:[#allocation1] sm:$0xff]  ;;  %v161_v11 = vld [vmem:[#allocation1 + $0x9] sm:$0xff]  ;;  %499 = vmatpush.bf16.msra.mxu3 %v938_v22  ;;  %v946_v30 = vld [vmem:[%s1370_s7 + $0x78] sm:$0xff] }
  0x1f   :  { %275 = vmatpush.bf16.msra.mxu1 %v924_v6  ;;  %398 = vst [vmem:[#allocation1] ss:$9 sm:$0xff] %v360_v9  ;;  %v936_v28 = vld [vmem:[%s1370_s7 + $0x28] sm:$0xff]  ;;  %v927_v29 = vld [vmem:[%s1368_s5] sm:$0xff]  ;;  %v945_v32 = vld [vmem:[%s1370_s7 + $0x70] sm:$0xff] }
  0x20   :  { %352 = vmatpush.bf16.msra.mxu2 %v929_v23  ;;  %v935_v31 = vld [vmem:[%s1370_s7 + $0x20] sm:$0xff]  ;;  %v934_v33 = vld [vmem:[%s1370_s7 + $0x18] sm:$0xff]  ;;  %v944_v34 = vld [vmem:[%s1370_s7 + $0x68] sm:$0xff] }
  0x21   :  { %v964_v35 = vld [vmem:[%s1367_s4] ss:$0 sm:$0xff]  ;;  %v933_v36 = vld [vmem:[%s1370_s7 + $0x10] sm:$0xff]  ;;  %v932_v41 = vld [vmem:[%s1370_s7 + $0x8] sm:$0xff] }
  0x22   :  { %263 = vmatpush.bf16.msra.mxu0 %v915_v7  ;;  %500 = vmatpush.bf16.msra.mxu3 %v937_v25  ;;  %v943_v39 = vld [vmem:[%s1370_s7 + $0x60] sm:$0xff]  ;;  %v942_v43 = vld [vmem:[%s1370_s7 + $0x58] sm:$0xff]  ;;  %v941_v46 = vld [vmem:[%s1370_s7 + $0x50] sm:$0xff] }
  0x23   :  { %276 = vmatpush.bf16.msra.mxu1 %v923_v8  ;;  %v931_v45 = vld [vmem:[%s1370_s7] sm:$0xff]  ;;  %v940_v50 = vld [vmem:[%s1370_s7 + $0x48] sm:$0xff]  ;;  %v965_v3 = vld [vmem:[#allocation7] ss:$0 sm:$0xff] }
  0x24   :  { %353 = vmatpush.bf16.msra.mxu2 %v928_v26  ;;  %v939_v53 = vld [vmem:[%s1370_s7 + $0x40] sm:$0xff]  ;;  %v956_v6 = vld [vmem:[%s1376_s13 + $0x18] sm:$0xff]  ;;  %v955_v8 = vld [vmem:[%s1376_s13 + $0x10] sm:$0xff] }
  0x26   :  { %264 = vmatpush.bf16.msra.mxu0 %v914_v12  ;;  %501 = vmatpush.bf16.msra.mxu3 %v936_v28  ;;  %v399_v49 = vld [vmem:[#allocation1] sm:$0xff]  ;;  %v400_v2 = vld [vmem:[#allocation1 + $0x9] sm:$0xff] }
  0x27   :  { %277 = vmatpush.bf16.msra.mxu1 %v922_v13 }
  0x28   :  { %354 = vmatpush.bf16.msra.mxu2 %v927_v29  ;;  %v950_v29 = vld [vmem:[%s1372_s9 + $0x18] sm:$0xff] }
  0x2a   :  { %265 = vmatpush.bf16.msra.mxu0 %v913_v14  ;;  %502 = vmatpush.bf16.msra.mxu3 %v935_v31 }
  0x2b   :  { %278 = vmatpush.bf16.msra.mxu1 %v921_v15 }
  0x2c   :  { %512 = vmatpush.bf16.msrb.mxu2 %v946_v30  ;;  %v949_v30 = vld [vmem:[%s1372_s9 + $0x10] sm:$0xff] }
  0x2e   :  { %266 = vmatpush.bf16.msra.mxu0 %v912_v16  ;;  %503 = vmatpush.bf16.msra.mxu3 %v934_v33  ;;  %v948_v33 = vld [vmem:[%s1372_s9 + $0x8] sm:$0xff] }
  0x2f   :  { %279 = vmatpush.bf16.msra.mxu1 %v920_v17 }
  0x30   :  { %513 = vmatpush.bf16.msrb.mxu2 %v945_v32  ;;  %v967_v32 = vld [vmem:[#allocation2] ss:$0 sm:$0xff] }
  0x32   :  { %267 = vmatpush.bf16.msra.mxu0 %v911_v18  ;;  %504 = vmatpush.bf16.msra.mxu3 %v933_v36 }
  0x33   :  { %280 = vmatpush.bf16.msra.mxu1 %v919_v19  ;;  %v954_v19 = vld [vmem:[%s1376_s13 + $0x8] sm:$0xff] }
  0x34   :  { %514 = vmatpush.bf16.msrb.mxu2 %v944_v34 }
  0x35   :  { %268 = vmatmul.bf16.vlgmr.msra.gmra.mxu0 %v160_v10 }
  0x36   :  { %281 = vmatmul.bf16.vlgmr.msra.gmra.mxu1 %v161_v11  ;;  %505 = vmatpush.bf16.msra.mxu3 %v932_v41 }
  0x37   :  { %630 = vmatpush.bf16.msrb.mxu1 %v952_v21  ;;  %v953_v21 = vld [vmem:[%s1376_s13] sm:$0xff]  ;;  %589 = vmatpush.bf16.msrb.mxu0 %v950_v29 }
  0x38   :  { %515 = vmatpush.bf16.msrb.mxu2 %v943_v39 }
  0x3a   :  { %506 = vmatpush.bf16.msra.mxu3 %v931_v45 }
  0x3b   :  { %631 = vmatpush.bf16.msrb.mxu1 %v951_v24  ;;  %590 = vmatpush.bf16.msrb.mxu0 %v949_v30 }
  0x3c   :  { %516 = vmatpush.bf16.msrb.mxu2 %v942_v43 }
  0x3d   :  { %507 = vmatmul.bf16.vlgmr.msra.gmra.mxu3 %v399_v49 }
  0x3e   :  { %701 = vmatpush.bf16.msrb.mxu3 %v956_v6 }
  0x3f   :  { %591 = vmatpush.bf16.msrb.mxu0 %v948_v33 }
  0x40   :  { %517 = vmatpush.bf16.msrb.mxu2 %v941_v46 }
  0x42   :  { %702 = vmatpush.bf16.msrb.mxu3 %v955_v8 }
  0x44   :  { %518 = vmatpush.bf16.msrb.mxu2 %v940_v50 }
  0x46   :  { %892 = vmatmul.msk.bf16.vlgmr.msrb.gmra.mxu1 %vm620_vm0, %v599_v27  ;;  %703 = vmatpush.bf16.msrb.mxu3 %v954_v19 }
  0x48   :  { %519 = vmatpush.bf16.msrb.mxu2 %v939_v53 }
  0x4a   :  { %704 = vmatpush.bf16.msrb.mxu3 %v953_v21 }
  0xb2   :  { %v269_v37 = vpop.f32.mrf.mxu0 }
  0xb3   :  { %v282_v38 = vpop.f32.mrf.mxu1  ;;  %v270_v40 = vadd.f32 %v964_v35, %v269_v37  ;;  %v947_v35 = vld [vmem:[%s1372_s9] sm:$0xff] }
  0xb4   :  { %592 = vmatpush.bf16.msrb.mxu0 %v947_v35 }
  0xb5   :  { %v283_v42 = vadd.f32 %v282_v38, %v270_v40 }
  0xb7   :  { %v784_v44 = vmul.f32 -1.442695, %v283_v42 }
  0xb9   :  { %970 = vpow2.f32 %v784_v44 }
  0xba   :  { %v271_v47 = vpop.f32.mrf.mxu0 }
  0xbb   :  { %v284_v48 = vpop.f32.mrf.mxu1 }
  0xbf   :  { %v971_v51 = vpop.eup %970 }
  0xc0   :  { %v289_v52 = vadd.f32 1.0, %v971_v51  ;;  %v508_v25 = vpop.f32.mrf.mxu3 }
  0xc1   :  { %v509_v34 = vadd.f32 %v967_v32, %v508_v25 }
  0xc2   :  { %972 = vrcp.f32 %v289_v52  ;;  %v301_v57 = vand.u32 2147483648, %v289_v52  ;;  %v299_v59 = vand.u32 2147483647, %v289_v52  ;;  %vm295_vm2 = vweird.f32 %v289_v52 }
  0xc3   :  { %v633_v4 = vpop.f32.mrf.mxu1 }
  0xc4   :  { %v302_v61 = vor.u32 1.1754944e-38, %v301_v57  ;;  %vm300_vm4 = vcmp.eq.f32.partialorder %v299_v59, 8.507059e+37  ;;  %v634_v5 = vadd.f32 %v965_v3, %v633_v4  ;;  %v969_v57 = vld [vmem:[#allocation4] ss:$0 sm:$0xff] }
  0xc6   :  { %v893_v7 = vmul.f32 -1.442695, %v634_v5 }
  0xc8   :  { %v973_v54 = vpop.eup %972  ;;  %974 = vpow2.f32 %v893_v7  ;;  %v510_v27 = vpop.f32.mrf.mxu3 }
  0xc9   :  { %v291_v55 = vmul.f32 %v973_v54, %v289_v52  ;;  %vm296_vm1 = vweird.f32 %v973_v54 }
  0xca   :  { %vm297_vm3 = vmor %vm295_vm2, %vm296_vm1 }
  0xcb   :  { %v292_v56 = vsub.f32 1.0, %v291_v55  ;;  %v635_v9 = vpop.f32.mrf.mxu1 }
  0xcd   :  { %v293_v58 = vmul.f32 %v973_v54, %v292_v56  ;;  %v966_v56 = vld [vmem:[%s1369_s6] ss:$0 sm:$0xff] }
  0xce   :  { %v975_v10 = vpop.eup %974 }
  0xcf   :  { %v294_v60 = vadd.f32 %v973_v54, %v293_v58  ;;  %v640_v11 = vadd.f32 1.0, %v975_v10  ;;  %v968_v58 = vld [vmem:[#allocation9] ss:$0 sm:$0xff] }
  0xd1   :  { %v298_v62 = vsel %vm297_vm3, %v973_v54, %v294_v60  ;;  %976 = vrcp.f32 %v640_v11  ;;  %v652_v14 = vand.u32 2147483648, %v640_v11  ;;  %vm646_vm6 = vweird.f32 %v640_v11 }
  0xd2   :  { %v303_v63 = vsel %vm300_vm4, %v302_v61, %v298_v62  ;;  %v650_v16 = vand.u32 2147483647, %v640_v11 }
  0xd3   :  { %v305_v0 = vmul.f32 %v303_v63, %v283_v42  ;;  %v653_v18 = vor.u32 1.1754944e-38, %v652_v14 }
  0xd4   :  { %vm651_vm9 = vcmp.eq.f32.partialorder %v650_v16, 8.507059e+37 }
  0xd5   :  { %v306_v1 = vpack.c.bf16 %v305_v0, %v305_v0 }
  0xd7   :  { %801 = vmatmul.msk.bf16.vlgmr.msra.gmra.mxu2 %vm343_vm5, %v306_v1  ;;  %v977_v12 = vpop.eup %976 }
  0xd8   :  { %v642_v13 = vmul.f32 %v977_v12, %v640_v11  ;;  %vm647_vm7 = vweird.f32 %v977_v12 }
  0xd9   :  { %vm648_vm8 = vmor %vm646_vm6, %vm647_vm7 }
  0xda   :  { %v643_v15 = vsub.f32 1.0, %v642_v13 }
  0xdc   :  { %v644_v17 = vmul.f32 %v977_v12, %v643_v15 }
  0xde   :  { %v645_v20 = vadd.f32 %v977_v12, %v644_v17 }
  0xe0   :  { %v649_v22 = vsel %vm648_vm8, %v977_v12, %v645_v20 }
  0xe1   :  { %v654_v23 = vsel %vm651_vm9, %v653_v18, %v649_v22 }
  0xe2   :  { %v656_v24 = vmul.f32 %v654_v23, %v634_v5 }
  0xe4   :  { %v657_v26 = vpack.c.bf16 %v656_v24, %v656_v24 }
  0xe6   :  { %910 = vmatmul.msk.bf16.vlgmr.msrb.gmra.mxu3 %vm343_vm5, %v657_v26 }
  0xe7   :  { %520 = vmatmul.bf16.vlgmr.msrb.gmra.mxu2 %v400_v2 }
 0x15a   :  { %v356_v28 = vpop.f32.mrf.mxu2 }
 0x15b   :  { %v357_v60 = vadd.f32 %v966_v56, %v356_v28 }
 0x162   :  { %v358_v31 = vpop.f32.mrf.mxu2 }
 0x169   :  { %v706_v54 = vpop.f32.mrf.mxu3 }
 0x16a   :  { %v521_v36 = vpop.f32.mrf.mxu2  ;;  %v707_v62 = vadd.f32 %v968_v58, %v706_v54 }
 0x16b   :  { %v522_v37 = vadd.f32 %v521_v36, %v509_v34 }
 0x16d   :  { %v866_v38 = vmul.f32 -1.442695, %v522_v37 }
 0x16f   :  { %978 = vpow2.f32 %v866_v38 }
 0x171   :  { %v708_v55 = vpop.f32.mrf.mxu3 }
 0x172   :  { %v523_v39 = vpop.f32.mrf.mxu2 }
 0x175   :  { %v979_v40 = vpop.eup %978 }
 0x176   :  { %v528_v41 = vadd.f32 1.0, %v979_v40 }
 0x178   :  { %980 = vrcp.f32 %v528_v41  ;;  %v540_v45 = vand.u32 2147483648, %v528_v41  ;;  %v538_v47 = vand.u32 2147483647, %v528_v41  ;;  %vm534_vm11 = vweird.f32 %v528_v41 }
 0x17a   :  { %v541_v49 = vor.u32 1.1754944e-38, %v540_v45  ;;  %vm539_vm13 = vcmp.eq.f32.partialorder %v538_v47, 8.507059e+37 }
 0x17e   :  { %v981_v42 = vpop.eup %980 }
 0x17f   :  { %v530_v43 = vmul.f32 %v981_v42, %v528_v41  ;;  %vm535_vm10 = vweird.f32 %v981_v42 }
 0x180   :  { %vm536_vm12 = vmor %vm534_vm11, %vm535_vm10 }
 0x181   :  { %v531_v44 = vsub.f32 1.0, %v530_v43 }
 0x183   :  { %v532_v46 = vmul.f32 %v981_v42, %v531_v44 }
 0x185   :  { %v533_v48 = vadd.f32 %v981_v42, %v532_v46 }
 0x187   :  { %v537_v50 = vsel %vm536_vm12, %v981_v42, %v533_v48 }
 0x188   :  { %v542_v51 = vsel %vm539_vm13, %v541_v49, %v537_v50 }
 0x189   :  { %v544_v52 = vmul.f32 %v542_v51, %v522_v37 }
 0x18b   :  { %v545_v53 = vpack.c.bf16 %v544_v52, %v544_v52 }
 0x18d   :  { %883 = vmatmul.msk.bf16.vlgmr.msrb.gmra.mxu0 %vm343_vm5, %v545_v53 }
 0x20a   :  { %v594_v59 = vpop.f32.mrf.mxu0 }
 0x20b   :  { %v595_v61 = vadd.f32 %v969_v57, %v594_v59 }
 0x20d   :  { %v598_v63 = vadd.f32 %v595_v61, %v357_v60 }
 0x20f   :  { %v710_v0 = vadd.f32 %v707_v62, %v598_v63 }
 0x211   :  { %712 = vst.msk [vmem:[%s1378_s15] sm:$0x3] %vm711_vm14, %v710_v0 }
 0x212   :  { %v596_v1 = vpop.f32.mrf.mxu0 }
 0x213   :  { %717 = vsyncpa [#allocation3], 1 }
 0x214   :  { %718 = vsyncpa [#allocation5], 1 }
 0x215   :  { %719 = vsyncpa [#allocation8], 1 }

// kernel: step_fn.18
= control target key start
LH: loop header
LB: loop body
LE: loop exit
PB: predicated region body
PF: predicated region fallthrough
CT: control target
= control target key end

     0   :  { %8 = vsyncpa [#allocation4], 0  ;;  %s276_s0 = inlined_call_operand.hbm [shape: f32[16,32], index: 0, kind: input, shape index: {}]   ;;  %s277_s1 = inlined_call_operand.hbm [shape: bf16[32,64], index: 1, kind: input, shape index: {}]   ;;  %s278_s2 = inlined_call_operand.hbm [shape: f32[1,64], index: 2, kind: input, shape index: {}]   ;;  %s279_s3 = inlined_call_operand.vmem [shape: bf16[16,64], index: 3, kind: output, shape index: {}]  }
   0x1   :  { %9 = vsyncpa [#allocation6], 0  ;;  %s27_s14 = sshll.u32 %s277_s1, 4  ;;  %s229_s15 = smov [#allocation5]   ;;  %s28_s14 = int_to_ptr.hbm [resolvable:$true] %s27_s14 }
   0x2   :  { %s29_s16 = sshll.u32 %s229_s15, 4  ;;  %s14_s19 = sshll.u32 %s276_s0, 4  ;;  %s30_s16 = int_to_ptr.vmem [resolvable:$true] %s29_s16  ;;  %s15_s19 = int_to_ptr.hbm [resolvable:$true] %s14_s19 }
   0x3   :  { %s230_s20 = smov 64   ;;  %s231_s21 = smov 4  }
   0x4   :  { %35 = dma.hbm_to_vmem [thread:$0]  %s28_s14, 256, %s30_s16, [#allocation6], %s230_s20, %s230_s20, %s231_s21  }
   0x5   :  { %s232_s22 = smov [#allocation3]   ;;  %s233_s24 = smov 128  }
   0x6   :  { %s16_s23 = sshll.u32 %s232_s22, 4  ;;  %s234_s25 = smov 8   ;;  %s17_s23 = int_to_ptr.vmem [resolvable:$true] %s16_s23 }
   0x7   :  { %22 = dma.hbm_to_vmem [thread:$0]  %s15_s19, 256, %s17_s23, [#allocation4], %s233_s24, %s233_s24, %s234_s25  }
   0x8   :  { %s41_s27 = sshll.u32 %s278_s2, 4  ;;  %s235_s28 = smov [#allocation7]   ;;  %s42_s27 = int_to_ptr.hbm [resolvable:$true] %s41_s27 }
   0x9   :  { %s43_s29 = sshll.u32 %s235_s28, 4  ;;  %s44_s29 = int_to_ptr.vmem [resolvable:$true] %s43_s29 }
   0xa   :  { %46 = dma.hbm_to_vmem [thread:$0]  %s42_s27, 16, %s44_s29, [#allocation6]  }
   0xb   :  { %225 = dma.done.wait [#allocation4], 256  }
   0xc   :  { %226 = vsyncadd [#allocation4], 4294967040 }
   0xd   :  { %227 = dma.done.wait [#allocation6], 272  }
   0xe   :  { %228 = vsyncadd [#allocation6], 4294967024  ;;  %vm64_vm0 = vcmask 523264   ;;  %v236_v0 = vmov 0.0   ;;  %v143_v1 = vld [vmem:[#allocation5 + $0x8] sm:$0xff]  ;;  %v142_v2 = vld [vmem:[#allocation5] sm:$0xff] }
   0xf   :  { %65 = vst.msk [vmem:[#allocation2] sm:$0xff] %vm64_vm0, %v236_v0  ;;  %98 = vmatpush.bf16.msra.mxu0 %v143_v1  ;;  %v67_v3 = vld [vmem:[#allocation3] sm:$0xff]  ;;  %v68_v4 = vld [vmem:[#allocation3 + $0x8] sm:$0xff]  ;;  %vm88_vm1 = vcmask 261120   ;;  %vm124_vm2 = vcmask 519168  }
  0x10   :  { %66 = vst.msk [vmem:[#allocation2 + $0x8] sm:$0xff] %vm64_vm0, %v236_v0  ;;  %v71_v5 = vpack.c.bf16 %v68_v4, %v67_v3  ;;  %v152_v10 = vld [vmem:[#allocation7] ss:$0 sm:$0xff] }
  0x13   :  { %99 = vmatpush.bf16.msra.mxu0 %v142_v2 }
  0x16   :  { %141 = vmatmul.msk.bf16.vlgmr.msra.gmra.mxu0 %vm88_vm1, %v71_v5  ;;  %v69_v6 = vld [vmem:[#allocation2] sm:$0xff] }
  0x17   :  { %v70_v9 = vld [vmem:[#allocation2 + $0x8] sm:$0xff] }
  0x93   :  { %v101_v7 = vpop.f32.mrf.mxu0 }
  0x94   :  { %v106_v8 = vadd.f32 %v101_v7, %v69_v6 }
  0x96   :  { %109 = vst.msk [vmem:[#allocation2] sm:$0xff] %vm64_vm0, %v106_v8 }
  0x9b   :  { %v103_v11 = vpop.f32.mrf.mxu0 }
  0x9c   :  { %v107_v12 = vadd.f32 %v103_v11, %v70_v9 }
  0x9d   :  { %v114_v13 = vld [vmem:[#allocation2] sm:$0xff] }
  0x9e   :  { %v120_v14 = vadd.f32 %v152_v10, %v114_v13  ;;  %110 = vst.msk [vmem:[#allocation2 + $0x8] sm:$0xff] %vm64_vm0, %v107_v12 }
  0xa0   :  { %v122_v15 = vpack.c.bf16 %v120_v14, %v120_v14 }
  0xa2   :  { %125 = vst.msk [vmem:[%s279_s3] sm:$0xf] %vm124_vm2, %v122_v15 }
  0xa5   :  { %v115_v16 = vld [vmem:[#allocation2 + $0x8] sm:$0xff] }
  0xa6   :  { %v121_v17 = vadd.f32 %v152_v10, %v115_v16 }
  0xa8   :  { %v123_v18 = vpack.c.bf16 %v121_v17, %v121_v17 }
  0xaa   :  { %126 = vst.msk [vmem:[%s279_s3 + $0x4] sm:$0xf] %vm124_vm2, %v123_v18 }
  0xab   :  { %131 = vsyncpa [#allocation4], 1 }
  0xac   :  { %132 = vsyncpa [#allocation6], 1 }

// kernel: step_fn.22
= control target key start
LH: loop header
LB: loop body
LE: loop exit
PB: predicated region body
PF: predicated region fallthrough
CT: control target
= control target key end

     0   :  { %s562_s18 = smov 0   ;;  %s651_s0 = inlined_call_operand.vmem [shape: bf16[2,8,64], index: 0, kind: input, shape index: {}]   ;;  %s652_s1 = inlined_call_operand.vmem [shape: f32[2,1,64], index: 1, kind: input, shape index: {}]   ;;  %s653_s2 = inlined_call_operand.vmem [shape: f32[2,1,64], index: 2, kind: input, shape index: {}]   ;;  %s654_s3 = inlined_call_operand.vmem [shape: bf16[64,192], index: 3, kind: input, shape index: {}]   ;;  %s655_s4 = inlined_call_operand.vmem [shape: f32[1,192], index: 4, kind: input, shape index: {}]   ;;  %s656_s5 = inlined_call_operand.vmem [shape: bf16[2,8,192], index: 5, kind: output, shape index: {}]  }
   0x1 LB: > { %s456_s19 = sadd.s32 4294967295, %s529_s18   ;;  %p460_p0 = scmp.ge.s32.totalorder %s529_s18, 1  ;;  %s529_s18 = sphi %s562_s18, %s15_s18  }
   0x2   : > { %p202_p1 = scmp.lt.s32.totalorder %s529_s18, 3 }
   0x4   : > { %p203_p2 = pnand %p460_p0, %p202_p1 }
   0x5   : > { %p235_p3 = scmp.lt.s32.totalorder (!%p203_p2), %s456_s19, 1 }
   0x6   : > { %206 = sbr.rel (%p203_p2) target bundleno = 421 (0x1a5), region = 40 }
   0xb   : > { %s658_s19 = smov (!%p235_p3, %s456_s19), 1  ;;  %vm255_vm0 = vcmask 523264   ;;  %v531_v3 = vmov 64.0   ;;  %v490_v15 = vld [vmem:[%s654_s3 + $0x30] sm:$0xf]  ;;  %vm379_vm5 = vcmask 1043456  }
   0xc   : > { %s461_s20 = sshll.u32 %s658_s19, 2  ;;  %519 = vrcp.f32 %v531_v3  ;;  %s241_s26 = scalar_lea.vmem %s652_s1, %s658_s19  ;;  %v508_v16 = vld [vmem:[%s654_s3 + $0x34] sm:$0xf0]  ;;  %v507_v17 = vld [vmem:[%s654_s3 + $0x34] sm:$0xf]  ;;  %vm380_vm6 = vcmask 523268  }
   0xd   : > { %s238_s23 = scalar_lea.vmem %s651_s0, %s461_s20  ;;  %v491_v18 = vor.u32 %v508_v16, %v490_v15  ;;  %v492_v19 = vld [vmem:[%s654_s3 + $0x38] sm:$0xf0]  ;;  %v482_v21 = vld [vmem:[%s654_s3 + $0x20] sm:$0xf]  ;;  %v506_v22 = vld [vmem:[%s654_s3 + $0x24] sm:$0xf0]  ;;  %s244_s14 = scalar_lea.vmem %s653_s2, %s658_s19 }
   0xe   : > { %v251_v0 = vld [vmem:[%s238_s23] sm:$0xf]  ;;  %v495_v20 = vor.u32 %v507_v17, %v492_v19  ;;  %v505_v23 = vld [vmem:[%s654_s3 + $0x24] sm:$0xf]  ;;  %v483_v24 = vor.u32 %v506_v22, %v482_v21  ;;  %v484_v25 = vld [vmem:[%s654_s3 + $0x28] sm:$0xf0] }
   0xf   : > { %v252_v1 = vunpack.c.l.bf16 %v251_v0  ;;  %356 = vmatpush.bf16.msra.mxu0 %v491_v18  ;;  %v487_v26 = vor.u32 %v505_v23, %v484_v25  ;;  %v474_v27 = vld [vmem:[%s654_s3 + $0x10] sm:$0xf]  ;;  %v504_v28 = vld [vmem:[%s654_s3 + $0x14] sm:$0xf0]  ;;  %v503_v29 = vld [vmem:[%s654_s3 + $0x14] sm:$0xf] }
  0x10   : > { %369 = vmatpush.bf16.msra.mxu1 %v495_v20  ;;  %v475_v30 = vor.u32 %v504_v28, %v474_v27  ;;  %v476_v31 = vld [vmem:[%s654_s3 + $0x18] sm:$0xf0]  ;;  %v466_v32 = vld [vmem:[%s654_s3] sm:$0xf]  ;;  %v502_v33 = vld [vmem:[%s654_s3 + $0x4] sm:$0xf0] }
  0x11   : > { %v256_v2 = vsel %vm255_vm0, %v252_v1, 0.0  ;;  %v479_v34 = vor.u32 %v503_v29, %v476_v31  ;;  %v501_v35 = vld [vmem:[%s654_s3 + $0x4] sm:$0xf]  ;;  %v468_v36 = vld [vmem:[%s654_s3 + $0x8] sm:$0xf0]  ;;  %v467_v37 = vor.u32 %v502_v33, %v466_v32  ;;  %s500_s21 = sshll.u32 %s658_s19, 3  ;;  %vm381_vm7 = vmor %vm380_vm6, %vm379_vm5 }
  0x12   : > { %257 = vadd.xlane.f32.xlu0 %v256_v2  ;;  %v520_v4 = vpop.eup %519  ;;  %v471_v38 = vor.u32 %v501_v35, %v468_v36  ;;  %v254_v45 = vld [vmem:[%s244_s14] sm:$0x1]  ;;  %s249_s23 = scalar_lea.vmem %s656_s5, %s500_s21 }
  0x13   : > { %v260_v5 = vmul.f32 64.0, %v520_v4  ;;  %vm264_vm1 = vweird.f32 %v520_v4  ;;  %357 = vmatpush.bf16.msra.mxu0 %v483_v24  ;;  %v273_v47 = vadd.f32 1.0, %v254_v45  ;;  %v518_v53 = vld [vmem:[%s241_s26] ss:$0 sm:$0xff] }
  0x14   : > { %370 = vmatpush.bf16.msra.mxu1 %v487_v26  ;;  %v303_v57 = vld [vmem:[%s655_s4] sm:$0x3] }
  0x15   : > { %v261_v6 = vsub.f32 1.0, %v260_v5  ;;  %v287_v50 = vperm.slane %v273_v47, 0  ;;  %v305_v58 = vperm.slane %v303_v57, 0  ;;  %v306_v59 = vperm.slane %v303_v57, 1 }
  0x17   : > { %v262_v7 = vmul.f32 %v520_v4, %v261_v6  ;;  %358 = vmatpush.bf16.msra.mxu0 %v475_v30 }
  0x18   : > { %371 = vmatpush.bf16.msra.mxu1 %v479_v34 }
  0x19   : > { %v263_v8 = vadd.f32 %v520_v4, %v262_v7 }
  0x1b   : > { %v265_v9 = vsel %vm264_vm1, %v520_v4, %v263_v8  ;;  %359 = vmatpush.bf16.msra.mxu0 %v467_v37 }
  0x1c   : > { %372 = vmatpush.bf16.msra.mxu1 %v471_v38 }
  0x85   : > { %v258_v10 = vpop.xlane.xlu0 %257 }
  0x86   : > { %v266_v11 = vmul.f32 %v265_v9, %v258_v10 }
  0x88   : > { %v267_v12 = vsub.f32 %v252_v1, %v266_v11 }
  0x8a   : > { %v268_v13 = vmul.f32 %v267_v12, %v267_v12 }
  0x8c   : > { %v269_v14 = vsel %vm255_vm0, %v268_v13, 0.0 }
  0x8d   : > { %270 = vadd.xlane.f32.xlu0 %v269_v14 }
 0x100   : > { %v271_v39 = vpop.xlane.xlu0 %270 }
 0x101   : > { %v272_v40 = vmul.f32 %v271_v39, %v265_v9 }
 0x103   : > { %v274_v41 = vadd.f32 1e-06, %v272_v40 }
 0x105   : > { %521 = vrsqrt.f32 %v274_v41  ;;  %vm281_vm3 = vweird.f32 %v274_v41 }
 0x10b   : > { %v522_v42 = vpop.eup %521 }
 0x10c   : > { %v276_v43 = vmul.f32 %v522_v42, %v274_v41  ;;  %vm282_vm2 = vweird.f32 %v522_v42 }
 0x10d   : > { %vm283_vm4 = vmor %vm281_vm3, %vm282_vm2 }
 0x10e   : > { %v277_v44 = vmul.f32 %v522_v42, %v276_v43 }
 0x110   : > { %v278_v46 = vmul.f32 0.5, %v277_v44 }
 0x112   : > { %v279_v48 = vsub.f32 1.5, %v278_v46 }
 0x114   : > { %v280_v49 = vmul.f32 %v522_v42, %v279_v48 }
 0x116   : > { %v284_v51 = vsel %vm283_vm4, %v522_v42, %v280_v49 }
 0x117   : > { %v285_v52 = vmul.f32 %v284_v51, %v267_v12 }
 0x119   : > { %v289_v54 = vmul.f32 %v287_v50, %v285_v52 }
 0x11b   : > { %v293_v55 = vadd.f32 %v518_v53, %v289_v54 }
 0x11d   : > { %v294_v56 = vpack.c.bf16 %v293_v55, %v293_v55 }
 0x11f   : > { %496 = vmatmul.msk.bf16.vlgmr.msra.gmra.mxu0 %vm255_vm0, %v294_v56  ;;  %497 = vmatmul.msk.bf16.vlgmr.msra.gmra.mxu1 %vm255_vm0, %v294_v56 }
 0x19c   : > { %v361_v60 = vpop.f32.mrf.mxu0  ;;  %v374_v61 = vpop.f32.mrf.mxu1 }
 0x19d   : > { %v362_v62 = vadd.f32 %v361_v60, %v305_v58  ;;  %v375_v63 = vadd.f32 %v374_v61, %v306_v59 }
 0x19f   : > { %v378_v0 = vpack.c.bf16 %v375_v63, %v362_v62 }
 0x1a1   : > { %382 = vst.msk [vmem:[%s249_s23] sm:$0xff] %vm381_vm7, %v378_v0 }
 0x1a4   : > { %v363_v1 = vpop.f32.mrf.mxu0  ;;  %v376_v2 = vpop.f32.mrf.mxu1 }
 0x1a5 PF: > { %s15_s18 = sadd.s32 1, %s529_s18  }
 0x1a6   : > { %p12_p4 = scmp.ge.s32.totalorder %s15_s18, 4  }
 0x1a8   :  { %14 = sbr.rel (!%p12_p4) target bundleno = 1 (0x1), region = 76 }

// kernel: step_fn.26
= control target key start
LH: loop header
LB: loop body
LE: loop exit
PB: predicated region body
PF: predicated region fallthrough
CT: control target
= control target key end

     0   :  { %s470_s18 = smov 0   ;;  %s508_s0 = inlined_call_operand.vmem [shape: bf16[2,8,64], index: 0, kind: input, shape index: {}]   ;;  %s509_s1 = inlined_call_operand.vmem [shape: bf16[2,8,64], index: 1, kind: input, shape index: {}]   ;;  %s510_s2 = inlined_call_operand.vmem [shape: f32[2,1,64], index: 2, kind: input, shape index: {}]   ;;  %s511_s3 = inlined_call_operand.vmem [shape: bf16[64,64], index: 3, kind: input, shape index: {}]   ;;  %s512_s4 = inlined_call_operand.vmem [shape: f32[1,64], index: 4, kind: input, shape index: {}]   ;;  %s513_s5 = inlined_call_operand.vmem [shape: bf16[2,8,64], index: 5, kind: output, shape index: {}]  }
   0x1 LB: > { %s391_s19 = sadd.s32 4294967295, %s438_s18   ;;  %p395_p0 = scmp.ge.s32.totalorder %s438_s18, 1  ;;  %s438_s18 = sphi %s470_s18, %s15_s18  }
   0x2   : > { %p203_p1 = scmp.lt.s32.totalorder %s438_s18, 3 }
   0x4   : > { %p204_p2 = pnand %p395_p0, %p203_p1 }
   0x5   : > { %p236_p3 = scmp.lt.s32.totalorder (!%p204_p2), %s391_s19, 1 }
   0x6   : > { %207 = sbr.rel (%p204_p2) target bundleno = 162 (0xa2), region = 40 }
   0xb   : > { %v421_v0 = vld [vmem:[%s511_s3 + $0x18] sm:$0xff]  ;;  %v420_v1 = vld [vmem:[%s511_s3 + $0x10] sm:$0xff]  ;;  %s515_s19 = smov (!%p236_p3, %s391_s19), 1  ;;  %v419_v2 = vld [vmem:[%s511_s3 + $0x8] sm:$0xff]  ;;  %vm289_vm0 = vcmask 523264   ;;  %vm315_vm1 = vcmask 519168  }
   0xc   : > { %297 = vmatpush.bf16.msra.mxu0 %v421_v0  ;;  %s246_s26 = scalar_lea.vmem %s510_s2, %s515_s19  ;;  %s396_s29 = sshll.u32 %s515_s19, 2  ;;  %v418_v3 = vld [vmem:[%s511_s3] sm:$0xff] }
   0xd   : > { %s243_s9 = scalar_lea.vmem %s509_s1, %s396_s29  ;;  %s239_s12 = scalar_lea.vmem %s508_s0, %s396_s29  ;;  %v430_v5 = vld [vmem:[%s512_s4] ss:$0 sm:$0xff] }
   0xe   : > { %v252_v4 = vld [vmem:[%s243_s9] sm:$0xf]  ;;  %s250_s17 = scalar_lea.vmem %s513_s5, %s396_s29 }
   0xf   : > { %v306_v6 = vld [vmem:[%s239_s12] sm:$0xf] }
  0x10   : > { %298 = vmatpush.bf16.msra.mxu0 %v420_v1  ;;  %v431_v7 = vld [vmem:[%s246_s26] ss:$0 sm:$0xff]  ;;  %v307_v10 = vunpack.c.l.bf16 %v306_v6 }
  0x14   : > { %299 = vmatpush.bf16.msra.mxu0 %v419_v2 }
  0x18   : > { %300 = vmatpush.bf16.msra.mxu0 %v418_v3 }
  0x1b   : > { %415 = vmatmul.msk.bf16.vlgmr.msra.gmra.mxu0 %vm289_vm0, %v252_v4 }
  0x98   : > { %v302_v8 = vpop.f32.mrf.mxu0 }
  0x99   : > { %v303_v9 = vadd.f32 %v430_v5, %v302_v8 }
  0x9b   : > { %v312_v11 = vmul.f32 %v431_v7, %v303_v9 }
  0x9d   : > { %v313_v12 = vadd.f32 %v312_v11, %v307_v10 }
  0x9f   : > { %v314_v13 = vpack.c.bf16 %v313_v12, %v313_v12 }
  0xa0   : > { %v304_v14 = vpop.f32.mrf.mxu0 }
  0xa1   : > { %316 = vst.msk [vmem:[%s250_s17] sm:$0xf] %vm315_vm1, %v314_v13 }
  0xa2 PF: > { %s15_s18 = sadd.s32 1, %s438_s18  }
  0xa3   : > { %p12_p4 = scmp.ge.s32.totalorder %s15_s18, 4  }
  0xa5   :  { %14 = sbr.rel (!%p12_p4) target bundleno = 1 (0x1), region = 76 }

// kernel: step_fn.24
= control target key start
LH: loop header
LB: loop body
LE: loop exit
PB: predicated region body
PF: predicated region fallthrough
CT: control target
= control target key end

     0   :  { %s508_s18 = smov 0   ;;  %s546_s0 = inlined_call_operand.vmem [shape: bf16[2,16,64], index: 0, kind: input, shape index: {}]   ;;  %s547_s1 = inlined_call_operand.vmem [shape: bf16[2,16,64], index: 1, kind: input, shape index: {}]   ;;  %s548_s2 = inlined_call_operand.vmem [shape: f32[2,1,64], index: 2, kind: input, shape index: {}]   ;;  %s549_s3 = inlined_call_operand.vmem [shape: bf16[64,64], index: 3, kind: input, shape index: {}]   ;;  %s550_s4 = inlined_call_operand.vmem [shape: f32[1,64], index: 4, kind: input, shape index: {}]   ;;  %s551_s5 = inlined_call_operand.vmem [shape: bf16[2,16,64], index: 5, kind: output, shape index: {}]  }
   0x1 LB: > { %s414_s19 = sadd.s32 4294967295, %s476_s18   ;;  %p418_p0 = scmp.ge.s32.totalorder %s476_s18, 1  ;;  %s476_s18 = sphi %s508_s18, %s15_s18  }
   0x2   : > { %p205_p1 = scmp.lt.s32.totalorder %s476_s18, 3 }
   0x4   : > { %p206_p2 = pnand %p418_p0, %p205_p1 }
   0x5   : > { %p241_p3 = scmp.lt.s32.totalorder (!%p206_p2), %s414_s19, 1 }
   0x6   : > { %209 = sbr.rel (%p206_p2) target bundleno = 170 (0xaa), region = 40 }
   0xb   : > { %v455_v0 = vld [vmem:[%s549_s3 + $0x18] sm:$0xff]  ;;  %v454_v1 = vld [vmem:[%s549_s3 + $0x10] sm:$0xff]  ;;  %s553_s19 = smov (!%p241_p3, %s414_s19), 1  ;;  %v453_v2 = vld [vmem:[%s549_s3 + $0x8] sm:$0xff]  ;;  %vm303_vm0 = vcmask 523264   ;;  %vm335_vm1 = vcmask 519168  }
   0xc   : > { %311 = vmatpush.bf16.msra.mxu0 %v455_v0  ;;  %s253_s26 = scalar_lea.vmem %s548_s2, %s553_s19  ;;  %s448_s29 = sshll.u32 %s553_s19, 3  ;;  %v452_v3 = vld [vmem:[%s549_s3] sm:$0xff] }
   0xd   : > { %s250_s9 = scalar_lea.vmem %s547_s1, %s448_s29  ;;  %s245_s12 = scalar_lea.vmem %s546_s0, %s448_s29  ;;  %v468_v5 = vld [vmem:[%s550_s4] ss:$0 sm:$0xff] }
   0xe   : > { %v451_v4 = vld [vmem:[%s250_s9] sm:$0xff]  ;;  %s258_s17 = scalar_lea.vmem %s551_s5, %s448_s29 }
   0xf   : > { %v457_v6 = vld [vmem:[%s245_s12] sm:$0xff]  }
  0x10   : > { %312 = vmatpush.bf16.msra.mxu0 %v454_v1  ;;  %v469_v7 = vld [vmem:[%s253_s26] ss:$0 sm:$0xff]  ;;  %v458_v10 = vunpack.c.l.bf16 %v457_v6  ;;  %v459_v16 = vunpack.c.h.bf16 %v457_v6 }
  0x14   : > { %313 = vmatpush.bf16.msra.mxu0 %v453_v2 }
  0x18   : > { %314 = vmatpush.bf16.msra.mxu0 %v452_v3 }
  0x1b   : > { %445 = vmatmul.msk.bf16.vlgmr.msra.gmra.mxu0 %vm303_vm0, %v451_v4 }
  0x98   : > { %v316_v8 = vpop.f32.mrf.mxu0 }
  0x99   : > { %v317_v9 = vadd.f32 %v468_v5, %v316_v8 }
  0x9b   : > { %v329_v11 = vmul.f32 %v469_v7, %v317_v9 }
  0x9d   : > { %v331_v12 = vadd.f32 %v458_v10, %v329_v11 }
  0x9f   : > { %v333_v13 = vpack.c.bf16 %v331_v12, %v331_v12 }
  0xa0   : > { %v318_v14 = vpop.f32.mrf.mxu0 }
  0xa1   : > { %336 = vst.msk [vmem:[%s258_s17] sm:$0xf] %vm335_vm1, %v333_v13  ;;  %v319_v15 = vadd.f32 %v468_v5, %v318_v14 }
  0xa3   : > { %v330_v17 = vmul.f32 %v469_v7, %v319_v15 }
  0xa5   : > { %v332_v18 = vadd.f32 %v459_v16, %v330_v17 }
  0xa7   : > { %v334_v19 = vpack.c.bf16 %v332_v18, %v332_v18 }
  0xa9   : > { %337 = vst.msk [vmem:[%s258_s17 + $0x4] sm:$0xf] %vm335_vm1, %v334_v19 }
  0xaa PF: > { %s15_s18 = sadd.s32 1, %s476_s18  }
  0xab   : > { %p12_p4 = scmp.ge.s32.totalorder %s15_s18, 4  }
  0xad   :  { %14 = sbr.rel (!%p12_p4) target bundleno = 1 (0x1), region = 76 }

// kernel: step_fn.27
= control target key start
LH: loop header
LB: loop body
LE: loop exit
PB: predicated region body
PF: predicated region fallthrough
CT: control target
= control target key end

     0   :  { %s943_s27 = smov 0   ;;  %s1095_s0 = inlined_call_operand.vmem [shape: bf16[2,8,64], index: 0, kind: input, shape index: {}]   ;;  %s1096_s1 = inlined_call_operand.vmem [shape: f32[2,1,64], index: 1, kind: input, shape index: {}]   ;;  %s1097_s2 = inlined_call_operand.vmem [shape: f32[2,1,64], index: 2, kind: input, shape index: {}]   ;;  %s1098_s3 = inlined_call_operand.vmem [shape: f32[2,1,64], index: 3, kind: input, shape index: {}]   ;;  %s1099_s4 = inlined_call_operand.vmem [shape: bf16[64,256], index: 4, kind: input, shape index: {}]   ;;  %s1100_s5 = inlined_call_operand.vmem [shape: f32[1,256], index: 5, kind: input, shape index: {}]   ;;  %s1101_s6 = inlined_call_operand.vmem [shape: bf16[256,64], index: 6, kind: input, shape index: {}]   ;;  %s1102_s7 = inlined_call_operand.vmem [shape: f32[1,64], index: 7, kind: input, shape index: {}]   ;;  %s1103_s8 = inlined_call_operand.vmem [shape: bf16[2,8,64], index: 8, kind: output, shape index: {}]  }
   0x1 LB: > { %s738_s28 = sadd.s32 4294967295, %s895_s27   ;;  %p742_p0 = scmp.ge.s32.totalorder %s895_s27, 1  ;;  %s895_s27 = sphi %s943_s27, %s18_s27  }
   0x2   : > { %p285_p1 = scmp.lt.s32.totalorder %s895_s27, 3 }
   0x4   : > { %p286_p2 = pnand %p742_p0, %p285_p1 }
   0x5   : > { %p326_p3 = scmp.lt.s32.totalorder (!%p286_p2), %s738_s28, 1 }
   0x6   : > { %289 = sbr.rel (%p286_p2) target bundleno = 583 (0x247), region = 52 }
   0xb   : > { %s1105_s28 = smov (!%p326_p3, %s738_s28), 1  ;;  %vm348_vm0 = vcmask 523264   ;;  %v897_v3 = vmov 64.0   ;;  %v771_v15 = vld [vmem:[%s1099_s4 + $0x30] sm:$0xf]  ;;  %v860_v39 = vld [vmem:[%s1101_s6 + $0x38] sm:$0xff] }
   0xc   : > { %s743_s29 = sshll.u32 %s1105_s28, 2  ;;  %881 = vrcp.f32 %v897_v3  ;;  %s332_s13 = scalar_lea.vmem %s1096_s1, %s1105_s28  ;;  %v852_v16 = vld [vmem:[%s1099_s4 + $0x34] sm:$0xf0]  ;;  %v851_v17 = vld [vmem:[%s1099_s4 + $0x34] sm:$0xf]  ;;  %623 = vmatpush.bf16.msra.mxu2 %v860_v39  ;;  %v858_v61 = vld [vmem:[%s1101_s6 + $0x28] sm:$0xff] }
   0xd   : > { %s329_s10 = scalar_lea.vmem %s1095_s0, %s743_s29  ;;  %v772_v18 = vor.u32 %v852_v16, %v771_v15  ;;  %v773_v19 = vld [vmem:[%s1099_s4 + $0x38] sm:$0xf0]  ;;  %v763_v21 = vld [vmem:[%s1099_s4 + $0x20] sm:$0xf]  ;;  %v850_v22 = vld [vmem:[%s1099_s4 + $0x24] sm:$0xf0]  ;;  %s335_s16 = scalar_lea.vmem %s1097_s2, %s1105_s28 }
   0xe   : > { %v344_v0 = vld [vmem:[%s329_s10] sm:$0xf]  ;;  %v776_v20 = vor.u32 %v851_v17, %v773_v19  ;;  %v849_v23 = vld [vmem:[%s1099_s4 + $0x24] sm:$0xf]  ;;  %v764_v24 = vor.u32 %v850_v22, %v763_v21  ;;  %v765_v25 = vld [vmem:[%s1099_s4 + $0x28] sm:$0xf0]  ;;  %s338_s12 = scalar_lea.vmem %s1098_s3, %s1105_s28  ;;  %s342_s18 = scalar_lea.vmem %s1103_s8, %s743_s29 }
   0xf   : > { %v959_v1 = vunpack.c.l.bf16 %v344_v0  ;;  %449 = vmatpush.bf16.msra.mxu0 %v772_v18  ;;  %v768_v26 = vor.u32 %v849_v23, %v765_v25  ;;  %v755_v27 = vld [vmem:[%s1099_s4 + $0x10] sm:$0xf]  ;;  %v848_v28 = vld [vmem:[%s1099_s4 + $0x14] sm:$0xf0]  ;;  %v847_v29 = vld [vmem:[%s1099_s4 + $0x14] sm:$0xf] }
  0x10   : > { %462 = vmatpush.bf16.msra.mxu1 %v776_v20  ;;  %v756_v30 = vor.u32 %v848_v28, %v755_v27  ;;  %v757_v31 = vld [vmem:[%s1099_s4 + $0x18] sm:$0xf0]  ;;  %v747_v32 = vld [vmem:[%s1099_s4] sm:$0xf]  ;;  %v846_v33 = vld [vmem:[%s1099_s4 + $0x4] sm:$0xf0] }
  0x11   : > { %v349_v2 = vsel %vm348_vm0, %v959_v1, 0.0  ;;  %v760_v34 = vor.u32 %v847_v29, %v757_v31  ;;  %v845_v35 = vld [vmem:[%s1099_s4 + $0x4] sm:$0xf]  ;;  %v749_v36 = vld [vmem:[%s1099_s4 + $0x8] sm:$0xf0]  ;;  %v748_v37 = vor.u32 %v846_v33, %v747_v32  ;;  %v868_v40 = vld [vmem:[%s1101_s6 + $0x78] sm:$0xff] }
  0x12   : > { %350 = vadd.xlane.f32.xlu0 %v349_v2  ;;  %v882_v4 = vpop.eup %881  ;;  %v752_v38 = vor.u32 %v845_v35, %v749_v36  ;;  %636 = vmatpush.bf16.msra.mxu3 %v868_v40  ;;  %v347_v47 = vld [vmem:[%s335_s16] sm:$0x1]  ;;  %v859_v59 = vld [vmem:[%s1101_s6 + $0x30] sm:$0xff]  ;;  %v866_v62 = vld [vmem:[%s1101_s6 + $0x68] sm:$0xff]  ;;  %vm656_vm5 = vcmask 519168  }
  0x13   : > { %v353_v5 = vmul.f32 64.0, %v882_v4  ;;  %vm357_vm1 = vweird.f32 %v882_v4  ;;  %450 = vmatpush.bf16.msra.mxu0 %v764_v24  ;;  %v366_v49 = vadd.f32 1.0, %v347_v47  ;;  %v878_v55 = vld [vmem:[%s332_s13] ss:$0 sm:$0xff]  ;;  %v867_v60 = vld [vmem:[%s1101_s6 + $0x70] sm:$0xff]  ;;  %624 = vmatpush.bf16.msra.mxu2 %v859_v59  ;;  %v856_v2 = vld [vmem:[%s1101_s6 + $0x18] sm:$0xff] }
  0x14   : > { %463 = vmatpush.bf16.msra.mxu1 %v768_v26  ;;  %v857_v63 = vld [vmem:[%s1101_s6 + $0x20] sm:$0xff]  ;;  %v864_v3 = vld [vmem:[%s1101_s6 + $0x58] sm:$0xff] }
  0x15   : > { %v354_v6 = vsub.f32 1.0, %v353_v5  ;;  %v380_v52 = vperm.slane %v366_v49, 0  ;;  %v865_v0 = vld [vmem:[%s1101_s6 + $0x60] sm:$0xff]  ;;  %v863_v5 = vld [vmem:[%s1101_s6 + $0x50] sm:$0xff] }
  0x16   : > { %637 = vmatpush.bf16.msra.mxu3 %v867_v60  ;;  %v879_v39 = vld [vmem:[%s1102_s7] ss:$0 sm:$0xff] }
  0x17   : > { %v355_v7 = vmul.f32 %v882_v4, %v354_v6  ;;  %451 = vmatpush.bf16.msra.mxu0 %v756_v30  ;;  %625 = vmatpush.bf16.msra.mxu2 %v858_v61  ;;  %v854_v6 = vld [vmem:[%s1101_s6 + $0x8] sm:$0xff] }
  0x18   : > { %464 = vmatpush.bf16.msra.mxu1 %v760_v34 }
  0x19   : > { %v356_v8 = vadd.f32 %v882_v4, %v355_v7  ;;  %v862_v7 = vld [vmem:[%s1101_s6 + $0x48] sm:$0xff] }
  0x1a   : > { %638 = vmatpush.bf16.msra.mxu3 %v866_v62 }
  0x1b   : > { %v358_v9 = vsel %vm357_vm1, %v882_v4, %v356_v8  ;;  %452 = vmatpush.bf16.msra.mxu0 %v748_v37  ;;  %626 = vmatpush.bf16.msra.mxu2 %v857_v63  ;;  %v855_v4 = vld [vmem:[%s1101_s6 + $0x10] sm:$0xff]  ;;  %v853_v8 = vld [vmem:[%s1101_s6] sm:$0xff] }
  0x1c   : > { %465 = vmatpush.bf16.msra.mxu1 %v752_v38 }
  0x1e   : > { %639 = vmatpush.bf16.msra.mxu3 %v865_v0 }
  0x1f   : > { %627 = vmatpush.bf16.msra.mxu2 %v856_v2 }
  0x22   : > { %640 = vmatpush.bf16.msra.mxu3 %v864_v3 }
  0x23   : > { %628 = vmatpush.bf16.msra.mxu2 %v855_v4 }
  0x26   : > { %641 = vmatpush.bf16.msra.mxu3 %v863_v5 }
  0x27   : > { %629 = vmatpush.bf16.msra.mxu2 %v854_v6 }
  0x2a   : > { %642 = vmatpush.bf16.msra.mxu3 %v862_v7 }
  0x2b   : > { %630 = vmatpush.bf16.msra.mxu2 %v853_v8 }
  0x85   : > { %v351_v10 = vpop.xlane.xlu0 %350 }
  0x86   : > { %v359_v11 = vmul.f32 %v358_v9, %v351_v10  ;;  %v396_v10 = vld [vmem:[%s1100_s5] sm:$0x3] }
  0x88   : > { %v360_v12 = vsub.f32 %v959_v1, %v359_v11  ;;  %v398_v11 = vperm.slane %v396_v10, 0 }
  0x8a   : > { %v361_v13 = vmul.f32 %v360_v12, %v360_v12 }
  0x8c   : > { %v362_v14 = vsel %vm348_vm0, %v361_v13, 0.0 }
  0x8d   : > { %363 = vadd.xlane.f32.xlu0 %v362_v14 }
 0x100   : > { %v364_v41 = vpop.xlane.xlu0 %363 }
 0x101   : > { %v365_v42 = vmul.f32 %v364_v41, %v358_v9  ;;  %v861_v9 = vld [vmem:[%s1101_s6 + $0x40] sm:$0xff] }
 0x102   : > { %643 = vmatpush.bf16.msra.mxu3 %v861_v9 }
 0x103   : > { %v367_v43 = vadd.f32 1e-06, %v365_v42 }
 0x105   : > { %883 = vrsqrt.f32 %v367_v43  ;;  %vm374_vm3 = vweird.f32 %v367_v43 }
 0x10b   : > { %v884_v44 = vpop.eup %883 }
 0x10c   : > { %v369_v45 = vmul.f32 %v884_v44, %v367_v43  ;;  %vm375_vm2 = vweird.f32 %v884_v44  ;;  %v880_v43 = vld [vmem:[%s338_s12] ss:$0 sm:$0xff] }
 0x10d   : > { %vm376_vm4 = vmor %vm374_vm3, %vm375_vm2 }
 0x10e   : > { %v370_v46 = vmul.f32 %v884_v44, %v369_v45 }
 0x110   : > { %v371_v48 = vmul.f32 0.5, %v370_v46 }
 0x112   : > { %v372_v50 = vsub.f32 1.5, %v371_v48 }
 0x114   : > { %v373_v51 = vmul.f32 %v884_v44, %v372_v50 }
 0x116   : > { %v377_v53 = vsel %vm376_vm4, %v884_v44, %v373_v51 }
 0x117   : > { %v378_v54 = vmul.f32 %v377_v53, %v360_v12  ;;  %v399_v12 = vperm.slane %v396_v10, 1 }
 0x119   : > { %v382_v56 = vmul.f32 %v380_v52, %v378_v54 }
 0x11b   : > { %v386_v57 = vadd.f32 %v878_v55, %v382_v56 }
 0x11d   : > { %v387_v58 = vpack.c.bf16 %v386_v57, %v386_v57 }
 0x11f   : > { %777 = vmatmul.msk.bf16.vlgmr.msra.gmra.mxu0 %vm348_vm0, %v387_v58  ;;  %778 = vmatmul.msk.bf16.vlgmr.msra.gmra.mxu1 %vm348_vm0, %v387_v58 }
 0x19c   : > { %v454_v13 = vpop.f32.mrf.mxu0  ;;  %v467_v14 = vpop.f32.mrf.mxu1 }
 0x19d   : > { %v455_v15 = vadd.f32 %v454_v13, %v398_v11  ;;  %v468_v16 = vadd.f32 %v467_v14, %v399_v12 }
 0x19f   : > { %v471_v17 = vmul.f32 %v455_v15, %v455_v15  ;;  %v472_v18 = vmul.f32 %v468_v16, %v468_v16 }
 0x1a1   : > { %v473_v19 = vmul.f32 %v471_v17, %v455_v15  ;;  %v474_v20 = vmul.f32 %v472_v18, %v468_v16 }
 0x1a3   : > { %v475_v21 = vmul.f32 0.044715, %v473_v19  ;;  %v476_v22 = vmul.f32 0.044715, %v474_v20 }
 0x1a4   : > { %v456_v23 = vpop.f32.mrf.mxu0  ;;  %v469_v24 = vpop.f32.mrf.mxu1 }
 0x1a5   : > { %v477_v25 = vadd.f32 %v475_v21, %v455_v15  ;;  %v478_v26 = vadd.f32 %v476_v22, %v468_v16 }
 0x1a7   : > { %v479_v27 = vmul.f32 0.7978846, %v477_v25  ;;  %v480_v28 = vmul.f32 0.7978846, %v478_v26 }
 0x1a9   : > { %885 = vtanh.f32 %v479_v27 }
 0x1aa   : > { %887 = vtanh.f32 %v480_v28 }
 0x1af   : > { %v886_v29 = vpop.eup %885 }
 0x1b0   : > { %v888_v30 = vpop.eup %887  ;;  %v483_v31 = vadd.f32 1.0, %v886_v29 }
 0x1b1   : > { %v484_v32 = vadd.f32 1.0, %v888_v30 }
 0x1b2   : > { %v485_v33 = vmul.f32 0.5, %v483_v31 }
 0x1b3   : > { %v486_v34 = vmul.f32 0.5, %v484_v32 }
 0x1b4   : > { %v487_v35 = vmul.f32 %v485_v33, %v455_v15 }
 0x1b5   : > { %v488_v36 = vmul.f32 %v486_v34, %v468_v16 }
 0x1b6   : > { %v489_v37 = vpack.c.bf16 %v487_v35, %v487_v35 }
 0x1b7   : > { %v490_v38 = vpack.c.bf16 %v488_v36, %v488_v36 }
 0x1b8   : > { %631 = vmatmul.bf16.vlgmr.msra.gmra.mxu2 %v489_v37 }
 0x1b9   : > { %644 = vmatmul.bf16.vlgmr.msra.gmra.mxu3 %v490_v38 }
 0x23b   : > { %v632_v40 = vpop.f32.mrf.mxu2 }
 0x23c   : > { %v633_v41 = vadd.f32 %v879_v39, %v632_v40  ;;  %v645_v42 = vpop.f32.mrf.mxu3 }
 0x23e   : > { %v646_v44 = vadd.f32 %v645_v42, %v633_v41 }
 0x240   : > { %v653_v45 = vmul.f32 %v880_v43, %v646_v44 }
 0x242   : > { %v654_v46 = vadd.f32 %v653_v45, %v959_v1 }
 0x243   : > { %v634_v47 = vpop.f32.mrf.mxu2 }
 0x244   : > { %v655_v48 = vpack.c.bf16 %v654_v46, %v654_v46  ;;  %v647_v49 = vpop.f32.mrf.mxu3 }
 0x246   : > { %657 = vst.msk [vmem:[%s342_s18] sm:$0xf] %vm656_vm5, %v655_v48 }
 0x247 PF: > { %s18_s27 = sadd.s32 1, %s895_s27  }
 0x248   : > { %p15_p4 = scmp.ge.s32.totalorder %s18_s27, 4  }
 0x24a   :  { %17 = sbr.rel (!%p15_p4) target bundleno = 1 (0x1), region = 91 }

// kernel: step_fn.23
= control target key start
LH: loop header
LB: loop body
LE: loop exit
PB: predicated region body
PF: predicated region fallthrough
CT: control target
= control target key end

     0   :  { %s1385_s30 = smov 0   ;;  %s1836_s0 = inlined_call_operand.vmem [shape: bf16[2,8,192], index: 0, kind: input, shape index: {}]   ;;  %s1837_s1 = inlined_call_operand.vmem [shape: bf16[2,16,192], index: 1, kind: input, shape index: {}]   ;;  %s1838_s2 = inlined_call_operand.vmem [shape: f32[24,16], index: 2, kind: input, shape index: {}]   ;;  %s1839_s3 = inlined_call_operand.vmem [shape: f32[24,16], index: 3, kind: input, shape index: {}]   ;;  %s1840_s4 = inlined_call_operand.vmem [shape: f32[1,32], index: 4, kind: input, shape index: {}]   ;;  %s1841_s5 = inlined_call_operand.vmem [shape: f32[1,32], index: 5, kind: input, shape index: {}]   ;;  %s1842_s6 = inlined_call_operand.vmem [shape: f32[1,32], index: 6, kind: input, shape index: {}]   ;;  %s1843_s7 = inlined_call_operand.vmem [shape: f32[1,32], index: 7, kind: input, shape index: {}]   ;;  %s1844_s8 = inlined_call_operand.vmem [shape: bf16[2,8,64], index: 8, kind: output, shape index: {0}]   ;;  %s1845_s9 = inlined_call_operand.vmem [shape: bf16[2,16,64], index: 9, kind: output, shape index: {1}]  }
   0x1 LB: > { %s1194_s10 = sadd.s32 4294967295, %s1325_s30   ;;  %p1198_p0 = scmp.ge.s32.totalorder %s1325_s30, 1  ;;  %s1325_s30 = sphi %s1385_s30, %s20_s30  }
   0x2   : > { %p300_p1 = scmp.lt.s32.totalorder %s1325_s30, 3 }
   0x4   : > { %p301_p2 = pnand %p1198_p0, %p300_p1 }
   0x5   : > { %p345_p3 = scmp.lt.s32.totalorder (!%p301_p2), %s1194_s10, 1  ;;  %s1327_s19 = smov (!%p301_p2), 32  }
   0x6   : > { %304 = sbr.rel (%p301_p2) target bundleno = 1092 (0x444), region = 52  ;;  %s1328_s20 = smov (!%p301_p2), 96  }
   0x7   : > { %s1329_s21 = smov (!%p301_p2), 64   ;;  %s1332_s13 = smov (!%p301_p2), 80  }
   0x8   : > { %s1333_s14 = smov (!%p301_p2), 48  }
   0xb   : > { %s1849_s10 = smov (!%p345_p3, %s1194_s10), 1  ;;  %v1265_v9 = vld [vmem:[%s1843_s7] ss:$0 sm:$0xff]  ;;  %vm385_vm0 = vcmask 261120   ;;  %v1330_v33 = vmov 32.0  }
   0xc   : > { %s1221_s11 = sshll.u32 %s1849_s10, 4  ;;  %s1220_s12 = sshll.u32 %s1849_s10, 3  ;;  %v1447_v10 = vld [vmem:[%s1842_s6] ss:$0 sm:$0xff]  ;;  %1269 = vrcp.f32 %v1330_v33 }
   0xd   : > { %s1400_s15 = scalar_lea.vmem %s1837_s1, %s1221_s11  ;;  %s1407_s18 = scalar_lea.vmem %s1836_s0, %s1220_s12  ;;  %v1267_v11 = vld [vmem:[%s1841_s5] ss:$0 sm:$0xff] }
   0xe   : > { %v1410_v0 = vld [vmem:[%s1400_s15 + $0x8] sm:$0xff]  ;;  %v368_v1 = vld [vmem:[%s1400_s15] sm:$0xf]  ;;  %s1331_s11 = smov 16   ;;  %s363_s17 = scalar_lea.vmem %s1845_s9, %s1220_s12 }
   0xf   : > { %v1414_v2 = vunpack.c.l.bf16 %v1410_v0  ;;  %v1416_v3 = vunpack.c.l.bf16 %v368_v1  ;;  %v365_v4 = vld [vmem:[%s1407_s18] sm:$0xf] }
  0x10   : > { %v1428_v7 = vunpack.c.l.bf16 %v365_v4  ;;  %v1459_v12 = vld [vmem:[%s1840_s4] ss:$0 sm:$0xff] }
  0x11   : > { %v1421_v5 = vmul.f32 %v1414_v2, %v1414_v2  ;;  %v429_v6 = vmul.f32 %v1416_v3, %v1416_v3 }
  0x12   : > { %v384_v8 = vmul.f32 %v1428_v7, %v1428_v7  ;;  %v1270_v34 = vpop.eup %1269 }
  0x13   : > { %891 = vrot.lane.b32.xlu0 %v1421_v5, %s1327_s19  ;;  %889 = vrot.lane.b32.xlu1 %v429_v6, %s1327_s19  ;;  %v431_v32 = vsel %vm385_vm0, %v429_v6, 0.0  ;;  %v390_v36 = vmul.f32 32.0, %v1270_v34  ;;  %vm394_vm1 = vweird.f32 %v1270_v34 }
  0x14   : > { %769 = vrot.lane.b32.xlu2 %v429_v6, %s1328_s20  ;;  %v386_v30 = vsel %vm385_vm0, %v384_v8, 0.0 }
  0x15   : > { %v391_v37 = vsub.f32 1.0, %v390_v36 }
  0x17   : > { %v392_v38 = vmul.f32 %v1270_v34, %v391_v37 }
  0x19   : > { %v393_v41 = vadd.f32 %v1270_v34, %v392_v38 }
  0x1b   : > { %728 = vrot.lane.b32.xlu1 %v384_v8, %s1328_s20  ;;  %848 = vrot.lane.b32.xlu0 %v384_v8, %s1327_s19  ;;  %v1482_v42 = vsel %vm394_vm1, %v1270_v34, %v393_v41 }
  0x1c   : > { %771 = vrot.lane.b32.xlu2 %v1421_v5, %s1328_s20 }
  0x23   : > { %499 = vrot.lane.b32.xlu0 %v384_v8, %s1329_s21  ;;  %544 = vrot.lane.b32.xlu1 %v429_v6, %s1329_s21 }
  0x24   : > { %546 = vrot.lane.b32.xlu2 %v1421_v5, %s1329_s21 }
  0x2b   : > { %867 = vrot.lane.b32.xlu0 %v1265_v9, %s1328_s20  ;;  %747 = vrot.lane.b32.xlu1 %v1447_v10, %s1327_s19 }
  0x2c   : > { %927 = vrot.lane.b32.xlu2 %v1267_v11, %s1328_s20 }
  0x33   : > { %807 = vrot.lane.b32.xlu0 %v1459_v12, %s1327_s19 }
  0x6e   : > { %v770_v13 = vpop.permute.xlu2 %769 }
  0x6f   : > { %v775_v24 = vsel %vm385_vm0, %v770_v13, 0.0 }
  0x76   : > { %v772_v18 = vpop.permute.xlu2 %771 }
  0x77   : > { %v778_v19 = vsel %vm385_vm0, %v772_v18, 0.0 }
  0x7e   : > { %v547_v29 = vpop.permute.xlu2 %546 }
  0x7f   : > { %v553_v31 = vsel %vm385_vm0, %v547_v29, 0.0 }
  0x85   : > { %v892_v14 = vpop.permute.xlu0 %891  ;;  %v890_v15 = vpop.permute.xlu1 %889 }
  0x86   : > { %v895_v16 = vsel %vm385_vm0, %v890_v15, 0.0  ;;  %v898_v17 = vsel %vm385_vm0, %v892_v14, 0.0  ;;  %v1478_v39 = vpop.permute.xlu2 %927 }
  0x87   : > { %896 = vadd.xlane.f32.xlu2 %v895_v16  ;;  %899 = vadd.xlane.f32.xlu0 %v898_v17 }
  0x8d   : > { %v729_v20 = vpop.permute.xlu1 %728  ;;  %v849_v21 = vpop.permute.xlu0 %848 }
  0x8e   : > { %v731_v22 = vsel %vm385_vm0, %v729_v20, 0.0  ;;  %v851_v23 = vsel %vm385_vm0, %v849_v21, 0.0 }
  0x8f   : > { %779 = vadd.xlane.f32.xlu2 %v778_v19  ;;  %732 = vadd.xlane.f32.xlu0 %v731_v22 }
  0x90   : > { %852 = vadd.xlane.f32.xlu1 %v851_v23 }
  0x95   : > { %v500_v25 = vpop.permute.xlu0 %499  ;;  %v545_v26 = vpop.permute.xlu1 %544 }
  0x96   : > { %v502_v27 = vsel %vm385_vm0, %v500_v25, 0.0  ;;  %v550_v28 = vsel %vm385_vm0, %v545_v26, 0.0 }
  0x97   : > { %503 = vadd.xlane.f32.xlu0 %v502_v27  ;;  %551 = vadd.xlane.f32.xlu2 %v550_v28 }
  0x98   : > { %776 = vadd.xlane.f32.xlu1 %v775_v24 }
  0x9d   : > { %v1476_v35 = vpop.permute.xlu0 %867  ;;  %v1484_v45 = vpop.permute.xlu1 %747 }
  0x9f   : > { %387 = vadd.xlane.f32.xlu2 %v386_v30 }
  0xa0   : > { %554 = vadd.xlane.f32.xlu1 %v553_v31 }
  0xa5   : > { %v1480_v40 = vpop.permute.xlu0 %807 }
  0xa8   : > { %432 = vadd.xlane.f32.xlu1 %v431_v32 }
  0xb7   : > { %520 = vrot.lane.b32.xlu2 %v1265_v9, %s1329_s21 }
  0xc1   : > { %584 = vrot.lane.b32.xlu1 %v1267_v11, %s1329_s21 }
  0xfa   : > { %v897_v43 = vpop.xlane.xlu2 %896  ;;  %v900_v44 = vpop.xlane.xlu0 %899 }
  0xfb   : > { %v901_v46 = vmul.f32 %v897_v43, %v1482_v42  ;;  %v902_v47 = vmul.f32 %v900_v44, %v1482_v42 }
  0xfd   : > { %v903_v48 = vadd.f32 1e-06, %v901_v46  ;;  %v904_v49 = vadd.f32 1e-06, %v902_v47 }
  0xff   : > { %1271 = vrsqrt.f32 %v903_v48  ;;  %vm911_vm2 = vweird.f32 %v903_v48  ;;  %vm921_vm6 = vweird.f32 %v904_v49 }
 0x100   : > { %1273 = vrsqrt.f32 %v904_v49 }
 0x102   : > { %v780_v50 = vpop.xlane.xlu2 %779  ;;  %v733_v51 = vpop.xlane.xlu0 %732 }
 0x103   : > { %v782_v52 = vmul.f32 %v780_v50, %v1482_v42  ;;  %v853_v53 = vpop.xlane.xlu1 %852  ;;  %v734_v54 = vmul.f32 %v733_v51, %v1482_v42 }
 0x104   : > { %v854_v55 = vmul.f32 %v853_v53, %v1482_v42 }
 0x105   : > { %v1272_v56 = vpop.eup %1271  ;;  %v1491_v57 = vadd.f32 1e-06, %v782_v52  ;;  %v735_v58 = vadd.f32 1e-06, %v734_v54 }
 0x106   : > { %v1274_v59 = vpop.eup %1273  ;;  %v906_v60 = vmul.f32 %v1272_v56, %v903_v48  ;;  %v855_v61 = vadd.f32 1e-06, %v854_v55  ;;  %vm912_vm3 = vweird.f32 %v1272_v56 }
 0x107   : > { %v916_v62 = vmul.f32 %v1274_v59, %v904_v49  ;;  %1275 = vrsqrt.f32 %v1491_v57  ;;  %vm922_vm4 = vweird.f32 %v1274_v59  ;;  %vm913_vm5 = vmor %vm911_vm2, %vm912_vm3  ;;  %vm742_vm8 = vweird.f32 %v735_v58 }
 0x108   : > { %v907_v63 = vmul.f32 %v1272_v56, %v906_v60  ;;  %1277 = vrsqrt.f32 %v855_v61  ;;  %vm923_vm7 = vmor %vm921_vm6, %vm922_vm4  ;;  %vm862_vm11 = vweird.f32 %v855_v61  ;;  %vm801_vm2 = vweird.f32 %v1491_v57 }
 0x109   : > { %v917_v1 = vmul.f32 %v1274_v59, %v916_v62  ;;  %1279 = vrsqrt.f32 %v735_v58 }
 0x10a   : > { %v908_v4 = vmul.f32 0.5, %v907_v63 }
 0x10b   : > { %v918_v6 = vmul.f32 0.5, %v917_v1  ;;  %v777_v8 = vpop.xlane.xlu1 %776 }
 0x10c   : > { %v909_v9 = vsub.f32 1.5, %v908_v4  ;;  %v781_v11 = vmul.f32 %v777_v8, %v1482_v42 }
 0x10d   : > { %v1495_v13 = vpop.eup %1275  ;;  %v919_v14 = vsub.f32 1.5, %v918_v6 }
 0x10e   : > { %v1278_v15 = vpop.eup %1277  ;;  %v910_v16 = vmul.f32 %v1272_v56, %v909_v9  ;;  %v783_v17 = vadd.f32 1e-06, %v781_v11  ;;  %v796_v25 = vmul.f32 %v1495_v13, %v1491_v57  ;;  %vm802_vm3 = vweird.f32 %v1495_v13 }
 0x10f   : > { %v1280_v18 = vpop.eup %1279  ;;  %v920_v19 = vmul.f32 %v1274_v59, %v919_v14  ;;  %v857_v20 = vmul.f32 %v1278_v15, %v855_v61  ;;  %vm863_vm10 = vweird.f32 %v1278_v15  ;;  %vm803_vm4 = vmor %vm801_vm2, %vm802_vm3 }
 0x110   : > { %v737_v21 = vmul.f32 %v1280_v18, %v735_v58  ;;  %1281 = vrsqrt.f32 %v783_v17  ;;  %v914_v23 = vsel %vm913_vm5, %v1272_v56, %v910_v16  ;;  %vm743_vm9 = vweird.f32 %v1280_v18  ;;  %vm864_vm13 = vmor %vm862_vm11, %vm863_vm10  ;;  %v504_v58 = vpop.xlane.xlu0 %503 }
 0x111   : > { %v858_v22 = vmul.f32 %v1278_v15, %v857_v20  ;;  %v924_v24 = vsel %vm923_vm7, %v1274_v59, %v920_v19  ;;  %v925_v27 = vmul.f32 %v914_v23, %v1416_v3  ;;  %v797_v38 = vmul.f32 %v1495_v13, %v796_v25  ;;  %vm744_vm12 = vmor %vm742_vm8, %vm743_vm9 }
 0x112   : > { %v738_v26 = vmul.f32 %v1280_v18, %v737_v21  ;;  %v926_v28 = vmul.f32 %v924_v24, %v1414_v2  ;;  %vm791_vm14 = vweird.f32 %v783_v17  ;;  %v552_v24 = vpop.xlane.xlu2 %551 }
 0x113   : > { %v859_v29 = vmul.f32 0.5, %v858_v22  ;;  %v555_v30 = vpop.xlane.xlu1 %554  ;;  %v930_v32 = vmul.f32 %v1478_v39, %v925_v27  ;;  %v798_v49 = vmul.f32 0.5, %v797_v38 }
 0x114   : > { %v739_v31 = vmul.f32 0.5, %v738_v26  ;;  %v931_v33 = vmul.f32 %v1478_v39, %v926_v28  ;;  %v557_v36 = vmul.f32 %v555_v30, %v1482_v42 }
 0x115   : > { %v860_v34 = vsub.f32 1.5, %v859_v29  ;;  %942 = vrot.lane.b32.xlu1 %v930_v32, %s1331_s11  ;;  %v799_v59 = vsub.f32 1.5, %v798_v49  ;;  %v434_v29 = vsel %vm385_vm0, %v1421_v5, 0.0 }
 0x116   : > { %v1282_v37 = vpop.eup %1281  ;;  %v740_v41 = vsub.f32 1.5, %v739_v31  ;;  %936 = vrot.lane.b32.xlu0 %v931_v33, %s1327_s19  ;;  %944 = vrot.lane.b32.xlu2 %v931_v33, %s1331_s11  ;;  %v559_v39 = vadd.f32 1e-06, %v557_v36  ;;  %v556_v33 = vmul.f32 %v552_v24, %v1482_v42 }
 0x117   : > { %v861_v43 = vmul.f32 %v1278_v15, %v860_v34  ;;  %v786_v44 = vmul.f32 %v1282_v37, %v783_v17  ;;  %vm792_vm15 = vweird.f32 %v1282_v37  ;;  %v800_v63 = vmul.f32 %v1495_v13, %v799_v59 }
 0x118   : > { %v741_v46 = vmul.f32 %v1280_v18, %v740_v41  ;;  %1283 = vrsqrt.f32 %v559_v39  ;;  %vm793_vm1 = vmor %vm791_vm14, %vm792_vm15  ;;  %vm576_vm5 = vweird.f32 %v559_v39  ;;  %v558_v34 = vadd.f32 1e-06, %v556_v33 }
 0x119   : > { %v787_v47 = vmul.f32 %v1282_v37, %v786_v44  ;;  %v865_v48 = vsel %vm864_vm13, %v1278_v15, %v861_v43  ;;  %v804_v57 = vsel %vm803_vm4, %v1495_v13, %v800_v63  ;;  %v1555_v44 = vld [vmem:[%s1839_s3 + $0x10] sm:$0xff] }
 0x11a   : > { %v866_v50 = vmul.f32 %v865_v48, %v1428_v7  ;;  %v745_v51 = vsel %vm744_vm12, %v1280_v18, %v741_v46  ;;  %v806_v14 = vmul.f32 %v804_v57, %v1414_v2  ;;  %v388_v26 = vpop.xlane.xlu2 %387  ;;  %v1561_v46 = vld [vmem:[%s1838_s2 + $0x10] sm:$0xff]  ;;  %vm566_vm11 = vweird.f32 %v558_v34 }
 0x11b   : > { %v788_v52 = vmul.f32 0.5, %v787_v47  ;;  %v746_v53 = vmul.f32 %v745_v51, %v1428_v7  ;;  %v433_v15 = vpop.xlane.xlu1 %432  ;;  %v396_v36 = vmul.f32 %v1482_v42, %v388_v26 }
 0x11c   : > { %v870_v54 = vmul.f32 %v1476_v35, %v866_v50  ;;  %v505_v35 = vmul.f32 %v504_v58, %v1482_v42  ;;  %v811_v17 = vmul.f32 %v1480_v40, %v806_v14 }
 0x11d   : > { %v789_v55 = vsub.f32 1.5, %v788_v52  ;;  %v750_v56 = vmul.f32 %v1484_v45, %v746_v53  ;;  %v1547_v38 = vadd.f32 1e-06, %v396_v36 }
 0x11e   : > { %872 = vrot.lane.b32.xlu0 %v870_v54, %s1327_s19  ;;  %v1284_v60 = vpop.eup %1283  ;;  %876 = vrot.lane.b32.xlu2 %v870_v54, %s1331_s11  ;;  %v506_v6 = vadd.f32 1e-06, %v505_v35  ;;  %v1578_v54 = vld [vmem:[%s1838_s2] sm:$0xff] }
 0x11f   : > { %v790_v61 = vmul.f32 %v1282_v37, %v789_v55  ;;  %756 = vrot.lane.b32.xlu1 %v750_v56, %s1332_s13  ;;  %v571_v62 = vmul.f32 %v1284_v60, %v559_v39  ;;  %vm577_vm6 = vweird.f32 %v1284_v60  ;;  %v1583_v55 = vld [vmem:[%s1839_s3] sm:$0xff] }
 0x120   : > { %1285 = vrsqrt.f32 %v506_v6  ;;  %vm578_vm7 = vmor %vm576_vm5, %vm577_vm6  ;;  %vm513_vm8 = vweird.f32 %v506_v6 }
 0x121   : > { %v794_v45 = vsel %vm793_vm1, %v1282_v37, %v790_v61  ;;  %v572_v4 = vmul.f32 %v1284_v60, %v571_v62  ;;  %1287 = vrsqrt.f32 %v558_v34  ;;  %v437_v37 = vmul.f32 %v433_v15, %v1482_v42 }
 0x122   : > { %v805_v1 = vmul.f32 %v794_v45, %v1416_v3  ;;  %v521_v31 = vpop.permute.xlu2 %520  ;;  %1289 = vrsqrt.f32 %v1547_v38  ;;  %vm404_vm1 = vweird.f32 %v1547_v38 }
 0x123   : > { %v573_v9 = vmul.f32 0.5, %v572_v4  ;;  %v1549_v5 = vadd.f32 1e-06, %v437_v37 }
 0x124   : > { %v810_v8 = vmul.f32 %v1480_v40, %v805_v1 }
 0x125   : > { %v574_v11 = vsub.f32 1.5, %v573_v9  ;;  %1291 = vrsqrt.f32 %v1549_v5  ;;  %vm447_vm14 = vweird.f32 %v1549_v5 }
 0x126   : > { %934 = vrot.lane.b32.xlu0 %v930_v32, %s1327_s19  ;;  %814 = vrot.lane.b32.xlu2 %v810_v8, %s1328_s20  ;;  %v1286_v19 = vpop.eup %1285 }
 0x127   : > { %v575_v16 = vmul.f32 %v1284_v60, %v574_v11  ;;  %v508_v20 = vmul.f32 %v1286_v19, %v506_v6  ;;  %vm514_vm9 = vweird.f32 %v1286_v19  ;;  %v1288_v43 = vpop.eup %1287 }
 0x128   : > { %vm515_vm10 = vmor %vm513_vm8, %vm514_vm9  ;;  %v561_v39 = vmul.f32 %v1288_v43, %v558_v34  ;;  %v1571_v51 = vpop.eup %1289  ;;  %vm567_vm12 = vweird.f32 %v1288_v43  ;;  %vm427_vm8 = vcmask 130048   ;;  %vm662_vm9 = vcmask 195584  }
 0x129   : > { %v579_v18 = vsel %vm578_vm7, %v1284_v60, %v575_v16  ;;  %v509_v23 = vmul.f32 %v1286_v19, %v508_v20  ;;  %v399_v60 = vmul.f32 %v1571_v51, %v1547_v38  ;;  %v1612_v20 = vld [vmem:[%s1839_s3 + $0x8] sm:$0xff]  ;;  %vm1614_vm13 = vmor %vm566_vm11, %vm567_vm12  ;;  %vm405_vm2 = vweird.f32 %v1571_v51 }
 0x12a   : > { %v581_v13 = vmul.f32 %v579_v18, %v1414_v2  ;;  %v562_v52 = vmul.f32 %v1288_v43, %v561_v39  ;;  %vm406_vm4 = vmor %vm404_vm1, %vm405_vm2  ;;  %vm1080_vm11 = vcmask 519168  }
 0x12b   : > { %v510_v40 = vmul.f32 0.5, %v509_v23  ;;  %v1573_v53 = vpop.eup %1291  ;;  %v400_v57 = vmul.f32 %v1571_v51, %v399_v60 }
 0x12c   : > { %v563_v59 = vmul.f32 0.5, %v562_v52  ;;  %v442_v61 = vmul.f32 %v1573_v53, %v1549_v5  ;;  %vm448_vm15 = vweird.f32 %v1573_v53 }
 0x12d   : > { %v511_v25 = vsub.f32 1.5, %v510_v40  ;;  %vm449_vm3 = vmor %vm447_vm14, %vm448_vm15 }
 0x12e   : > { %752 = vrot.lane.b32.xlu0 %v750_v56, %s1328_s20  ;;  %816 = vrot.lane.b32.xlu2 %v811_v17, %s1328_s20  ;;  %v564_v11 = vsub.f32 1.5, %v563_v59  ;;  %v443_v14 = vmul.f32 %v1573_v53, %v442_v61 }
 0x12f   : > { %v512_v27 = vmul.f32 %v1286_v19, %v511_v25 }
 0x130   : > { %v444_v18 = vmul.f32 0.5, %v443_v14 }
 0x131   : > { %v516_v28 = vsel %vm515_vm10, %v1286_v19, %v512_v27  ;;  %v565_v19 = vmul.f32 %v1288_v43, %v564_v11  ;;  %vm691_vm10 = vcmask 1043456  }
 0x132   : > { %v517_v30 = vmul.f32 %v516_v28, %v1428_v7 }
 0x133   : > { %v1530_v21 = vpop.permute.xlu1 %584 }
 0x134   : > { %v588_v22 = vmul.f32 %v1530_v21, %v581_v13  ;;  %v1540_v32 = vmul.f32 %v521_v31, %v517_v30  ;;  %v1607_v13 = vld [vmem:[%s1838_s2 + $0x8] sm:$0xff]  ;;  %v569_v30 = vsel %vm1614_vm13, %v1288_v43, %v565_v19 }
 0x135   : > { %v580_v34 = vmul.f32 %v569_v30, %v1416_v3 }
 0x136   : > { %822 = vrot.lane.b32.xlu0 %v810_v8, %s1332_s13  ;;  %601 = vrot.lane.b32.xlu2 %v588_v22, %s1333_s14 }
 0x137   : > { %v587_v38 = vmul.f32 %v1530_v21, %v580_v34 }
 0x13e   : > { %824 = vrot.lane.b32.xlu0 %v811_v17, %s1332_s13  ;;  %v401_v17 = vmul.f32 0.5, %v400_v57 }
 0x140   : > { %v402_v31 = vsub.f32 1.5, %v401_v17 }
 0x146   : > { %593 = vrot.lane.b32.xlu0 %v588_v22, %s1329_s21 }
 0x149   : > { %435 = vadd.xlane.f32.xlu1 %v434_v29  ;;  %v445_v29 = vsub.f32 1.5, %v444_v18 }
 0x14b   : > { %v446_v36 = vmul.f32 %v1573_v53, %v445_v29 }
 0x14e   : > { %529 = vrot.lane.b32.xlu0 %v1540_v32, %s1333_s14 }
 0x170   : > { %v945_v41 = vpop.permute.xlu2 %944 }
 0x171   : > { %v1564_v48 = vmul.f32 %v945_v41, %v1555_v44  ;;  %v955_v35 = vmul.f32 %v945_v41, %v1561_v46  ;;  %v403_v41 = vmul.f32 %v1571_v51, %v402_v31 }
 0x173   : > { %v407_v52 = vsel %vm406_vm4, %v1571_v51, %v403_v41 }
 0x174   : > { %v408_v60 = vmul.f32 %v407_v52, %v1428_v7 }
 0x176   : > { %v1673_v7 = vmul.f32 %v1447_v10, %v408_v60 }
 0x178   : > { %v877_v56 = vpop.permute.xlu2 %876 }
 0x179   : > { %v1592_v45 = vmul.f32 %v877_v56, %v1583_v55  ;;  %v882_v63 = vmul.f32 %v877_v56, %v1578_v54 }
 0x187   : > { %v943_v15 = vpop.permute.xlu1 %942 }
 0x188   : > { %v937_v47 = vpop.permute.xlu0 %936  ;;  %v1619_v24 = vmul.f32 %v943_v15, %v1612_v20  ;;  %v954_v40 = vmul.f32 %v943_v15, %v1607_v13 }
 0x189   : > { %v1567_v49 = vmul.f32 %v937_v47, %v1561_v46  ;;  %v953_v58 = vmul.f32 %v937_v47, %v1555_v44  ;;  %v815_v47 = vpop.permute.xlu2 %814 }
 0x18a   : > { %v1656_v59 = vmul.f32 %v815_v47, %v1607_v13  ;;  %v832_v61 = vmul.f32 %v815_v47, %v1612_v20 }
 0x18b   : > { %v951_v50 = vsub.f32 %v1567_v49, %v1564_v48  ;;  %v957_v6 = vadd.f32 %v955_v35, %v953_v58 }
 0x190   : > { %v873_v62 = vpop.permute.xlu0 %872 }
 0x191   : > { %v1596_v1 = vmul.f32 %v873_v62, %v1578_v54  ;;  %v881_v4 = vmul.f32 %v873_v62, %v1583_v55  ;;  %v757_v33 = vpop.permute.xlu1 %756 }
 0x192   : > { %v1641_v5 = vmul.f32 %v757_v33, %v1583_v55 }
 0x193   : > { %v880_v8 = vsub.f32 %v1596_v1, %v1592_v45  ;;  %v883_v9 = vadd.f32 %v882_v63, %v881_v4 }
 0x195   : > { %v1240_v16 = vpack.i.bf16 %v883_v9, %v957_v6  ;;  %v817_v9 = vpop.permute.xlu2 %816 }
 0x196   : > { %v1679_v57 = vmul.f32 %v817_v9, %v1561_v46 }
 0x197   : > { %1241 = vrot.lane.b32.xlu2 %v1240_v16, %s1331_s11  ;;  %v833_v16 = vmul.f32 %v817_v9, %v1555_v44 }
 0x198   : > { %v935_v22 = vpop.permute.xlu0 %934 }
 0x199   : > { %v1623_v25 = vmul.f32 %v935_v22, %v1607_v13  ;;  %v952_v26 = vmul.f32 %v935_v22, %v1612_v20 }
 0x19b   : > { %v950_v27 = vsub.f32 %v1623_v25, %v1619_v24  ;;  %v956_v28 = vadd.f32 %v954_v40, %v952_v26 }
 0x19d   : > { %960 = vrot.lane.b32.xlu0 %v956_v28, %s1331_s11  ;;  %v602_v18 = vpop.permute.xlu2 %601 }
 0x19e   : > { %v612_v23 = vmul.f32 %v602_v18, %v1561_v46 }
 0x19f   : > { %525 = vrot.lane.b32.xlu2 %v1540_v32, %s1329_s21  ;;  %v450_v32 = vsel %vm449_vm3, %v1573_v53, %v446_v36  ;;  %v762_v53 = vmul.f32 %v757_v33, %v1578_v54 }
 0x1a0   : > { %v753_v37 = vpop.permute.xlu0 %752  ;;  %v461_v58 = vmul.f32 %v450_v32, %v1416_v3 }
 0x1a1   : > { %v1644_v43 = vmul.f32 %v753_v37, %v1578_v54  ;;  %v761_v56 = vmul.f32 %v753_v37, %v1583_v55 }
 0x1a2   : > { %v1668_v4 = vmul.f32 %v1459_v12, %v461_v58 }
 0x1a3   : > { %v760_v39 = vsub.f32 %v1644_v43, %v1641_v5  ;;  %v763_v62 = vadd.f32 %v762_v53, %v761_v56 }
 0x1a5   : > { %599 = vrot.lane.b32.xlu0 %v587_v38, %s1333_s14 }
 0x1a7   : > { %591 = vrot.lane.b32.xlu2 %v587_v38, %s1329_s21  ;;  %s1334_s21 = smov 112  }
 0x1a8   : > { %v823_v21 = vpop.permute.xlu0 %822 }
 0x1a9   : > { %v1662_v35 = vmul.f32 %v823_v21, %v1612_v20  ;;  %v834_v51 = vmul.f32 %v823_v21, %v1607_v13 }
 0x1ab   : > { %v830_v63 = vsub.f32 %v1656_v59, %v1662_v35  ;;  %v836_v3 = vadd.f32 %v834_v51, %v832_v61  ;;  %v1710_v61 = vmul.f32 %v1673_v7, %v1578_v54 }
 0x1ad   : > { %472 = vrot.lane.b32.xlu0 %v1668_v4, %s1334_s21  ;;  %v1245_v6 = vpack.i.bf16 %v836_v3, %v763_v62 }
 0x1af   : > { %415 = vrot.lane.b32.xlu2 %v1673_v7, %s1334_s21  ;;  %1246 = vrot.lane.b32.xlu1 %v1245_v6, %s1331_s11 }
 0x1b0   : > { %v825_v11 = vpop.permute.xlu0 %824 }
 0x1b1   : > { %v1682_v14 = vmul.f32 %v825_v11, %v1555_v44  ;;  %v835_v15 = vmul.f32 %v825_v11, %v1561_v46 }
 0x1b3   : > { %v831_v10 = vsub.f32 %v1679_v57, %v1682_v14  ;;  %v837_v17 = vadd.f32 %v835_v15, %v833_v16  ;;  %v606_v15 = vmul.f32 %v602_v18, %v1555_v44  ;;  %v1223_v57 = vld [vmem:[%s1407_s18 + $0x4] sm:$0xf] }
 0x1b4   : > { %v1208_v14 = vld [vmem:[%s1400_s15] sm:$0xf0]  ;;  %s1203_s15 = sshll.u32 %s1849_s10, 2 }
 0x1b7   : > { %842 = vrot.lane.b32.xlu2 %v837_v17, %s1331_s11 }
 0x1b8   : > { %v594_v19 = vpop.permute.xlu0 %593 }
 0x1b9   : > { %v610_v22 = vmul.f32 %v594_v19, %v1555_v44  ;;  %v598_v9 = vmul.f32 %v594_v19, %v1561_v46 }
 0x1bb   : > { %v614_v26 = vadd.f32 %v612_v23, %v610_v22  ;;  %v608_v24 = vsub.f32 %v598_v9, %v606_v15 }
 0x1bc   : > { %v436_v40 = vpop.xlane.xlu1 %435 }
 0x1bd   : > { %v438_v28 = vmul.f32 %v436_v40, %v1482_v42 }
 0x1bf   : > { %v440_v29 = vadd.f32 1e-06, %v438_v28  ;;  %619 = vrot.lane.b32.xlu2 %v614_v26, %s1331_s11 }
 0x1c1   : > { %1293 = vrsqrt.f32 %v440_v29  ;;  %vm457_vm5 = vweird.f32 %v440_v29 }
 0x1c7   : > { %v1294_v30 = vpop.eup %1293 }
 0x1c8   : > { %v452_v31 = vmul.f32 %v1294_v30, %v440_v29  ;;  %vm458_vm6 = vweird.f32 %v1294_v30 }
 0x1c9   : > { %vm459_vm7 = vmor %vm457_vm5, %vm458_vm6 }
 0x1ca   : > { %v453_v33 = vmul.f32 %v1294_v30, %v452_v31 }
 0x1cc   : > { %v454_v34 = vmul.f32 0.5, %v453_v33  ;;  %v420_v33 = vmul.f32 %v1673_v7, %v1583_v55 }
 0x1ce   : > { %v455_v36 = vsub.f32 1.5, %v454_v34  ;;  %v482_v34 = vmul.f32 %v1668_v4, %v1612_v20 }
 0x1d0   : > { %v456_v37 = vmul.f32 %v1294_v30, %v455_v36 }
 0x1d2   : > { %v460_v41 = vsel %vm459_vm7, %v1294_v30, %v456_v37 }
 0x1d3   : > { %v462_v38 = vmul.f32 %v460_v41, %v1414_v2 }
 0x1d5   : > { %v1695_v47 = vmul.f32 %v1459_v12, %v462_v38  ;;  %v1706_v12 = vpop.permute.xlu0 %529 }
 0x1d6   : > { %v535_v25 = vmul.f32 %v1706_v12, %v1578_v54 }
 0x1d7   : > { %474 = vrot.lane.b32.xlu0 %v1695_v47, %s1334_s21 }
 0x1f1   : > { %v1242_v42 = vpop.permute.xlu2 %1241 }
 0x1f2   : > { %v1243_v32 = vunpack.i.l.bf16 %v1242_v42  ;;  %v1244_v48 = vunpack.i.h.bf16 %v1242_v42 }
 0x1f4   : > { %v967_v52 = vsel %vm427_vm8, %v951_v50, %v1243_v32  ;;  %v888_v62 = vsel %vm427_vm8, %v880_v8, %v1244_v48 }
 0x1f5   : > { %v971_v56 = vpack.c.bf16 %v967_v52, %v967_v52 }
 0x1f7   : > { %v982_v58 = vsel %vm385_vm0, %v971_v56, 0 }
 0x1f8   : > { %990 = vmatpush.bf16.xpose.msra.mxu2 %v982_v58 }
 0x1f9   : > { %v1704_v21 = vpop.permute.xlu2 %525 }
 0x1fa   : > { %v534_v16 = vmul.f32 %v1704_v21, %v1583_v55  ;;  %v528_v48 = vmul.f32 %v1704_v21, %v1578_v54 }
 0x1fc   : > { %v536_v22 = vadd.f32 %v535_v25, %v534_v16 }
 0x201   : > { %v592_v2 = vpop.permute.xlu2 %591 }
 0x202   : > { %v597_v45 = vmul.f32 %v592_v2, %v1607_v13  ;;  %v609_v1 = vmul.f32 %v592_v2, %v1612_v20 }
 0x209   : > { %v416_v60 = vpop.permute.xlu2 %415 }
 0x20a   : > { %v1713_v53 = vmul.f32 %v416_v60, %v1583_v55  ;;  %v421_v30 = vmul.f32 %v416_v60, %v1578_v54 }
 0x20c   : > { %v419_v49 = vsub.f32 %v1710_v61, %v1713_v53  ;;  %v422_v41 = vadd.f32 %v421_v30, %v420_v33 }
 0x20f   : > { %v961_v50 = vpop.permute.xlu0 %960 }
 0x210   : > { %v966_v51 = vsel %vm427_vm8, %v950_v27, %v961_v50  ;;  %v532_v50 = vmul.f32 %v1706_v12, %v1583_v55 }
 0x211   : > { %v843_v3 = vpop.permute.xlu2 %842  ;;  %v970_v6 = vpack.c.bf16 %v966_v51, %v888_v62 }
 0x212   : > { %v847_v2 = vsel %vm427_vm8, %v831_v10, %v843_v3  ;;  %v1771_v10 = vor.u32 %v1223_v57, %v1208_v14 }
 0x213   : > { %v979_v11 = vsel %vm385_vm0, %v970_v6, 0  ;;  %v969_v5 = vpack.c.bf16 %v847_v2, %v847_v2 }
 0x214   : > { %991 = vmatpush.bf16.xpose.msra.mxu2 %v979_v11 }
 0x217   : > { %v600_v27 = vpop.permute.xlu0 %599 }
 0x218   : > { %v605_v8 = vmul.f32 %v600_v27, %v1612_v20  ;;  %v611_v17 = vmul.f32 %v600_v27, %v1607_v13 }
 0x219   : > { %v620_v19 = vpop.permute.xlu2 %619 }
 0x21a   : > { %v607_v23 = vsub.f32 %v597_v45, %v605_v8  ;;  %v613_v18 = vadd.f32 %v611_v17, %v609_v1  ;;  %v624_v40 = vsel %vm427_vm8, %v608_v24, %v620_v19  ;;  %v468_v24 = vmul.f32 %v1668_v4, %v1607_v13 }
 0x21b   : > { %v628_v26 = vpack.c.bf16 %v624_v40, %v624_v40 }
 0x21c   : > { %v1250_v28 = vpack.i.bf16 %v613_v18, %v536_v22 }
 0x21d   : > { %v639_v29 = vsel %vm385_vm0, %v628_v26, 0 }
 0x21e   : > { %1251 = vrot.lane.b32.xlu0 %v1250_v28, %s1331_s11  ;;  %647 = vmatpush.bf16.xpose.msra.mxu0 %v639_v29 }
 0x21f   : > { %v473_v31 = vpop.permute.xlu0 %472 }
 0x220   : > { %v484_v36 = vmul.f32 %v473_v31, %v1607_v13  ;;  %v478_v15 = vmul.f32 %v473_v31, %v1612_v20  ;;  %v469_v13 = vmul.f32 %v1695_v47, %v1561_v46 }
 0x221   : > { %v1247_v37 = vpop.permute.xlu1 %1246 }
 0x222   : > { %v486_v38 = vadd.f32 %v484_v36, %v482_v34  ;;  %v1249_v42 = vunpack.i.h.bf16 %v1247_v37  ;;  %v1248_v32 = vunpack.i.l.bf16 %v1247_v37  ;;  %v480_v21 = vsub.f32 %v468_v24, %v478_v15 }
 0x224   : > { %v1255_v52 = vpack.i.bf16 %v486_v38, %v422_v41  ;;  %v768_v56 = vsel %vm427_vm8, %v760_v39, %v1248_v32  ;;  %v846_v7 = vsel %vm427_vm8, %v830_v63, %v1249_v42  ;;  %v483_v39 = vmul.f32 %v1695_v47, %v1555_v44 }
 0x225   : > { %v968_v58 = vpack.c.bf16 %v846_v7, %v768_v56  ;;  %v373_v63 = vunpack.c.h.bf16 %v1410_v0  ;;  %v533_v0 = vsub.f32 %v528_v48, %v532_v50 }
 0x226   : > { %1256 = vrot.lane.b32.xlu1 %v1255_v52, %s1331_s11 }
 0x227   : > { %1214 = vmatmul.msk.bf16.vlgmr.msra.gmra.mxu2 %vm385_vm0, %v968_v58  ;;  %v1765_v60 = vpack.c.bf16 %v373_v63, %v373_v63 }
 0x237   : > { %1215 = vmatmul.msk.bf16.gmra.mxu2 %vm385_vm0, %v969_v5 }
 0x249   : > { %v475_v43 = vpop.permute.xlu0 %474 }
 0x24a   : > { %v485_v59 = vmul.f32 %v475_v43, %v1561_v46  ;;  %v479_v20 = vmul.f32 %v475_v43, %v1555_v44 }
 0x24c   : > { %v487_v35 = vadd.f32 %v485_v59, %v483_v39  ;;  %v481_v4 = vsub.f32 %v469_v13, %v479_v20 }
 0x24e   : > { %492 = vrot.lane.b32.xlu2 %v487_v35, %s1331_s11  ;;  %s358_s11 = scalar_lea.vmem %s1844_s8, %s1203_s15 }
 0x256   : > { %1029 = vrot.lane.b32.xlu2 %v1765_v60, %s1328_s20 }
 0x25e   : > { %1027 = vrot.lane.b32.xlu2 %v1771_v10, %s1328_s20 }
 0x290   : > { %v1252_v51 = vpop.permute.xlu0 %1251 }
 0x291   : > { %v1254_v62 = vunpack.i.h.bf16 %v1252_v51  ;;  %v1253_v3 = vunpack.i.l.bf16 %v1252_v51 }
 0x293   : > { %v541_v6 = vsel %vm427_vm8, %v533_v0, %v1253_v3  ;;  %v623_v9 = vsel %vm427_vm8, %v607_v23, %v1254_v62  ;;  %v693_v0 = vsel %vm691_vm10, %v1765_v60, 0 }
 0x294   : > { %v627_v11 = vpack.c.bf16 %v623_v9, %v541_v6  ;;  %701 = vmatpush.bf16.msra.mxu1 %v693_v0 }
 0x296   : > { %v636_v16 = vsel %vm385_vm0, %v627_v11, 0 }
 0x297   : > { %648 = vmatpush.bf16.xpose.msra.mxu0 %v636_v16 }
 0x298   : > { %v1257_v54 = vpop.permute.xlu1 %1256  ;;  %702 = vmatpush.bf16.msra.mxu1 %v1771_v10 }
 0x299   : > { %v1259_v55 = vunpack.i.h.bf16 %v1257_v54  ;;  %v1258_v12 = vunpack.i.l.bf16 %v1257_v54 }
 0x29b   : > { %v428_v25 = vsel %vm427_vm8, %v419_v49, %v1258_v12  ;;  %v496_v27 = vsel %vm427_vm8, %v480_v21, %v1259_v55 }
 0x29c   : > { %v625_v45 = vpack.c.bf16 %v496_v27, %v428_v25 }
 0x29e   : > { %1206 = vmatmul.msk.bf16.vlgmr.msra.gmra.mxu0 %vm385_vm0, %v625_v45 }
 0x2a8   : > { %v493_v1 = vpop.permute.xlu2 %492 }
 0x2a9   : > { %v497_v8 = vsel %vm427_vm8, %v481_v4, %v493_v1 }
 0x2aa   : > { %v993_v17 = vpop.f32.mrf.mxu2  ;;  %v626_v61 = vpack.c.bf16 %v497_v8, %v497_v8 }
 0x2ab   : > { %v1002_v19 = vmul.f32 0.17677669, %v993_v17 }
 0x2ad   : > { %v1005_v53 = vsel %vm662_vm9, %v1002_v19, -inf }
 0x2ae   : > { %1207 = vmatmul.msk.bf16.gmra.mxu0 %vm385_vm0, %v626_v61  ;;  %1006 = vmax.xlane.f32.xlu0 %v1005_v53 }
 0x2b0   : > { %v1030_v49 = vpop.permute.xlu2 %1029 }
 0x2b1   : > { %v1039_v44 = vsel %vm691_vm10, %v1030_v49, 0 }
 0x2b2   : > { %v995_v22 = vpop.f32.mrf.mxu2  ;;  %1047 = vmatpush.bf16.msra.mxu3 %v1039_v44 }
 0x2b3   : > { %v1003_v46 = vmul.f32 0.17677669, %v995_v22 }
 0x2b5   : > { %v1008_v47 = vsel %vm662_vm9, %v1003_v46, -inf }
 0x2b6   : > { %1009 = vmax.xlane.f32.xlu1 %v1008_v47 }
 0x2b8   : > { %v1028_v28 = vpop.permute.xlu2 %1027 }
 0x2b9   : > { %1048 = vmatpush.bf16.msra.mxu3 %v1028_v28 }
 0x2ba   : > { %v998_v23 = vpop.f32.mrf.mxu2 }
 0x2bb   : > { %v1004_v18 = vmul.f32 0.17677669, %v998_v23 }
 0x2bd   : > { %v1011_v40 = vsel %vm662_vm9, %v1004_v18, -inf }
 0x2be   : > { %1012 = vmax.xlane.f32.xlu2 %v1011_v40 }
 0x2c2   : > { %v1000_v26 = vpop.f32.mrf.mxu2 }
 0x31b   : > { %v650_v29 = vpop.f32.mrf.mxu0 }
 0x31c   : > { %v659_v30 = vmul.f32 0.17677669, %v650_v29 }
 0x31e   : > { %v663_v31 = vsel %vm662_vm9, %v659_v30, -inf }
 0x31f   : > { %664 = vmax.xlane.f32.xlu0 %v663_v31 }
 0x321   : > { %v1007_v33 = vpop.xlane.xlu0 %1006 }
 0x322   : > { %v1014_v34 = vsub.f32 %v1002_v19, %v1007_v33 }
 0x323   : > { %v652_v36 = vpop.f32.mrf.mxu0 }
 0x324   : > { %v1017_v37 = vmul.f32 1.442695, %v1014_v34  ;;  %v660_v41 = vmul.f32 0.17677669, %v652_v36 }
 0x326   : > { %1295 = vpow2.f32 %v1017_v37  ;;  %v666_v38 = vsel %vm662_vm9, %v660_v41, -inf }
 0x327   : > { %667 = vmax.xlane.f32.xlu1 %v666_v38 }
 0x329   : > { %v1010_v42 = vpop.xlane.xlu1 %1009 }
 0x32a   : > { %v1015_v32 = vsub.f32 %v1003_v46, %v1010_v42 }
 0x32b   : > { %v655_v52 = vpop.f32.mrf.mxu0 }
 0x32c   : > { %v1296_v56 = vpop.eup %1295  ;;  %v1019_v7 = vmul.f32 1.442695, %v1015_v32  ;;  %v661_v58 = vmul.f32 0.17677669, %v655_v52 }
 0x32d   : > { %v1059_v2 = vsel %vm662_vm9, %v1296_v56, 0.0 }
 0x32e   : > { %1297 = vpow2.f32 %v1019_v7  ;;  %v669_v5 = vsel %vm662_vm9, %v661_v58, -inf }
 0x32f   : > { %670 = vmax.xlane.f32.xlu0 %v669_v5  ;;  %1060 = vadd.xlane.f32.xlu1 %v1059_v2 }
 0x331   : > { %v1013_v43 = vpop.xlane.xlu2 %1012 }
 0x332   : > { %v1016_v39 = vsub.f32 %v1004_v18, %v1013_v43 }
 0x333   : > { %v657_v59 = vpop.f32.mrf.mxu0 }
 0x334   : > { %v1298_v35 = vpop.eup %1297  ;;  %v1021_v63 = vmul.f32 1.442695, %v1016_v39 }
 0x335   : > { %v1062_v57 = vsel %vm662_vm9, %v1298_v35, 0.0  ;;  %v1023_v14 = vpack.c.bf16 %v1298_v35, %v1296_v56 }
 0x336   : > { %1299 = vpow2.f32 %v1021_v63 }
 0x337   : > { %1063 = vadd.xlane.f32.xlu0 %v1062_v57  ;;  %1216 = vmatmul.msk.bf16.vlgmr.msra.gmra.mxu3 %vm662_vm9, %v1023_v14 }
 0x33c   : > { %v1300_v48 = vpop.eup %1299 }
 0x33d   : > { %v1065_v50 = vsel %vm662_vm9, %v1300_v48, 0.0  ;;  %v1024_v51 = vpack.c.bf16 %v1300_v48, %v1300_v48 }
 0x33e   : > { %1066 = vadd.xlane.f32.xlu1 %v1065_v50 }
 0x347   : > { %1217 = vmatmul.msk.bf16.gmra.mxu3 %vm662_vm9, %v1024_v51 }
 0x392   : > { %v665_v62 = vpop.xlane.xlu0 %664 }
 0x393   : > { %v672_v3 = vsub.f32 %v659_v30, %v665_v62 }
 0x395   : > { %v675_v6 = vmul.f32 1.442695, %v672_v3 }
 0x397   : > { %1301 = vpow2.f32 %v675_v6 }
 0x39a   : > { %v668_v9 = vpop.xlane.xlu1 %667 }
 0x39b   : > { %v673_v11 = vsub.f32 %v660_v41, %v668_v9 }
 0x39d   : > { %v1302_v15 = vpop.eup %1301  ;;  %v677_v16 = vmul.f32 1.442695, %v673_v11 }
 0x39e   : > { %v713_v24 = vsel %vm662_vm9, %v1302_v15, 0.0 }
 0x39f   : > { %1303 = vpow2.f32 %v677_v16  ;;  %714 = vadd.xlane.f32.xlu2 %v713_v24 }
 0x3a2   : > { %v671_v54 = vpop.xlane.xlu0 %670  ;;  %v1061_v20 = vpop.xlane.xlu1 %1060 }
 0x3a3   : > { %v674_v21 = vsub.f32 %v661_v58, %v671_v54 }
 0x3a5   : > { %v1304_v55 = vpop.eup %1303  ;;  %v679_v12 = vmul.f32 1.442695, %v674_v21 }
 0x3a6   : > { %v716_v60 = vsel %vm662_vm9, %v1304_v55, 0.0  ;;  %v681_v25 = vpack.c.bf16 %v1304_v55, %v1302_v15 }
 0x3a7   : > { %1305 = vpow2.f32 %v679_v12  ;;  %717 = vadd.xlane.f32.xlu0 %v716_v60 }
 0x3a8   : > { %1212 = vmatmul.msk.bf16.vlgmr.msra.gmra.mxu1 %vm662_vm9, %v681_v25  ;;  %1307 = vrcp.f32 %v1061_v20 }
 0x3aa   : > { %v1064_v13 = vpop.xlane.xlu0 %1063 }
 0x3ab   : > { %1309 = vrcp.f32 %v1064_v13 }
 0x3ad   : > { %v1306_v10 = vpop.eup %1305 }
 0x3ae   : > { %v719_v27 = vsel %vm662_vm9, %v1306_v10, 0.0  ;;  %v682_v45 = vpack.c.bf16 %v1306_v10, %v1306_v10  ;;  %v1308_v1 = vpop.eup %1307 }
 0x3af   : > { %720 = vadd.xlane.f32.xlu1 %v719_v27 }
 0x3b1   : > { %v1067_v8 = vpop.xlane.xlu1 %1066  ;;  %v1310_v17 = vpop.eup %1309 }
 0x3b2   : > { %1311 = vrcp.f32 %v1067_v8 }
 0x3b8   : > { %1213 = vmatmul.msk.bf16.gmra.mxu1 %vm662_vm9, %v682_v45  ;;  %v1312_v44 = vpop.eup %1311 }
 0x3ba   : > { %v1050_v4 = vpop.f32.mrf.mxu3 }
 0x3bb   : > { %v1071_v61 = vmul.f32 %v1308_v1, %v1050_v4 }
 0x3c2   : > { %v1052_v19 = vpop.f32.mrf.mxu3 }
 0x3c3   : > { %v1072_v53 = vmul.f32 %v1310_v17, %v1052_v19 }
 0x3c5   : > { %v1260_v49 = vpack.i.bf16 %v1072_v53, %v1071_v61 }
 0x3c7   : > { %1261 = vrot.lane.b32.xlu2 %v1260_v49, %s1327_s19 }
 0x3ca   : > { %v1055_v22 = vpop.f32.mrf.mxu3 }
 0x3cb   : > { %v1073_v46 = vmul.f32 %v1312_v44, %v1055_v22 }
 0x3cd   : > { %1086 = vrot.lane.b32.xlu0 %v1073_v46, %s1327_s19 }
 0x3d2   : > { %v1057_v47 = vpop.f32.mrf.mxu3 }
 0x412   : > { %v715_v23 = vpop.xlane.xlu2 %714 }
 0x413   : > { %1313 = vrcp.f32 %v715_v23 }
 0x419   : > { %v1314_v26 = vpop.eup %1313 }
 0x41a   : > { %v718_v40 = vpop.xlane.xlu0 %717 }
 0x41b   : > { %1315 = vrcp.f32 %v718_v40 }
 0x421   : > { %v1262_v18 = vpop.permute.xlu2 %1261  ;;  %v1316_v34 = vpop.eup %1315 }
 0x422   : > { %v1263_v29 = vunpack.i.l.bf16 %v1262_v18  ;;  %v1264_v37 = vunpack.i.h.bf16 %v1262_v18  ;;  %v721_v32 = vpop.xlane.xlu1 %720 }
 0x423   : > { %1317 = vrcp.f32 %v721_v32 }
 0x425   : > { %v704_v28 = vpop.f32.mrf.mxu1 }
 0x426   : > { %v725_v30 = vmul.f32 %v1314_v26, %v704_v28 }
 0x428   : > { %v1078_v31 = vsel %vm385_vm0, %v725_v30, %v1263_v29 }
 0x429   : > { %v1079_v33 = vpack.c.bf16 %v1078_v31, %v1078_v31  ;;  %v1318_v56 = vpop.eup %1317 }
 0x42b   : > { %1081 = vst.msk [vmem:[%s358_s11] sm:$0xf] %vm1080_vm11, %v1079_v33 }
 0x42d   : > { %v706_v36 = vpop.f32.mrf.mxu1 }
 0x42e   : > { %v726_v41 = vmul.f32 %v1316_v34, %v706_v36 }
 0x430   : > { %v1090_v38 = vsel %vm385_vm0, %v726_v41, %v1264_v37 }
 0x431   : > { %v1092_v42 = vpack.c.bf16 %v1090_v38, %v1090_v38 }
 0x433   : > { %1094 = vst.msk [vmem:[%s363_s17] sm:$0xf] %vm1080_vm11, %v1092_v42 }
 0x435   : > { %v709_v52 = vpop.f32.mrf.mxu1 }
 0x436   : > { %v727_v58 = vmul.f32 %v1318_v56, %v709_v52 }
 0x43d   : > { %v711_v7 = vpop.f32.mrf.mxu1 }
 0x43f   : > { %v1087_v2 = vpop.permute.xlu0 %1086 }
 0x440   : > { %v1091_v5 = vsel %vm385_vm0, %v727_v58, %v1087_v2 }
 0x441   : > { %v1093_v43 = vpack.c.bf16 %v1091_v5, %v1091_v5 }
 0x443   : > { %1095 = vst.msk [vmem:[%s363_s17 + $0x4] sm:$0xf] %vm1080_vm11, %v1093_v43 }
 0x444 PF: > { %s20_s30 = sadd.s32 1, %s1325_s30  }
 0x445   : > { %p17_p4 = scmp.ge.s32.totalorder %s20_s30, 4  }
 0x447   :  { %19 = sbr.rel (!%p17_p4) target bundleno = 1 (0x1), region = 97 }

// kernel: step_fn.25
= control target key start
LH: loop header
LB: loop body
LE: loop exit
PB: predicated region body
PF: predicated region fallthrough
CT: control target
= control target key end

     0   :  { %s1016_s27 = smov 0   ;;  %s1185_s0 = inlined_call_operand.vmem [shape: bf16[2,16,64], index: 0, kind: input, shape index: {}]   ;;  %s1186_s1 = inlined_call_operand.vmem [shape: f32[2,1,64], index: 1, kind: input, shape index: {}]   ;;  %s1187_s2 = inlined_call_operand.vmem [shape: f32[2,1,64], index: 2, kind: input, shape index: {}]   ;;  %s1188_s3 = inlined_call_operand.vmem [shape: f32[2,1,64], index: 3, kind: input, shape index: {}]   ;;  %s1189_s4 = inlined_call_operand.vmem [shape: bf16[64,256], index: 4, kind: input, shape index: {}]   ;;  %s1190_s5 = inlined_call_operand.vmem [shape: f32[1,256], index: 5, kind: input, shape index: {}]   ;;  %s1191_s6 = inlined_call_operand.vmem [shape: bf16[256,64], index: 6, kind: input, shape index: {}]   ;;  %s1192_s7 = inlined_call_operand.vmem [shape: f32[1,64], index: 7, kind: input, shape index: {}]   ;;  %s1193_s8 = inlined_call_operand.vmem [shape: bf16[2,16,64], index: 8, kind: output, shape index: {}]  }
   0x1 LB: > { %s797_s28 = sadd.s32 4294967295, %s968_s27   ;;  %p801_p0 = scmp.ge.s32.totalorder %s968_s27, 1  ;;  %s968_s27 = sphi %s1016_s27, %s18_s27  }
   0x2   : > { %p286_p1 = scmp.lt.s32.totalorder %s968_s27, 3 }
   0x4   : > { %p287_p2 = pnand %p801_p0, %p286_p1 }
   0x5   : > { %p329_p3 = scmp.lt.s32.totalorder (!%p287_p2), %s797_s28, 1 }
   0x6   : > { %290 = sbr.rel (%p287_p2) target bundleno = 607 (0x25f), region = 52 }
   0xb   : > { %s1195_s28 = smov (!%p329_p3, %s797_s28), 1  ;;  %vm355_vm0 = vcmask 523264   ;;  %v970_v5 = vmov 64.0   ;;  %v832_v22 = vld [vmem:[%s1189_s4 + $0x30] sm:$0xf]  ;;  %vm712_vm8 = vcmask 519168  }
   0xc   : > { %s906_s29 = sshll.u32 %s1195_s28, 3  ;;  %948 = vrcp.f32 %v970_v5  ;;  %s336_s13 = scalar_lea.vmem %s1186_s1, %s1195_s28  ;;  %v915_v23 = vld [vmem:[%s1189_s4 + $0x34] sm:$0xf0]  ;;  %v914_v24 = vld [vmem:[%s1189_s4 + $0x34] sm:$0xf] }
   0xd   : > { %s333_s10 = scalar_lea.vmem %s1185_s0, %s906_s29  ;;  %v833_v25 = vor.u32 %v915_v23, %v832_v22  ;;  %v834_v26 = vld [vmem:[%s1189_s4 + $0x38] sm:$0xf0]  ;;  %v824_v28 = vld [vmem:[%s1189_s4 + $0x20] sm:$0xf]  ;;  %v913_v29 = vld [vmem:[%s1189_s4 + $0x24] sm:$0xf0]  ;;  %s339_s11 = scalar_lea.vmem %s1187_s2, %s1195_s28 }
   0xe   : > { %v933_v0 = vld [vmem:[%s333_s10] sm:$0xff]   ;;  %v837_v27 = vor.u32 %v914_v24, %v834_v26  ;;  %v825_v31 = vor.u32 %v913_v29, %v824_v28  ;;  %v826_v32 = vld [vmem:[%s1189_s4 + $0x28] sm:$0xf0]  ;;  %v816_v34 = vld [vmem:[%s1189_s4 + $0x10] sm:$0xf]  ;;  %s342_s12 = scalar_lea.vmem %s1188_s3, %s1195_s28  ;;  %s347_s18 = scalar_lea.vmem %s1193_s8, %s906_s29 }
   0xf   : > { %v1032_v1 = vunpack.c.l.bf16 %v933_v0  ;;  %v1036_v3 = vunpack.c.h.bf16 %v933_v0  ;;  %480 = vmatpush.bf16.msra.mxu0 %v833_v25  ;;  %v912_v30 = vld [vmem:[%s1189_s4 + $0x24] sm:$0xf]  ;;  %v911_v35 = vld [vmem:[%s1189_s4 + $0x14] sm:$0xf0]  ;;  %v910_v36 = vld [vmem:[%s1189_s4 + $0x14] sm:$0xf] }
  0x10   : > { %494 = vmatpush.bf16.msra.mxu1 %v837_v27  ;;  %v829_v33 = vor.u32 %v912_v30, %v826_v32  ;;  %v817_v37 = vor.u32 %v911_v35, %v816_v34  ;;  %v818_v38 = vld [vmem:[%s1189_s4 + $0x18] sm:$0xf0]  ;;  %v808_v40 = vld [vmem:[%s1189_s4] sm:$0xf]  ;;  %v909_v41 = vld [vmem:[%s1189_s4 + $0x4] sm:$0xf0] }
  0x11   : > { %v356_v2 = vsel %vm355_vm0, %v1032_v1, 0.0  ;;  %v359_v4 = vsel %vm355_vm0, %v1036_v3, 0.0  ;;  %v821_v39 = vor.u32 %v910_v36, %v818_v38  ;;  %v908_v42 = vld [vmem:[%s1189_s4 + $0x4] sm:$0xf]  ;;  %v809_v44 = vor.u32 %v909_v41, %v808_v40  ;;  %v810_v45 = vld [vmem:[%s1189_s4 + $0x8] sm:$0xf0] }
  0x12   : > { %357 = vadd.xlane.f32.xlu0 %v356_v2  ;;  %v949_v6 = vpop.eup %948  ;;  %v813_v47 = vor.u32 %v908_v42, %v810_v45  ;;  %v354_v60 = vld [vmem:[%s339_s11] sm:$0x1]  ;;  %v919_v23 = vld [vmem:[%s1191_s6 + $0x18] sm:$0xff]  ;;  %v918_v25 = vld [vmem:[%s1191_s6 + $0x10] sm:$0xff] }
  0x13   : > { %v363_v7 = vmul.f32 64.0, %v949_v6  ;;  %vm367_vm1 = vweird.f32 %v949_v6  ;;  %481 = vmatpush.bf16.msra.mxu0 %v825_v31  ;;  %v383_v62 = vadd.f32 1.0, %v354_v60  ;;  %v928_v22 = vld [vmem:[%s1191_s6 + $0x60] sm:$0xff]  ;;  %v927_v24 = vld [vmem:[%s1191_s6 + $0x58] sm:$0xff]  ;;  %v926_v26 = vld [vmem:[%s1191_s6 + $0x50] sm:$0xff] }
  0x14   : > { %495 = vmatpush.bf16.msra.mxu1 %v829_v33  ;;  %v917_v27 = vld [vmem:[%s1191_s6 + $0x8] sm:$0xff]  ;;  %v427_v29 = vld [vmem:[%s1190_s5] sm:$0x3] }
  0x15   : > { %v364_v8 = vsub.f32 1.0, %v363_v7  ;;  %v409_v5 = vperm.slane %v383_v62, 0  ;;  %v925_v28 = vld [vmem:[%s1191_s6 + $0x48] sm:$0xff]  ;;  %v429_v30 = vperm.slane %v427_v29, 0  ;;  %v430_v31 = vperm.slane %v427_v29, 1  ;;  %v916_v32 = vld [vmem:[%s1191_s6] sm:$0xff] }
  0x16   : > { %v924_v33 = vld [vmem:[%s1191_s6 + $0x40] sm:$0xff] }
  0x17   : > { %v365_v9 = vmul.f32 %v949_v6, %v364_v8  ;;  %482 = vmatpush.bf16.msra.mxu0 %v817_v37 }
  0x18   : > { %496 = vmatpush.bf16.msra.mxu1 %v821_v39 }
  0x19   : > { %v366_v10 = vadd.f32 %v949_v6, %v365_v9 }
  0x1a   : > { %360 = vadd.xlane.f32.xlu0 %v359_v4 }
  0x1b   : > { %v368_v11 = vsel %vm367_vm1, %v949_v6, %v366_v10  ;;  %483 = vmatpush.bf16.msra.mxu0 %v809_v44  ;;  %v945_v10 = vld [vmem:[%s336_s13] ss:$0 sm:$0xff] }
  0x1c   : > { %497 = vmatpush.bf16.msra.mxu1 %v813_v47 }
  0x85   : > { %v358_v12 = vpop.xlane.xlu0 %357 }
  0x86   : > { %v369_v13 = vmul.f32 %v368_v11, %v358_v12 }
  0x88   : > { %v1041_v14 = vsub.f32 %v1032_v1, %v369_v13 }
  0x8a   : > { %v373_v15 = vmul.f32 %v1041_v14, %v1041_v14 }
  0x8c   : > { %v375_v16 = vsel %vm355_vm0, %v373_v15, 0.0 }
  0x8d   : > { %376 = vadd.xlane.f32.xlu1 %v375_v16  ;;  %v361_v17 = vpop.xlane.xlu0 %360  ;;  %v931_v16 = vld [vmem:[%s1191_s6 + $0x78] sm:$0xff] }
  0x8e   : > { %v370_v18 = vmul.f32 %v368_v11, %v361_v17  ;;  %688 = vmatpush.bf16.msra.mxu3 %v931_v16  ;;  %v922_v17 = vld [vmem:[%s1191_s6 + $0x30] sm:$0xff] }
  0x90   : > { %v1047_v19 = vsub.f32 %v1036_v3, %v370_v18  ;;  %v930_v18 = vld [vmem:[%s1191_s6 + $0x70] sm:$0xff] }
  0x92   : > { %v374_v20 = vmul.f32 %v1047_v19, %v1047_v19  ;;  %689 = vmatpush.bf16.msra.mxu3 %v930_v18  ;;  %v946_v18 = vld [vmem:[%s1192_s7] ss:$0 sm:$0xff] }
  0x94   : > { %v378_v21 = vsel %vm355_vm0, %v374_v20, 0.0  ;;  %v929_v20 = vld [vmem:[%s1191_s6 + $0x68] sm:$0xff] }
  0x95   : > { %379 = vadd.xlane.f32.xlu1 %v378_v21  ;;  %v920_v21 = vld [vmem:[%s1191_s6 + $0x20] sm:$0xff] }
  0x96   : > { %690 = vmatpush.bf16.msra.mxu3 %v929_v20 }
  0x9a   : > { %691 = vmatpush.bf16.msra.mxu3 %v928_v22  ;;  %v947_v22 = vld [vmem:[%s342_s12] ss:$0 sm:$0xff] }
  0x9e   : > { %692 = vmatpush.bf16.msra.mxu3 %v927_v24 }
  0xa2   : > { %693 = vmatpush.bf16.msra.mxu3 %v926_v26 }
  0xa6   : > { %694 = vmatpush.bf16.msra.mxu3 %v925_v28 }
  0xaa   : > { %695 = vmatpush.bf16.msra.mxu3 %v924_v33 }
 0x100   : > { %v377_v43 = vpop.xlane.xlu1 %376 }
 0x101   : > { %v381_v46 = vmul.f32 %v377_v43, %v368_v11 }
 0x103   : > { %v384_v48 = vadd.f32 1e-06, %v381_v46 }
 0x105   : > { %950 = vrsqrt.f32 %v384_v48  ;;  %vm392_vm3 = vweird.f32 %v384_v48 }
 0x108   : > { %v380_v49 = vpop.xlane.xlu1 %379 }
 0x109   : > { %v382_v50 = vmul.f32 %v380_v49, %v368_v11 }
 0x10b   : > { %v951_v51 = vpop.eup %950  ;;  %v385_v52 = vadd.f32 1e-06, %v382_v50 }
 0x10c   : > { %v387_v53 = vmul.f32 %v951_v51, %v384_v48  ;;  %vm393_vm2 = vweird.f32 %v951_v51 }
 0x10d   : > { %952 = vrsqrt.f32 %v385_v52  ;;  %vm394_vm4 = vmor %vm392_vm3, %vm393_vm2  ;;  %vm402_vm6 = vweird.f32 %v385_v52 }
 0x10e   : > { %v388_v54 = vmul.f32 %v951_v51, %v387_v53 }
 0x110   : > { %v389_v55 = vmul.f32 0.5, %v388_v54 }
 0x112   : > { %v390_v56 = vsub.f32 1.5, %v389_v55 }
 0x113   : > { %v953_v57 = vpop.eup %952 }
 0x114   : > { %v391_v58 = vmul.f32 %v951_v51, %v390_v56  ;;  %v397_v59 = vmul.f32 %v953_v57, %v385_v52  ;;  %vm403_vm5 = vweird.f32 %v953_v57 }
 0x115   : > { %vm404_vm7 = vmor %vm402_vm6, %vm403_vm5 }
 0x116   : > { %v398_v61 = vmul.f32 %v953_v57, %v397_v59  ;;  %v395_v63 = vsel %vm394_vm4, %v951_v51, %v391_v58 }
 0x117   : > { %v406_v4 = vmul.f32 %v395_v63, %v1041_v14  ;;  %v923_v14 = vld [vmem:[%s1191_s6 + $0x38] sm:$0xff] }
 0x118   : > { %v399_v0 = vmul.f32 0.5, %v398_v61  ;;  %674 = vmatpush.bf16.msra.mxu2 %v923_v14 }
 0x119   : > { %v411_v9 = vmul.f32 %v409_v5, %v406_v4 }
 0x11a   : > { %v400_v2 = vsub.f32 1.5, %v399_v0 }
 0x11b   : > { %v416_v12 = vadd.f32 %v945_v10, %v411_v9 }
 0x11c   : > { %v401_v6 = vmul.f32 %v953_v57, %v400_v2  ;;  %675 = vmatpush.bf16.msra.mxu2 %v922_v17 }
 0x11e   : > { %v405_v7 = vsel %vm404_vm7, %v953_v57, %v401_v6 }
 0x11f   : > { %v407_v8 = vmul.f32 %v405_v7, %v1047_v19  ;;  %v921_v19 = vld [vmem:[%s1191_s6 + $0x28] sm:$0xff] }
 0x120   : > { %676 = vmatpush.bf16.msra.mxu2 %v921_v19 }
 0x121   : > { %v412_v11 = vmul.f32 %v409_v5, %v407_v8 }
 0x123   : > { %v417_v13 = vadd.f32 %v945_v10, %v412_v11 }
 0x124   : > { %677 = vmatpush.bf16.msra.mxu2 %v920_v21 }
 0x125   : > { %v418_v15 = vpack.c.bf16 %v417_v13, %v416_v12 }
 0x127   : > { %838 = vmatmul.msk.bf16.vlgmr.msra.gmra.mxu0 %vm355_vm0, %v418_v15  ;;  %839 = vmatmul.msk.bf16.vlgmr.msra.gmra.mxu1 %vm355_vm0, %v418_v15 }
 0x128   : > { %678 = vmatpush.bf16.msra.mxu2 %v919_v23 }
 0x12c   : > { %679 = vmatpush.bf16.msra.mxu2 %v918_v25 }
 0x130   : > { %680 = vmatpush.bf16.msra.mxu2 %v917_v27 }
 0x134   : > { %681 = vmatpush.bf16.msra.mxu2 %v916_v32 }
 0x1a4   : > { %v485_v34 = vpop.f32.mrf.mxu0  ;;  %v499_v35 = vpop.f32.mrf.mxu1 }
 0x1a5   : > { %v486_v36 = vadd.f32 %v485_v34, %v429_v30  ;;  %v500_v37 = vadd.f32 %v499_v35, %v430_v31 }
 0x1a7   : > { %v504_v38 = vmul.f32 %v486_v36, %v486_v36  ;;  %v505_v39 = vmul.f32 %v500_v37, %v500_v37 }
 0x1a9   : > { %v508_v40 = vmul.f32 %v504_v38, %v486_v36  ;;  %v509_v41 = vmul.f32 %v505_v39, %v500_v37 }
 0x1ab   : > { %v512_v42 = vmul.f32 0.044715, %v508_v40  ;;  %v513_v43 = vmul.f32 0.044715, %v509_v41 }
 0x1ac   : > { %v487_v44 = vpop.f32.mrf.mxu0  ;;  %v501_v45 = vpop.f32.mrf.mxu1 }
 0x1ad   : > { %v516_v46 = vadd.f32 %v512_v42, %v486_v36  ;;  %v517_v47 = vadd.f32 %v513_v43, %v500_v37  ;;  %v488_v48 = vadd.f32 %v487_v44, %v429_v30  ;;  %v502_v49 = vadd.f32 %v501_v45, %v430_v31 }
 0x1af   : > { %v506_v50 = vmul.f32 %v488_v48, %v488_v48  ;;  %v507_v51 = vmul.f32 %v502_v49, %v502_v49  ;;  %v520_v52 = vmul.f32 0.7978846, %v516_v46  ;;  %v521_v53 = vmul.f32 0.7978846, %v517_v47 }
 0x1b1   : > { %v510_v54 = vmul.f32 %v506_v50, %v488_v48  ;;  %v511_v55 = vmul.f32 %v507_v51, %v502_v49  ;;  %954 = vtanh.f32 %v520_v52 }
 0x1b2   : > { %956 = vtanh.f32 %v521_v53 }
 0x1b3   : > { %v514_v56 = vmul.f32 0.044715, %v510_v54  ;;  %v515_v57 = vmul.f32 0.044715, %v511_v55 }
 0x1b5   : > { %v518_v58 = vadd.f32 %v514_v56, %v488_v48  ;;  %v519_v59 = vadd.f32 %v515_v57, %v502_v49 }
 0x1b7   : > { %v522_v60 = vmul.f32 0.7978846, %v518_v58  ;;  %v523_v61 = vmul.f32 0.7978846, %v519_v59  ;;  %v955_v62 = vpop.eup %954 }
 0x1b8   : > { %v957_v63 = vpop.eup %956  ;;  %v528_v0 = vadd.f32 1.0, %v955_v62 }
 0x1b9   : > { %958 = vtanh.f32 %v522_v60  ;;  %v529_v2 = vadd.f32 1.0, %v957_v63 }
 0x1ba   : > { %960 = vtanh.f32 %v523_v61  ;;  %v532_v7 = vmul.f32 0.5, %v528_v0 }
 0x1bb   : > { %v533_v9 = vmul.f32 0.5, %v529_v2 }
 0x1bc   : > { %v536_v12 = vmul.f32 %v532_v7, %v486_v36 }
 0x1bd   : > { %v537_v15 = vmul.f32 %v533_v9, %v500_v37 }
 0x1bf   : > { %v959_v4 = vpop.eup %958 }
 0x1c0   : > { %v961_v5 = vpop.eup %960  ;;  %v530_v6 = vadd.f32 1.0, %v959_v4 }
 0x1c1   : > { %v531_v8 = vadd.f32 1.0, %v961_v5 }
 0x1c2   : > { %v534_v10 = vmul.f32 0.5, %v530_v6 }
 0x1c3   : > { %v535_v11 = vmul.f32 0.5, %v531_v8 }
 0x1c4   : > { %v538_v13 = vmul.f32 %v534_v10, %v488_v48 }
 0x1c5   : > { %v539_v14 = vmul.f32 %v535_v11, %v502_v49 }
 0x1c6   : > { %v540_v16 = vpack.c.bf16 %v538_v13, %v536_v12 }
 0x1c7   : > { %v541_v17 = vpack.c.bf16 %v539_v14, %v537_v15 }
 0x1c8   : > { %682 = vmatmul.bf16.vlgmr.msra.gmra.mxu2 %v540_v16 }
 0x1c9   : > { %696 = vmatmul.bf16.vlgmr.msra.gmra.mxu3 %v541_v17 }
 0x24b   : > { %v683_v19 = vpop.f32.mrf.mxu2 }
 0x24c   : > { %v684_v20 = vadd.f32 %v946_v18, %v683_v19  ;;  %v697_v21 = vpop.f32.mrf.mxu3 }
 0x24e   : > { %v698_v23 = vadd.f32 %v697_v21, %v684_v20 }
 0x250   : > { %v706_v24 = vmul.f32 %v947_v22, %v698_v23 }
 0x252   : > { %v708_v25 = vadd.f32 %v1032_v1, %v706_v24 }
 0x253   : > { %v685_v26 = vpop.f32.mrf.mxu2 }
 0x254   : > { %v710_v27 = vpack.c.bf16 %v708_v25, %v708_v25  ;;  %v686_v28 = vadd.f32 %v946_v18, %v685_v26  ;;  %v699_v29 = vpop.f32.mrf.mxu3 }
 0x256   : > { %713 = vst.msk [vmem:[%s347_s18] sm:$0xf] %vm712_vm8, %v710_v27  ;;  %v700_v30 = vadd.f32 %v699_v29, %v686_v28 }
 0x258   : > { %v707_v31 = vmul.f32 %v947_v22, %v700_v30 }
 0x25a   : > { %v709_v32 = vadd.f32 %v1036_v3, %v707_v31 }
 0x25c   : > { %v711_v33 = vpack.c.bf16 %v709_v32, %v709_v32 }
 0x25e   : > { %714 = vst.msk [vmem:[%s347_s18 + $0x4] sm:$0xf] %vm712_vm8, %v711_v33 }
 0x25f PF: > { %s18_s27 = sadd.s32 1, %s968_s27  }
 0x260   : > { %p15_p4 = scmp.ge.s32.totalorder %s18_s27, 4  }
 0x262   :  { %17 = sbr.rel (!%p15_p4) target bundleno = 1 (0x1), region = 91 }

// kernel: step_fn.28
= control target key start
LH: loop header
LB: loop body
LE: loop exit
PB: predicated region body
PF: predicated region fallthrough
CT: control target
= control target key end

     0   :  { %vm94_vm4 = vcmask 523264   ;;  %vm19_vm5 = vcmask 1041408   ;;  %vm20_vm6 = vcmask 519170   ;;  %v199_v41 = vmov 0.0   ;;  %s290_s1 = inlined_call_operand.vmem [shape: bf16[64,192], index: 1, kind: input, shape index: {}]   ;;  %s291_s0 = inlined_call_operand.vmem [shape: f32[2,64], index: 0, kind: input, shape index: {}]   ;;  %s292_s2 = inlined_call_operand.vmem [shape: f32[1,192], index: 2, kind: input, shape index: {}]   ;;  %s293_s3 = inlined_call_operand.vmem [shape: f32[2,192], index: 3, kind: output, shape index: {}]  }
   0x1   :  { %v178_v0 = vld [vmem:[%s290_s1 + $0x30] sm:$0xf]  ;;  %v193_v1 = vld [vmem:[%s290_s1 + $0x34] sm:$0xf0]  ;;  %v192_v2 = vld [vmem:[%s290_s1 + $0x34] sm:$0xf] }
   0x2   :  { %v179_v3 = vor.u32 %v193_v1, %v178_v0  ;;  %v180_v4 = vld [vmem:[%s290_s1 + $0x38] sm:$0xf0]  ;;  %v170_v5 = vld [vmem:[%s290_s1 + $0x20] sm:$0xf]  ;;  %v191_v6 = vld [vmem:[%s290_s1 + $0x24] sm:$0xf0] }
   0x3   :  { %v183_v7 = vor.u32 %v192_v2, %v180_v4  ;;  %v190_v8 = vld [vmem:[%s290_s1 + $0x24] sm:$0xf]  ;;  %v172_v9 = vld [vmem:[%s290_s1 + $0x28] sm:$0xf0]  ;;  %v171_v10 = vor.u32 %v191_v6, %v170_v5  ;;  %v162_v12 = vld [vmem:[%s290_s1 + $0x10] sm:$0xf] }
   0x4   :  { %102 = vmatpush.bf16.msra.mxu0 %v179_v3  ;;  %v175_v11 = vor.u32 %v190_v8, %v172_v9  ;;  %v189_v13 = vld [vmem:[%s290_s1 + $0x14] sm:$0xf0]  ;;  %v188_v14 = vld [vmem:[%s290_s1 + $0x14] sm:$0xf]  ;;  %v164_v15 = vld [vmem:[%s290_s1 + $0x18] sm:$0xf0] }
   0x5   :  { %115 = vmatpush.bf16.msra.mxu1 %v183_v7  ;;  %v23_v16 = vld [vmem:[%s291_s0] sm:$0x3]  ;;  %v163_v18 = vor.u32 %v189_v13, %v162_v12  ;;  %v167_v19 = vor.u32 %v188_v14, %v164_v15  ;;  %v187_v21 = vld [vmem:[%s290_s1 + $0x4] sm:$0xf0]  ;;  %v186_v22 = vld [vmem:[%s290_s1 + $0x4] sm:$0xf] }
   0x6   :  { %v151_v17 = vmul.f32 -1.442695, %v23_v16  ;;  %v154_v20 = vld [vmem:[%s290_s1] sm:$0xf]  ;;  %v156_v23 = vld [vmem:[%s290_s1 + $0x8] sm:$0xf0]  ;;  %vm272_vm7 = vmor %vm20_vm6, %vm19_vm5 }
   0x7   :  { %v155_v24 = vor.u32 %v187_v21, %v154_v20  ;;  %v159_v25 = vor.u32 %v186_v22, %v156_v23  ;;  %22 = vst.msk [vmem:[#allocation2] sm:$0xf] %vm272_vm7, %v199_v41  ;;  %v138_v44 = vld [vmem:[%s292_s2] sm:$0x3] }
   0x8   :  { %103 = vmatpush.bf16.msra.mxu0 %v171_v10  ;;  %195 = vpow2.f32 %v151_v17  ;;  %v141_v48 = vperm.slane %v138_v44, 1  ;;  %v140_v50 = vperm.slane %v138_v44, 0 }
   0x9   :  { %116 = vmatpush.bf16.msra.mxu1 %v175_v11 }
   0xa   :  { %v142_v51 = vrot.slane %v141_v48, 6 }
   0xc   :  { %104 = vmatpush.bf16.msra.mxu0 %v163_v18  ;;  %v143_v54 = vsel %vm19_vm5, %v140_v50, %v142_v51 }
   0xd   :  { %117 = vmatpush.bf16.msra.mxu1 %v167_v19 }
   0xe   :  { %v196_v26 = vpop.eup %195  ;;  %v44_v45 = vld [vmem:[#allocation2] sm:$0xf] }
   0xf   :  { %v27_v27 = vadd.f32 1.0, %v196_v26 }
  0x10   :  { %105 = vmatpush.bf16.msra.mxu0 %v155_v24 }
  0x11   :  { %118 = vmatpush.bf16.msra.mxu1 %v159_v25  ;;  %197 = vrcp.f32 %v27_v27  ;;  %v39_v30 = vand.u32 2147483648, %v27_v27  ;;  %vm33_vm0 = vweird.f32 %v27_v27  ;;  %v37_v32 = vand.u32 2147483647, %v27_v27 }
  0x13   :  { %v40_v34 = vor.u32 1.1754944e-38, %v39_v30  ;;  %vm38_vm3 = vcmp.eq.f32.partialorder %v37_v32, 8.507059e+37 }
  0x17   :  { %v198_v28 = vpop.eup %197 }
  0x18   :  { %v29_v29 = vmul.f32 %v198_v28, %v27_v27  ;;  %vm34_vm1 = vweird.f32 %v198_v28 }
  0x19   :  { %vm35_vm2 = vmor %vm33_vm0, %vm34_vm1 }
  0x1a   :  { %v30_v31 = vsub.f32 1.0, %v29_v29 }
  0x1c   :  { %v31_v33 = vmul.f32 %v198_v28, %v30_v31 }
  0x1e   :  { %v32_v35 = vadd.f32 %v198_v28, %v31_v33 }
  0x20   :  { %v36_v36 = vsel %vm35_vm2, %v198_v28, %v32_v35 }
  0x21   :  { %v41_v37 = vsel %vm38_vm3, %v40_v34, %v36_v36 }
  0x22   :  { %v43_v38 = vmul.f32 %v41_v37, %v23_v16 }
  0x24   :  { %v45_v39 = vpack.c.bf16 %v43_v38, %v43_v38 }
  0x26   :  { %184 = vmatmul.msk.bf16.vlgmr.msra.gmra.mxu0 %vm94_vm4, %v45_v39  ;;  %185 = vmatmul.msk.bf16.vlgmr.msra.gmra.mxu1 %vm94_vm4, %v45_v39 }
  0xa3   :  { %v107_v42 = vpop.f32.mrf.mxu0  ;;  %v120_v43 = vpop.f32.mrf.mxu1 }
  0xa4   :  { %v126_v46 = vrot.slane %v120_v43, 6 }
  0xa6   :  { %v128_v47 = vsel %vm19_vm5, %v107_v42, %v126_v46 }
  0xa7   :  { %v130_v49 = vadd.f32 %v128_v47, %v44_v45 }
  0xa9   :  { %133 = vst.msk [vmem:[#allocation2] sm:$0xf] %vm272_vm7, %v130_v49 }
  0xab   :  { %v109_v52 = vpop.f32.mrf.mxu0  ;;  %v122_v53 = vpop.f32.mrf.mxu1 }
  0xb0   :  { %v137_v55 = vld [vmem:[#allocation2] sm:$0xf] }
  0xb1   :  { %v145_v56 = vadd.f32 %v143_v54, %v137_v55 }
  0xb3   :  { %146 = vst.msk [vmem:[%s293_s3] sm:$0xf] %vm272_vm7, %v145_v56 }

// kernel: step_fn.29
= control target key start
LH: loop header
LB: loop body
LE: loop exit
PB: predicated region body
PF: predicated region fallthrough
CT: control target
= control target key end

     0   :  { %s994_s27 = smov 0   ;;  %s1189_s0 = inlined_call_operand.vmem [shape: bf16[2,24,64], index: 0, kind: input, shape index: {}]   ;;  %s1190_s1 = inlined_call_operand.vmem [shape: f32[2,1,64], index: 1, kind: input, shape index: {}]   ;;  %s1191_s2 = inlined_call_operand.vmem [shape: f32[2,1,64], index: 2, kind: input, shape index: {}]   ;;  %s1192_s3 = inlined_call_operand.vmem [shape: bf16[64,192], index: 3, kind: input, shape index: {}]   ;;  %s1193_s4 = inlined_call_operand.vmem [shape: f32[1,192], index: 4, kind: input, shape index: {}]   ;;  %s1194_s5 = inlined_call_operand.vmem [shape: bf16[64,256], index: 5, kind: input, shape index: {}]   ;;  %s1195_s6 = inlined_call_operand.vmem [shape: f32[1,256], index: 6, kind: input, shape index: {}]   ;;  %s1196_s7 = inlined_call_operand.vmem [shape: bf16[2,24,192], index: 7, kind: output, shape index: {0}]   ;;  %s1197_s8 = inlined_call_operand.vmem [shape: bf16[2,24,256], index: 8, kind: output, shape index: {1}]  }
   0x1 LB: > { %s806_s28 = sadd.s32 4294967295, %s946_s27   ;;  %p810_p0 = scmp.ge.s32.totalorder %s946_s27, 1  ;;  %s946_s27 = sphi %s994_s27, %s19_s27  }
   0x2   : > { %p281_p1 = scmp.lt.s32.totalorder %s946_s27, 3 }
   0x4   : > { %p282_p2 = pnand %p810_p0, %p281_p1 }
   0x5   : > { %p326_p3 = scmp.lt.s32.totalorder (!%p282_p2), %s806_s28, 1 }
   0x6   : > { %285 = sbr.rel (%p282_p2) target bundleno = 474 (0x1da), region = 48 }
   0xb   : > { %s1201_s28 = smov (!%p326_p3, %s806_s28), 1  ;;  %vm356_vm0 = vcmask 523264   ;;  %v948_v8 = vmov 64.0   ;;  %v840_v30 = vld [vmem:[%s1192_s3 + $0x30] sm:$0xf]  ;;  %vm544_vm11 = vcmask 1043456  }
   0xc   : > { %s908_s29 = smul.u32 12, %s1201_s28  ;;  %920 = vrcp.f32 %v948_v8  ;;  %s333_s13 = scalar_lea.vmem %s1190_s1, %s1201_s28  ;;  %v895_v31 = vld [vmem:[%s1192_s3 + $0x34] sm:$0xf0]  ;;  %v894_v32 = vld [vmem:[%s1192_s3 + $0x34] sm:$0xf]  ;;  %vm545_vm12 = vcmask 523268  }
   0xd   : > { %v841_v33 = vor.u32 %v895_v31, %v840_v30  ;;  %v842_v34 = vld [vmem:[%s1192_s3 + $0x38] sm:$0xf0]  ;;  %v876_v35 = vld [vmem:[%s1194_s5 + $0x30] sm:$0xf]  ;;  %v903_v36 = vld [vmem:[%s1194_s5 + $0x34] sm:$0xf0]  ;;  %s336_s23 = scalar_lea.vmem %s1191_s2, %s1201_s28 }
   0xe   : > { %s330_s10 = scalar_lea.vmem %s1189_s0, %s908_s29  ;;  %v845_v37 = vor.u32 %v894_v32, %v842_v34  ;;  %v877_v38 = vor.u32 %v903_v36, %v876_v35  ;;  %v902_v39 = vld [vmem:[%s1194_s5 + $0x34] sm:$0xf]  ;;  %v878_v40 = vld [vmem:[%s1194_s5 + $0x38] sm:$0xf0]  ;;  %v832_v42 = vld [vmem:[%s1192_s3 + $0x20] sm:$0xf] }
   0xf   : > { %v905_v0 = vld [vmem:[%s330_s10] sm:$0xff]   ;;  %v350_v1 = vld [vmem:[%s330_s10 + $0x8] sm:$0xf]  ;;  %509 = vmatpush.bf16.msra.mxu0 %v841_v33  ;;  %v881_v41 = vor.u32 %v902_v39, %v878_v40  ;;  %v834_v46 = vld [vmem:[%s1192_s3 + $0x28] sm:$0xf0]  ;;  %s909_s29 = smul.u32 24, %s1201_s28 }
  0x10   : > { %v906_v2 = vunpack.c.l.bf16 %v905_v0  ;;  %v353_v3 = vunpack.c.l.bf16 %v350_v1  ;;  %v907_v6 = vunpack.c.h.bf16 %v905_v0  ;;  %527 = vmatpush.bf16.msra.mxu1 %v845_v37  ;;  %608 = vmatpush.bf16.msra.mxu2 %v877_v38  ;;  %v893_v43 = vld [vmem:[%s1192_s3 + $0x24] sm:$0xf0]  ;;  %v892_v44 = vld [vmem:[%s1192_s3 + $0x24] sm:$0xf]  ;;  %v868_v47 = vld [vmem:[%s1194_s5 + $0x20] sm:$0xf] }
  0x11   : > { %626 = vmatpush.bf16.msra.mxu3 %v881_v41  ;;  %v833_v45 = vor.u32 %v893_v43, %v832_v42  ;;  %v901_v48 = vld [vmem:[%s1194_s5 + $0x24] sm:$0xf0]  ;;  %v837_v49 = vor.u32 %v892_v44, %v834_v46  ;;  %v900_v51 = vld [vmem:[%s1194_s5 + $0x24] sm:$0xf]  ;;  %v870_v52 = vld [vmem:[%s1194_s5 + $0x28] sm:$0xf0]  ;;  %s1166_s12 = scalar_lea.vmem %s1196_s7, %s909_s29  ;;  %s346_s16 = scalar_lea.vmem %s1197_s8, %s909_s29 }
  0x12   : > { %v357_v4 = vsel %vm356_vm0, %v906_v2, 0.0  ;;  %v363_v5 = vsel %vm356_vm0, %v353_v3, 0.0  ;;  %v360_v7 = vsel %vm356_vm0, %v907_v6, 0.0  ;;  %v921_v9 = vpop.eup %920  ;;  %v869_v50 = vor.u32 %v901_v48, %v868_v47  ;;  %v824_v54 = vld [vmem:[%s1192_s3 + $0x10] sm:$0xf]  ;;  %vm1168_vm13 = vmor %vm545_vm12, %vm544_vm11 }
  0x13   : > { %358 = vadd.xlane.f32.xlu0 %v357_v4  ;;  %364 = vadd.xlane.f32.xlu1 %v363_v5  ;;  %v367_v10 = vmul.f32 64.0, %v921_v9  ;;  %vm371_vm1 = vweird.f32 %v921_v9  ;;  %v873_v53 = vor.u32 %v900_v51, %v870_v52  ;;  %v891_v55 = vld [vmem:[%s1192_s3 + $0x14] sm:$0xf0]  ;;  %v890_v56 = vld [vmem:[%s1192_s3 + $0x14] sm:$0xf] }
  0x14   : > { %510 = vmatpush.bf16.msra.mxu0 %v833_v45  ;;  %528 = vmatpush.bf16.msra.mxu1 %v837_v49  ;;  %v825_v57 = vor.u32 %v891_v55, %v824_v54  ;;  %v826_v58 = vld [vmem:[%s1192_s3 + $0x18] sm:$0xf0]  ;;  %v860_v59 = vld [vmem:[%s1194_s5 + $0x10] sm:$0xf]  ;;  %v899_v60 = vld [vmem:[%s1194_s5 + $0x14] sm:$0xf0] }
  0x15   : > { %v368_v11 = vsub.f32 1.0, %v367_v10  ;;  %609 = vmatpush.bf16.msra.mxu2 %v869_v50  ;;  %627 = vmatpush.bf16.msra.mxu3 %v873_v53  ;;  %v829_v61 = vor.u32 %v890_v56, %v826_v58  ;;  %v861_v62 = vor.u32 %v899_v60, %v860_v59  ;;  %v898_v63 = vld [vmem:[%s1194_s5 + $0x14] sm:$0xf]  ;;  %v862_v0 = vld [vmem:[%s1194_s5 + $0x18] sm:$0xf0] }
  0x16   : > { %v816_v4 = vld [vmem:[%s1192_s3] sm:$0xf]  ;;  %v889_v5 = vld [vmem:[%s1192_s3 + $0x4] sm:$0xf0]  ;;  %v818_v8 = vld [vmem:[%s1192_s3 + $0x8] sm:$0xf0] }
  0x17   : > { %v369_v12 = vmul.f32 %v921_v9, %v368_v11  ;;  %v897_v10 = vld [vmem:[%s1194_s5 + $0x4] sm:$0xf0]  ;;  %v355_v35 = vld [vmem:[%s336_s23] sm:$0x1] }
  0x18   : > { %511 = vmatpush.bf16.msra.mxu0 %v825_v57  ;;  %529 = vmatpush.bf16.msra.mxu1 %v829_v61  ;;  %v394_v37 = vadd.f32 1.0, %v355_v35  ;;  %v919_v49 = vld [vmem:[%s333_s13] ss:$0 sm:$0xff] }
  0x19   : > { %v370_v13 = vadd.f32 %v921_v9, %v369_v12  ;;  %610 = vmatpush.bf16.msra.mxu2 %v861_v62  ;;  %v453_v60 = vld [vmem:[%s1193_s4] sm:$0x3] }
  0x1a   : > { %v432_v42 = vperm.slane %v394_v37, 0  ;;  %v455_v61 = vperm.slane %v453_v60, 0  ;;  %v456_v62 = vperm.slane %v453_v60, 1 }
  0x1b   : > { %361 = vadd.xlane.f32.xlu0 %v360_v7  ;;  %v1011_v14 = vsel %vm371_vm1, %v921_v9, %v370_v13  ;;  %v817_v7 = vor.u32 %v889_v5, %v816_v4  ;;  %v852_v9 = vld [vmem:[%s1194_s5] sm:$0xf] }
  0x1c   : > { %v853_v13 = vor.u32 %v897_v10, %v852_v9 }
  0x1d   : > { %512 = vmatpush.bf16.msra.mxu0 %v817_v7 }
  0x1e   : > { %611 = vmatpush.bf16.msra.mxu2 %v853_v13 }
  0x86   : > { %v359_v15 = vpop.xlane.xlu0 %358  ;;  %v365_v19 = vpop.xlane.xlu1 %364 }
  0x87   : > { %v373_v16 = vmul.f32 %v1011_v14, %v359_v15  ;;  %v375_v23 = vmul.f32 %v1011_v14, %v365_v19  ;;  %v896_v15 = vld [vmem:[%s1194_s5 + $0x4] sm:$0xf] }
  0x89   : > { %v1014_v17 = vsub.f32 %v906_v2, %v373_v16  ;;  %v1023_v25 = vsub.f32 %v353_v3, %v375_v23  ;;  %v865_v2 = vor.u32 %v898_v63, %v862_v0  ;;  %v854_v16 = vld [vmem:[%s1194_s5 + $0x8] sm:$0xf0] }
  0x8b   : > { %v379_v18 = vmul.f32 %v1014_v17, %v1014_v17  ;;  %v381_v28 = vmul.f32 %v1023_v25, %v1023_v25  ;;  %628 = vmatpush.bf16.msra.mxu3 %v865_v2  ;;  %v558_v2 = vld [vmem:[%s1195_s6] sm:$0x3] }
  0x8c   : > { %v560_v5 = vperm.slane %v558_v2, 0 }
  0x8d   : > { %v382_v20 = vsel %vm356_vm0, %v379_v18, 0.0  ;;  %v388_v29 = vsel %vm356_vm0, %v381_v28, 0.0  ;;  %v857_v18 = vor.u32 %v896_v15, %v854_v16 }
  0x8e   : > { %383 = vadd.xlane.f32.xlu1 %v382_v20  ;;  %v362_v21 = vpop.xlane.xlu0 %361 }
  0x8f   : > { %v374_v22 = vmul.f32 %v1011_v14, %v362_v21  ;;  %629 = vmatpush.bf16.msra.mxu3 %v857_v18 }
  0x91   : > { %v1021_v24 = vsub.f32 %v907_v6, %v374_v22  ;;  %v888_v6 = vld [vmem:[%s1192_s3 + $0x4] sm:$0xf] }
  0x92   : > { %v821_v12 = vor.u32 %v888_v6, %v818_v8  ;;  %v561_v6 = vperm.slane %v558_v2, 1 }
  0x93   : > { %v380_v26 = vmul.f32 %v1021_v24, %v1021_v24 }
  0x94   : > { %530 = vmatpush.bf16.msra.mxu1 %v821_v12 }
  0x95   : > { %v385_v27 = vsel %vm356_vm0, %v380_v26, 0.0 }
  0x96   : > { %386 = vadd.xlane.f32.xlu2 %v385_v27 }
  0x9e   : > { %389 = vadd.xlane.f32.xlu2 %v388_v29 }
 0x101   : > { %v384_v1 = vpop.xlane.xlu1 %383 }
 0x102   : > { %v391_v3 = vmul.f32 %v384_v1, %v1011_v14 }
 0x104   : > { %v395_v11 = vadd.f32 1e-06, %v391_v3 }
 0x106   : > { %922 = vrsqrt.f32 %v395_v11  ;;  %vm404_vm3 = vweird.f32 %v395_v11 }
 0x109   : > { %v387_v19 = vpop.xlane.xlu2 %386 }
 0x10a   : > { %v392_v20 = vmul.f32 %v387_v19, %v1011_v14 }
 0x10c   : > { %v923_v21 = vpop.eup %922  ;;  %v396_v22 = vadd.f32 1e-06, %v392_v20 }
 0x10d   : > { %v399_v23 = vmul.f32 %v923_v21, %v395_v11  ;;  %vm405_vm2 = vweird.f32 %v923_v21 }
 0x10e   : > { %924 = vrsqrt.f32 %v396_v22  ;;  %vm406_vm4 = vmor %vm404_vm3, %vm405_vm2  ;;  %vm414_vm6 = vweird.f32 %v396_v22 }
 0x10f   : > { %v400_v26 = vmul.f32 %v923_v21, %v399_v23 }
 0x111   : > { %v401_v27 = vmul.f32 0.5, %v400_v26  ;;  %v390_v28 = vpop.xlane.xlu2 %389 }
 0x112   : > { %v393_v29 = vmul.f32 %v390_v28, %v1011_v14 }
 0x113   : > { %v402_v30 = vsub.f32 1.5, %v401_v27 }
 0x114   : > { %v925_v31 = vpop.eup %924  ;;  %v397_v32 = vadd.f32 1e-06, %v393_v29 }
 0x115   : > { %v403_v33 = vmul.f32 %v923_v21, %v402_v30  ;;  %v409_v34 = vmul.f32 %v925_v31, %v396_v22  ;;  %vm415_vm5 = vweird.f32 %v925_v31 }
 0x116   : > { %926 = vrsqrt.f32 %v397_v32  ;;  %vm416_vm7 = vmor %vm414_vm6, %vm415_vm5  ;;  %vm424_vm8 = vweird.f32 %v397_v32 }
 0x117   : > { %v410_v36 = vmul.f32 %v925_v31, %v409_v34  ;;  %v407_v38 = vsel %vm406_vm4, %v923_v21, %v403_v33 }
 0x118   : > { %v428_v41 = vmul.f32 %v407_v38, %v1014_v17 }
 0x119   : > { %v411_v39 = vmul.f32 0.5, %v410_v36 }
 0x11a   : > { %v434_v48 = vmul.f32 %v432_v42, %v428_v41 }
 0x11b   : > { %v412_v14 = vsub.f32 1.5, %v411_v39 }
 0x11c   : > { %v927_v40 = vpop.eup %926  ;;  %v440_v17 = vadd.f32 %v919_v49, %v434_v48 }
 0x11d   : > { %v413_v43 = vmul.f32 %v925_v31, %v412_v14  ;;  %v419_v44 = vmul.f32 %v927_v40, %v397_v32  ;;  %vm425_vm9 = vweird.f32 %v927_v40 }
 0x11e   : > { %vm426_vm10 = vmor %vm424_vm8, %vm425_vm9 }
 0x11f   : > { %v417_v45 = vsel %vm416_vm7, %v925_v31, %v413_v43  ;;  %v420_v46 = vmul.f32 %v927_v40, %v419_v44 }
 0x120   : > { %v429_v47 = vmul.f32 %v417_v45, %v1021_v24 }
 0x121   : > { %v421_v50 = vmul.f32 0.5, %v420_v46 }
 0x122   : > { %v435_v51 = vmul.f32 %v432_v42, %v429_v47 }
 0x123   : > { %v422_v52 = vsub.f32 1.5, %v421_v50 }
 0x124   : > { %v441_v53 = vadd.f32 %v919_v49, %v435_v51 }
 0x125   : > { %v423_v54 = vmul.f32 %v927_v40, %v422_v52 }
 0x126   : > { %v443_v55 = vpack.c.bf16 %v441_v53, %v440_v17 }
 0x127   : > { %v427_v56 = vsel %vm426_vm10, %v927_v40, %v423_v54 }
 0x128   : > { %846 = vmatmul.msk.bf16.vlgmr.msra.gmra.mxu0 %vm356_vm0, %v443_v55  ;;  %848 = vmatmul.msk.bf16.vlgmr.msra.gmra.mxu1 %vm356_vm0, %v443_v55  ;;  %v430_v24 = vmul.f32 %v427_v56, %v1023_v25 }
 0x129   : > { %882 = vmatmul.msk.bf16.vlgmr.msra.gmra.mxu2 %vm356_vm0, %v443_v55  ;;  %884 = vmatmul.msk.bf16.vlgmr.msra.gmra.mxu3 %vm356_vm0, %v443_v55 }
 0x12a   : > { %v436_v57 = vmul.f32 %v432_v42, %v430_v24 }
 0x12c   : > { %v442_v58 = vadd.f32 %v919_v49, %v436_v57 }
 0x12e   : > { %v444_v59 = vpack.c.bf16 %v442_v58, %v442_v58 }
 0x138   : > { %847 = vmatmul.msk.bf16.gmra.mxu0 %vm356_vm0, %v444_v59  ;;  %849 = vmatmul.msk.bf16.gmra.mxu1 %vm356_vm0, %v444_v59 }
 0x139   : > { %883 = vmatmul.msk.bf16.gmra.mxu2 %vm356_vm0, %v444_v59  ;;  %885 = vmatmul.msk.bf16.gmra.mxu3 %vm356_vm0, %v444_v59 }
 0x1a5   : > { %v514_v25 = vpop.f32.mrf.mxu0  ;;  %v532_v63 = vpop.f32.mrf.mxu1 }
 0x1a6   : > { %v515_v0 = vadd.f32 %v514_v25, %v455_v61  ;;  %v533_v1 = vadd.f32 %v532_v63, %v456_v62 }
 0x1a8   : > { %v541_v4 = vpack.c.bf16 %v533_v1, %v515_v0 }
 0x1aa   : > { %547 = vst.msk [vmem:[%s1166_s12] sm:$0xff] %vm1168_vm13, %v541_v4 }
 0x1ac   : > { %v613_v7 = vpop.f32.mrf.mxu2  ;;  %v631_v8 = vpop.f32.mrf.mxu3 }
 0x1ad   : > { %v614_v9 = vadd.f32 %v613_v7, %v560_v5  ;;  %v632_v10 = vadd.f32 %v631_v8, %v561_v6  ;;  %v516_v11 = vpop.f32.mrf.mxu0  ;;  %v534_v12 = vpop.f32.mrf.mxu1 }
 0x1ae   : > { %v517_v13 = vadd.f32 %v516_v11, %v455_v61  ;;  %v535_v15 = vadd.f32 %v534_v12, %v456_v62 }
 0x1af   : > { %v640_v16 = vmul.f32 %v614_v9, %v614_v9  ;;  %v641_v18 = vmul.f32 %v632_v10, %v632_v10 }
 0x1b0   : > { %v542_v19 = vpack.c.bf16 %v535_v15, %v517_v13 }
 0x1b1   : > { %v646_v20 = vmul.f32 %v640_v16, %v614_v9  ;;  %v647_v21 = vmul.f32 %v641_v18, %v632_v10 }
 0x1b2   : > { %548 = vst.msk [vmem:[%s1166_s12 + $0x8] sm:$0xff] %vm1168_vm13, %v542_v19 }
 0x1b3   : > { %v652_v22 = vmul.f32 0.044715, %v646_v20  ;;  %v653_v23 = vmul.f32 0.044715, %v647_v21 }
 0x1b4   : > { %v615_v26 = vpop.f32.mrf.mxu2  ;;  %v633_v27 = vpop.f32.mrf.mxu3 }
 0x1b5   : > { %v658_v28 = vadd.f32 %v652_v22, %v614_v9  ;;  %v659_v29 = vadd.f32 %v653_v23, %v632_v10  ;;  %v616_v30 = vadd.f32 %v615_v26, %v560_v5  ;;  %v634_v31 = vadd.f32 %v633_v27, %v561_v6  ;;  %v519_v32 = vpop.f32.mrf.mxu0  ;;  %v537_v33 = vpop.f32.mrf.mxu1 }
 0x1b6   : > { %v520_v34 = vadd.f32 %v519_v32, %v455_v61  ;;  %v538_v35 = vadd.f32 %v537_v33, %v456_v62 }
 0x1b7   : > { %v664_v36 = vmul.f32 0.7978846, %v658_v28  ;;  %v665_v37 = vmul.f32 0.7978846, %v659_v29  ;;  %v642_v38 = vmul.f32 %v616_v30, %v616_v30  ;;  %v643_v39 = vmul.f32 %v634_v31, %v634_v31 }
 0x1b8   : > { %v543_v14 = vpack.c.bf16 %v538_v35, %v520_v34 }
 0x1b9   : > { %928 = vtanh.f32 %v664_v36  ;;  %v648_v40 = vmul.f32 %v642_v38, %v616_v30  ;;  %v649_v41 = vmul.f32 %v643_v39, %v634_v31 }
 0x1ba   : > { %930 = vtanh.f32 %v665_v37  ;;  %549 = vst.msk [vmem:[%s1166_s12 + $0x10] sm:$0xff] %vm1168_vm13, %v543_v14 }
 0x1bb   : > { %v654_v42 = vmul.f32 0.044715, %v648_v40  ;;  %v655_v43 = vmul.f32 0.044715, %v649_v41 }
 0x1bc   : > { %v618_v44 = vpop.f32.mrf.mxu2  ;;  %v636_v45 = vpop.f32.mrf.mxu3 }
 0x1bd   : > { %v660_v46 = vadd.f32 %v654_v42, %v616_v30  ;;  %v661_v47 = vadd.f32 %v655_v43, %v634_v31  ;;  %v619_v48 = vadd.f32 %v618_v44, %v560_v5  ;;  %v637_v49 = vadd.f32 %v636_v45, %v561_v6  ;;  %v521_v50 = vpop.f32.mrf.mxu0  ;;  %v539_v51 = vpop.f32.mrf.mxu1 }
 0x1bf   : > { %v929_v52 = vpop.eup %928  ;;  %v666_v17 = vmul.f32 0.7978846, %v660_v46  ;;  %v667_v53 = vmul.f32 0.7978846, %v661_v47  ;;  %v644_v54 = vmul.f32 %v619_v48, %v619_v48  ;;  %v645_v55 = vmul.f32 %v637_v49, %v637_v49 }
 0x1c0   : > { %v931_v56 = vpop.eup %930  ;;  %v676_v24 = vadd.f32 1.0, %v929_v52 }
 0x1c1   : > { %v677_v57 = vadd.f32 1.0, %v931_v56  ;;  %932 = vtanh.f32 %v666_v17  ;;  %v650_v58 = vmul.f32 %v644_v54, %v619_v48  ;;  %v651_v59 = vmul.f32 %v645_v55, %v637_v49 }
 0x1c2   : > { %v682_v60 = vmul.f32 0.5, %v676_v24  ;;  %934 = vtanh.f32 %v667_v53 }
 0x1c3   : > { %v683_v61 = vmul.f32 0.5, %v677_v57  ;;  %v656_v62 = vmul.f32 0.044715, %v650_v58  ;;  %v657_v25 = vmul.f32 0.044715, %v651_v59 }
 0x1c4   : > { %v688_v63 = vmul.f32 %v682_v60, %v614_v9  ;;  %v620_v0 = vpop.f32.mrf.mxu2  ;;  %v638_v1 = vpop.f32.mrf.mxu3 }
 0x1c5   : > { %v689_v2 = vmul.f32 %v683_v61, %v632_v10  ;;  %v662_v3 = vadd.f32 %v656_v62, %v619_v48  ;;  %v663_v4 = vadd.f32 %v657_v25, %v637_v49 }
 0x1c7   : > { %v933_v5 = vpop.eup %932  ;;  %v694_v6 = vpack.c.bf16 %v689_v2, %v688_v63  ;;  %v668_v7 = vmul.f32 0.7978846, %v662_v3  ;;  %v669_v8 = vmul.f32 0.7978846, %v663_v4 }
 0x1c8   : > { %v935_v11 = vpop.eup %934  ;;  %v678_v12 = vadd.f32 1.0, %v933_v5 }
 0x1c9   : > { %697 = vst [vmem:[%s346_s16] sm:$0xff] %v694_v6  ;;  %v679_v13 = vadd.f32 1.0, %v935_v11  ;;  %936 = vtanh.f32 %v668_v7 }
 0x1ca   : > { %v684_v9 = vmul.f32 0.5, %v678_v12  ;;  %938 = vtanh.f32 %v669_v8 }
 0x1cb   : > { %v685_v15 = vmul.f32 0.5, %v679_v13 }
 0x1cc   : > { %v690_v10 = vmul.f32 %v684_v9, %v616_v30 }
 0x1cd   : > { %v691_v16 = vmul.f32 %v685_v15, %v634_v31 }
 0x1cf   : > { %v937_v18 = vpop.eup %936  ;;  %v695_v19 = vpack.c.bf16 %v691_v16, %v690_v10 }
 0x1d0   : > { %v939_v20 = vpop.eup %938  ;;  %v680_v21 = vadd.f32 1.0, %v937_v18 }
 0x1d1   : > { %698 = vst [vmem:[%s346_s16 + $0x8] sm:$0xff] %v695_v19  ;;  %v681_v22 = vadd.f32 1.0, %v939_v20 }
 0x1d2   : > { %v686_v23 = vmul.f32 0.5, %v680_v21 }
 0x1d3   : > { %v687_v26 = vmul.f32 0.5, %v681_v22 }
 0x1d4   : > { %v692_v27 = vmul.f32 %v686_v23, %v619_v48 }
 0x1d5   : > { %v693_v28 = vmul.f32 %v687_v26, %v637_v49 }
 0x1d7   : > { %v696_v29 = vpack.c.bf16 %v693_v28, %v692_v27 }
 0x1d9   : > { %699 = vst [vmem:[%s346_s16 + $0x10] sm:$0xff] %v696_v29 }
 0x1da PF: > { %s19_s27 = sadd.s32 1, %s946_s27  }
 0x1db   : > { %p16_p4 = scmp.ge.s32.totalorder %s19_s27, 4  }
 0x1dd   :  { %18 = sbr.rel (!%p16_p4) target bundleno = 1 (0x1), region = 96 }

// kernel: step_fn.31
= control target key start
LH: loop header
LB: loop body
LE: loop exit
PB: predicated region body
PF: predicated region fallthrough
CT: control target
= control target key end

     0   :  { %s904_s24 = smov 0   ;;  %s1012_s0 = inlined_call_operand.vmem [shape: bf16[2,24,64], index: 0, kind: input, shape index: {}]   ;;  %s1013_s1 = inlined_call_operand.vmem [shape: bf16[2,24,64], index: 1, kind: input, shape index: {}]   ;;  %s1014_s2 = inlined_call_operand.vmem [shape: bf16[2,24,256], index: 2, kind: input, shape index: {}]   ;;  %s1015_s3 = inlined_call_operand.vmem [shape: f32[2,1,64], index: 3, kind: input, shape index: {}]   ;;  %s1016_s4 = inlined_call_operand.vmem [shape: bf16[64,64], index: 4, kind: input, shape index: {}]   ;;  %s1017_s5 = inlined_call_operand.vmem [shape: bf16[256,64], index: 5, kind: input, shape index: {}]   ;;  %s1018_s6 = inlined_call_operand.vmem [shape: f32[1,64], index: 6, kind: input, shape index: {}]   ;;  %s1019_s7 = inlined_call_operand.vmem [shape: bf16[2,24,64], index: 7, kind: output, shape index: {}]  }
   0x1 LB: > { %s704_s25 = sadd.s32 4294967295, %s862_s24   ;;  %p708_p0 = scmp.ge.s32.totalorder %s862_s24, 1  ;;  %s862_s24 = sphi %s904_s24, %s17_s24  }
   0x2   : > { %p265_p1 = scmp.lt.s32.totalorder %s862_s24, 3 }
   0x4   : > { %p266_p2 = pnand %p708_p0, %p265_p1 }
   0x5   : > { %p310_p3 = scmp.lt.s32.totalorder (!%p266_p2), %s704_s25, 1 }
   0x6   : > { %269 = sbr.rel (%p266_p2) target bundleno = 199 (0xc7), region = 48 }
   0xb   : > { %v823_v0 = vld [vmem:[%s1017_s5 + $0x38] sm:$0xff]  ;;  %v822_v3 = vld [vmem:[%s1017_s5 + $0x30] sm:$0xff]  ;;  %s1021_s25 = smov (!%p310_p3, %s704_s25), 1  ;;  %v821_v6 = vld [vmem:[%s1017_s5 + $0x28] sm:$0xff]  ;;  %vm561_vm0 = vcmask 523264   ;;  %vm612_vm1 = vcmask 519168  }
   0xc   : > { %v831_v1 = vld [vmem:[%s1017_s5 + $0x78] sm:$0xff]  ;;  %493 = vmatpush.bf16.msra.mxu0 %v823_v0  ;;  %v830_v4 = vld [vmem:[%s1017_s5 + $0x70] sm:$0xff]  ;;  %836 = vmatpush.bf16.msra.mxu3 %v823_v0  ;;  %v829_v7 = vld [vmem:[%s1017_s5 + $0x68] sm:$0xff]  ;;  %s942_s21 = smul.u32 12, %s1021_s25  ;;  %s327_s12 = scalar_lea.vmem %s1015_s3, %s1021_s25 }
   0xd   : > { %v813_v2 = vld [vmem:[%s1016_s4 + $0x18] sm:$0xff]  ;;  %511 = vmatpush.bf16.msra.mxu1 %v831_v1  ;;  %v812_v5 = vld [vmem:[%s1016_s4 + $0x10] sm:$0xff]  ;;  %v811_v8 = vld [vmem:[%s1016_s4 + $0x8] sm:$0xff]  ;;  %s845_s14 = smul.u32 24, %s1021_s25 }
   0xe   : > { %572 = vmatpush.bf16.msra.mxu2 %v813_v2  ;;  %v820_v9 = vld [vmem:[%s1017_s5 + $0x20] sm:$0xff]  ;;  %s319_s9 = scalar_lea.vmem %s1013_s1, %s942_s21  ;;  %v819_v12 = vld [vmem:[%s1017_s5 + $0x18] sm:$0xff]  ;;  %v818_v15 = vld [vmem:[%s1017_s5 + $0x10] sm:$0xff]  ;;  %s995_s15 = scalar_lea.vmem %s1012_s0, %s942_s21 }
   0xf   : > { %v828_v10 = vld [vmem:[%s1017_s5 + $0x60] sm:$0xff]  ;;  %v827_v13 = vld [vmem:[%s1017_s5 + $0x58] sm:$0xff]  ;;  %v826_v16 = vld [vmem:[%s1017_s5 + $0x50] sm:$0xff]  ;;  %s324_s22 = scalar_lea.vmem %s1014_s2, %s845_s14  ;;  %s332_s19 = scalar_lea.vmem %s1019_s7, %s942_s21 }
  0x10   : > { %494 = vmatpush.bf16.msra.mxu0 %v822_v3  ;;  %837 = vmatpush.bf16.msra.mxu3 %v822_v3  ;;  %v810_v11 = vld [vmem:[%s1016_s4] sm:$0xff]  ;;  %v817_v17 = vld [vmem:[%s1017_s5 + $0x8] sm:$0xff]  ;;  %v347_v19 = vld [vmem:[%s324_s22 + $0x10] sm:$0xff] }
  0x11   : > { %512 = vmatpush.bf16.msra.mxu1 %v830_v4  ;;  %v809_v14 = vld [vmem:[%s319_s9] sm:$0xff]  ;;  %v825_v18 = vld [vmem:[%s1017_s5 + $0x48] sm:$0xff]  ;;  %v387_v27 = vunpack.c.l.b16 %v347_v19  ;;  %v388_v33 = vunpack.c.h.b16 %v347_v19 }
  0x12   : > { %573 = vmatpush.bf16.msra.mxu2 %v812_v5  ;;  %v336_v20 = vld [vmem:[%s319_s9 + $0x8] sm:$0xf]  ;;  %v816_v21 = vld [vmem:[%s1017_s5] sm:$0xff]  ;;  %v717_v26 = vld [vmem:[%s324_s22 + $0x8] sm:$0xf0] }
  0x13   : > { %v824_v22 = vld [vmem:[%s1017_s5 + $0x40] sm:$0xff]  ;;  %v815_v24 = vld [vmem:[%s324_s22 + $0x4] sm:$0xf0]  ;;  %v534_v28 = vunpack.c.l.b16 %v336_v20  ;;  %v391_v31 = vpack.c.b16 %v387_v27, %v387_v27  ;;  %v392_v34 = vpack.c.b16 %v388_v33, %v388_v33 }
  0x14   : > { %495 = vmatpush.bf16.msra.mxu0 %v821_v6  ;;  %838 = vmatpush.bf16.msra.mxu3 %v821_v6  ;;  %v715_v23 = vld [vmem:[%s324_s22] sm:$0xf]  ;;  %v814_v25 = vld [vmem:[%s324_s22 + $0x4] sm:$0xf]  ;;  %v595_v63 = vld [vmem:[%s995_s15 + $0x8] sm:$0xf] }
  0x15   : > { %513 = vmatpush.bf16.msra.mxu1 %v829_v7  ;;  %v716_v29 = vor.u32 %v815_v24, %v715_v23  ;;  %v720_v30 = vor.u32 %v814_v25, %v717_v26  ;;  %v536_v32 = vpack.c.b16 %v534_v28, %v534_v28  ;;  %v854_v39 = vld [vmem:[%s1018_s6] ss:$0 sm:$0xff]  ;;  %v598_v3 = vunpack.c.l.bf16 %v595_v63 }
  0x16   : > { %574 = vmatpush.bf16.msra.mxu2 %v811_v8  ;;  %v833_v41 = vld [vmem:[%s995_s15] sm:$0xff]  }
  0x17   : > { %v855_v43 = vld [vmem:[%s327_s12] ss:$0 sm:$0xff]  ;;  %v834_v45 = vunpack.c.l.bf16 %v833_v41  ;;  %v835_v56 = vunpack.c.h.bf16 %v833_v41 }
  0x18   : > { %496 = vmatpush.bf16.msra.mxu0 %v820_v9  ;;  %839 = vmatpush.bf16.msra.mxu3 %v820_v9 }
  0x19   : > { %514 = vmatpush.bf16.msra.mxu1 %v828_v10 }
  0x1a   : > { %575 = vmatpush.bf16.msra.mxu2 %v810_v11 }
  0x1c   : > { %497 = vmatpush.bf16.msra.mxu0 %v819_v12  ;;  %840 = vmatpush.bf16.msra.mxu3 %v819_v12 }
  0x1d   : > { %515 = vmatpush.bf16.msra.mxu1 %v827_v13  ;;  %805 = vmatmul.msk.bf16.vlgmr.msra.gmra.mxu2 %vm561_vm0, %v809_v14 }
  0x20   : > { %498 = vmatpush.bf16.msra.mxu0 %v818_v15  ;;  %841 = vmatpush.bf16.msra.mxu3 %v818_v15 }
  0x21   : > { %516 = vmatpush.bf16.msra.mxu1 %v826_v16 }
  0x24   : > { %499 = vmatpush.bf16.msra.mxu0 %v817_v17  ;;  %842 = vmatpush.bf16.msra.mxu3 %v817_v17 }
  0x25   : > { %517 = vmatpush.bf16.msra.mxu1 %v825_v18 }
  0x28   : > { %500 = vmatpush.bf16.msra.mxu0 %v816_v21  ;;  %843 = vmatpush.bf16.msra.mxu3 %v816_v21 }
  0x29   : > { %518 = vmatpush.bf16.msra.mxu1 %v824_v22 }
  0x2b   : > { %501 = vmatmul.bf16.vlgmr.msra.gmra.mxu0 %v716_v29  ;;  %506 = vmatmul.bf16.vlgmr.msra.gmra.mxu3 %v391_v31 }
  0x2c   : > { %519 = vmatmul.bf16.vlgmr.msra.gmra.mxu1 %v720_v30 }
  0x2d   : > { %806 = vmatmul.msk.bf16.gmra.mxu2 %vm561_vm0, %v536_v32 }
  0x3c   : > { %524 = vmatmul.bf16.gmra.mxu1 %v392_v34 }
  0xa0   : > { %v577_v35 = vpop.f32.mrf.mxu2 }
  0xa8   : > { %v502_v36 = vpop.f32.mrf.mxu0  ;;  %v579_v40 = vpop.f32.mrf.mxu2 }
  0xa9   : > { %v520_v37 = vpop.f32.mrf.mxu1 }
  0xaa   : > { %v521_v38 = vadd.f32 %v520_v37, %v502_v36 }
  0xac   : > { %v578_v42 = vadd.f32 %v577_v35, %v521_v38 }
  0xae   : > { %v590_v44 = vadd.f32 %v854_v39, %v578_v42  ;;  %v507_v47 = vpop.f32.mrf.mxu3 }
  0xb0   : > { %v603_v46 = vmul.f32 %v855_v43, %v590_v44  ;;  %v504_v48 = vpop.f32.mrf.mxu0  ;;  %v582_v52 = vpop.f32.mrf.mxu2 }
  0xb1   : > { %v522_v49 = vpop.f32.mrf.mxu1 }
  0xb2   : > { %v606_v50 = vadd.f32 %v834_v45, %v603_v46  ;;  %v523_v51 = vadd.f32 %v522_v49, %v504_v48 }
  0xb4   : > { %v609_v53 = vpack.c.bf16 %v606_v50, %v606_v50  ;;  %v580_v54 = vadd.f32 %v579_v40, %v523_v51 }
  0xb6   : > { %613 = vst.msk [vmem:[%s332_s19] sm:$0xf] %vm612_vm1, %v609_v53  ;;  %v591_v55 = vadd.f32 %v854_v39, %v580_v54  ;;  %v509_v58 = vpop.f32.mrf.mxu3 }
  0xb8   : > { %v604_v57 = vmul.f32 %v855_v43, %v591_v55  ;;  %v584_v62 = vpop.f32.mrf.mxu2 }
  0xb9   : > { %v525_v59 = vpop.f32.mrf.mxu1 }
  0xba   : > { %v607_v60 = vadd.f32 %v835_v56, %v604_v57  ;;  %v526_v61 = vadd.f32 %v525_v59, %v507_v47 }
  0xbc   : > { %v610_v0 = vpack.c.bf16 %v607_v60, %v607_v60  ;;  %v583_v1 = vadd.f32 %v582_v52, %v526_v61 }
  0xbe   : > { %614 = vst.msk [vmem:[%s332_s19 + $0x4] sm:$0xf] %vm612_vm1, %v610_v0  ;;  %v592_v2 = vadd.f32 %v854_v39, %v583_v1 }
  0xc0   : > { %v605_v4 = vmul.f32 %v855_v43, %v592_v2 }
  0xc1   : > { %v527_v5 = vpop.f32.mrf.mxu1 }
  0xc2   : > { %v608_v6 = vadd.f32 %v605_v4, %v598_v3 }
  0xc4   : > { %v611_v7 = vpack.c.bf16 %v608_v6, %v608_v6 }
  0xc6   : > { %615 = vst.msk [vmem:[%s332_s19 + $0x8] sm:$0xf] %vm612_vm1, %v611_v7 }
  0xc7 PF: > { %s17_s24 = sadd.s32 1, %s862_s24  }
  0xc8   : > { %p14_p4 = scmp.ge.s32.totalorder %s17_s24, 4  }
  0xca   :  { %16 = sbr.rel (!%p14_p4) target bundleno = 1 (0x1), region = 87 }

// kernel: step_fn.32
= control target key start
LH: loop header
LB: loop body
LE: loop exit
PB: predicated region body
PF: predicated region fallthrough
CT: control target
= control target key end

     0   :  { %v136_v4 = vmov 0.0   ;;  %vm75_vm4 = vcmask 523264   ;;  %s178_s1 = inlined_call_operand.vmem [shape: bf16[64,128], index: 1, kind: input, shape index: {}]   ;;  %s179_s0 = inlined_call_operand.vmem [shape: f32[2,64], index: 0, kind: input, shape index: {}]   ;;  %s180_s2 = inlined_call_operand.vmem [shape: f32[1,128], index: 2, kind: input, shape index: {}]   ;;  %s181_s3 = inlined_call_operand.vmem [shape: f32[2,128], index: 3, kind: output, shape index: {}]  }
   0x1   :  { %v129_v0 = vld [vmem:[%s178_s1 + $0x18] sm:$0xff]  ;;  %v20_v1 = vld [vmem:[%s179_s0] sm:$0x3]  ;;  %v128_v2 = vld [vmem:[%s178_s1 + $0x10] sm:$0xff]  ;;  %19 = vst [vmem:[#allocation2] sm:$0x3] %v136_v4 }
   0x2   :  { %83 = vmatpush.bf16.msra.mxu0 %v129_v0  ;;  %v108_v3 = vmul.f32 -1.442695, %v20_v1  ;;  %v127_v5 = vld [vmem:[%s178_s1 + $0x8] sm:$0xff]  ;;  %v126_v7 = vld [vmem:[%s178_s1] sm:$0xff] }
   0x3   :  { %v131_v24 = vld [vmem:[%s180_s2] ss:$0 sm:$0xff] }
   0x4   :  { %132 = vpow2.f32 %v108_v3 }
   0x6   :  { %84 = vmatpush.bf16.msra.mxu0 %v128_v2 }
   0x8   :  { %v41_v21 = vld [vmem:[#allocation2] sm:$0x3] }
   0xa   :  { %v133_v6 = vpop.eup %132  ;;  %85 = vmatpush.bf16.msra.mxu0 %v127_v5 }
   0xb   :  { %v24_v8 = vadd.f32 1.0, %v133_v6 }
   0xd   :  { %134 = vrcp.f32 %v24_v8  ;;  %v36_v11 = vand.u32 2147483648, %v24_v8  ;;  %vm30_vm0 = vweird.f32 %v24_v8  ;;  %v34_v13 = vand.u32 2147483647, %v24_v8 }
   0xe   :  { %86 = vmatpush.bf16.msra.mxu0 %v126_v7 }
   0xf   :  { %v37_v15 = vor.u32 1.1754944e-38, %v36_v11  ;;  %vm35_vm3 = vcmp.eq.f32.partialorder %v34_v13, 8.507059e+37 }
  0x13   :  { %v135_v9 = vpop.eup %134 }
  0x14   :  { %v26_v10 = vmul.f32 %v135_v9, %v24_v8  ;;  %vm31_vm1 = vweird.f32 %v135_v9 }
  0x15   :  { %vm32_vm2 = vmor %vm30_vm0, %vm31_vm1 }
  0x16   :  { %v27_v12 = vsub.f32 1.0, %v26_v10 }
  0x18   :  { %v28_v14 = vmul.f32 %v135_v9, %v27_v12 }
  0x1a   :  { %v29_v16 = vadd.f32 %v135_v9, %v28_v14 }
  0x1c   :  { %v33_v17 = vsel %vm32_vm2, %v135_v9, %v29_v16 }
  0x1d   :  { %v38_v18 = vsel %vm35_vm3, %v37_v15, %v33_v17 }
  0x1e   :  { %v40_v19 = vmul.f32 %v38_v18, %v20_v1 }
  0x20   :  { %v42_v20 = vpack.c.bf16 %v40_v19, %v40_v19 }
  0x22   :  { %125 = vmatmul.msk.bf16.vlgmr.msra.gmra.mxu0 %vm75_vm4, %v42_v20 }
  0x9f   :  { %v88_v22 = vpop.f32.mrf.mxu0 }
  0xa0   :  { %v92_v23 = vadd.f32 %v88_v22, %v41_v21 }
  0xa2   :  { %93 = vst [vmem:[#allocation2] sm:$0x3] %v92_v23 }
  0xa7   :  { %v90_v25 = vpop.f32.mrf.mxu0 }
  0xa9   :  { %v97_v26 = vld [vmem:[#allocation2] sm:$0x3] }
  0xaa   :  { %v102_v27 = vadd.f32 %v131_v24, %v97_v26 }
  0xac   :  { %103 = vst [vmem:[%s181_s3] sm:$0x3] %v102_v27 }

// kernel: step_fn.30
= control target key start
LH: loop header
LB: loop body
LE: loop exit
PB: predicated region body
PF: predicated region fallthrough
CT: control target
= control target key end

     0   :  { %s1159_s18 = smov 0   ;;  %s1593_s0 = inlined_call_operand.vmem [shape: bf16[2,24,192], index: 0, kind: input, shape index: {}]   ;;  %s1594_s1 = inlined_call_operand.vmem [shape: f32[24,16], index: 1, kind: input, shape index: {}]   ;;  %s1595_s2 = inlined_call_operand.vmem [shape: f32[24,16], index: 2, kind: input, shape index: {}]   ;;  %s1596_s3 = inlined_call_operand.vmem [shape: f32[1,32], index: 3, kind: input, shape index: {}]   ;;  %s1597_s4 = inlined_call_operand.vmem [shape: f32[1,32], index: 4, kind: input, shape index: {}]   ;;  %s1598_s5 = inlined_call_operand.vmem [shape: bf16[2,24,64], index: 5, kind: output, shape index: {}]  }
   0x1 LB: > { %s996_s19 = sadd.s32 4294967295, %s1119_s18   ;;  %p1000_p0 = scmp.ge.s32.totalorder %s1119_s18, 1  ;;  %s1119_s18 = sphi %s1159_s18, %s15_s18  }
   0x2   : > { %p187_p1 = scmp.lt.s32.totalorder %s1119_s18, 3 }
   0x4   : > { %p188_p2 = pnand %p1000_p0, %p187_p1 }
   0x5   : > { %p215_p3 = scmp.lt.s32.totalorder (!%p188_p2), %s996_s19, 1  ;;  %s1121_s24 = smov (!%p188_p2), 32  }
   0x6   : > { %191 = sbr.rel (%p188_p2) target bundleno = 1085 (0x43d), region = 40  ;;  %s1122_s25 = smov (!%p188_p2), 96  }
   0x7   : > { %s1123_s26 = smov (!%p188_p2), 64   ;;  %s1125_s6 = smov (!%p188_p2), 16  }
   0x8   : > { %s1126_s7 = smov (!%p188_p2), 80   ;;  %s1127_s8 = smov (!%p188_p2), 48  }
   0x9   : > { %s1128_s27 = smov (!%p188_p2), 112  }
   0xb   : > { %s1602_s19 = smov (!%p215_p3, %s996_s19), 1  ;;  %v1061_v9 = vld [vmem:[%s1597_s4] ss:$0 sm:$0xff]  ;;  %vm246_vm0 = vcmask 261120   ;;  %v1124_v31 = vmov 32.0  }
   0xc   : > { %s1018_s20 = smul.u32 24, %s1602_s19  ;;  %v1220_v24 = vld [vmem:[%s1596_s3] ss:$0 sm:$0xff]  ;;  %1063 = vrcp.f32 %v1124_v31 }
   0xe   : > { %s1173_s23 = scalar_lea.vmem %s1593_s0, %s1018_s20 }
   0xf   : > { %v1176_v0 = vld [vmem:[%s1173_s23 + $0x10] sm:$0xff]  ;;  %v227_v1 = vld [vmem:[%s1173_s23 + $0x8] sm:$0xf]  ;;  %v226_v4 = vld [vmem:[%s1173_s23] sm:$0xf] }
  0x10   : > { %v1180_v2 = vunpack.c.l.bf16 %v1176_v0  ;;  %v1182_v3 = vunpack.c.l.bf16 %v227_v1  ;;  %v1194_v7 = vunpack.c.l.bf16 %v226_v4 }
  0x12   : > { %v1187_v5 = vmul.f32 %v1180_v2, %v1180_v2  ;;  %v244_v6 = vmul.f32 %v1182_v3, %v1182_v3  ;;  %v243_v8 = vmul.f32 %v1194_v7, %v1194_v7  ;;  %v1064_v32 = vpop.eup %1063 }
  0x13   : > { %v257_v33 = vmul.f32 32.0, %v1064_v32  ;;  %vm261_vm1 = vweird.f32 %v1064_v32 }
  0x14   : > { %700 = vrot.lane.b32.xlu0 %v1187_v5, %s1121_s24  ;;  %698 = vrot.lane.b32.xlu1 %v244_v6, %s1121_s24  ;;  %v250_v27 = vsel %vm246_vm0, %v244_v6, 0.0  ;;  %v247_v28 = vsel %vm246_vm0, %v243_v8, 0.0 }
  0x15   : > { %581 = vrot.lane.b32.xlu2 %v244_v6, %s1122_s25  ;;  %v258_v34 = vsub.f32 1.0, %v257_v33 }
  0x17   : > { %v259_v35 = vmul.f32 %v1064_v32, %v258_v34 }
  0x19   : > { %v260_v37 = vadd.f32 %v1064_v32, %v259_v35 }
  0x1b   : > { %v1232_v38 = vsel %vm261_vm1, %v1064_v32, %v260_v37 }
  0x1c   : > { %579 = vrot.lane.b32.xlu1 %v243_v8, %s1122_s25  ;;  %696 = vrot.lane.b32.xlu0 %v243_v8, %s1121_s24 }
  0x1d   : > { %583 = vrot.lane.b32.xlu2 %v1187_v5, %s1122_s25 }
  0x24   : > { %359 = vrot.lane.b32.xlu1 %v244_v6, %s1123_s26  ;;  %357 = vrot.lane.b32.xlu0 %v243_v8, %s1123_s26 }
  0x25   : > { %361 = vrot.lane.b32.xlu2 %v1187_v5, %s1123_s26 }
  0x2d   : > { %753 = vrot.lane.b32.xlu2 %v1061_v9, %s1122_s25 }
  0x6f   : > { %v582_v14 = vpop.permute.xlu2 %581 }
  0x70   : > { %v591_v21 = vsel %vm246_vm0, %v582_v14, 0.0 }
  0x77   : > { %v584_v19 = vpop.permute.xlu2 %583 }
  0x78   : > { %v594_v20 = vsel %vm246_vm0, %v584_v19, 0.0 }
  0x7f   : > { %v362_v23 = vpop.permute.xlu2 %361 }
  0x80   : > { %v372_v26 = vsel %vm246_vm0, %v362_v23, 0.0 }
  0x86   : > { %v701_v10 = vpop.permute.xlu0 %700  ;;  %v699_v11 = vpop.permute.xlu1 %698 }
  0x87   : > { %v708_v12 = vsel %vm246_vm0, %v699_v11, 0.0  ;;  %v711_v13 = vsel %vm246_vm0, %v701_v10, 0.0  ;;  %v1230_v36 = vpop.permute.xlu2 %753 }
  0x88   : > { %709 = vadd.xlane.f32.xlu2 %v708_v12  ;;  %712 = vadd.xlane.f32.xlu0 %v711_v13 }
  0x8e   : > { %v580_v15 = vpop.permute.xlu1 %579  ;;  %v697_v16 = vpop.permute.xlu0 %696 }
  0x8f   : > { %v588_v17 = vsel %vm246_vm0, %v580_v15, 0.0  ;;  %v705_v18 = vsel %vm246_vm0, %v697_v16, 0.0 }
  0x90   : > { %589 = vadd.xlane.f32.xlu0 %v588_v17  ;;  %706 = vadd.xlane.f32.xlu1 %v705_v18 }
  0x96   : > { %v360_v22 = vpop.permute.xlu1 %359  ;;  %v358_v29 = vpop.permute.xlu0 %357 }
  0x97   : > { %v369_v25 = vsel %vm246_vm0, %v360_v22, 0.0  ;;  %v366_v30 = vsel %vm246_vm0, %v358_v29, 0.0 }
  0x98   : > { %595 = vadd.xlane.f32.xlu0 %v594_v20  ;;  %592 = vadd.xlane.f32.xlu1 %v591_v21 }
  0xa0   : > { %636 = vrot.lane.b32.xlu2 %v1220_v24, %s1121_s24  ;;  %370 = vadd.xlane.f32.xlu0 %v369_v25 }
  0xa1   : > { %373 = vadd.xlane.f32.xlu1 %v372_v26 }
  0xa8   : > { %251 = vadd.xlane.f32.xlu0 %v250_v27 }
  0xa9   : > { %248 = vadd.xlane.f32.xlu1 %v247_v28 }
  0xbc   : > { %416 = vrot.lane.b32.xlu0 %v1061_v9, %s1123_s26 }
  0xc9   : > { %367 = vadd.xlane.f32.xlu2 %v366_v30 }
  0xfb   : > { %v710_v39 = vpop.xlane.xlu2 %709  ;;  %v713_v40 = vpop.xlane.xlu0 %712 }
  0xfc   : > { %v715_v41 = vmul.f32 %v710_v39, %v1232_v38  ;;  %v716_v42 = vmul.f32 %v713_v40, %v1232_v38 }
  0xfe   : > { %v718_v43 = vadd.f32 1e-06, %v715_v41  ;;  %v719_v44 = vadd.f32 1e-06, %v716_v42 }
 0x100   : > { %1065 = vrsqrt.f32 %v718_v43  ;;  %vm736_vm2 = vweird.f32 %v718_v43  ;;  %vm746_vm6 = vweird.f32 %v719_v44 }
 0x101   : > { %1067 = vrsqrt.f32 %v719_v44 }
 0x103   : > { %v707_v45 = vpop.xlane.xlu1 %706  ;;  %v590_v46 = vpop.xlane.xlu0 %589 }
 0x104   : > { %v714_v47 = vmul.f32 %v707_v45, %v1232_v38  ;;  %v597_v48 = vmul.f32 %v590_v46, %v1232_v38 }
 0x106   : > { %v1066_v49 = vpop.eup %1065  ;;  %v717_v50 = vadd.f32 1e-06, %v714_v47  ;;  %v1238_v51 = vadd.f32 1e-06, %v597_v48 }
 0x107   : > { %v1068_v52 = vpop.eup %1067  ;;  %v731_v53 = vmul.f32 %v1066_v49, %v718_v43  ;;  %vm737_vm3 = vweird.f32 %v1066_v49 }
 0x108   : > { %v741_v54 = vmul.f32 %v1068_v52, %v719_v44  ;;  %1069 = vrsqrt.f32 %v717_v50  ;;  %vm747_vm4 = vweird.f32 %v1068_v52  ;;  %vm738_vm5 = vmor %vm736_vm2, %vm737_vm3  ;;  %vm609_vm9 = vweird.f32 %v1238_v51  ;;  %v637_v44 = vpop.permute.xlu2 %636 }
 0x109   : > { %v732_v55 = vmul.f32 %v1066_v49, %v731_v53  ;;  %1071 = vrsqrt.f32 %v1238_v51  ;;  %vm748_vm7 = vmor %vm746_vm6, %vm747_vm4  ;;  %vm726_vm11 = vweird.f32 %v717_v50 }
 0x10a   : > { %v742_v56 = vmul.f32 %v1068_v52, %v741_v54 }
 0x10b   : > { %v733_v57 = vmul.f32 0.5, %v732_v55  ;;  %v593_v58 = vpop.xlane.xlu1 %592  ;;  %v596_v59 = vpop.xlane.xlu0 %595 }
 0x10c   : > { %v743_v60 = vmul.f32 0.5, %v742_v56  ;;  %v598_v61 = vmul.f32 %v593_v58, %v1232_v38  ;;  %v599_v62 = vmul.f32 %v596_v59, %v1232_v38 }
 0x10d   : > { %v734_v63 = vsub.f32 1.5, %v733_v57 }
 0x10e   : > { %v1070_v1 = vpop.eup %1069  ;;  %v744_v4 = vsub.f32 1.5, %v743_v60  ;;  %v1243_v6 = vadd.f32 1e-06, %v598_v61  ;;  %v1245_v8 = vadd.f32 1e-06, %v599_v62 }
 0x10f   : > { %v1072_v9 = vpop.eup %1071  ;;  %v735_v10 = vmul.f32 %v1066_v49, %v734_v63  ;;  %v721_v11 = vmul.f32 %v1070_v1, %v717_v50  ;;  %vm727_vm8 = vweird.f32 %v1070_v1 }
 0x110   : > { %v745_v12 = vmul.f32 %v1068_v52, %v744_v4  ;;  %v604_v13 = vmul.f32 %v1072_v9, %v1238_v51  ;;  %1073 = vrsqrt.f32 %v1243_v6  ;;  %vm610_vm10 = vweird.f32 %v1072_v9  ;;  %vm728_vm12 = vmor %vm726_vm11, %vm727_vm8 }
 0x111   : > { %v722_v14 = vmul.f32 %v1070_v1, %v721_v11  ;;  %1075 = vrsqrt.f32 %v1245_v8  ;;  %v739_v16 = vsel %vm738_vm5, %v1066_v49, %v735_v10  ;;  %vm611_vm13 = vmor %vm609_vm9, %vm610_vm10  ;;  %vm619_vm15 = vweird.f32 %v1243_v6 }
 0x112   : > { %v605_v15 = vmul.f32 %v1072_v9, %v604_v13  ;;  %v749_v17 = vsel %vm748_vm7, %v1068_v52, %v745_v12  ;;  %v751_v19 = vmul.f32 %v739_v16, %v1182_v3  ;;  %vm629_vm2 = vweird.f32 %v1245_v8 }
 0x113   : > { %v723_v18 = vmul.f32 0.5, %v722_v14  ;;  %v752_v20 = vmul.f32 %v749_v17, %v1180_v2  ;;  %v371_v21 = vpop.xlane.xlu0 %370 }
 0x114   : > { %v606_v22 = vmul.f32 0.5, %v605_v15  ;;  %v374_v23 = vpop.xlane.xlu1 %373  ;;  %v376_v25 = vmul.f32 %v371_v21, %v1232_v38  ;;  %v757_v27 = vmul.f32 %v1230_v36, %v751_v19 }
 0x115   : > { %v724_v26 = vsub.f32 1.5, %v723_v18  ;;  %v758_v28 = vmul.f32 %v1230_v36, %v752_v20  ;;  %v377_v29 = vmul.f32 %v374_v23, %v1232_v38 }
 0x116   : > { %v1074_v30 = vpop.eup %1073  ;;  %v607_v31 = vsub.f32 1.5, %v606_v22  ;;  %v1257_v32 = vadd.f32 1e-06, %v376_v25  ;;  %764 = vrot.lane.b32.xlu0 %v757_v27, %s1121_s24  ;;  %v253_v22 = vsel %vm246_vm0, %v1187_v5, 0.0 }
 0x117   : > { %v1076_v33 = vpop.eup %1075  ;;  %v725_v34 = vmul.f32 %v1070_v1, %v724_v26  ;;  %v614_v35 = vmul.f32 %v1074_v30, %v1243_v6  ;;  %766 = vrot.lane.b32.xlu2 %v758_v28, %s1121_s24  ;;  %v380_v37 = vadd.f32 1e-06, %v377_v29  ;;  %778 = vrot.lane.b32.xlu1 %v758_v28, %s1125_s6  ;;  %vm620_vm14 = vweird.f32 %v1074_v30 }
 0x118   : > { %v608_v39 = vmul.f32 %v1072_v9, %v607_v31  ;;  %v624_v40 = vmul.f32 %v1076_v33, %v1245_v8  ;;  %1077 = vrsqrt.f32 %v1257_v32  ;;  %vm621_vm1 = vmor %vm619_vm15, %vm620_vm14  ;;  %vm630_vm3 = vweird.f32 %v1076_v33 }
 0x119   : > { %v615_v41 = vmul.f32 %v1074_v30, %v614_v35  ;;  %1079 = vrsqrt.f32 %v380_v37  ;;  %v729_v42 = vsel %vm728_vm12, %v1070_v1, %v725_v34  ;;  %vm631_vm4 = vmor %vm629_vm2, %vm630_vm3  ;;  %vm407_vm5 = vweird.f32 %v380_v37 }
 0x11a   : > { %v625_v43 = vmul.f32 %v1076_v33, %v624_v40  ;;  %v612_v45 = vsel %vm611_vm13, %v1072_v9, %v608_v39  ;;  %v750_v46 = vmul.f32 %v729_v42, %v1194_v7  ;;  %vm397_vm8 = vweird.f32 %v1257_v32  ;;  %v1322_v42 = vld [vmem:[%s1595_s2 + $0x8] sm:$0xff] }
 0x11b   : > { %v616_v47 = vmul.f32 0.5, %v615_v41  ;;  %v633_v48 = vmul.f32 %v612_v45, %v1194_v7  ;;  %v252_v8 = vpop.xlane.xlu0 %251  ;;  %v1317_v41 = vld [vmem:[%s1594_s1 + $0x8] sm:$0xff] }
 0x11c   : > { %v626_v49 = vmul.f32 0.5, %v625_v43  ;;  %v756_v50 = vmul.f32 %v1230_v36, %v750_v46  ;;  %v264_v25 = vmul.f32 %v1232_v38, %v252_v8 }
 0x11d   : > { %v617_v52 = vsub.f32 1.5, %v616_v47  ;;  %v639_v53 = vmul.f32 %v637_v44, %v633_v48  ;;  %v1334_v47 = vld [vmem:[%s1595_s2 + $0x10] sm:$0xff] }
 0x11e   : > { %v1078_v54 = vpop.eup %1077  ;;  %v627_v51 = vsub.f32 1.5, %v626_v49  ;;  %v267_v28 = vadd.f32 1e-06, %v264_v25 }
 0x11f   : > { %v1080_v55 = vpop.eup %1079  ;;  %v618_v56 = vmul.f32 %v1074_v30, %v617_v52  ;;  %762 = vrot.lane.b32.xlu2 %v756_v50, %s1121_s24  ;;  %645 = vrot.lane.b32.xlu0 %v639_v53, %s1122_s25  ;;  %v392_v36 = vmul.f32 %v1078_v54, %v1257_v32  ;;  %vm398_vm9 = vweird.f32 %v1078_v54  ;;  %v249_v32 = vpop.xlane.xlu1 %248 }
 0x120   : > { %v402_v57 = vmul.f32 %v1080_v55, %v380_v37  ;;  %774 = vrot.lane.b32.xlu1 %v756_v50, %s1125_s6  ;;  %v628_v59 = vmul.f32 %v1076_v33, %v627_v51  ;;  %vm408_vm6 = vweird.f32 %v1080_v55  ;;  %vm399_vm10 = vmor %vm397_vm8, %vm398_vm9  ;;  %1081 = vrsqrt.f32 %v267_v28 }
 0x121   : > { %v622_v58 = vsel %vm621_vm1, %v1074_v30, %v618_v56  ;;  %v393_v1 = vmul.f32 %v1078_v54, %v392_v36  ;;  %vm409_vm7 = vmor %vm407_vm5, %vm408_vm6  ;;  %v263_v34 = vmul.f32 %v1232_v38, %v249_v32  ;;  %vm285_vm11 = vweird.f32 %v267_v28 }
 0x122   : > { %v634_v60 = vmul.f32 %v622_v58, %v1182_v3  ;;  %v403_v61 = vmul.f32 %v1080_v55, %v402_v57  ;;  %v632_v4 = vsel %vm631_vm4, %v1076_v33, %v628_v59  ;;  %vm350_vm8 = vcmask 130048  }
 0x123   : > { %v394_v10 = vmul.f32 0.5, %v393_v1  ;;  %v635_v11 = vmul.f32 %v632_v4, %v1180_v2  ;;  %v1312_v39 = vadd.f32 1e-06, %v263_v34  ;;  %vm513_vm9 = vcmask 195584  }
 0x124   : > { %v640_v62 = vmul.f32 %v637_v44, %v634_v60  ;;  %v404_v63 = vmul.f32 0.5, %v403_v61 }
 0x125   : > { %v395_v12 = vsub.f32 1.5, %v394_v10  ;;  %v641_v14 = vmul.f32 %v637_v44, %v635_v11  ;;  %v1328_v44 = vld [vmem:[%s1594_s1 + $0x10] sm:$0xff]  ;;  %vm275_vm2 = vweird.f32 %v1312_v39 }
 0x126   : > { %v405_v6 = vsub.f32 1.5, %v404_v63  ;;  %v1303_v31 = vpop.eup %1081  ;;  %v1366_v63 = vld [vmem:[%s1595_s2] sm:$0xff] }
 0x127   : > { %776 = vrot.lane.b32.xlu2 %v757_v27, %s1125_s6  ;;  %659 = vrot.lane.b32.xlu0 %v640_v62, %s1126_s7  ;;  %v396_v16 = vmul.f32 %v1078_v54, %v395_v12  ;;  %v280_v5 = vmul.f32 %v1303_v31, %v267_v28  ;;  %vm286_vm12 = vweird.f32 %v1303_v31 }
 0x128   : > { %v406_v9 = vmul.f32 %v1080_v55, %v405_v6  ;;  %647 = vrot.lane.b32.xlu1 %v640_v62, %s1122_s25  ;;  %v1361_v62 = vld [vmem:[%s1594_s1] sm:$0xff]  ;;  %vm1370_vm13 = vmor %vm285_vm11, %vm286_vm12  ;;  %vm937_vm11 = vcmask 519168  }
 0x129   : > { %v400_v19 = vsel %vm399_vm10, %v1078_v54, %v396_v16  ;;  %v281_v37 = vmul.f32 %v1303_v31, %v280_v5  ;;  %vm542_vm10 = vcmask 1043456  }
 0x12a   : > { %v410_v13 = vsel %vm409_vm7, %v1080_v55, %v406_v9  ;;  %v412_v20 = vmul.f32 %v400_v19, %v1182_v3 }
 0x12b   : > { %v413_v15 = vmul.f32 %v410_v13, %v1180_v2  ;;  %v282_v45 = vmul.f32 0.5, %v281_v37 }
 0x12d   : > { %v283_v36 = vsub.f32 1.5, %v282_v45 }
 0x12e   : > { %v1284_v17 = vpop.permute.xlu0 %416 }
 0x12f   : > { %657 = vrot.lane.b32.xlu2 %v639_v53, %s1126_s7  ;;  %661 = vrot.lane.b32.xlu0 %v641_v14, %s1126_s7  ;;  %v421_v18 = vmul.f32 %v1284_v17, %v413_v15  ;;  %v1291_v21 = vmul.f32 %v1284_v17, %v412_v20  ;;  %v284_v1 = vmul.f32 %v1303_v31, %v283_v36 }
 0x137   : > { %649 = vrot.lane.b32.xlu2 %v641_v14, %s1122_s25  ;;  %429 = vrot.lane.b32.xlu0 %v421_v18, %s1123_s26 }
 0x13c   : > { %v368_v23 = vpop.xlane.xlu2 %367 }
 0x13d   : > { %v375_v27 = vmul.f32 %v368_v23, %v1232_v38 }
 0x13f   : > { %441 = vrot.lane.b32.xlu2 %v421_v18, %s1127_s8  ;;  %427 = vrot.lane.b32.xlu0 %v1291_v21, %s1123_s26  ;;  %v1300_v29 = vadd.f32 1e-06, %v375_v27 }
 0x141   : > { %1083 = vrsqrt.f32 %v1300_v29  ;;  %vm387_vm14 = vweird.f32 %v1300_v29 }
 0x142   : > { %1085 = vrsqrt.f32 %v1312_v39 }
 0x147   : > { %v1305_v33 = vpop.eup %1083 }
 0x148   : > { %v382_v35 = vmul.f32 %v1305_v33, %v1300_v29  ;;  %v1355_v59 = vpop.eup %1085  ;;  %vm388_vm15 = vweird.f32 %v1305_v33 }
 0x149   : > { %v270_v9 = vmul.f32 %v1355_v59, %v1312_v39  ;;  %vm389_vm1 = vmor %vm387_vm14, %vm388_vm15  ;;  %vm276_vm3 = vweird.f32 %v1355_v59 }
 0x14a   : > { %v383_v43 = vmul.f32 %v1305_v33, %v382_v35  ;;  %vm277_vm4 = vmor %vm275_vm2, %vm276_vm3 }
 0x14b   : > { %v271_v28 = vmul.f32 %v1355_v59, %v270_v9 }
 0x14c   : > { %v384_v55 = vmul.f32 0.5, %v383_v43 }
 0x14e   : > { %v385_v61 = vsub.f32 1.5, %v384_v55 }
 0x150   : > { %v386_v19 = vmul.f32 %v1305_v33, %v385_v61 }
 0x152   : > { %254 = vadd.xlane.f32.xlu1 %v253_v22 }
 0x171   : > { %v767_v26 = vpop.permute.xlu2 %766 }
 0x172   : > { %v1345_v54 = vmul.f32 %v767_v26, %v1328_v44  ;;  %v791_v10 = vmul.f32 %v767_v26, %v1334_v47  ;;  %v288_v26 = vsel %vm1370_vm13, %v1303_v31, %v284_v1 }
 0x173   : > { %v300_v29 = vmul.f32 %v288_v26, %v1182_v3 }
 0x175   : > { %v1419_v43 = vmul.f32 %v1220_v24, %v300_v29 }
 0x179   : > { %v763_v30 = vpop.permute.xlu2 %762 }
 0x17a   : > { %v1384_v14 = vmul.f32 %v763_v30, %v1361_v62  ;;  %v789_v15 = vmul.f32 %v763_v30, %v1366_v63  ;;  %v390_v30 = vsel %vm389_vm1, %v1305_v33, %v386_v19 }
 0x17b   : > { %v411_v33 = vmul.f32 %v390_v30, %v1194_v7 }
 0x181   : > { %v777_v40 = vpop.permute.xlu2 %776 }
 0x182   : > { %v1337_v48 = vmul.f32 %v777_v40, %v1322_v42  ;;  %v793_v49 = vmul.f32 %v777_v40, %v1317_v41  ;;  %v272_v40 = vmul.f32 0.5, %v271_v28 }
 0x188   : > { %v765_v46 = vpop.permute.xlu0 %764 }
 0x189   : > { %v1341_v50 = vmul.f32 %v765_v46, %v1317_v41  ;;  %v790_v52 = vmul.f32 %v765_v46, %v1322_v42  ;;  %v779_v53 = vpop.permute.xlu1 %778  ;;  %v658_v60 = vpop.permute.xlu2 %657 }
 0x18a   : > { %v1348_v51 = vmul.f32 %v779_v53, %v1334_v47  ;;  %v794_v4 = vmul.f32 %v779_v53, %v1328_v44  ;;  %v1378_v11 = vmul.f32 %v658_v60, %v1366_v63  ;;  %v419_v53 = vmul.f32 %v1284_v17, %v411_v33 }
 0x18b   : > { %v787_v56 = vsub.f32 %v1341_v50, %v1337_v48  ;;  %v796_v57 = vadd.f32 %v793_v49, %v790_v52 }
 0x18c   : > { %v788_v58 = vsub.f32 %v1345_v54, %v1348_v51  ;;  %v797_v22 = vadd.f32 %v794_v4, %v791_v10 }
 0x18d   : > { %803 = vrot.lane.b32.xlu0 %v796_v57, %s1125_s6  ;;  %v273_v57 = vsub.f32 1.5, %v272_v40 }
 0x18f   : > { %v274_v1 = vmul.f32 %v1355_v59, %v273_v57 }
 0x191   : > { %v646_v6 = vpop.permute.xlu0 %645  ;;  %v650_v52 = vpop.permute.xlu2 %649  ;;  %v278_v4 = vsel %vm277_vm4, %v1355_v59, %v274_v1 }
 0x192   : > { %v1381_v12 = vmul.f32 %v646_v6, %v1361_v62  ;;  %v775_v13 = vpop.permute.xlu1 %774  ;;  %v672_v32 = vmul.f32 %v646_v6, %v1366_v63  ;;  %v299_v39 = vmul.f32 %v278_v4, %v1194_v7  ;;  %v674_v9 = vmul.f32 %v650_v52, %v1334_v47 }
 0x193   : > { %v1388_v16 = vmul.f32 %v775_v13, %v1366_v63  ;;  %v792_v18 = vmul.f32 %v775_v13, %v1361_v62 }
 0x194   : > { %v669_v20 = vsub.f32 %v1381_v12, %v1378_v11  ;;  %v1443_v6 = vmul.f32 %v1220_v24, %v299_v39 }
 0x195   : > { %v786_v23 = vsub.f32 %v1384_v14, %v1388_v16  ;;  %v795_v25 = vadd.f32 %v792_v18, %v789_v15  ;;  %439 = vrot.lane.b32.xlu0 %v1291_v21, %s1127_s8  ;;  %v675_v21 = vmul.f32 %v658_v60, %v1361_v62  ;;  %v1431_v60 = vmul.f32 %v650_v52, %v1328_v44 }
 0x197   : > { %v1036_v27 = vpack.i.bf16 %v795_v25, %v797_v22  ;;  %v678_v45 = vadd.f32 %v675_v21, %v672_v32 }
 0x199   : > { %1037 = vrot.lane.b32.xlu2 %v1036_v27, %s1125_s6  ;;  %v660_v5 = vpop.permute.xlu0 %659  ;;  %v1452_v59 = vpop.permute.xlu2 %441 }
 0x19a   : > { %v1409_v34 = vmul.f32 %v660_v5, %v1322_v42  ;;  %v676_v31 = vmul.f32 %v660_v5, %v1317_v41  ;;  %v648_v35 = vpop.permute.xlu1 %647  ;;  %v457_v15 = vmul.f32 %v1452_v59, %v1328_v44 }
 0x19b   : > { %v1414_v37 = vmul.f32 %v648_v35, %v1317_v41  ;;  %v673_v3 = vmul.f32 %v648_v35, %v1322_v42 }
 0x19d   : > { %v670_v46 = vsub.f32 %v1414_v37, %v1409_v34  ;;  %v679_v49 = vadd.f32 %v676_v31, %v673_v3  ;;  %316 = vrot.lane.b32.xlu0 %v1419_v43, %s1128_s27 }
 0x19f   : > { %v1041_v55 = vpack.i.bf16 %v679_v49, %v678_v45 }
 0x1a1   : > { %425 = vrot.lane.b32.xlu2 %v419_v53, %s1123_s26  ;;  %1042 = vrot.lane.b32.xlu1 %v1041_v55, %s1125_s6  ;;  %v662_v36 = vpop.permute.xlu0 %661 }
 0x1a2   : > { %v1434_v61 = vmul.f32 %v662_v36, %v1334_v47  ;;  %v677_v8 = vmul.f32 %v662_v36, %v1328_v44 }
 0x1a4   : > { %v671_v17 = vsub.f32 %v1431_v60, %v1434_v61  ;;  %v680_v10 = vadd.f32 %v677_v8, %v674_v9  ;;  %v234_v60 = vunpack.c.h.bf16 %v1176_v0 }
 0x1a6   : > { %v1531_v61 = vpack.c.bf16 %v234_v60, %v234_v60 }
 0x1a9   : > { %437 = vrot.lane.b32.xlu2 %v419_v53, %s1127_s8  ;;  %v1449_v13 = vpop.permute.xlu0 %429 }
 0x1aa   : > { %v454_v7 = vmul.f32 %v1449_v13, %v1334_v47 }
 0x1ac   : > { %v460_v18 = vadd.f32 %v457_v15, %v454_v7  ;;  %v330_v7 = vmul.f32 %v1419_v43, %v1322_v42 }
 0x1b1   : > { %314 = vrot.lane.b32.xlu2 %v1443_v6, %s1128_s27  ;;  %v1470_v40 = vpop.permute.xlu0 %427 }
 0x1b2   : > { %v453_v14 = vmul.f32 %v1470_v40, %v1322_v42 }
 0x1b9   : > { %688 = vrot.lane.b32.xlu2 %v680_v10, %s1125_s6  ;;  %v329_v10 = vmul.f32 %v1443_v6, %v1366_v63 }
 0x1c1   : > { %468 = vrot.lane.b32.xlu2 %v460_v18, %s1125_s6 }
 0x1c5   : > { %v255_v19 = vpop.xlane.xlu1 %254 }
 0x1c6   : > { %v265_v22 = vmul.f32 %v1232_v38, %v255_v19 }
 0x1c8   : > { %v268_v25 = vadd.f32 1e-06, %v265_v22 }
 0x1ca   : > { %1087 = vrsqrt.f32 %v268_v25  ;;  %vm295_vm6 = vweird.f32 %v268_v25 }
 0x1d0   : > { %v1088_v26 = vpop.eup %1087 }
 0x1d1   : > { %v290_v27 = vmul.f32 %v1088_v26, %v268_v25  ;;  %vm296_vm5 = vweird.f32 %v1088_v26 }
 0x1d2   : > { %vm297_vm7 = vmor %vm295_vm6, %vm296_vm5 }
 0x1d3   : > { %v291_v28 = vmul.f32 %v1088_v26, %v290_v27 }
 0x1d5   : > { %v292_v29 = vmul.f32 0.5, %v291_v28 }
 0x1d7   : > { %v293_v30 = vsub.f32 1.5, %v292_v29  ;;  %v436_v29 = vmul.f32 %v1449_v13, %v1328_v44 }
 0x1d9   : > { %v294_v32 = vmul.f32 %v1088_v26, %v293_v30 }
 0x1db   : > { %v298_v5 = vsel %vm297_vm7, %v1088_v26, %v294_v32 }
 0x1dc   : > { %v301_v31 = vmul.f32 %v298_v5, %v1180_v2 }
 0x1de   : > { %v1462_v35 = vmul.f32 %v1220_v24, %v301_v31  ;;  %v448_v31 = vmul.f32 %v1452_v59, %v1334_v47 }
 0x1e0   : > { %318 = vrot.lane.b32.xlu0 %v1462_v35, %s1128_s27 }
 0x1f3   : > { %v1038_v38 = vpop.permute.xlu2 %1037 }
 0x1f4   : > { %v1039_v21 = vunpack.i.l.bf16 %v1038_v38  ;;  %v1040_v24 = vunpack.i.h.bf16 %v1038_v38  ;;  %v451_v38 = vsub.f32 %v436_v29, %v448_v31 }
 0x1f6   : > { %v812_v3 = vsel %vm350_vm8, %v788_v58, %v1039_v21  ;;  %v810_v54 = vsel %vm350_vm8, %v786_v23, %v1040_v24  ;;  %v1005_v24 = vld [vmem:[%s1173_s23 + $0x8] sm:$0xf0] }
 0x1f7   : > { %v816_v33 = vpack.c.bf16 %v812_v3, %v812_v3  ;;  %v331_v3 = vmul.f32 %v1462_v35, %v1334_v47 }
 0x1f9   : > { %v827_v45 = vsel %vm246_vm0, %v816_v33, 0 }
 0x1fa   : > { %835 = vmatpush.bf16.xpose.msra.mxu2 %v827_v45 }
 0x1fb   : > { %v426_v2 = vpop.permute.xlu2 %425 }
 0x1fc   : > { %v1482_v53 = vmul.f32 %v426_v2, %v1361_v62  ;;  %v452_v16 = vmul.f32 %v426_v2, %v1366_v63 }
 0x1ff   : > { %v804_v49 = vpop.permute.xlu0 %803 }
 0x200   : > { %v811_v52 = vsel %vm350_vm8, %v787_v56, %v804_v49 }
 0x201   : > { %v815_v51 = vpack.c.bf16 %v811_v52, %v810_v54 }
 0x203   : > { %v438_v58 = vpop.permute.xlu2 %437  ;;  %v824_v57 = vsel %vm246_vm0, %v815_v51, 0 }
 0x204   : > { %v1485_v55 = vmul.f32 %v438_v58, %v1366_v63  ;;  %836 = vmatpush.bf16.xpose.msra.mxu2 %v824_v57  ;;  %v455_v50 = vmul.f32 %v438_v58, %v1361_v62 }
 0x206   : > { %v449_v48 = vsub.f32 %v1482_v53, %v1485_v55  ;;  %v458_v36 = vadd.f32 %v455_v50, %v452_v16 }
 0x207   : > { %v440_v56 = vpop.permute.xlu0 %439 }
 0x208   : > { %v456_v23 = vmul.f32 %v440_v56, %v1317_v41 }
 0x20a   : > { %v459_v1 = vadd.f32 %v456_v23, %v453_v14 }
 0x20b   : > { %v315_v4 = vpop.permute.xlu2 %314 }
 0x20c   : > { %v1046_v39 = vpack.i.bf16 %v459_v1, %v458_v36  ;;  %v332_v8 = vmul.f32 %v315_v4, %v1361_v62  ;;  %v323_v55 = vmul.f32 %v315_v4, %v1366_v63 }
 0x20e   : > { %1047 = vrot.lane.b32.xlu0 %v1046_v39, %s1125_s6  ;;  %v335_v18 = vadd.f32 %v332_v8, %v329_v10 }
 0x20f   : > { %v317_v9 = vpop.permute.xlu0 %316 }
 0x210   : > { %v333_v15 = vmul.f32 %v317_v9, %v1317_v41  ;;  %v324_v57 = vmul.f32 %v317_v9, %v1322_v42 }
 0x212   : > { %v336_v19 = vadd.f32 %v333_v15, %v330_v7 }
 0x213   : > { %v689_v22 = vpop.permute.xlu2 %688  ;;  %v1043_v25 = vpop.permute.xlu1 %1042 }
 0x214   : > { %v1045_v26 = vunpack.i.h.bf16 %v1043_v25  ;;  %v1044_v27 = vunpack.i.l.bf16 %v1043_v25  ;;  %v1051_v28 = vpack.i.bf16 %v336_v19, %v335_v18 }
 0x216   : > { %v693_v30 = vsel %vm350_vm8, %v669_v20, %v1044_v27  ;;  %v694_v32 = vsel %vm350_vm8, %v670_v46, %v1045_v26  ;;  %1052 = vrot.lane.b32.xlu1 %v1051_v28, %s1125_s6  ;;  %v695_v20 = vsel %vm350_vm8, %v671_v17, %v689_v22  ;;  %v310_v46 = vmul.f32 %v1462_v35, %v1328_v44  ;;  %v1017_v17 = vld [vmem:[%s1173_s23 + $0x4] sm:$0xf]  ;;  %s1019_s23 = smul.u32 12, %s1602_s19 }
 0x217   : > { %v813_v5 = vpack.c.bf16 %v694_v32, %v693_v30  ;;  %v814_v34 = vpack.c.bf16 %v695_v20, %v695_v20  ;;  %v1537_v49 = vor.u32 %v1017_v17, %v1005_v24 }
 0x218   : > { %s224_s28 = scalar_lea.vmem %s1598_s5, %s1019_s23 }
 0x219   : > { %1011 = vmatmul.msk.bf16.vlgmr.msra.gmra.mxu2 %vm246_vm0, %v813_v5 }
 0x21b   : > { %v469_v13 = vpop.permute.xlu2 %468 }
 0x21c   : > { %v475_v21 = vsel %vm350_vm8, %v451_v38, %v469_v13 }
 0x21d   : > { %v479_v11 = vpack.c.bf16 %v475_v21, %v475_v21 }
 0x21f   : > { %v490_v12 = vsel %vm246_vm0, %v479_v11, 0 }
 0x220   : > { %498 = vmatpush.bf16.xpose.msra.mxu0 %v490_v12 }
 0x229   : > { %1012 = vmatmul.msk.bf16.gmra.mxu2 %vm246_vm0, %v814_v34 }
 0x252   : > { %v319_v37 = vpop.permute.xlu0 %318 }
 0x253   : > { %v325_v59 = vmul.f32 %v319_v37, %v1334_v47  ;;  %v334_v33 = vmul.f32 %v319_v37, %v1328_v44  ;;  %v447_v44 = vmul.f32 %v440_v56, %v1322_v42  ;;  %v435_v47 = vmul.f32 %v1470_v40, %v1317_v41 }
 0x254   : > { %v308_v56 = vmul.f32 %v1443_v6, %v1361_v62  ;;  %v309_v40 = vmul.f32 %v1419_v43, %v1317_v41 }
 0x255   : > { %v328_v45 = vsub.f32 %v310_v46, %v325_v59  ;;  %v337_v2 = vadd.f32 %v334_v33, %v331_v3  ;;  %v450_v52 = vsub.f32 %v435_v47, %v447_v44 }
 0x256   : > { %v326_v16 = vsub.f32 %v308_v56, %v323_v55  ;;  %v327_v23 = vsub.f32 %v309_v40, %v324_v57 }
 0x257   : > { %345 = vrot.lane.b32.xlu2 %v337_v2, %s1125_s6 }
 0x25f   : > { %874 = vrot.lane.b32.xlu2 %v1531_v61, %s1122_s25 }
 0x267   : > { %872 = vrot.lane.b32.xlu2 %v1537_v49, %s1122_s25 }
 0x280   : > { %v1048_v35 = vpop.permute.xlu0 %1047 }
 0x281   : > { %v1050_v0 = vunpack.i.h.bf16 %v1048_v35  ;;  %v1049_v54 = vunpack.i.l.bf16 %v1048_v35 }
 0x283   : > { %v473_v51 = vsel %vm350_vm8, %v449_v48, %v1049_v54  ;;  %v474_v58 = vsel %vm350_vm8, %v450_v52, %v1050_v0  ;;  %v544_v52 = vsel %vm542_vm10, %v1531_v61, 0 }
 0x284   : > { %v478_v53 = vpack.c.bf16 %v474_v58, %v473_v51  ;;  %552 = vmatpush.bf16.msra.mxu1 %v544_v52 }
 0x286   : > { %v487_v50 = vsel %vm246_vm0, %v478_v53, 0 }
 0x287   : > { %499 = vmatpush.bf16.xpose.msra.mxu0 %v487_v50 }
 0x288   : > { %v1053_v14 = vpop.permute.xlu1 %1052  ;;  %553 = vmatpush.bf16.msra.mxu1 %v1537_v49 }
 0x289   : > { %v1055_v48 = vunpack.i.h.bf16 %v1053_v14  ;;  %v1054_v36 = vunpack.i.l.bf16 %v1053_v14 }
 0x28b   : > { %v351_v1 = vsel %vm350_vm8, %v326_v16, %v1054_v36  ;;  %v352_v63 = vsel %vm350_vm8, %v327_v23, %v1055_v48 }
 0x28c   : > { %v476_v4 = vpack.c.bf16 %v352_v63, %v351_v1 }
 0x28e   : > { %1003 = vmatmul.msk.bf16.vlgmr.msra.gmra.mxu0 %vm246_vm0, %v476_v4 }
 0x29c   : > { %v838_v42 = vpop.f32.mrf.mxu2 }
 0x29d   : > { %v847_v39 = vmul.f32 0.17677669, %v838_v42 }
 0x29f   : > { %v850_v62 = vsel %vm513_vm9, %v847_v39, -inf }
 0x2a0   : > { %851 = vmax.xlane.f32.xlu0 %v850_v62 }
 0x2a4   : > { %v840_v41 = vpop.f32.mrf.mxu2 }
 0x2a5   : > { %v848_v43 = vmul.f32 0.17677669, %v840_v41 }
 0x2a7   : > { %v853_v6 = vsel %vm513_vm9, %v848_v43, -inf }
 0x2a8   : > { %854 = vmax.xlane.f32.xlu1 %v853_v6 }
 0x2ac   : > { %v843_v8 = vpop.f32.mrf.mxu2 }
 0x2ad   : > { %v849_v9 = vmul.f32 0.17677669, %v843_v8 }
 0x2af   : > { %v856_v10 = vsel %vm513_vm9, %v849_v9, -inf }
 0x2b0   : > { %857 = vmax.xlane.f32.xlu2 %v856_v10 }
 0x2b1   : > { %v346_v7 = vpop.permute.xlu2 %345 }
 0x2b2   : > { %v353_v15 = vsel %vm350_vm8, %v328_v45, %v346_v7 }
 0x2b3   : > { %v477_v18 = vpack.c.bf16 %v353_v15, %v353_v15 }
 0x2b4   : > { %v845_v19 = vpop.f32.mrf.mxu2 }
 0x2b5   : > { %1004 = vmatmul.msk.bf16.gmra.mxu0 %vm246_vm0, %v477_v18 }
 0x2b9   : > { %v875_v22 = vpop.permute.xlu2 %874 }
 0x2ba   : > { %v884_v25 = vsel %vm542_vm10, %v875_v22, 0 }
 0x2bb   : > { %892 = vmatpush.bf16.msra.mxu3 %v884_v25 }
 0x2c1   : > { %v873_v26 = vpop.permute.xlu2 %872 }
 0x2c2   : > { %893 = vmatpush.bf16.msra.mxu3 %v873_v26 }
 0x30b   : > { %v501_v27 = vpop.f32.mrf.mxu0 }
 0x30c   : > { %v510_v28 = vmul.f32 0.17677669, %v501_v27 }
 0x30e   : > { %v514_v29 = vsel %vm513_vm9, %v510_v28, -inf }
 0x30f   : > { %515 = vmax.xlane.f32.xlu0 %v514_v29 }
 0x313   : > { %v852_v30 = vpop.xlane.xlu0 %851  ;;  %v503_v5 = vpop.f32.mrf.mxu0 }
 0x314   : > { %v859_v32 = vsub.f32 %v847_v39, %v852_v30  ;;  %v511_v31 = vmul.f32 0.17677669, %v503_v5 }
 0x316   : > { %v862_v38 = vmul.f32 1.442695, %v859_v32  ;;  %v517_v13 = vsel %vm513_vm9, %v511_v31, -inf }
 0x317   : > { %518 = vmax.xlane.f32.xlu1 %v517_v13 }
 0x318   : > { %1089 = vpow2.f32 %v862_v38 }
 0x31b   : > { %v855_v21 = vpop.xlane.xlu1 %854 }
 0x31c   : > { %v860_v11 = vsub.f32 %v848_v43, %v855_v21 }
 0x31e   : > { %v1090_v12 = vpop.eup %1089  ;;  %v864_v20 = vmul.f32 1.442695, %v860_v11 }
 0x31f   : > { %v904_v34 = vsel %vm513_vm9, %v1090_v12, 0.0 }
 0x320   : > { %1091 = vpow2.f32 %v864_v20  ;;  %905 = vadd.xlane.f32.xlu1 %v904_v34 }
 0x323   : > { %v858_v37 = vpop.xlane.xlu2 %857 }
 0x324   : > { %v861_v46 = vsub.f32 %v849_v9, %v858_v37 }
 0x326   : > { %v1092_v59 = vpop.eup %1091  ;;  %v866_v3 = vmul.f32 1.442695, %v861_v46 }
 0x327   : > { %v868_v33 = vpack.c.bf16 %v1092_v59, %v1090_v12  ;;  %v907_v35 = vsel %vm513_vm9, %v1092_v59, 0.0 }
 0x328   : > { %1093 = vpow2.f32 %v866_v3 }
 0x329   : > { %1013 = vmatmul.msk.bf16.vlgmr.msra.gmra.mxu3 %vm513_vm9, %v868_v33 }
 0x32e   : > { %v1094_v45 = vpop.eup %1093 }
 0x32f   : > { %v910_v2 = vsel %vm513_vm9, %v1094_v45, 0.0  ;;  %v869_v44 = vpack.c.bf16 %v1094_v45, %v1094_v45 }
 0x330   : > { %911 = vadd.xlane.f32.xlu1 %v910_v2 }
 0x332   : > { %v506_v60 = vpop.f32.mrf.mxu0 }
 0x333   : > { %v512_v17 = vmul.f32 0.17677669, %v506_v60 }
 0x335   : > { %v520_v24 = vsel %vm513_vm9, %v512_v17, -inf }
 0x336   : > { %521 = vmax.xlane.f32.xlu0 %v520_v24 }
 0x339   : > { %1014 = vmatmul.msk.bf16.gmra.mxu3 %vm513_vm9, %v869_v44 }
 0x33a   : > { %v508_v47 = vpop.f32.mrf.mxu0 }
 0x33e   : > { %908 = vadd.xlane.f32.xlu0 %v907_v35 }
 0x382   : > { %v516_v0 = vpop.xlane.xlu0 %515 }
 0x383   : > { %v523_v54 = vsub.f32 %v510_v28, %v516_v0 }
 0x385   : > { %v526_v51 = vmul.f32 1.442695, %v523_v54 }
 0x387   : > { %1095 = vpow2.f32 %v526_v51 }
 0x38a   : > { %v519_v58 = vpop.xlane.xlu1 %518 }
 0x38b   : > { %v524_v53 = vsub.f32 %v511_v31, %v519_v58 }
 0x38d   : > { %v1096_v55 = vpop.eup %1095  ;;  %v528_v57 = vmul.f32 1.442695, %v524_v53 }
 0x38e   : > { %v564_v50 = vsel %vm513_vm9, %v1096_v55, 0.0 }
 0x38f   : > { %1097 = vpow2.f32 %v528_v57  ;;  %565 = vadd.xlane.f32.xlu2 %v564_v50 }
 0x393   : > { %v906_v16 = vpop.xlane.xlu1 %905 }
 0x395   : > { %v1098_v56 = vpop.eup %1097 }
 0x396   : > { %v567_v40 = vsel %vm513_vm9, %v1098_v56, 0.0  ;;  %v532_v14 = vpack.c.bf16 %v1098_v56, %v1096_v55 }
 0x397   : > { %568 = vadd.xlane.f32.xlu0 %v567_v40 }
 0x398   : > { %1009 = vmatmul.msk.bf16.vlgmr.msra.gmra.mxu1 %vm513_vm9, %v532_v14 }
 0x3a3   : > { %v912_v1 = vpop.xlane.xlu1 %911 }
 0x3a9   : > { %v522_v61 = vpop.xlane.xlu0 %521 }
 0x3aa   : > { %v525_v49 = vsub.f32 %v512_v17, %v522_v61 }
 0x3ac   : > { %v530_v23 = vmul.f32 1.442695, %v525_v49  ;;  %v895_v48 = vpop.f32.mrf.mxu3 }
 0x3ae   : > { %1099 = vpow2.f32 %v530_v23 }
 0x3af   : > { %1101 = vrcp.f32 %v906_v16 }
 0x3b1   : > { %v909_v36 = vpop.xlane.xlu0 %908 }
 0x3b2   : > { %1103 = vrcp.f32 %v909_v36 }
 0x3b3   : > { %1105 = vrcp.f32 %v912_v1 }
 0x3b4   : > { %v1100_v63 = vpop.eup %1099  ;;  %v897_v4 = vpop.f32.mrf.mxu3 }
 0x3b5   : > { %v570_v42 = vsel %vm513_vm9, %v1100_v63, 0.0  ;;  %v533_v39 = vpack.c.bf16 %v1100_v63, %v1100_v63  ;;  %v1102_v62 = vpop.eup %1101 }
 0x3b6   : > { %571 = vadd.xlane.f32.xlu1 %v570_v42  ;;  %v916_v43 = vmul.f32 %v1102_v62, %v895_v48 }
 0x3b7   : > { %1010 = vmatmul.msk.bf16.gmra.mxu1 %vm513_vm9, %v533_v39 }
 0x3b8   : > { %v1104_v41 = vpop.eup %1103 }
 0x3b9   : > { %v917_v6 = vmul.f32 %v1104_v41, %v897_v4  ;;  %v1106_v9 = vpop.eup %1105 }
 0x3bb   : > { %v1056_v8 = vpack.i.bf16 %v917_v6, %v916_v43 }
 0x3bc   : > { %v900_v10 = vpop.f32.mrf.mxu3 }
 0x3bd   : > { %v918_v7 = vmul.f32 %v1106_v9, %v900_v10  ;;  %1057 = vrot.lane.b32.xlu2 %v1056_v8, %s1121_s24 }
 0x3bf   : > { %926 = vrot.lane.b32.xlu0 %v918_v7, %s1121_s24 }
 0x3c4   : > { %v902_v15 = vpop.f32.mrf.mxu3 }
 0x402   : > { %v566_v18 = vpop.xlane.xlu2 %565 }
 0x403   : > { %1107 = vrcp.f32 %v566_v18 }
 0x409   : > { %v1108_v22 = vpop.eup %1107 }
 0x40a   : > { %v569_v19 = vpop.xlane.xlu0 %568 }
 0x40b   : > { %1109 = vrcp.f32 %v569_v19 }
 0x411   : > { %v1110_v32 = vpop.eup %1109 }
 0x415   : > { %v555_v25 = vpop.f32.mrf.mxu1 }
 0x416   : > { %v576_v26 = vmul.f32 %v1108_v22, %v555_v25 }
 0x417   : > { %v1058_v27 = vpop.permute.xlu2 %1057 }
 0x418   : > { %v1059_v28 = vunpack.i.l.bf16 %v1058_v27  ;;  %v1060_v31 = vunpack.i.h.bf16 %v1058_v27 }
 0x41a   : > { %v931_v29 = vsel %vm246_vm0, %v576_v26, %v1059_v28 }
 0x41b   : > { %v934_v30 = vpack.c.bf16 %v931_v29, %v931_v29 }
 0x41d   : > { %938 = vst.msk [vmem:[%s224_s28] sm:$0xf] %vm937_vm11, %v934_v30  ;;  %v557_v5 = vpop.f32.mrf.mxu1 }
 0x41e   : > { %v577_v38 = vmul.f32 %v1110_v32, %v557_v5 }
 0x420   : > { %v932_v13 = vsel %vm246_vm0, %v577_v38, %v1060_v31 }
 0x421   : > { %v935_v21 = vpack.c.bf16 %v932_v13, %v932_v13 }
 0x423   : > { %939 = vst.msk [vmem:[%s224_s28 + $0x4] sm:$0xf] %vm937_vm11, %v935_v21 }
 0x429   : > { %v572_v11 = vpop.xlane.xlu1 %571 }
 0x42a   : > { %1111 = vrcp.f32 %v572_v11 }
 0x430   : > { %v1112_v12 = vpop.eup %1111 }
 0x431   : > { %v927_v37 = vpop.permute.xlu0 %926 }
 0x434   : > { %v560_v20 = vpop.f32.mrf.mxu1 }
 0x435   : > { %v578_v34 = vmul.f32 %v1112_v12, %v560_v20 }
 0x437   : > { %v933_v46 = vsel %vm246_vm0, %v578_v34, %v927_v37 }
 0x438   : > { %v936_v59 = vpack.c.bf16 %v933_v46, %v933_v46 }
 0x43a   : > { %940 = vst.msk [vmem:[%s224_s28 + $0x8] sm:$0xf] %vm937_vm11, %v936_v59 }
 0x43c   : > { %v562_v3 = vpop.f32.mrf.mxu1 }
 0x43d PF: > { %s15_s18 = sadd.s32 1, %s1119_s18  }
 0x43e   : > { %p12_p4 = scmp.ge.s32.totalorder %s15_s18, 4  }
 0x440   :  { %14 = sbr.rel (!%p12_p4) target bundleno = 1 (0x1), region = 70 }

// kernel: step_fn.33
= control target key start
LH: loop header
LB: loop body
LE: loop exit
PB: predicated region body
PF: predicated region fallthrough
CT: control target
= control target key end

     0   :  { %s896_s0 = inlined_call_operand.<no memory space> [shape: f32[1], index: 0, kind: input, shape index: {}]   ;;  %s897_s1 = inlined_call_operand.vmem [shape: bf16[2,16,64], index: 1, kind: input, shape index: {}]   ;;  %s898_s2 = inlined_call_operand.vmem [shape: f32[2,1,64], index: 2, kind: input, shape index: {}]   ;;  %s899_s3 = inlined_call_operand.vmem [shape: f32[2,1,64], index: 3, kind: input, shape index: {}]   ;;  %s900_s4 = inlined_call_operand.vmem [shape: bf16[64,16], index: 4, kind: input, shape index: {}]   ;;  %s901_s5 = inlined_call_operand.vmem [shape: f32[1,16], index: 5, kind: input, shape index: {}]   ;;  %s902_s6 = inlined_call_operand.vmem [shape: f32[2,16,16], index: 6, kind: input, shape index: {}]   ;;  %s903_s7 = inlined_call_operand.hbm [shape: f32[2,16,16], index: 7, kind: output, shape index: {}]  }
   0x1   :  { %12 = sst [smem:[#allocation2]] %s896_s0 }
   0x2   :  { %13 = vsyncpa [#allocation4], 0 }
   0x3   :  { %15 = vsyncpa [#allocation4 + $0x1], 0  ;;  %s771_s26 = smov 0   ;;  %s773_s27 = smov 0  }
   0x4   :  { %s775_s28 = smov 0   ;;  %s777_s29 = smov 0  }
   0x5 LB: > { %s792_s0 = sadd.s32 4294967295, %s723_s29   ;;  %s569_s30 = sadd.s32 4294967294, %s723_s29   ;;  %s723_s29 = sphi %s777_s29, %s909_s29   ;;  %s719_s28 = sphi %s775_s28, %s908_s28   ;;  %s715_s27 = sphi %s773_s27, %s907_s27   ;;  %s711_s26 = sphi %s771_s26, %s906_s26  }
   0x6   : > { %s796_s8 = sadd.s32 1, %s723_s29   ;;  %s195_s9 = sadd.s32 1, %s719_s28 }
   0x7   : > { %s192_s10 = ssub.s32 %s723_s29, %s796_s8  ;;  %p205_p0 = scmp.ne.s32.totalorder %s719_s28, %s715_s27 }
   0x8   : > { %p193_p1 = scmp.eq.s32.totalorder %s192_s10, 0  ;;  %p206_p2 = scmp.eq.s32.totalorder %s792_s0, 1 }
   0x9   : > { %p211_p3 = scmp.ne.s32.totalorder %s715_s27, %s711_s26  ;;  %p212_p4 = scmp.eq.s32.totalorder %s569_s30, 1 }
   0xa   : > { %s807_s11 = scalar_select %p193_p1, %s719_s28, %s195_s9  }
   0xb   : > { %p809_p5 = por %p206_p2, %p205_p0  ;;  %p813_p6 = por %p212_p4, %p211_p3 }
   0xc   : > { %p572_p7 = scmp.ge.s32.totalorder %s723_s29, 1  ;;  %p267_p8 = scmp.lt.s32.totalorder %s723_s29, 3 }
   0xe   : > { %p268_p9 = pnand %p572_p7, %p267_p8 }
   0xf   : > { %p310_p10 = scmp.lt.s32.totalorder (!%p268_p9), %s792_s0, 1  ;;  %s452_s22 = sld [smem:[#allocation2]] (!%p268_p9) }
  0x10   : > { %271 = sbr.rel (%p268_p9) target bundleno = 450 (0x1c2), region = 48  ;;  %s307_s30 = sand.u32 (!%p268_p9), 1, %s715_s27  }
  0x11   : > { %s606_s16 = sshll.u32 (!%p268_p9), %s792_s0, 4  ;;  %s681_s10 = scalar_lea.hbm (!%p268_p9), %s903_s7, 32 }
  0x15   : > { %s821_s14 = scalar_select %p310_p10, %s792_s0, 1  ;;  %vm333_vm0 = vcmask 523264   ;;  %v725_v5 = vmov 64.0   ;;  %v605_v22 = vld [vmem:[%s900_s4 + $0x18] sm:$0xff]  ;;  %v604_v23 = vld [vmem:[%s900_s4 + $0x10] sm:$0xff]  ;;  %v603_v24 = vld [vmem:[%s900_s4 + $0x8] sm:$0xff]  ;;  %v453_v59 = vstv %s452_s22 }
  0x16   : > { %655 = vrcp.f32 %v725_v5  ;;  %440 = vmatpush.bf16.msra.mxu0 %v605_v22  ;;  %v602_v26 = vld [vmem:[%s900_s4] sm:$0xff]  ;;  %vm458_vm8 = vcmask 130048   ;;  %s462_s0 = scalar_lea.sflag [#allocation4], %s307_s30 }
  0x17   : > { %s600_s15 = sshll.u32 %s821_s14, 3  ;;  %s317_s21 = scalar_lea.vmem %s898_s2, %s821_s14  ;;  %v654_v57 = vld [vmem:[%s901_s5] ss:$0 sm:$0xff] }
  0x18   : > { %s314_s18 = scalar_lea.vmem %s897_s1, %s600_s15  ;;  %v653_v52 = vld [vmem:[%s317_s21] ss:$0 sm:$0xff]  ;;  %s601_s23 = sshll.u32 %s821_s14, 4 }
  0x19   : > { %v608_v0 = vld [vmem:[%s314_s18] sm:$0xff]   ;;  %s320_s18 = scalar_lea.vmem %s899_s3, %s821_s14  ;;  %s325_s15 = scalar_lea.vmem %s902_s6, %s601_s23 }
  0x1a   : > { %v609_v1 = vunpack.c.l.bf16 %v608_v0  ;;  %v610_v3 = vunpack.c.h.bf16 %v608_v0  ;;  %441 = vmatpush.bf16.msra.mxu0 %v604_v23  ;;  %v332_v40 = vld [vmem:[%s320_s18] sm:$0x1]  ;;  %s573_s21 = sshll.u32 %s307_s30, 4  ;;  %s473_s18 = scalar_lea.hbm %s903_s7, %s606_s16 }
  0x1b   : > { %v361_v42 = vadd.f32 1.0, %v332_v40  ;;  %v450_v61 = vld [vmem:[%s325_s15] sm:$0xff]  ;;  %s309_s19 = scalar_lea.vmem [#allocation3], %s573_s21  ;;  %s476_s23 = sshll.u32 %s473_s18, 4  ;;  %s477_s23 = int_to_ptr.hbm [resolvable:$true] %s476_s23 }
  0x1c   : > { %v334_v2 = vsel %vm333_vm0, %v609_v1, 0.0  ;;  %v337_v4 = vsel %vm333_vm0, %v610_v3, 0.0  ;;  %v656_v6 = vpop.eup %655  ;;  %s474_s20 = sshll.u32 %s309_s19, 4  ;;  %s675_s22 = sshra.s32 %s477_s23, 4  ;;  %s475_s20 = int_to_ptr.vmem [resolvable:$true] %s474_s20  ;;  %s676_s22 = int_to_ptr.hbm [resolvable:$true] %s675_s22 }
  0x1d   : > { %335 = vadd.xlane.f32.xlu0 %v334_v2  ;;  %v341_v7 = vmul.f32 64.0, %v656_v6  ;;  %vm345_vm1 = vweird.f32 %v656_v6  ;;  %v387_v47 = vperm.slane %v361_v42, 0  ;;  %v451_v2 = vld [vmem:[%s325_s15 + $0x8] sm:$0xff]  ;;  %s677_s24 = scalar_lea.hbm %s676_s22, 16  ;;  %p682_p0 = scmp.lt.s32.totalorder %s676_s22, %s903_s7 }
  0x1e   : > { %442 = vmatpush.bf16.msra.mxu0 %v603_v24  ;;  %p678_p11 = scmp.ne.s32.totalorder %s676_s22, %s677_s24  ;;  %p683_p1 = scmp.lt.s32.totalorder %s681_s10, %s677_s24 }
  0x1f   : > { %v342_v8 = vsub.f32 1.0, %v341_v7 }
  0x20   : > { %p679_p12 = pnand %p678_p11, %p809_p5  ;;  %p684_p2 = por %p683_p1, %p682_p0 }
  0x21   : > { %v343_v9 = vmul.f32 %v656_v6, %v342_v8 }
  0x22   : > { %443 = vmatpush.bf16.msra.mxu0 %v602_v26  ;;  %p680_p13 = pneg %p679_p12 }
  0x23   : > { %v344_v10 = vadd.f32 %v656_v6, %v343_v9 }
  0x24   : > { %p685_p3 = pnand %p684_p2, %p680_p13 }
  0x25   : > { %338 = vadd.xlane.f32.xlu0 %v337_v4  ;;  %v346_v11 = vsel %vm345_vm1, %v656_v6, %v344_v10 }
  0x90   : > { %v336_v12 = vpop.xlane.xlu0 %335 }
  0x91   : > { %v347_v13 = vmul.f32 %v346_v11, %v336_v12 }
  0x93   : > { %v349_v14 = vsub.f32 %v609_v1, %v347_v13 }
  0x95   : > { %v351_v15 = vmul.f32 %v349_v14, %v349_v14 }
  0x97   : > { %v353_v16 = vsel %vm333_vm0, %v351_v15, 0.0 }
  0x98   : > { %354 = vadd.xlane.f32.xlu1 %v353_v16  ;;  %v339_v17 = vpop.xlane.xlu0 %338 }
  0x99   : > { %v348_v18 = vmul.f32 %v346_v11, %v339_v17 }
  0x9b   : > { %v350_v19 = vsub.f32 %v610_v3, %v348_v18 }
  0x9d   : > { %v352_v20 = vmul.f32 %v350_v19, %v350_v19 }
  0x9f   : > { %v356_v21 = vsel %vm333_vm0, %v352_v20, 0.0 }
  0xa0   : > { %357 = vadd.xlane.f32.xlu1 %v356_v21 }
 0x10b   : > { %v355_v25 = vpop.xlane.xlu1 %354 }
 0x10c   : > { %v359_v27 = vmul.f32 %v355_v25, %v346_v11 }
 0x10e   : > { %v362_v28 = vadd.f32 1e-06, %v359_v27 }
 0x110   : > { %657 = vrsqrt.f32 %v362_v28  ;;  %vm370_vm3 = vweird.f32 %v362_v28 }
 0x113   : > { %v358_v29 = vpop.xlane.xlu1 %357 }
 0x114   : > { %v360_v30 = vmul.f32 %v358_v29, %v346_v11 }
 0x116   : > { %v658_v31 = vpop.eup %657  ;;  %v363_v32 = vadd.f32 1e-06, %v360_v30 }
 0x117   : > { %v365_v33 = vmul.f32 %v658_v31, %v362_v28  ;;  %vm371_vm2 = vweird.f32 %v658_v31 }
 0x118   : > { %659 = vrsqrt.f32 %v363_v32  ;;  %vm372_vm4 = vmor %vm370_vm3, %vm371_vm2  ;;  %vm380_vm6 = vweird.f32 %v363_v32 }
 0x119   : > { %v366_v34 = vmul.f32 %v658_v31, %v365_v33 }
 0x11b   : > { %v367_v35 = vmul.f32 0.5, %v366_v34 }
 0x11d   : > { %v368_v36 = vsub.f32 1.5, %v367_v35 }
 0x11e   : > { %v660_v37 = vpop.eup %659 }
 0x11f   : > { %v369_v38 = vmul.f32 %v658_v31, %v368_v36  ;;  %v375_v39 = vmul.f32 %v660_v37, %v363_v32  ;;  %vm381_vm5 = vweird.f32 %v660_v37 }
 0x120   : > { %vm382_vm7 = vmor %vm380_vm6, %vm381_vm5 }
 0x121   : > { %v376_v41 = vmul.f32 %v660_v37, %v375_v39  ;;  %v373_v43 = vsel %vm372_vm4, %v658_v31, %v369_v38 }
 0x122   : > { %v384_v46 = vmul.f32 %v373_v43, %v349_v14 }
 0x123   : > { %v377_v44 = vmul.f32 0.5, %v376_v41 }
 0x124   : > { %v389_v51 = vmul.f32 %v387_v47, %v384_v46 }
 0x125   : > { %v378_v45 = vsub.f32 1.5, %v377_v44 }
 0x126   : > { %v394_v54 = vadd.f32 %v653_v52, %v389_v51 }
 0x127   : > { %v379_v48 = vmul.f32 %v660_v37, %v378_v45 }
 0x129   : > { %v383_v49 = vsel %vm382_vm7, %v660_v37, %v379_v48 }
 0x12a   : > { %v385_v50 = vmul.f32 %v383_v49, %v350_v19 }
 0x12c   : > { %v390_v53 = vmul.f32 %v387_v47, %v385_v50 }
 0x12e   : > { %v395_v55 = vadd.f32 %v653_v52, %v390_v53 }
 0x130   : > { %v396_v56 = vpack.c.bf16 %v395_v55, %v394_v54 }
 0x132   : > { %594 = vmatmul.msk.bf16.vlgmr.msra.gmra.mxu0 %vm333_vm0, %v396_v56 }
 0x1af   : > { %v445_v58 = vpop.f32.mrf.mxu0 }
 0x1b0   : > { %v446_v60 = vadd.f32 %v654_v57, %v445_v58 }
 0x1b2   : > { %v454_v62 = vmul.f32 %v453_v59, %v446_v60 }
 0x1b4   : > { %v456_v63 = vadd.f32 %v454_v62, %v450_v61 }
 0x1b6   : > { %459 = vst.msk [vmem:[%s309_s19] sm:$0xff] %vm458_vm8, %v456_v63 }
 0x1b7   : > { %v447_v0 = vpop.f32.mrf.mxu0 }
 0x1b8   : > { %v448_v1 = vadd.f32 %v654_v57, %v447_v0 }
 0x1ba   : > { %v455_v3 = vmul.f32 %v453_v59, %v448_v1 }
 0x1bc   : > { %v457_v4 = vadd.f32 %v455_v3, %v451_v2 }
 0x1be   : > { %460 = vst.msk [vmem:[%s309_s19 + $0x8] sm:$0xff] %vm458_vm8, %v457_v4 }
 0x1bf   : > { %688 = shalt.err (!%p685_p3)
}
 0x1c0   : > { %s726_s30 = smov 128   ;;  %s727_s15 = smov 8  }
 0x1c1   : > { %611 = dma.vmem_to_hbm [thread:$0]  (%p809_p5), %s475_s20, 256, %s477_s23, %s462_s0, %s726_s30, %s726_s30, %s727_s15  }
 0x1c2 PF: > { %p617_p4 = scmp.ge.s32.totalorder %s723_s29, 2  ;;  %s491_s17 = sand.u32 1, %s711_s26  }
 0x1c3   : > { %s492_s14 = scalar_lea.sflag [#allocation4], %s491_s17 }
 0x1c4   : > { %p614_p7 = pnand %p617_p4, %p813_p6 }
 0x1c6   : > { %p615_p8 = pneg %p614_p7 }
 0x1c8   : > { %706 = dma.done.wait (%p615_p8), %s492_s14, 256  }
 0x1c9   : > { %708 = vsyncadd (%p615_p8), %s492_s14, 4294967040  ;;  %p18_p9 = scmp.ge.s32.totalorder %s796_s8, 4   ;;  %s906_s26 = smov %s715_s27 }
 0x1ca   : > { %s907_s27 = smov %s719_s28  ;;  %s908_s28 = smov %s807_s11 }
 0x1cb   : > { %s909_s29 = smov %s796_s8  ;;  %20 = sbr.rel (!%p18_p9) target bundleno = 5 (0x5), region = 92 }
 0x1d0   :  { %498 = vsyncpa [#allocation4], 1 }
 0x1d1   :  { %500 = vsyncpa [#allocation4 + $0x1], 1 }

</bundles_post_ra>
